<compile_context>
chip_gen: v7x
topology: tpu7x:2x2x1
jax: 0.10.0
libtpu: 0.0.40
codegen_flags: <defaults>
</compile_context>

<pallas_src>
import math
from functools import partial

import jax
import jax.numpy as jnp
import numpy as np
from jax.experimental import pallas as pl
from jax.experimental.pallas import tpu as pltpu

C_IN, C_OUT, KSZ, STRIDE, PAD = 48, 3, 4, 2, 1
NCOL = 4 * C_OUT            # 12 real output rows: (dy, dx, c_out)
NCOL_PAD = 16               # padded to a full sublane tile -> aligned slices / unmasked stores
NTAP = 9                    # 3x3 union of input taps
KROWS = NTAP * NCOL_PAD     # 144 rows of the folded (kn2row) weight


def _round_up(a, b):
    return (a + b - 1) // b * b


def _cdiv(a, b):
    return -(-a // b)


# ----------------------------- Pallas kernel -----------------------------
def _make_kernel(th, wp2):
    tm = th * wp2                       # padded output pixels per step (multiple of 128)

    def kernel(xm_ref, xh_ref, w_ref, b_ref, o_ref):
        # xm_ref: (48, tm)      main bf16 window: th padded image rows, flattened
        # xh_ref: (48, 3*wp2)   the 3 padded rows that follow it (halo)
        # w_ref : (144, 48)     folded ConvTranspose weight, 9 taps x 16 rows (last 4 zero)
        # b_ref : (16, 1)       bias (rows 12..15 zero)
        # o_ref : (32, tm)      rows 0:16 = image, rows 16:32 = sigmoid mask (lane-dense)
        xwin = jnp.concatenate([xm_ref[...], xh_ref[...]], axis=1)      # (48, (th+3)*wp2)
        y = jnp.dot(w_ref[...], xwin,
                    preferred_element_type=jnp.float32)                 # (144, (th+3)*wp2)

        # kn2row tap reduction: out[:, m] = sum_tap y[tap_rows, m + rh*wp2 + rw]
        acc = y[0:NCOL_PAD, 0:tm]                                       # tap (0,0), offset 0
        for tap in range(1, NTAP):
            rh, rw = tap // 3, tap % 3
            off = rh * wp2 + rw
            acc = acc + y[tap * NCOL_PAD:(tap + 1) * NCOL_PAD, off:off + tm]
        acc = acc + b_ref[...]

        o_ref[0:NCOL_PAD, :] = acc.astype(o_ref.dtype)
        # exp runs on the EUP; plain divide keeps full f32 accuracy for the mask.
        o_ref[NCOL_PAD:2 * NCOL_PAD, :] = (1.0 / (1.0 + jnp.exp(-acc))).astype(o_ref.dtype)

    return kernel


# ----------------------------- glue: fused weight -----------------------------
def build_fused_weight(w_ct, b_ct):
    """Fold the (C_IN, C_OUT, 4, 4) ConvTranspose2d weight into a (144, 48) kn2row matrix.

    Rows are tap-major (tap = rh*3 + rw over the 3x3 union patch), 16 rows per tap: the first
    12 are (dy, dx, c_out), the last 4 are zero padding.  Columns are c_in.
    For stride=2, k=4, pad=1: dy=0 uses kernel rows {1,3} at patch rows {1,0};
    dy=1 uses rows {0,2} at patch rows {2,1} (same mapping for dx / columns).
    """
    w_np = np.asarray(w_ct, dtype=np.float32)            # (48, 3, 4, 4)
    b_np = np.asarray(b_ct, dtype=np.float32)            # (3,)
    w_tap = np.zeros((NTAP, NCOL_PAD, C_IN), dtype=np.float32)
    b_pad = np.zeros((NCOL_PAD, 1), dtype=np.float32)
    pairs = {0: [(1, 1), (3, 0)], 1: [(0, 2), (2, 1)]}   # d -> [(kernel_tap, patch_offset)]
    for dy in (0, 1):
        for dx in (0, 1):
            col0 = (dy * 2 + dx) * C_OUT
            for kh, rh in pairs[dy]:
                for kw, rw in pairs[dx]:
                    tap = rh * 3 + rw
                    w_tap[tap, col0:col0 + C_OUT, :] += w_np[:, :, kh, kw].T
            b_pad[col0:col0 + C_OUT, 0] = b_np
    return jnp.asarray(w_tap.reshape(KROWS, C_IN)), jnp.asarray(b_pad)


def _vmem_limit_bytes():
    # Per-generation scoped-VMEM budget: ~96 MiB on v5e/v6e (128 MiB physical),
    # ~48 MiB on v7x (64 MiB physical).  Conservative fallback if the query is unavailable.
    try:
        cap = pltpu.get_tpu_info().vmem_capacity_bytes
        return int(min(96 * 2**20, max(32 * 2**20, (cap * 3) // 4)))
    except Exception:
        return 32 * 2**20


# ----------------------------- wrapper -----------------------------
@partial(jax.jit, static_argnames=("target_pixels", "compute_dtype", "out_dtype"))
def _upconv4_apply(x, w2t, b_pad, target_pixels, compute_dtype, out_dtype):
    N, C, H, W = x.shape
    assert C == C_IN

    # --- tile geometry (static under jit) ---
    wp2 = _round_up(W + 2, 8)                   # padded width (>= W+2)
    unit = 128 // math.gcd(wp2, 128)            # smallest th with th*wp2 % 128 == 0
    rows = max(unit, (max(1, target_pixels // wp2) // unit) * unit)
    th = min(rows, _round_up(H, unit))          # output rows per grid step
    nt = _cdiv(H, th)
    while N * nt < 8 and th > unit:             # keep grid deep enough for v7x's 2 TensorCores
        th -= unit
        nt = _cdiv(H, th)
    Hp = nt * th
    tm = th * wp2

    # --- single fused pad + cast pass: f32 NCHW -> bf16 padded NCHW (Hp+3 rows, wp2 cols) ---
    xpad = jnp.pad(x.astype(compute_dtype),
                   ((0, 0), (0, 0), (1, Hp + 2 - H), (1, wp2 - W - 1)))   # (N, 48, Hp+3, wp2)
    x_main = xpad[:, :, :Hp, :].reshape(N, C_IN, Hp * wp2)                # flat, contiguous
    # tiny duplicated halo: the 3 padded rows following each th-row tile (~3/th of the input)
    x_halo = jnp.stack(
        [xpad[:, :, i * th + th: i * th + th + 3, :] for i in range(nt)],
        axis=1).reshape(N, nt, C_IN, 3 * wp2)

    w2t_c = w2t.astype(compute_dtype)

    kernel = _make_kernel(th, wp2)
    out_flat = pl.pallas_call(
        kernel,
        out_shape=jax.ShapeDtypeStruct((2 * NCOL_PAD, N * Hp * wp2), out_dtype),
        grid_spec=pltpu.PrefetchScalarGridSpec(
            num_scalar_prefetch=0,
            grid=(N, nt),
            in_specs=[
                pl.BlockSpec((None, C_IN, tm), lambda n, i: (n, 0, i)),          # main tiles
                pl.BlockSpec((None, None, C_IN, 3 * wp2), lambda n, i: (n, i, 0, 0)),  # halo
                pl.BlockSpec((KROWS, C_IN), lambda n, i: (0, 0)),                # resident W
                pl.BlockSpec((NCOL_PAD, 1), lambda n, i: (0, 0)),                # resident b
            ],
            out_specs=pl.BlockSpec((2 * NCOL_PAD, tm), lambda n, i: (0, n * nt + i)),
        ),
        compiler_params=pltpu.CompilerParams(
            dimension_semantics=("parallel", "parallel"),
            vmem_limit_bytes=_vmem_limit_bytes()),
    )(x_main, x_halo, w2t_c, b_pad)

    # --- ONE fused pixel-shuffle over both outputs ---
    # rows: (which[img|mask], 16) ; cols: (n, a, b) with a in [0,Hp), b in [0,wp2)
    y = out_flat.reshape(2, NCOL_PAD, N, Hp, wp2)[:, :NCOL, :, :H, :W]
    y = y.reshape(2, 2, 2, C_OUT, N, H, W)            # (which, dy, dx, c, N, H, W)
    y = y.transpose(0, 4, 3, 5, 1, 6, 2)              # (which, N, c, H, dy, W, dx)
    y = y.reshape(2, N, C_OUT, 2 * H, 2 * W)
    return y[0], y[1]


def upconv4_forward(x, w_ct, b_ct, *, target_pixels=8192,
                    compute_dtype=jnp.bfloat16, out_dtype=jnp.float32):
    """image, mask = UpConv4(x) for x: (N, 48, H, W) (PyTorch NCHW semantics)."""
    w2t, b_pad = build_fused_weight(w_ct, b_ct)       # host-side, done once per parameter set
    return _upconv4_apply(x, w2t, b_pad,
                          target_pixels=target_pixels,
                          compute_dtype=compute_dtype,
                          out_dtype=out_dtype)


# ----------------------------- plain-JAX reference -----------------------------
def reference(x, w_ct, b_ct):
    # ConvTranspose2d == lhs-dilated correlation with spatially flipped, channel-swapped kernel.
    w_conv = jnp.flip(w_ct, axis=(2, 3)).transpose(1, 0, 2, 3)   # (C_OUT, C_IN, 4, 4)
    out = jax.lax.conv_general_dilated(
        x, w_conv,
        window_strides=(1, 1),
        padding=((KSZ - 1 - PAD, KSZ - 1 - PAD), (KSZ - 1 - PAD, KSZ - 1 - PAD)),
        lhs_dilation=(STRIDE, STRIDE),
        dimension_numbers=('NCHW', 'OIHW', 'NCHW'),
        precision=jax.lax.Precision.HIGHEST)
    return out + b_ct.reshape(1, C_OUT, 1, 1)


if __name__ == "__main__":
    key = jax.random.PRNGKey(0)
    kx, kw, kb = jax.random.split(key, 3)

    N, H, W = 2, 16, 16
    x = jax.random.normal(kx, (N, C_IN, H, W), dtype=jnp.float32)

    # Deterministic parameter init (PyTorch-style uniform fan-in scaling).
    scale = 1.0 / math.sqrt(C_IN * KSZ * KSZ)
    w_ct = jax.random.uniform(kw, (C_IN, C_OUT, KSZ, KSZ), jnp.float32, -scale, scale)
    b_ct = jax.random.uniform(kb, (C_OUT,), jnp.float32, -scale, scale)

    img, mask = upconv4_forward(x, w_ct, b_ct)
    jax.block_until_ready((img, mask))

    # Tight check: reference on the same bf16-rounded inputs (bf16 x bf16 products are exact
    # in f32, so only accumulation order differs) -> validates the kn2row fold + flat indexing.
    x_r = x.astype(jnp.bfloat16).astype(jnp.float32)
    w_r = w_ct.astype(jnp.bfloat16).astype(jnp.float32)
    ref_img_r = reference(x_r, w_r, b_ct)
    np.testing.assert_allclose(np.asarray(img), np.asarray(ref_img_r), atol=1e-3, rtol=1e-3)
    np.testing.assert_allclose(np.asarray(mask), np.asarray(jax.nn.sigmoid(ref_img_r)),
                               atol=1e-3, rtol=1e-3)

    # Loose check: full-f32 reference (difference = bf16 input/weight rounding only).
    ref_img = reference(x, w_ct, b_ct)
    np.testing.assert_allclose(np.asarray(img), np.asarray(ref_img), atol=5e-2, rtol=0)
    np.testing.assert_allclose(np.asarray(mask), np.asarray(jax.nn.sigmoid(ref_img)),
                               atol=5e-2, rtol=0)

    assert img.shape == (N, C_OUT, 2 * H, 2 * W) and mask.shape == img.shape
    print("KERNEL_OK")
</pallas_src>

<mosaic_0001>
module attributes {stable_mosaic.version = 11 : i64} {
  func.func @kernel(%arg0: i32, %arg1: i32, %arg2: memref<1x48x384xbf16, #tpu.memory_space<vmem>>, %arg3: memref<1x1x48x72xbf16, #tpu.memory_space<vmem>>, %arg4: memref<144x48xbf16, #tpu.memory_space<vmem>>, %arg5: memref<16x1xf32, #tpu.memory_space<vmem>>, %arg6: memref<32x384xf32, #tpu.memory_space<vmem>>) attributes {dimension_semantics = [#tpu.dimension_semantics<parallel>, #tpu.dimension_semantics<parallel>], iteration_bounds = array<i64: 2, 1>, scalar_prefetch = 0 : i64, scratch_operands = 0 : i64, tpu.core_type = #tpu.core_type<tc>, window_params = [{transform_indices = @transform_0, window_bounds = array<i64: 1, 48, 384>}, {transform_indices = @transform_1, window_bounds = array<i64: 1, 1, 48, 72>}, {pipeline_mode = #tpu.pipeline_mode<synchronous>, transform_indices = @transform_2, window_bounds = array<i64: 144, 48>}, {pipeline_mode = #tpu.pipeline_mode<synchronous>, transform_indices = @transform_3, window_bounds = array<i64: 16, 1>}, {transform_indices = @transform_4, window_bounds = array<i64: 32, 384>}]} {
    %c0 = arith.constant 0 : index
    %c0_0 = arith.constant 0 : index
    %c0_1 = arith.constant 0 : index
    %0 = vector.load %arg2[%c0, %c0_0, %c0_1] : memref<1x48x384xbf16, #tpu.memory_space<vmem>>, vector<1x48x384xbf16>
    %1 = vector.shape_cast %0 : vector<1x48x384xbf16> to vector<48x384xbf16>
    %c0_2 = arith.constant 0 : index
    %c0_3 = arith.constant 0 : index
    %c0_4 = arith.constant 0 : index
    %c0_5 = arith.constant 0 : index
    %2 = vector.load %arg3[%c0_2, %c0_3, %c0_4, %c0_5] : memref<1x1x48x72xbf16, #tpu.memory_space<vmem>>, vector<1x1x48x72xbf16>
    %3 = vector.shape_cast %2 : vector<1x1x48x72xbf16> to vector<48x72xbf16>
    %4 = tpu.concatenate %1, %3 in 1 : vector<48x384xbf16>, vector<48x72xbf16> -> vector<48x456xbf16>
    %c0_6 = arith.constant 0 : index
    %c0_7 = arith.constant 0 : index
    %5 = vector.load %arg4[%c0_6, %c0_7] : memref<144x48xbf16, #tpu.memory_space<vmem>>, vector<144x48xbf16>
    %cst = arith.constant dense<0.000000e+00> : vector<144x456xf32>
    %6 = tpu.matmul %5, %4, %cst {dimension_numbers = #tpu.dot_dimension_numbers<[1], [0], [0], [1], [0, 0, 1, 1], [], []>} : vector<144x48xbf16>, vector<48x456xbf16>, vector<144x456xf32> -> vector<144x456xf32>
    %7 = vector.extract_strided_slice %6 {offsets = [0, 0], sizes = [16, 384], strides = [1, 1]} : vector<144x456xf32> to vector<16x384xf32>
    %8 = vector.extract_strided_slice %6 {offsets = [16, 1], sizes = [16, 384], strides = [1, 1]} : vector<144x456xf32> to vector<16x384xf32>
    %9 = arith.addf %7, %8 : vector<16x384xf32>
    %10 = vector.extract_strided_slice %6 {offsets = [32, 2], sizes = [16, 384], strides = [1, 1]} : vector<144x456xf32> to vector<16x384xf32>
    %11 = arith.addf %9, %10 : vector<16x384xf32>
    %12 = vector.extract_strided_slice %6 {offsets = [48, 24], sizes = [16, 384], strides = [1, 1]} : vector<144x456xf32> to vector<16x384xf32>
    %13 = arith.addf %11, %12 : vector<16x384xf32>
    %14 = vector.extract_strided_slice %6 {offsets = [64, 25], sizes = [16, 384], strides = [1, 1]} : vector<144x456xf32> to vector<16x384xf32>
    %15 = arith.addf %13, %14 : vector<16x384xf32>
    %16 = vector.extract_strided_slice %6 {offsets = [80, 26], sizes = [16, 384], strides = [1, 1]} : vector<144x456xf32> to vector<16x384xf32>
    %17 = arith.addf %15, %16 : vector<16x384xf32>
    %18 = vector.extract_strided_slice %6 {offsets = [96, 48], sizes = [16, 384], strides = [1, 1]} : vector<144x456xf32> to vector<16x384xf32>
    %19 = arith.addf %17, %18 : vector<16x384xf32>
    %20 = vector.extract_strided_slice %6 {offsets = [112, 49], sizes = [16, 384], strides = [1, 1]} : vector<144x456xf32> to vector<16x384xf32>
    %21 = arith.addf %19, %20 : vector<16x384xf32>
    %22 = vector.extract_strided_slice %6 {offsets = [128, 50], sizes = [16, 384], strides = [1, 1]} : vector<144x456xf32> to vector<16x384xf32>
    %23 = arith.addf %21, %22 : vector<16x384xf32>
    %c0_8 = arith.constant 0 : index
    %c0_9 = arith.constant 0 : index
    %24 = vector.load %arg5[%c0_8, %c0_9] : memref<16x1xf32, #tpu.memory_space<vmem>>, vector<16x1xf32>
    %25 = vector.broadcast %24 : vector<16x1xf32> to vector<16x384xf32>
    %26 = arith.addf %23, %25 : vector<16x384xf32>
    %c0_10 = arith.constant 0 : index
    %c0_11 = arith.constant 0 : index
    %27 = vector.load %arg6[%c0_10, %c0_11] : memref<32x384xf32, #tpu.memory_space<vmem>>, vector<16x384xf32>
    tpu.vector_store %arg6[%c0_10, %c0_11], %26 {strides = array<i32>} : memref<32x384xf32, #tpu.memory_space<vmem>>, vector<16x384xf32>,
    %cst_12 = arith.constant 0.000000e+00 : f32
    %28 = vector.broadcast %cst_12 : f32 to vector<16x384xf32>
    %29 = arith.subf %28, %26 : vector<16x384xf32>
    %30 = math.exp %29 : vector<16x384xf32>
    %cst_13 = arith.constant 1.000000e+00 : f32
    %31 = vector.broadcast %cst_13 : f32 to vector<16x384xf32>
    %32 = arith.addf %31, %30 : vector<16x384xf32>
    %cst_14 = arith.constant 1.000000e+00 : f32
    %33 = vector.broadcast %cst_14 : f32 to vector<16x384xf32>
    %34 = arith.divf %33, %32 : vector<16x384xf32>
    %c16 = arith.constant 16 : index
    %c0_15 = arith.constant 0 : index
    %35 = vector.load %arg6[%c16, %c0_15] : memref<32x384xf32, #tpu.memory_space<vmem>>, vector<16x384xf32>
    tpu.vector_store %arg6[%c16, %c0_15], %34 {strides = array<i32>} : memref<32x384xf32, #tpu.memory_space<vmem>>, vector<16x384xf32>,
    return
  }
  func.func @transform_0(%arg0: i32, %arg1: i32) -> (i32, i32, i32) {
    %c0_i32 = arith.constant 0 : i32
    %c0_i32_0 = arith.constant 0 : i32
    return %arg0, %c0_i32, %arg1 : i32, i32, i32
  }
  func.func @transform_1(%arg0: i32, %arg1: i32) -> (i32, i32, i32, i32) {
    %c0_i32 = arith.constant 0 : i32
    %c0_i32_0 = arith.constant 0 : i32
    %c0_i32_1 = arith.constant 0 : i32
    return %arg0, %arg1, %c0_i32, %c0_i32_0 : i32, i32, i32, i32
  }
  func.func @transform_2(%arg0: i32, %arg1: i32) -> (i32, i32) {
    %c0_i32 = arith.constant 0 : i32
    %c0_i32_0 = arith.constant 0 : i32
    %c0_i32_1 = arith.constant 0 : i32
    return %c0_i32, %c0_i32_0 : i32, i32
  }
  func.func @transform_3(%arg0: i32, %arg1: i32) -> (i32, i32) {
    %c0_i32 = arith.constant 0 : i32
    %c0_i32_0 = arith.constant 0 : i32
    %c0_i32_1 = arith.constant 0 : i32
    return %c0_i32, %c0_i32_0 : i32, i32
  }
  func.func @transform_4(%arg0: i32, %arg1: i32) -> (i32, i32) {
    %c1_i32 = arith.constant 1 : i32
    %0 = arith.muli %arg0, %c1_i32 : i32
    %1 = arith.addi %0, %arg1 : i32
    %c0_i32 = arith.constant 0 : i32
    %c0_i32_0 = arith.constant 0 : i32
    return %c0_i32, %1 : i32, i32
  }
}

</mosaic_0001>

<bundles_post_ra>
// kernel: squeeze.2
= control target key start
LH: loop header
LB: loop body
LE: loop exit
PB: predicated region body
PF: predicated region fallthrough
CT: control target
= control target key end

     0   :  { %vm7_vm0 = vcmask 1043458   ;;  %vm11_vm1 = vcmask 1045508   ;;  %vm15_vm2 = vcmask 1047558   ;;  %s548_s6 = smov 3  ;;  %s551_s9 = smov 12  ;;  %s16975_s0 = inlined_call_operand.vmem [shape: f32[1,2,3,16,2,16,2], index: 0, kind: input, shape index: {}]   ;;  %s16976_s1 = inlined_call_operand.hbm [shape: f32[2,3,32,32], index: 1, kind: output, shape index: {}]  }
   0x1   :  { %v8877_v0 = vld [vmem:[%s16975_s0 + $0x40f] ss:$16 sm:%s548_s6]   ;;  %s556_s10 = smov 48 }
   0x2   :  { %2 = vsyncpa [#allocation1], 0  ;;  %v8878_v1 = vld [vmem:[%s16975_s0 + $0x40f] ss:$16 sm:%s551_s9]   ;;  %s561_s15 = smov 192  ;;  %s503_s16 = smov 3 }
   0x3   :  { %v8879_v2 = vld [vmem:[%s16975_s0 + $0x40f] ss:$16 sm:%s556_s10]   ;;  %v554_v3 = vsel %vm7_vm0, %v8878_v1, %v8877_v0  ;;  %s506_s21 = smov 12  ;;  %s511_s22 = smov 48  ;;  %vm17_vm3 = vcmask 15360   ;;  %vm522_vm4 = vcmask 261360  }
   0x4   :  { %v8880_v4 = vld [vmem:[%s16975_s0 + $0x40f] ss:$16 sm:%s561_s15]   ;;  %v559_v6 = vsel %vm11_vm1, %v8879_v2, %v554_v3  ;;  %s516_s27 = smov 192  ;;  %s571_s28 = smov 3  ;;  %vm1073_vm5 = vcmask 244960   ;;  %vm1624_vm6 = vcmask 228560  }
   0x5   :  { %v8869_v5 = vld [vmem:[%s16975_s0 + $0xf] ss:$16 sm:%s503_s16]   ;;  %v564_v9 = vsel %vm15_vm2, %v8880_v4, %v559_v6  ;;  %s574_s4 = smov 12  ;;  %s579_s5 = smov 48  ;;  %vm2175_vm7 = vcmask 212160   ;;  %vm2726_vm8 = vcmask 195760  }
   0x6   :  { %v8870_v7 = vld [vmem:[%s16975_s0 + $0xf] ss:$16 sm:%s506_s21]   ;;  %s10349_s6 = smov 30   ;;  %s584_s9 = smov 192  ;;  %vm3277_vm9 = vcmask 179360   ;;  %vm3828_vm10 = vcmask 162960  }
   0x7   :  { %v8871_v8 = vld [vmem:[%s16975_s0 + $0xf] ss:$16 sm:%s511_s22]   ;;  %v509_v10 = vsel %vm7_vm0, %v8870_v7, %v8869_v5  ;;  %565 = vrot.lane.b32.xlu1 %v564_v9, %s10349_s6  ;;  %s525_s10 = smov 3  ;;  %s528_s15 = smov 12  ;;  %vm4379_vm11 = vcmask 146560   ;;  %vm4930_vm12 = vcmask 130160  }
   0x8   :  { %v8872_v11 = vld [vmem:[%s16975_s0 + $0xf] ss:$16 sm:%s516_s27]   ;;  %v514_v13 = vsel %vm11_vm1, %v8871_v8, %v509_v10  ;;  %s533_s16 = smov 48  ;;  %s538_s19 = smov 192  ;;  %vm5481_vm13 = vcmask 113760   ;;  %vm6032_vm14 = vcmask 97360  }
   0x9   :  { %v8881_v12 = vld [vmem:[%s16975_s0 + $0x60f] ss:$16 sm:%s571_s28]   ;;  %v519_v15 = vsel %vm15_vm2, %v8872_v11, %v514_v13  ;;  %s617_s20 = smov 3  ;;  %s620_s25 = smov 12  ;;  %vm6583_vm15 = vcmask 80960  }
   0xa   :  { %v8882_v14 = vld [vmem:[%s16975_s0 + $0x60f] ss:$16 sm:%s574_s4]   ;;  %520 = vrot.lane.b32.xlu0 %v519_v15, %s10349_s6  ;;  %s625_s26 = smov 48  ;;  %s630_s29 = smov 192 }
   0xb   :  { %v577_v16 = vsel %vm7_vm0, %v8882_v14, %v8881_v12  ;;  %v8883_v17 = vld [vmem:[%s16975_s0 + $0x60f] ss:$16 sm:%s579_s5]   ;;  %s594_s30 = smov 3  ;;  %s597_s7 = smov 12 }
   0xc   :  { %v8884_v18 = vld [vmem:[%s16975_s0 + $0x60f] ss:$16 sm:%s584_s9]   ;;  %v582_v19 = vsel %vm11_vm1, %v8883_v17, %v577_v16  ;;  %s602_s8 = smov 48  ;;  %s607_s13 = smov 192 }
   0xd   :  { %v8873_v20 = vld [vmem:[%s16975_s0 + $0x20f] ss:$16 sm:%s525_s10]   ;;  %v587_v21 = vsel %vm15_vm2, %v8884_v18, %v582_v19  ;;  %s666_s17 = smov 12  ;;  %s671_s22 = smov 48 }
   0xe   :  { %v8874_v22 = vld [vmem:[%s16975_s0 + $0x20f] ss:$16 sm:%s528_s15]   ;;  %588 = vrot.lane.b32.xlu1 %v587_v21, %s10349_s6  ;;  %s676_s23 = smov 192  ;;  %s643_s2 = smov 12 }
   0xf   :  { %v8875_v23 = vld [vmem:[%s16975_s0 + $0x20f] ss:$16 sm:%s533_s16]   ;;  %v531_v24 = vsel %vm7_vm0, %v8874_v22, %v8873_v20  ;;  %s663_s16 = smov 3  ;;  %s648_s3 = smov 48 }
  0x10   :  { %v8876_v25 = vld [vmem:[%s16975_s0 + $0x20f] ss:$16 sm:%s538_s19]   ;;  %v536_v26 = vsel %vm11_vm1, %v8875_v23, %v531_v24  ;;  %s653_s9 = smov 192  ;;  %s709_s12 = smov 3 }
  0x11   :  { %v8889_v27 = vld [vmem:[%s16975_s0 + $0xa0f] ss:$16 sm:%s617_s20]   ;;  %v541_v29 = vsel %vm15_vm2, %v8876_v25, %v536_v26  ;;  %s717_s18 = smov 48  ;;  %s722_s19 = smov 192 }
  0x12   :  { %v8890_v28 = vld [vmem:[%s16975_s0 + $0xa0f] ss:$16 sm:%s620_s25]   ;;  %542 = vrot.lane.b32.xlu0 %v541_v29, %s10349_s6  ;;  %s689_s27 = smov 12  ;;  %s694_s28 = smov 48 }
  0x13   :  { %v623_v30 = vsel %vm7_vm0, %v8890_v28, %v8889_v27  ;;  %v8891_v31 = vld [vmem:[%s16975_s0 + $0xa0f] ss:$16 sm:%s625_s26]   ;;  %s640_s26 = smov 3  ;;  %s699_s4 = smov 192 }
  0x14   :  { %v8892_v32 = vld [vmem:[%s16975_s0 + $0xa0f] ss:$16 sm:%s630_s29]   ;;  %v628_v33 = vsel %vm11_vm1, %v8891_v31, %v623_v30  ;;  %s763_s14 = smov 48  ;;  %s768_s15 = smov 192 }
  0x15   :  { %v8885_v34 = vld [vmem:[%s16975_s0 + $0x80f] ss:$16 sm:%s594_s30]   ;;  %v633_v35 = vsel %vm15_vm2, %v8892_v32, %v628_v33  ;;  %s740_s24 = smov 48  ;;  %s745_s29 = smov 192 }
  0x16   :  { %v8886_v36 = vld [vmem:[%s16975_s0 + $0x80f] ss:$16 sm:%s597_s7]   ;;  %634 = vrot.lane.b32.xlu1 %v633_v35, %s10349_s6  ;;  %s809_s10 = smov 48  ;;  %s814_s11 = smov 192 }
  0x17   :  { %v8887_v37 = vld [vmem:[%s16975_s0 + $0x80f] ss:$16 sm:%s602_s8]   ;;  %v600_v38 = vsel %vm7_vm0, %v8886_v36, %v8885_v34  ;;  %s755_s8 = smov 3  ;;  %s786_s20 = smov 48 }
  0x18   :  { %v8888_v39 = vld [vmem:[%s16975_s0 + $0x80f] ss:$16 sm:%s607_s13]   ;;  %v605_v40 = vsel %vm11_vm1, %v8887_v37, %v600_v38  ;;  %s712_s13 = smov 12  ;;  %s791_s25 = smov 192 }
  0x19   :  { %v8897_v41 = vld [vmem:[%s16975_s0 + $0x28f] ss:$16 sm:%s663_s16]   ;;  %v610_v43 = vsel %vm15_vm2, %v8888_v39, %v605_v40  ;;  %s855_s5 = smov 48  ;;  %s860_s7 = smov 192 }
  0x1a   :  { %v8898_v42 = vld [vmem:[%s16975_s0 + $0x28f] ss:$16 sm:%s666_s17]   ;;  %611 = vrot.lane.b32.xlu0 %v610_v43, %s10349_s6  ;;  %s832_s16 = smov 48  ;;  %s837_s21 = smov 192 }
  0x1b   :  { %v669_v44 = vsel %vm7_vm0, %v8898_v42, %v8897_v41  ;;  %v8899_v45 = vld [vmem:[%s16975_s0 + $0x28f] ss:$16 sm:%s671_s22]   ;;  %s686_s22 = smov 3  ;;  %s901_s30 = smov 48 }
  0x1c   :  { %v8900_v46 = vld [vmem:[%s16975_s0 + $0x28f] ss:$16 sm:%s676_s23]   ;;  %v674_v47 = vsel %vm11_vm1, %v8899_v45, %v669_v44  ;;  %s735_s23 = smov 12  ;;  %s883_s17 = smov 192 }
  0x1d   :  { %v8893_v48 = vld [vmem:[%s16975_s0 + $0x8f] ss:$16 sm:%s640_s26]   ;;  %v679_v49 = vsel %vm15_vm2, %v8900_v46, %v674_v47  ;;  %s947_s26 = smov 48 }
  0x1e   :  { %v8894_v50 = vld [vmem:[%s16975_s0 + $0x8f] ss:$16 sm:%s643_s2]   ;;  %680 = vrot.lane.b32.xlu1 %v679_v49, %s10349_s6  ;;  %s906_s2 = smov 192 }
  0x1f   :  { %v8895_v51 = vld [vmem:[%s16975_s0 + $0x8f] ss:$16 sm:%s648_s3]   ;;  %v646_v52 = vsel %vm7_vm0, %v8894_v50, %v8893_v48  ;;  %s801_s3 = smov 3 }
  0x20   :  { %v8896_v53 = vld [vmem:[%s16975_s0 + $0x8f] ss:$16 sm:%s653_s9]   ;;  %v651_v54 = vsel %vm11_vm1, %v8895_v51, %v646_v52  ;;  %s758_s9 = smov 12 }
  0x21   :  { %v8905_v55 = vld [vmem:[%s16975_s0 + $0x68f] ss:$16 sm:%s709_s12]   ;;  %v656_v57 = vsel %vm15_vm2, %v8896_v53, %v651_v54  ;;  %s878_s12 = smov 48 }
  0x22   :  { %v8906_v56 = vld [vmem:[%s16975_s0 + $0x68f] ss:$16 sm:%s712_s13]   ;;  %657 = vrot.lane.b32.xlu0 %v656_v57, %s10349_s6  ;;  %s929_s13 = smov 192 }
  0x23   :  { %v715_v58 = vsel %vm7_vm0, %v8906_v56, %v8905_v55  ;;  %v8907_v59 = vld [vmem:[%s16975_s0 + $0x68f] ss:$16 sm:%s717_s18]   ;;  %s732_s18 = smov 3 }
  0x24   :  { %v8908_v60 = vld [vmem:[%s16975_s0 + $0x68f] ss:$16 sm:%s722_s19]   ;;  %v720_v61 = vsel %vm11_vm1, %v8907_v59, %v715_v58  ;;  %s781_s19 = smov 12 }
  0x25   :  { %v8901_v62 = vld [vmem:[%s16975_s0 + $0x48f] ss:$16 sm:%s686_s22]   ;;  %v725_v63 = vsel %vm15_vm2, %v8908_v60, %v720_v61  ;;  %s993_s22 = smov 48 }
  0x26   :  { %v8902_v0 = vld [vmem:[%s16975_s0 + $0x48f] ss:$16 sm:%s689_s27]   ;;  %726 = vrot.lane.b32.xlu1 %v725_v63, %s10349_s6  ;;  %s952_s27 = smov 192 }
  0x27   :  { %v8903_v1 = vld [vmem:[%s16975_s0 + $0x48f] ss:$16 sm:%s694_s28]   ;;  %v692_v2 = vsel %vm7_vm0, %v8902_v0, %v8901_v62  ;;  %s847_s28 = smov 3 }
  0x28   :  { %v8904_v3 = vld [vmem:[%s16975_s0 + $0x48f] ss:$16 sm:%s699_s4]   ;;  %v697_v4 = vsel %vm11_vm1, %v8903_v1, %v692_v2  ;;  %s804_s4 = smov 12 }
  0x29   :  { %v8913_v5 = vld [vmem:[%s16975_s0 + $0xa8f] ss:$16 sm:%s755_s8]   ;;  %v702_v7 = vsel %vm15_vm2, %v8904_v3, %v697_v4  ;;  %s924_s8 = smov 48 }
  0x2a   :  { %v8914_v6 = vld [vmem:[%s16975_s0 + $0xa8f] ss:$16 sm:%s758_s9]   ;;  %703 = vrot.lane.b32.xlu0 %v702_v7, %s10349_s6  ;;  %s975_s9 = smov 192 }
  0x2b   :  { %v761_v8 = vsel %vm7_vm0, %v8914_v6, %v8913_v5  ;;  %v8915_v9 = vld [vmem:[%s16975_s0 + $0xa8f] ss:$16 sm:%s763_s14]   ;;  %s778_s14 = smov 3 }
  0x2c   :  { %v8916_v10 = vld [vmem:[%s16975_s0 + $0xa8f] ss:$16 sm:%s768_s15]   ;;  %v766_v11 = vsel %vm11_vm1, %v8915_v9, %v761_v8  ;;  %s827_s15 = smov 12 }
  0x2d   :  { %v8909_v12 = vld [vmem:[%s16975_s0 + $0x88f] ss:$16 sm:%s732_s18]   ;;  %v771_v13 = vsel %vm15_vm2, %v8916_v10, %v766_v11  ;;  %s1039_s18 = smov 48 }
  0x2e   :  { %v8910_v14 = vld [vmem:[%s16975_s0 + $0x88f] ss:$16 sm:%s735_s23]   ;;  %772 = vrot.lane.b32.xlu1 %v771_v13, %s10349_s6  ;;  %s998_s23 = smov 192 }
  0x2f   :  { %v8911_v15 = vld [vmem:[%s16975_s0 + $0x88f] ss:$16 sm:%s740_s24]   ;;  %v738_v16 = vsel %vm7_vm0, %v8910_v14, %v8909_v12  ;;  %s893_s24 = smov 3 }
  0x30   :  { %v8912_v17 = vld [vmem:[%s16975_s0 + $0x88f] ss:$16 sm:%s745_s29]   ;;  %v743_v18 = vsel %vm11_vm1, %v8911_v15, %v738_v16  ;;  %s850_s29 = smov 12 }
  0x31   :  { %v8921_v19 = vld [vmem:[%s16975_s0 + $0x30f] ss:$16 sm:%s801_s3]   ;;  %v748_v21 = vsel %vm15_vm2, %v8912_v17, %v743_v18  ;;  %s970_s3 = smov 48 }
  0x32   :  { %v8922_v20 = vld [vmem:[%s16975_s0 + $0x30f] ss:$16 sm:%s804_s4]   ;;  %749 = vrot.lane.b32.xlu0 %v748_v21, %s10349_s6  ;;  %s1021_s4 = smov 192 }
  0x33   :  { %v807_v22 = vsel %vm7_vm0, %v8922_v20, %v8921_v19  ;;  %v8923_v23 = vld [vmem:[%s16975_s0 + $0x30f] ss:$16 sm:%s809_s10]   ;;  %s824_s10 = smov 3 }
  0x34   :  { %v8924_v24 = vld [vmem:[%s16975_s0 + $0x30f] ss:$16 sm:%s814_s11]   ;;  %v812_v25 = vsel %vm11_vm1, %v8923_v23, %v807_v22  ;;  %s873_s11 = smov 12 }
  0x35   :  { %v8917_v26 = vld [vmem:[%s16975_s0 + $0x10f] ss:$16 sm:%s778_s14]   ;;  %v817_v27 = vsel %vm15_vm2, %v8924_v24, %v812_v25  ;;  %s1084_s14 = smov 48 }
  0x36   :  { %v8918_v28 = vld [vmem:[%s16975_s0 + $0x10f] ss:$16 sm:%s781_s19]   ;;  %818 = vrot.lane.b32.xlu1 %v817_v27, %s10349_s6  ;;  %s1044_s19 = smov 192 }
  0x37   :  { %v8919_v29 = vld [vmem:[%s16975_s0 + $0x10f] ss:$16 sm:%s786_s20]   ;;  %v784_v30 = vsel %vm7_vm0, %v8918_v28, %v8917_v26  ;;  %s939_s20 = smov 3 }
  0x38   :  { %v8920_v31 = vld [vmem:[%s16975_s0 + $0x10f] ss:$16 sm:%s791_s25]   ;;  %v789_v32 = vsel %vm11_vm1, %v8919_v29, %v784_v30  ;;  %s896_s25 = smov 12 }
  0x39   :  { %v8929_v33 = vld [vmem:[%s16975_s0 + $0x70f] ss:$16 sm:%s847_s28]   ;;  %v794_v35 = vsel %vm15_vm2, %v8920_v31, %v789_v32  ;;  %s1016_s28 = smov 48 }
  0x3a   :  { %v8930_v34 = vld [vmem:[%s16975_s0 + $0x70f] ss:$16 sm:%s850_s29]   ;;  %795 = vrot.lane.b32.xlu0 %v794_v35, %s10349_s6  ;;  %s1067_s29 = smov 192 }
  0x3b   :  { %v853_v36 = vsel %vm7_vm0, %v8930_v34, %v8929_v33  ;;  %v8931_v37 = vld [vmem:[%s16975_s0 + $0x70f] ss:$16 sm:%s855_s5]   ;;  %s870_s5 = smov 3 }
  0x3c   :  { %v8932_v38 = vld [vmem:[%s16975_s0 + $0x70f] ss:$16 sm:%s860_s7]   ;;  %v858_v39 = vsel %vm11_vm1, %v8931_v37, %v853_v36  ;;  %s919_s7 = smov 12 }
  0x3d   :  { %v8925_v40 = vld [vmem:[%s16975_s0 + $0x50f] ss:$16 sm:%s824_s10]   ;;  %v863_v41 = vsel %vm15_vm2, %v8932_v38, %v858_v39  ;;  %s1135_s10 = smov 192 }
  0x3e   :  { %v8926_v42 = vld [vmem:[%s16975_s0 + $0x50f] ss:$16 sm:%s827_s15]   ;;  %864 = vrot.lane.b32.xlu1 %v863_v41, %s10349_s6  ;;  %s1089_s15 = smov 192 }
  0x3f   :  { %v8927_v43 = vld [vmem:[%s16975_s0 + $0x50f] ss:$16 sm:%s832_s16]   ;;  %v830_v44 = vsel %vm7_vm0, %v8926_v42, %v8925_v40  ;;  %s985_s16 = smov 3 }
  0x40   :  { %v8928_v45 = vld [vmem:[%s16975_s0 + $0x50f] ss:$16 sm:%s837_s21]   ;;  %v835_v46 = vsel %vm11_vm1, %v8927_v43, %v830_v44  ;;  %s942_s21 = smov 12  ;;  %v8971_v43 = vld [vmem:[%s16975_s0 + $0x20e] ss:$16 sm:%s1084_s14]   ;;  %s1099_s14 = smov 3 }
  0x41   :  { %v8937_v47 = vld [vmem:[%s16975_s0 + $0xb0f] ss:$16 sm:%s893_s24]   ;;  %v840_v49 = vsel %vm15_vm2, %v8928_v45, %v835_v46  ;;  %s1062_s24 = smov 48  ;;  %v8972_v44 = vld [vmem:[%s16975_s0 + $0x20e] ss:$16 sm:%s1089_s15]   ;;  %s1148_s15 = smov 12 }
  0x42   :  { %v8938_v48 = vld [vmem:[%s16975_s0 + $0xb0f] ss:$16 sm:%s896_s25]   ;;  %841 = vrot.lane.b32.xlu0 %v840_v49, %s10349_s6  ;;  %s1112_s25 = smov 192 }
  0x43   :  { %v899_v50 = vsel %vm7_vm0, %v8938_v48, %v8937_v47  ;;  %v8939_v51 = vld [vmem:[%s16975_s0 + $0xb0f] ss:$16 sm:%s901_s30]   ;;  %s916_s30 = smov 3  ;;  %v8967_v49 = vld [vmem:[%s16975_s0 + $0xe] ss:$16 sm:%s1062_s24]   ;;  %s1214_s24 = smov 3 }
  0x44   :  { %v8940_v52 = vld [vmem:[%s16975_s0 + $0xb0f] ss:$16 sm:%s906_s2]   ;;  %v904_v53 = vsel %vm11_vm1, %v8939_v51, %v899_v50  ;;  %s965_s2 = smov 12  ;;  %v8968_v51 = vld [vmem:[%s16975_s0 + $0xe] ss:$16 sm:%s1067_s29]   ;;  %s1171_s29 = smov 12 }
  0x45   :  { %v8933_v54 = vld [vmem:[%s16975_s0 + $0x90f] ss:$16 sm:%s870_s5]   ;;  %v909_v55 = vsel %vm15_vm2, %v8940_v52, %v904_v53  ;;  %s1181_s5 = smov 192 }
  0x46   :  { %v8934_v56 = vld [vmem:[%s16975_s0 + $0x90f] ss:$16 sm:%s873_s11]   ;;  %910 = vrot.lane.b32.xlu1 %v909_v55, %s10349_s6  ;;  %s10350_s11 = smov 28  }
  0x47   :  { %v8935_v57 = vld [vmem:[%s16975_s0 + $0x90f] ss:$16 sm:%s878_s12]   ;;  %v876_v58 = vsel %vm7_vm0, %v8934_v56, %v8933_v54  ;;  %s1031_s12 = smov 3 }
  0x48   :  { %v8936_v59 = vld [vmem:[%s16975_s0 + $0x90f] ss:$16 sm:%s883_s17]   ;;  %v881_v60 = vsel %vm11_vm1, %v8935_v57, %v876_v58  ;;  %s988_s17 = smov 12  ;;  %v8980_v58 = vld [vmem:[%s16975_s0 + $0x60e] ss:$16 sm:%s1135_s10]   ;;  %s1194_s10 = smov 12 }
  0x49   :  { %v8945_v61 = vld [vmem:[%s16975_s0 + $0x38f] ss:$16 sm:%s939_s20]   ;;  %v886_v63 = vsel %vm15_vm2, %v8936_v59, %v881_v60  ;;  %s1107_s20 = smov 48  ;;  %v8973_v60 = vld [vmem:[%s16975_s0 + $0x40e] ss:$16 sm:%s1099_s14]   ;;  %s1406_s14 = smov 48 }
  0x4a   :  { %v8946_v62 = vld [vmem:[%s16975_s0 + $0x38f] ss:$16 sm:%s942_s21]   ;;  %887 = vrot.lane.b32.xlu0 %v886_v63, %s10349_s6  ;;  %s1158_s21 = smov 192 }
  0x4b   :  { %v945_v0 = vsel %vm7_vm0, %v8946_v62, %v8945_v61  ;;  %v8947_v1 = vld [vmem:[%s16975_s0 + $0x38f] ss:$16 sm:%s947_s26]   ;;  %s962_s26 = smov 3  ;;  %v8975_v63 = vld [vmem:[%s16975_s0 + $0x40e] ss:$16 sm:%s1107_s20]   ;;  %s1260_s20 = smov 3 }
  0x4c   :  { %v8948_v2 = vld [vmem:[%s16975_s0 + $0x38f] ss:$16 sm:%s952_s27]   ;;  %v950_v3 = vsel %vm11_vm1, %v8947_v1, %v945_v0  ;;  %s1011_s27 = smov 12  ;;  %v8976_v1 = vld [vmem:[%s16975_s0 + $0x40e] ss:$16 sm:%s1112_s25]   ;;  %s1217_s25 = smov 12 }
  0x4d   :  { %v8941_v4 = vld [vmem:[%s16975_s0 + $0x18f] ss:$16 sm:%s916_s30]   ;;  %v955_v5 = vsel %vm15_vm2, %v8948_v2, %v950_v3  ;;  %s1227_s30 = smov 192 }
  0x4e   :  { %v8942_v6 = vld [vmem:[%s16975_s0 + $0x18f] ss:$16 sm:%s919_s7]   ;;  %956 = vrot.lane.b32.xlu1 %v955_v5, %s10349_s6  ;;  %s1245_s7 = smov 48 }
  0x4f   :  { %v8943_v7 = vld [vmem:[%s16975_s0 + $0x18f] ss:$16 sm:%s924_s8]   ;;  %v922_v8 = vsel %vm7_vm0, %v8942_v6, %v8941_v4  ;;  %s1076_s8 = smov 3  ;;  %v8986_v4 = vld [vmem:[%s16975_s0 + $0xa0e] ss:$16 sm:%s1171_s29]   ;;  %s1388_s29 = smov 192 }
  0x50   :  { %v8944_v9 = vld [vmem:[%s16975_s0 + $0x18f] ss:$16 sm:%s929_s13]   ;;  %v927_v10 = vsel %vm11_vm1, %v8943_v7, %v922_v8  ;;  %s1034_s13 = smov 12  ;;  %v8969_v39 = vld [vmem:[%s16975_s0 + $0x20e] ss:$16 sm:%s1076_s8]   ;;  %s1296_s8 = smov 192 }
  0x51   :  { %v8953_v11 = vld [vmem:[%s16975_s0 + $0x78f] ss:$16 sm:%s985_s16]   ;;  %v932_v13 = vsel %vm15_vm2, %v8944_v9, %v927_v10  ;;  %s1153_s16 = smov 48  ;;  %v8988_v8 = vld [vmem:[%s16975_s0 + $0xa0e] ss:$16 sm:%s1181_s5]   ;;  %s1240_s5 = smov 12 }
  0x52   :  { %v8954_v12 = vld [vmem:[%s16975_s0 + $0x78f] ss:$16 sm:%s988_s17]   ;;  %933 = vrot.lane.b32.xlu0 %v932_v13, %s10349_s6  ;;  %s1204_s17 = smov 192 }
  0x53   :  { %v991_v14 = vsel %vm7_vm0, %v8954_v12, %v8953_v11  ;;  %v8955_v15 = vld [vmem:[%s16975_s0 + $0x78f] ss:$16 sm:%s993_s22]   ;;  %s1008_s22 = smov 3  ;;  %v8982_v12 = vld [vmem:[%s16975_s0 + $0x80e] ss:$16 sm:%s1148_s15]   ;;  %s1411_s15 = smov 192 }
  0x54   :  { %v8956_v16 = vld [vmem:[%s16975_s0 + $0x78f] ss:$16 sm:%s998_s23]   ;;  %v996_v17 = vsel %vm11_vm1, %v8955_v15, %v991_v14  ;;  %s1057_s23 = smov 12  ;;  %v8983_v13 = vld [vmem:[%s16975_s0 + $0x80e] ss:$16 sm:%s1153_s16]   ;;  %s1306_s16 = smov 3 }
  0x55   :  { %v8949_v18 = vld [vmem:[%s16975_s0 + $0x58f] ss:$16 sm:%s962_s26]   ;;  %v1001_v19 = vsel %vm15_vm2, %v8956_v16, %v996_v17  ;;  %v8966_v48 = vld [vmem:[%s16975_s0 + $0xe] ss:$16 sm:%s1057_s23]   ;;  %s1268_s26 = smov 48  ;;  %s1319_s23 = smov 192 }
  0x56   :  { %v8950_v20 = vld [vmem:[%s16975_s0 + $0x58f] ss:$16 sm:%s965_s2]   ;;  %1002 = vrot.lane.b32.xlu1 %v1001_v19, %s10349_s6  ;;  %s1122_s2 = smov 3 }
  0x57   :  { %v8951_v21 = vld [vmem:[%s16975_s0 + $0x58f] ss:$16 sm:%s970_s3]   ;;  %v968_v22 = vsel %vm7_vm0, %v8950_v20, %v8949_v18  ;;  %s1125_s3 = smov 12  ;;  %v8977_v53 = vld [vmem:[%s16975_s0 + $0x60e] ss:$16 sm:%s1122_s2]   ;;  %s1291_s2 = smov 48 }
  0x58   :  { %v8952_v23 = vld [vmem:[%s16975_s0 + $0x58f] ss:$16 sm:%s975_s9]   ;;  %v973_v24 = vsel %vm11_vm1, %v8951_v21, %v968_v22  ;;  %s1079_s9 = smov 12  ;;  %v8978_v54 = vld [vmem:[%s16975_s0 + $0x60e] ss:$16 sm:%s1125_s3]   ;;  %s1342_s3 = smov 192 }
  0x59   :  { %v8961_v25 = vld [vmem:[%s16975_s0 + $0xb8f] ss:$16 sm:%s1031_s12]   ;;  %v978_v27 = vsel %vm15_vm2, %v8952_v23, %v973_v24  ;;  %v8970_v40 = vld [vmem:[%s16975_s0 + $0x20e] ss:$16 sm:%s1079_s9]   ;;  %s1130_s9 = smov 48  ;;  %v1128_v56 = vsel %vm7_vm0, %v8978_v54, %v8977_v53  ;;  %s1199_s12 = smov 48 }
  0x5a   :  { %v8962_v26 = vld [vmem:[%s16975_s0 + $0xb8f] ss:$16 sm:%s1034_s13]   ;;  %979 = vrot.lane.b32.xlu0 %v978_v27, %s10349_s6  ;;  %v1082_v42 = vsel %vm7_vm0, %v8970_v40, %v8969_v39  ;;  %s1250_s13 = smov 192 }
  0x5b   :  { %v1037_v28 = vsel %vm7_vm0, %v8962_v26, %v8961_v25  ;;  %v8963_v29 = vld [vmem:[%s16975_s0 + $0xb8f] ss:$16 sm:%s1039_s18]   ;;  %s1054_s18 = smov 3  ;;  %v1087_v45 = vsel %vm11_vm1, %v8971_v43, %v1082_v42  ;;  %v8979_v57 = vld [vmem:[%s16975_s0 + $0x60e] ss:$16 sm:%s1130_s9]   ;;  %s1145_s9 = smov 3 }
  0x5c   :  { %v8964_v30 = vld [vmem:[%s16975_s0 + $0xb8f] ss:$16 sm:%s1044_s19]   ;;  %v1042_v31 = vsel %vm11_vm1, %v8963_v29, %v1037_v28  ;;  %v8965_v46 = vld [vmem:[%s16975_s0 + $0xe] ss:$16 sm:%s1054_s18]   ;;  %v1092_v47 = vsel %vm15_vm2, %v8972_v44, %v1087_v45  ;;  %s1102_s19 = smov 12  ;;  %v1133_v59 = vsel %vm11_vm1, %v8979_v57, %v1128_v56  ;;  %s1360_s18 = smov 48 }
  0x5d   :  { %v8957_v32 = vld [vmem:[%s16975_s0 + $0x98f] ss:$16 sm:%s1008_s22]   ;;  %v1047_v33 = vsel %vm15_vm2, %v8964_v30, %v1042_v31  ;;  %v1060_v50 = vsel %vm7_vm0, %v8966_v48, %v8965_v46  ;;  %v1138_v61 = vsel %vm15_vm2, %v8980_v58, %v1133_v59  ;;  %v8974_v62 = vld [vmem:[%s16975_s0 + $0x40e] ss:$16 sm:%s1102_s19]   ;;  %s1314_s22 = smov 48  ;;  %s1365_s19 = smov 192 }
  0x5e   :  { %v8958_v34 = vld [vmem:[%s16975_s0 + $0x98f] ss:$16 sm:%s1011_s27]   ;;  %1048 = vrot.lane.b32.xlu1 %v1047_v33, %s10349_s6  ;;  %v1065_v52 = vsel %vm11_vm1, %v8967_v49, %v1060_v50  ;;  %v1105_v0 = vsel %vm7_vm0, %v8974_v62, %v8973_v60  ;;  %s1273_s27 = smov 192 }
  0x5f   :  { %v8959_v35 = vld [vmem:[%s16975_s0 + $0x98f] ss:$16 sm:%s1016_s28]   ;;  %v1014_v36 = vsel %vm7_vm0, %v8958_v34, %v8957_v32  ;;  %v1070_v55 = vsel %vm15_vm2, %v8968_v51, %v1065_v52  ;;  %s1168_s28 = smov 3  ;;  %v1110_v2 = vsel %vm11_vm1, %v8975_v63, %v1105_v0  ;;  %v8981_v10 = vld [vmem:[%s16975_s0 + $0x80e] ss:$16 sm:%s1145_s9]   ;;  %s1452_s9 = smov 48 }
  0x60   :  { %v8960_v37 = vld [vmem:[%s16975_s0 + $0x98f] ss:$16 sm:%s1021_s4]   ;;  %v1019_v38 = vsel %vm11_vm1, %v8959_v35, %v1014_v36  ;;  %s1176_s4 = smov 48  ;;  %v8985_v3 = vld [vmem:[%s16975_s0 + $0xa0e] ss:$16 sm:%s1168_s28]   ;;  %v1115_v5 = vsel %vm15_vm2, %v8976_v1, %v1110_v2  ;;  %v1151_v14 = vsel %vm7_vm0, %v8982_v12, %v8981_v10  ;;  %s1337_s28 = smov 48 }
  0x61   :  { %v1024_v41 = vsel %vm15_vm2, %v8960_v37, %v1019_v38  ;;  %v1174_v6 = vsel %vm7_vm0, %v8986_v4, %v8985_v3  ;;  %v8987_v7 = vld [vmem:[%s16975_s0 + $0xa0e] ss:$16 sm:%s1176_s4]   ;;  %s1191_s4 = smov 3  ;;  %v1156_v16 = vsel %vm11_vm1, %v8983_v13, %v1151_v14 }
  0x62   :  { %1025 = vrot.lane.b32.xlu0 %v1024_v41, %s10349_s6  ;;  %1093 = vrot.lane.b32.xlu1 %v1092_v47, %s10350_s11  ;;  %v1179_v9 = vsel %vm11_vm1, %v8987_v7, %v1174_v6  ;;  %s1222_s6 = smov 48  ;;  %v8984_v15 = vld [vmem:[%s16975_s0 + $0x80e] ss:$16 sm:%s1158_s21]   ;;  %s1263_s21 = smov 12 }
  0x63   :  { %v1184_v11 = vsel %vm15_vm2, %v8988_v8, %v1179_v9  ;;  %v8993_v17 = vld [vmem:[%s16975_s0 + $0x28e] ss:$16 sm:%s1214_s24]   ;;  %v1161_v19 = vsel %vm15_vm2, %v8984_v15, %v1156_v16  ;;  %s1383_s24 = smov 48 }
  0x64   :  { %v8994_v18 = vld [vmem:[%s16975_s0 + $0x28e] ss:$16 sm:%s1217_s25]   ;;  %s1434_s25 = smov 192 }
  0x65   :  { %v1220_v20 = vsel %vm7_vm0, %v8994_v18, %v8993_v17  ;;  %v8995_v21 = vld [vmem:[%s16975_s0 + $0x28e] ss:$16 sm:%s1222_s6]   ;;  %s1237_s6 = smov 3 }
  0x66   :  { %1071 = vrot.lane.b32.xlu0 %v1070_v55, %s10350_s11  ;;  %1139 = vrot.lane.b32.xlu1 %v1138_v61, %s10350_s11  ;;  %v8996_v22 = vld [vmem:[%s16975_s0 + $0x28e] ss:$16 sm:%s1227_s30]   ;;  %v1225_v23 = vsel %vm11_vm1, %v8995_v21, %v1220_v20  ;;  %s1286_s30 = smov 12 }
  0x67   :  { %v8989_v24 = vld [vmem:[%s16975_s0 + $0x8e] ss:$16 sm:%s1191_s4]   ;;  %v1230_v25 = vsel %vm15_vm2, %v8996_v22, %v1225_v23  ;;  %s1498_s4 = smov 48 }
  0x68   :  { %v8990_v26 = vld [vmem:[%s16975_s0 + $0x8e] ss:$16 sm:%s1194_s10]   ;;  %s1457_s10 = smov 192 }
  0x69   :  { %v8991_v27 = vld [vmem:[%s16975_s0 + $0x8e] ss:$16 sm:%s1199_s12]   ;;  %v1197_v28 = vsel %vm7_vm0, %v8990_v26, %v8989_v24  ;;  %s1352_s12 = smov 3 }
  0x6a   :  { %1116 = vrot.lane.b32.xlu0 %v1115_v5, %s10350_s11  ;;  %1185 = vrot.lane.b32.xlu1 %v1184_v11, %s10350_s11  ;;  %v8992_v29 = vld [vmem:[%s16975_s0 + $0x8e] ss:$16 sm:%s1204_s17]   ;;  %v1202_v30 = vsel %vm11_vm1, %v8991_v27, %v1197_v28  ;;  %s1309_s17 = smov 12 }
  0x6b   :  { %v9001_v31 = vld [vmem:[%s16975_s0 + $0x68e] ss:$16 sm:%s1260_s20]   ;;  %v1207_v33 = vsel %vm15_vm2, %v8992_v29, %v1202_v30  ;;  %s1429_s20 = smov 48 }
  0x6c   :  { %v9002_v32 = vld [vmem:[%s16975_s0 + $0x68e] ss:$16 sm:%s1263_s21]   ;;  %s1480_s21 = smov 192 }
  0x6d   :  { %v1266_v34 = vsel %vm7_vm0, %v9002_v32, %v9001_v31  ;;  %v9003_v35 = vld [vmem:[%s16975_s0 + $0x68e] ss:$16 sm:%s1268_s26]   ;;  %s1283_s26 = smov 3 }
  0x6e   :  { %1162 = vrot.lane.b32.xlu0 %v1161_v19, %s10350_s11  ;;  %1231 = vrot.lane.b32.xlu1 %v1230_v25, %s10350_s11  ;;  %v9004_v36 = vld [vmem:[%s16975_s0 + $0x68e] ss:$16 sm:%s1273_s27]   ;;  %v1271_v37 = vsel %vm11_vm1, %v9003_v35, %v1266_v34  ;;  %s1332_s27 = smov 12 }
  0x6f   :  { %v8997_v38 = vld [vmem:[%s16975_s0 + $0x48e] ss:$16 sm:%s1237_s6]   ;;  %v1276_v39 = vsel %vm15_vm2, %v9004_v36, %v1271_v37  ;;  %s1544_s6 = smov 48 }
  0x70   :  { %v8998_v40 = vld [vmem:[%s16975_s0 + $0x48e] ss:$16 sm:%s1240_s5]   ;;  %s1503_s5 = smov 192 }
  0x71   :  { %v8999_v41 = vld [vmem:[%s16975_s0 + $0x48e] ss:$16 sm:%s1245_s7]   ;;  %v1243_v42 = vsel %vm7_vm0, %v8998_v40, %v8997_v38  ;;  %s1398_s7 = smov 3 }
  0x72   :  { %1208 = vrot.lane.b32.xlu0 %v1207_v33, %s10350_s11  ;;  %1277 = vrot.lane.b32.xlu1 %v1276_v39, %s10350_s11  ;;  %v9000_v43 = vld [vmem:[%s16975_s0 + $0x48e] ss:$16 sm:%s1250_s13]   ;;  %v1248_v44 = vsel %vm11_vm1, %v8999_v41, %v1243_v42  ;;  %s1355_s13 = smov 12 }
  0x73   :  { %v9009_v45 = vld [vmem:[%s16975_s0 + $0xa8e] ss:$16 sm:%s1306_s16]   ;;  %v1253_v47 = vsel %vm15_vm2, %v9000_v43, %v1248_v44  ;;  %s1475_s16 = smov 48 }
  0x74   :  { %v9010_v46 = vld [vmem:[%s16975_s0 + $0xa8e] ss:$16 sm:%s1309_s17]   ;;  %s1526_s17 = smov 192 }
  0x75   :  { %v1312_v48 = vsel %vm7_vm0, %v9010_v46, %v9009_v45  ;;  %v9011_v49 = vld [vmem:[%s16975_s0 + $0xa8e] ss:$16 sm:%s1314_s22]   ;;  %s1329_s22 = smov 3 }
  0x76   :  { %v9012_v50 = vld [vmem:[%s16975_s0 + $0xa8e] ss:$16 sm:%s1319_s23]   ;;  %1254 = vrot.lane.b32.xlu0 %v1253_v47, %s10350_s11  ;;  %v1317_v51 = vsel %vm11_vm1, %v9011_v49, %v1312_v48  ;;  %s1378_s23 = smov 12 }
  0x77   :  { %v9005_v52 = vld [vmem:[%s16975_s0 + $0x88e] ss:$16 sm:%s1283_s26]   ;;  %v1322_v53 = vsel %vm15_vm2, %v9012_v50, %v1317_v51  ;;  %s1590_s26 = smov 48 }
  0x78   :  { %v9006_v54 = vld [vmem:[%s16975_s0 + $0x88e] ss:$16 sm:%s1286_s30]   ;;  %1323 = vrot.lane.b32.xlu1 %v1322_v53, %s10350_s11  ;;  %s1549_s30 = smov 192 }
  0x79   :  { %v9007_v55 = vld [vmem:[%s16975_s0 + $0x88e] ss:$16 sm:%s1291_s2]   ;;  %v1289_v56 = vsel %vm7_vm0, %v9006_v54, %v9005_v52  ;;  %s1444_s2 = smov 3 }
  0x7a   :  { %v9008_v57 = vld [vmem:[%s16975_s0 + $0x88e] ss:$16 sm:%s1296_s8]   ;;  %v1294_v58 = vsel %vm11_vm1, %v9007_v55, %v1289_v56  ;;  %s1401_s8 = smov 12 }
  0x7b   :  { %v9017_v59 = vld [vmem:[%s16975_s0 + $0x30e] ss:$16 sm:%s1352_s12]   ;;  %v1299_v61 = vsel %vm15_vm2, %v9008_v57, %v1294_v58  ;;  %s1521_s12 = smov 48 }
  0x7c   :  { %v9018_v60 = vld [vmem:[%s16975_s0 + $0x30e] ss:$16 sm:%s1355_s13]   ;;  %1300 = vrot.lane.b32.xlu0 %v1299_v61, %s10350_s11  ;;  %s1572_s13 = smov 192 }
  0x7d   :  { %v1358_v62 = vsel %vm7_vm0, %v9018_v60, %v9017_v59  ;;  %v9019_v63 = vld [vmem:[%s16975_s0 + $0x30e] ss:$16 sm:%s1360_s18]   ;;  %s1375_s18 = smov 3 }
  0x7e   :  { %v9020_v0 = vld [vmem:[%s16975_s0 + $0x30e] ss:$16 sm:%s1365_s19]   ;;  %v1363_v1 = vsel %vm11_vm1, %v9019_v63, %v1358_v62  ;;  %s1424_s19 = smov 12 }
  0x7f   :  { %v9013_v2 = vld [vmem:[%s16975_s0 + $0x10e] ss:$16 sm:%s1329_s22]   ;;  %v1368_v3 = vsel %vm15_vm2, %v9020_v0, %v1363_v1  ;;  %s1635_s22 = smov 48 }
  0x80   :  { %v9014_v4 = vld [vmem:[%s16975_s0 + $0x10e] ss:$16 sm:%s1332_s27]   ;;  %1369 = vrot.lane.b32.xlu1 %v1368_v3, %s10350_s11  ;;  %s1595_s27 = smov 192 }
  0x81   :  { %v9015_v5 = vld [vmem:[%s16975_s0 + $0x10e] ss:$16 sm:%s1337_s28]   ;;  %v1335_v6 = vsel %vm7_vm0, %v9014_v4, %v9013_v2  ;;  %s1490_s28 = smov 3 }
  0x82   :  { %v9016_v7 = vld [vmem:[%s16975_s0 + $0x10e] ss:$16 sm:%s1342_s3]   ;;  %v1340_v8 = vsel %vm11_vm1, %v9015_v5, %v1335_v6  ;;  %s1447_s3 = smov 12 }
  0x83   :  { %v9025_v9 = vld [vmem:[%s16975_s0 + $0x70e] ss:$16 sm:%s1398_s7]   ;;  %v1345_v11 = vsel %vm15_vm2, %v9016_v7, %v1340_v8  ;;  %s1567_s7 = smov 48 }
  0x84   :  { %v9026_v10 = vld [vmem:[%s16975_s0 + $0x70e] ss:$16 sm:%s1401_s8]   ;;  %1346 = vrot.lane.b32.xlu0 %v1345_v11, %s10350_s11  ;;  %s1618_s8 = smov 192 }
  0x85   :  { %v1404_v12 = vsel %vm7_vm0, %v9026_v10, %v9025_v9  ;;  %v9027_v13 = vld [vmem:[%s16975_s0 + $0x70e] ss:$16 sm:%s1406_s14]   ;;  %s1421_s14 = smov 3 }
  0x86   :  { %v9028_v14 = vld [vmem:[%s16975_s0 + $0x70e] ss:$16 sm:%s1411_s15]   ;;  %v1409_v15 = vsel %vm11_vm1, %v9027_v13, %v1404_v12  ;;  %s1470_s15 = smov 12 }
  0x87   :  { %v9021_v16 = vld [vmem:[%s16975_s0 + $0x50e] ss:$16 sm:%s1375_s18]   ;;  %v1414_v17 = vsel %vm15_vm2, %v9028_v14, %v1409_v15  ;;  %v11140_v14 = vpop.permute.xlu1 %565   ;;  %s1686_s18 = smov 192 }
  0x88   :  { %v9022_v18 = vld [vmem:[%s16975_s0 + $0x50e] ss:$16 sm:%s1378_s23]   ;;  %1415 = vrot.lane.b32.xlu1 %v1414_v17, %s10350_s11  ;;  %s1640_s23 = smov 192 }
  0x89   :  { %v9023_v19 = vld [vmem:[%s16975_s0 + $0x50e] ss:$16 sm:%s1383_s24]   ;;  %v1381_v20 = vsel %vm7_vm0, %v9022_v18, %v9021_v16  ;;  %s1536_s24 = smov 3 }
  0x8a   :  { %v9024_v21 = vld [vmem:[%s16975_s0 + $0x50e] ss:$16 sm:%s1388_s29]   ;;  %v1386_v22 = vsel %vm11_vm1, %v9023_v19, %v1381_v20  ;;  %s1493_s29 = smov 12  ;;  %v9067_v20 = vld [vmem:[%s16975_s0 + $0x20d] ss:$16 sm:%s1635_s22]   ;;  %s1650_s22 = smov 3 }
  0x8b   :  { %v9033_v23 = vld [vmem:[%s16975_s0 + $0xb0e] ss:$16 sm:%s1444_s2]   ;;  %v1391_v25 = vsel %vm15_vm2, %v9024_v21, %v1386_v22  ;;  %s1613_s2 = smov 48  ;;  %v9068_v21 = vld [vmem:[%s16975_s0 + $0x20d] ss:$16 sm:%s1640_s23]   ;;  %v11157_v22 = vpop.permute.xlu0 %520   ;;  %s1699_s23 = smov 12 }
  0x8c   :  { %v9034_v24 = vld [vmem:[%s16975_s0 + $0xb0e] ss:$16 sm:%s1447_s3]   ;;  %1392 = vrot.lane.b32.xlu0 %v1391_v25, %s10350_s11  ;;  %s1663_s3 = smov 192 }
  0x8d   :  { %v1450_v26 = vsel %vm7_vm0, %v9034_v24, %v9033_v23  ;;  %v9035_v27 = vld [vmem:[%s16975_s0 + $0xb0e] ss:$16 sm:%s1452_s9]   ;;  %s1467_s9 = smov 3 }
  0x8e   :  { %v9036_v28 = vld [vmem:[%s16975_s0 + $0xb0e] ss:$16 sm:%s1457_s10]   ;;  %v1455_v29 = vsel %vm11_vm1, %v9035_v27, %v1450_v26  ;;  %s1516_s10 = smov 12  ;;  %v9063_v27 = vld [vmem:[%s16975_s0 + $0xd] ss:$16 sm:%s1613_s2]   ;;  %s1765_s2 = smov 3 }
  0x8f   :  { %v9029_v30 = vld [vmem:[%s16975_s0 + $0x90e] ss:$16 sm:%s1421_s14]   ;;  %v1460_v31 = vsel %vm15_vm2, %v9036_v28, %v1455_v29  ;;  %v11171_v28 = vpop.permute.xlu1 %588   ;;  %s1732_s14 = smov 192 }
  0x90   :  { %v9030_v32 = vld [vmem:[%s16975_s0 + $0x90e] ss:$16 sm:%s1424_s19]   ;;  %1461 = vrot.lane.b32.xlu1 %v1460_v31, %s10350_s11  ;;  %s10351_s19 = smov 26  }
  0x91   :  { %v9031_v33 = vld [vmem:[%s16975_s0 + $0x90e] ss:$16 sm:%s1429_s20]   ;;  %v1427_v34 = vsel %vm7_vm0, %v9030_v32, %v9029_v30  ;;  %s1582_s20 = smov 3  ;;  %v9064_v30 = vld [vmem:[%s16975_s0 + $0xd] ss:$16 sm:%s1618_s8]   ;;  %s1722_s8 = smov 12 }
  0x92   :  { %v9032_v35 = vld [vmem:[%s16975_s0 + $0x90e] ss:$16 sm:%s1434_s25]   ;;  %v1432_v36 = vsel %vm11_vm1, %v9031_v33, %v1427_v34  ;;  %s1539_s25 = smov 12 }
  0x93   :  { %v9041_v37 = vld [vmem:[%s16975_s0 + $0x38e] ss:$16 sm:%s1490_s28]   ;;  %v1437_v39 = vsel %vm15_vm2, %v9032_v35, %v1432_v36  ;;  %s1658_s28 = smov 48 }
  0x94   :  { %v9042_v38 = vld [vmem:[%s16975_s0 + $0x38e] ss:$16 sm:%s1493_s29]   ;;  %1438 = vrot.lane.b32.xlu0 %v1437_v39, %s10350_s11  ;;  %s1709_s29 = smov 192 }
  0x95   :  { %v1496_v40 = vsel %vm7_vm0, %v9042_v38, %v9041_v37  ;;  %v9043_v41 = vld [vmem:[%s16975_s0 + $0x38e] ss:$16 sm:%s1498_s4]   ;;  %s1513_s4 = smov 3  ;;  %v9076_v37 = vld [vmem:[%s16975_s0 + $0x60d] ss:$16 sm:%s1686_s18]   ;;  %v11193_v38 = vpop.permute.xlu0 %542   ;;  %s1745_s18 = smov 12 }
  0x96   :  { %v9044_v42 = vld [vmem:[%s16975_s0 + $0x38e] ss:$16 sm:%s1503_s5]   ;;  %v1501_v43 = vsel %vm11_vm1, %v9043_v41, %v1496_v40  ;;  %s1562_s5 = smov 12  ;;  %v9069_v40 = vld [vmem:[%s16975_s0 + $0x40d] ss:$16 sm:%s1650_s22]   ;;  %s1865_s22 = smov 48 }
  0x97   :  { %v9037_v44 = vld [vmem:[%s16975_s0 + $0x18e] ss:$16 sm:%s1467_s9]   ;;  %v1506_v45 = vsel %vm15_vm2, %v9044_v42, %v1501_v43  ;;  %v9071_v43 = vld [vmem:[%s16975_s0 + $0x40d] ss:$16 sm:%s1658_s28]   ;;  %s1778_s9 = smov 192  ;;  %s1811_s28 = smov 3 }
  0x98   :  { %v9038_v46 = vld [vmem:[%s16975_s0 + $0x18e] ss:$16 sm:%s1470_s15]   ;;  %1507 = vrot.lane.b32.xlu1 %v1506_v45, %s10350_s11  ;;  %s1796_s15 = smov 48 }
  0x99   :  { %v9039_v47 = vld [vmem:[%s16975_s0 + $0x18e] ss:$16 sm:%s1475_s16]   ;;  %v1473_v48 = vsel %vm7_vm0, %v9038_v46, %v9037_v44  ;;  %s1627_s16 = smov 3  ;;  %v11207_v44 = vpop.permute.xlu1 %634   ;;  %v9072_v46 = vld [vmem:[%s16975_s0 + $0x40d] ss:$16 sm:%s1663_s3]   ;;  %s1768_s3 = smov 12 }
  0x9a   :  { %v9040_v49 = vld [vmem:[%s16975_s0 + $0x18e] ss:$16 sm:%s1480_s21]   ;;  %v1478_v50 = vsel %vm11_vm1, %v9039_v47, %v1473_v48  ;;  %s1585_s21 = smov 12  ;;  %v9065_v16 = vld [vmem:[%s16975_s0 + $0x20d] ss:$16 sm:%s1627_s16]   ;;  %s5_s16 = smov 12 }
  0x9b   :  { %v9049_v51 = vld [vmem:[%s16975_s0 + $0x78e] ss:$16 sm:%s1536_s24]   ;;  %v1483_v53 = vsel %vm15_vm2, %v9040_v49, %v1478_v50  ;;  %v9082_v49 = vld [vmem:[%s16975_s0 + $0xa0d] ss:$16 sm:%s1722_s8]   ;;  %s1704_s24 = smov 48  ;;  %s96_s8 = smov 192 }
  0x9c   :  { %v9050_v52 = vld [vmem:[%s16975_s0 + $0x78e] ss:$16 sm:%s1539_s25]   ;;  %1484 = vrot.lane.b32.xlu0 %v1483_v53, %s10350_s11  ;;  %s1755_s25 = smov 192 }
  0x9d   :  { %v1542_v54 = vsel %vm7_vm0, %v9050_v52, %v9049_v51  ;;  %v9051_v55 = vld [vmem:[%s16975_s0 + $0x78e] ss:$16 sm:%s1544_s6]   ;;  %s1559_s6 = smov 3  ;;  %v9084_v53 = vld [vmem:[%s16975_s0 + $0xa0d] ss:$16 sm:%s1732_s14]   ;;  %s1791_s14 = smov 12 }
  0x9e   :  { %v9052_v56 = vld [vmem:[%s16975_s0 + $0x78e] ss:$16 sm:%s1549_s30]   ;;  %v1547_v57 = vsel %vm11_vm1, %v9051_v55, %v1542_v54  ;;  %s1608_s30 = smov 12  ;;  %v11229_v54 = vpop.permute.xlu0 %611  }
  0x9f   :  { %v9045_v58 = vld [vmem:[%s16975_s0 + $0x58e] ss:$16 sm:%s1513_s4]   ;;  %v1552_v59 = vsel %vm15_vm2, %v9052_v56, %v1547_v57  ;;  %v9062_v26 = vld [vmem:[%s16975_s0 + $0xd] ss:$16 sm:%s1608_s30]   ;;  %s1819_s4 = smov 48  ;;  %s180_s30 = smov 192 }
  0xa0   :  { %v9046_v60 = vld [vmem:[%s16975_s0 + $0x58e] ss:$16 sm:%s1516_s10]   ;;  %1553 = vrot.lane.b32.xlu1 %v1552_v59, %s10350_s11  ;;  %s1673_s10 = smov 3 }
  0xa1   :  { %v9047_v61 = vld [vmem:[%s16975_s0 + $0x58e] ss:$16 sm:%s1521_s12]   ;;  %v1519_v62 = vsel %vm7_vm0, %v9046_v60, %v9045_v58  ;;  %s1676_s12 = smov 12  ;;  %v9073_v32 = vld [vmem:[%s16975_s0 + $0x60d] ss:$16 sm:%s1673_s10]   ;;  %v11243_v60 = vpop.permute.xlu1 %680   ;;  %s3_s10 = smov 3 }
  0xa2   :  { %v9048_v63 = vld [vmem:[%s16975_s0 + $0x58e] ss:$16 sm:%s1526_s17]   ;;  %v1524_v0 = vsel %vm11_vm1, %v9047_v61, %v1519_v62  ;;  %s1630_s17 = smov 12  ;;  %v9074_v33 = vld [vmem:[%s16975_s0 + $0x60d] ss:$16 sm:%s1676_s12]   ;;  %s1906_s12 = smov 12 }
  0xa3   :  { %v9057_v1 = vld [vmem:[%s16975_s0 + $0xb8e] ss:$16 sm:%s1582_s20]   ;;  %v1529_v3 = vsel %vm15_vm2, %v9048_v63, %v1524_v0  ;;  %v9066_v17 = vld [vmem:[%s16975_s0 + $0x20d] ss:$16 sm:%s1630_s17]   ;;  %s1681_s17 = smov 48  ;;  %v1679_v35 = vsel %vm7_vm0, %v9074_v33, %v9073_v32  ;;  %s1750_s20 = smov 48 }
  0xa4   :  { %v9058_v2 = vld [vmem:[%s16975_s0 + $0xb8e] ss:$16 sm:%s1585_s21]   ;;  %1530 = vrot.lane.b32.xlu0 %v1529_v3, %s10350_s11  ;;  %v1633_v19 = vsel %vm7_vm0, %v9066_v17, %v9065_v16  ;;  %s1801_s21 = smov 192 }
  0xa5   :  { %v1588_v4 = vsel %vm7_vm0, %v9058_v2, %v9057_v1  ;;  %v9059_v5 = vld [vmem:[%s16975_s0 + $0xb8e] ss:$16 sm:%s1590_s26]   ;;  %s1605_s26 = smov 3  ;;  %v1638_v23 = vsel %vm11_vm1, %v9067_v20, %v1633_v19  ;;  %v9075_v36 = vld [vmem:[%s16975_s0 + $0x60d] ss:$16 sm:%s1681_s17]   ;;  %s1696_s17 = smov 3 }
  0xa6   :  { %v9060_v6 = vld [vmem:[%s16975_s0 + $0xb8e] ss:$16 sm:%s1595_s27]   ;;  %v1593_v7 = vsel %vm11_vm1, %v9059_v5, %v1588_v4  ;;  %v9061_v24 = vld [vmem:[%s16975_s0 + $0xd] ss:$16 sm:%s1605_s26]   ;;  %v1643_v25 = vsel %vm15_vm2, %v9068_v21, %v1638_v23  ;;  %s1653_s27 = smov 12  ;;  %v1684_v39 = vsel %vm11_vm1, %v9075_v36, %v1679_v35  ;;  %s1888_s26 = smov 48 }
  0xa7   :  { %v9053_v8 = vld [vmem:[%s16975_s0 + $0x98e] ss:$16 sm:%s1559_s6]   ;;  %v1598_v9 = vsel %vm15_vm2, %v9060_v6, %v1593_v7  ;;  %v1611_v29 = vsel %vm7_vm0, %v9062_v26, %v9061_v24  ;;  %v1689_v41 = vsel %vm15_vm2, %v9076_v37, %v1684_v39  ;;  %v9070_v42 = vld [vmem:[%s16975_s0 + $0x40d] ss:$16 sm:%s1653_s27]   ;;  %v11265_v6 = vpop.permute.xlu0 %657   ;;  %s175_s6 = smov 48  ;;  %s1870_s27 = smov 192 }
  0xa8   :  { %v9054_v10 = vld [vmem:[%s16975_s0 + $0x98e] ss:$16 sm:%s1562_s5]   ;;  %1599 = vrot.lane.b32.xlu1 %v1598_v9, %s10350_s11  ;;  %v1616_v31 = vsel %vm11_vm1, %v9063_v27, %v1611_v29  ;;  %v1656_v45 = vsel %vm7_vm0, %v9070_v42, %v9069_v40  ;;  %s1824_s5 = smov 192 }
  0xa9   :  { %v9055_v11 = vld [vmem:[%s16975_s0 + $0x98e] ss:$16 sm:%s1567_s7]   ;;  %v1565_v12 = vsel %vm7_vm0, %v9054_v10, %v9053_v8  ;;  %v1621_v34 = vsel %vm15_vm2, %v9064_v30, %v1616_v31  ;;  %s1719_s7 = smov 3  ;;  %v1661_v47 = vsel %vm11_vm1, %v9071_v43, %v1656_v45  ;;  %v9077_v56 = vld [vmem:[%s16975_s0 + $0x80d] ss:$16 sm:%s1696_s17]   ;;  %s1857_s17 = smov 3 }
  0xaa   :  { %v9056_v13 = vld [vmem:[%s16975_s0 + $0x98e] ss:$16 sm:%s1572_s13]   ;;  %v1570_v15 = vsel %vm11_vm1, %v9055_v11, %v1565_v12  ;;  %s1727_s13 = smov 48  ;;  %v9081_v48 = vld [vmem:[%s16975_s0 + $0xa0d] ss:$16 sm:%s1719_s7]   ;;  %v1666_v50 = vsel %vm15_vm2, %v9072_v46, %v1661_v47  ;;  %v11279_v12 = vpop.permute.xlu1 %726   ;;  %s196_s7 = smov 48 }
  0xab   :  { %v1575_v18 = vsel %vm15_vm2, %v9056_v13, %v1570_v15  ;;  %v1725_v51 = vsel %vm7_vm0, %v9082_v49, %v9081_v48  ;;  %v9083_v52 = vld [vmem:[%s16975_s0 + $0xa0d] ss:$16 sm:%s1727_s13]   ;;  %s1742_s13 = smov 3  ;;  %v11301_v24 = vpop.permute.xlu0 %703   ;;  %v8807_v39 = vld [vmem:[%s16975_s0 + $0x400] ss:$16 sm:%s175_s6]   ;;  %s1949_s6 = smov 3 }
  0xac   :  { %1576 = vrot.lane.b32.xlu0 %v1575_v18, %s10350_s11  ;;  %1644 = vrot.lane.b32.xlu1 %v1643_v25, %s10351_s19  ;;  %v1730_v55 = vsel %vm11_vm1, %v9083_v52, %v1725_v51  ;;  %v9078_v58 = vld [vmem:[%s16975_s0 + $0x80d] ss:$16 sm:%s1699_s23]   ;;  %s1773_s11 = smov 48  ;;  %s264_s23 = smov 192 }
  0xad   :  { %v1735_v57 = vsel %vm15_vm2, %v9084_v53, %v1730_v55  ;;  %v9079_v59 = vld [vmem:[%s16975_s0 + $0x80d] ss:$16 sm:%s1704_s24]   ;;  %v1702_v61 = vsel %vm7_vm0, %v9078_v58, %v9077_v56  ;;  %s167_s24 = smov 3  ;;  %v8808_v40 = vld [vmem:[%s16975_s0 + $0x400] ss:$16 sm:%s180_s30]   ;;  %s86_s30 = smov 12 }
  0xae   :  { %v9080_v62 = vld [vmem:[%s16975_s0 + $0x80d] ss:$16 sm:%s1709_s29]   ;;  %v1707_v63 = vsel %vm11_vm1, %v9079_v59, %v1702_v61  ;;  %s1814_s29 = smov 12  ;;  %v11315_v31 = vpop.permute.xlu1 %772   ;;  %v8805_v35 = vld [vmem:[%s16975_s0 + $0x400] ss:$16 sm:%s167_s24]   ;;  %s343_s24 = smov 48 }
  0xaf   :  { %v9089_v0 = vld [vmem:[%s16975_s0 + $0x28d] ss:$16 sm:%s1765_s2]   ;;  %v1712_v2 = vsel %vm15_vm2, %v9080_v62, %v1707_v63  ;;  %v11337_v42 = vpop.permute.xlu0 %749   ;;  %v4_v48 = vld [vmem:[%s16975_s0] ss:$16 sm:%s3_s10]   ;;  %s251_s10 = smov 3  ;;  %s91_s2 = smov 48 }
  0xb0   :  { %1622 = vrot.lane.b32.xlu0 %v1621_v34, %s10351_s19  ;;  %1690 = vrot.lane.b32.xlu1 %v1689_v41, %s10351_s19  ;;  %v9090_v1 = vld [vmem:[%s16975_s0 + $0x28d] ss:$16 sm:%s1768_s3]   ;;  %s1837_s3 = smov 12 }
  0xb1   :  { %v1771_v3 = vsel %vm7_vm0, %v9090_v1, %v9089_v0  ;;  %v9091_v4 = vld [vmem:[%s16975_s0 + $0x28d] ss:$16 sm:%s1773_s11]   ;;  %s1788_s11 = smov 3 }
  0xb2   :  { %v9092_v5 = vld [vmem:[%s16975_s0 + $0x28d] ss:$16 sm:%s1778_s9]   ;;  %v1776_v7 = vsel %vm11_vm1, %v9091_v4, %v1771_v3  ;;  %s13_s9 = smov 192  ;;  %v11351_v49 = vpop.permute.xlu1 %818   ;;  %v8821_v4 = vld [vmem:[%s16975_s0 + $0x600] ss:$16 sm:%s251_s10]   ;;  %s1926_s10 = smov 3 }
  0xb3   :  { %v9085_v8 = vld [vmem:[%s16975_s0 + $0x8d] ss:$16 sm:%s1742_s13]   ;;  %v1781_v9 = vsel %vm15_vm2, %v9092_v5, %v1776_v7  ;;  %v14_v47 = vld [vmem:[%s16975_s0] ss:$16 sm:%s13_s9]   ;;  %s1847_s9 = smov 192  ;;  %v11377_v59 = vpop.permute.xlu0 %795   ;;  %s1911_s13 = smov 48 }
  0xb4   :  { %1667 = vrot.lane.b32.xlu0 %v1666_v50, %s10351_s19  ;;  %1736 = vrot.lane.b32.xlu1 %v1735_v57, %s10351_s19  ;;  %v9086_v10 = vld [vmem:[%s16975_s0 + $0x8d] ss:$16 sm:%s1745_s18]   ;;  %s1916_s18 = smov 192 }
  0xb5   :  { %v9087_v11 = vld [vmem:[%s16975_s0 + $0x8d] ss:$16 sm:%s1750_s20]   ;;  %v1748_v13 = vsel %vm7_vm0, %v9086_v10, %v9085_v8  ;;  %v6_v50 = vld [vmem:[%s16975_s0] ss:$16 sm:%s5_s16]   ;;  %s254_s16 = smov 12  ;;  %s1880_s20 = smov 3 }
  0xb6   :  { %v9088_v15 = vld [vmem:[%s16975_s0 + $0x8d] ss:$16 sm:%s1755_s25]   ;;  %v1753_v16 = vsel %vm11_vm1, %v9087_v11, %v1748_v13  ;;  %s170_s25 = smov 12  ;;  %v11396_v5 = vpop.permute.xlu1 %864   ;;  %v8822_v7 = vld [vmem:[%s16975_s0 + $0x600] ss:$16 sm:%s254_s16]   ;;  %s1929_s16 = smov 12 }
  0xb7   :  { %v9097_v17 = vld [vmem:[%s16975_s0 + $0x68d] ss:$16 sm:%s1811_s28]   ;;  %v1758_v19 = vsel %vm15_vm2, %v9088_v15, %v1753_v16  ;;  %v8806_v36 = vld [vmem:[%s16975_s0 + $0x400] ss:$16 sm:%s170_s25]   ;;  %s1834_s28 = smov 3  ;;  %v257_v11 = vsel %vm7_vm0, %v8822_v7, %v8821_v4  ;;  %v11418_v16 = vpop.permute.xlu0 %841   ;;  %s1883_s25 = smov 12 }
  0xb8   :  { %1713 = vrot.lane.b32.xlu0 %v1712_v2, %s10351_s19  ;;  %1782 = vrot.lane.b32.xlu1 %v1781_v9, %s10351_s19  ;;  %v9098_v18 = vld [vmem:[%s16975_s0 + $0x68d] ss:$16 sm:%s1814_s29]   ;;  %v173_v41 = vsel %vm7_vm0, %v8806_v36, %v8805_v35  ;;  %s348_s29 = smov 192 }
  0xb9   :  { %v1817_v20 = vsel %vm7_vm0, %v9098_v18, %v9097_v17  ;;  %v9099_v21 = vld [vmem:[%s16975_s0 + $0x68d] ss:$16 sm:%s1819_s4]   ;;  %s9_s4 = smov 48  ;;  %v178_v43 = vsel %vm11_vm1, %v8807_v39, %v173_v41  ;;  %v8824_v10 = vld [vmem:[%s16975_s0 + $0x600] ss:$16 sm:%s264_s23]   ;;  %s338_s23 = smov 12 }
  0xba   :  { %v9100_v23 = vld [vmem:[%s16975_s0 + $0x68d] ss:$16 sm:%s1824_s5]   ;;  %v1822_v25 = vsel %vm11_vm1, %v9099_v21, %v1817_v20  ;;  %v10_v45 = vld [vmem:[%s16975_s0] ss:$16 sm:%s9_s4]   ;;  %v183_v46 = vsel %vm15_vm2, %v8808_v40, %v178_v43  ;;  %s1842_s4 = smov 48  ;;  %s117_s5 = smov 192 }
  0xbb   :  { %v9093_v26 = vld [vmem:[%s16975_s0 + $0x48d] ss:$16 sm:%s1788_s11]   ;;  %v1827_v27 = vsel %vm15_vm2, %v9100_v23, %v1822_v25  ;;  %186 = vst.msk [vmem:[#allocation0 + $0x40] sm:$0xff] %vm17_vm3, %v183_v46   ;;  %s1903_s11 = smov 3  ;;  %v8790_v18 = vld [vmem:[%s16975_s0 + $0x200] ss:$16 sm:%s86_s30]   ;;  %v11435_v25 = vpop.permute.xlu1 %910  }
  0xbc   :  { %1759 = vrot.lane.b32.xlu0 %v1758_v19, %s10351_s19  ;;  %v9094_v29 = vld [vmem:[%s16975_s0 + $0x48d] ss:$16 sm:%s1791_s14]   ;;  %1828 = vrot.lane.b32.xlu1 %v1827_v27, %s10351_s19  ;;  %569 = vst.msk [vmem:[#allocation0 + $0x40] sm:$0xff] %vm522_vm4, %v11140_v14   ;;  %v8_v14 = vsel %vm7_vm0, %v6_v50, %v4_v48  ;;  %s1893_s30 = smov 192  ;;  %s432_s14 = smov 192 }
  0xbd   :  { %v9095_v30 = vld [vmem:[%s16975_s0 + $0x48d] ss:$16 sm:%s1796_s15]   ;;  %v1794_v32 = vsel %vm7_vm0, %v9094_v29, %v9093_v26  ;;  %v12_v55 = vsel %vm11_vm1, %v10_v45, %v8_v14  ;;  %v8791_v19 = vld [vmem:[%s16975_s0 + $0x200] ss:$16 sm:%s91_s2]   ;;  %s419_s2 = smov 3  ;;  %s28_s15 = smov 48 }
  0xbe   :  { %v9096_v33 = vld [vmem:[%s16975_s0 + $0x48d] ss:$16 sm:%s1801_s21]   ;;  %v1799_v34 = vsel %vm11_vm1, %v9095_v30, %v1794_v32  ;;  %s1860_s21 = smov 12  ;;  %v16_v61 = vsel %vm15_vm2, %v14_v47, %v12_v55  ;;  %v8792_v20 = vld [vmem:[%s16975_s0 + $0x200] ss:$16 sm:%s96_s8]   ;;  %s422_s8 = smov 12 }
  0xbf   :  { %v1804_v37 = vsel %vm15_vm2, %v9096_v33, %v1799_v34  ;;  %v9105_v51 = vld [vmem:[%s16975_s0 + $0xa8d] ss:$16 sm:%s1857_s17]   ;;  %18 = vst.msk [vmem:[#allocation0] sm:$0xff] %vm17_vm3, %v16_v61   ;;  %v8853_v41 = vld [vmem:[%s16975_s0 + $0xa00] ss:$16 sm:%s419_s2]   ;;  %s1934_s17 = smov 48 }
  0xc0   :  { %1805 = vrot.lane.b32.xlu0 %v1804_v37, %s10351_s19  ;;  %v9106_v52 = vld [vmem:[%s16975_s0 + $0xa8d] ss:$16 sm:%s1860_s21]   ;;  %523 = vst.msk [vmem:[#allocation0] sm:$0xff] %vm522_vm4, %v11157_v22   ;;  %v11462_v37 = vpop.permute.xlu0 %887   ;;  %v11479_v46 = vpop.permute.xlu1 %956   ;;  %s33_s21 = smov 192  ;;  %s1972_s2 = smov 3 }
  0xc1   :  { %v9107_v53 = vld [vmem:[%s16975_s0 + $0xa8d] ss:$16 sm:%s1865_s22]   ;;  %v1863_v56 = vsel %vm7_vm0, %v9106_v52, %v9105_v51  ;;  %s259_s22 = smov 48  ;;  %v8854_v45 = vld [vmem:[%s16975_s0 + $0xa00] ss:$16 sm:%s422_s8]   ;;  %s1975_s8 = smov 12 }
  0xc2   :  { %v9108_v57 = vld [vmem:[%s16975_s0 + $0xa8d] ss:$16 sm:%s1870_s27]   ;;  %v1868_v62 = vsel %vm11_vm1, %v9107_v53, %v1863_v56  ;;  %v8823_v9 = vld [vmem:[%s16975_s0 + $0x600] ss:$16 sm:%s259_s22]   ;;  %v425_v51 = vsel %vm7_vm0, %v8854_v45, %v8853_v41  ;;  %s1995_s22 = smov 3  ;;  %s285_s27 = smov 192 }
  0xc3   :  { %v9101_v58 = vld [vmem:[%s16975_s0 + $0x88d] ss:$16 sm:%s1834_s28]   ;;  %v1873_v1 = vsel %vm15_vm2, %v9108_v57, %v1868_v62  ;;  %s83_s28 = smov 3  ;;  %v262_v13 = vsel %vm11_vm1, %v8823_v9, %v257_v11  ;;  %v8856_v50 = vld [vmem:[%s16975_s0 + $0xa00] ss:$16 sm:%s432_s14]   ;;  %s23_s14 = smov 12 }
  0xc4   :  { %v9102_v63 = vld [vmem:[%s16975_s0 + $0x88d] ss:$16 sm:%s1837_s3]   ;;  %1874 = vrot.lane.b32.xlu1 %v1873_v1, %s10351_s19  ;;  %v267_v17 = vsel %vm15_vm2, %v8824_v10, %v262_v13  ;;  %s1952_s3 = smov 12  ;;  %v11501_v57 = vpop.permute.xlu0 %933  }
  0xc5   :  { %v9103_v0 = vld [vmem:[%s16975_s0 + $0x88d] ss:$16 sm:%s1842_s4]   ;;  %v1840_v2 = vsel %vm7_vm0, %v9102_v63, %v9101_v58  ;;  %v8789_v15 = vld [vmem:[%s16975_s0 + $0x200] ss:$16 sm:%s83_s28]   ;;  %270 = vst.msk [vmem:[#allocation0 + $0x60] sm:$0xff] %vm17_vm3, %v267_v17   ;;  %s1957_s4 = smov 48 }
  0xc6   :  { %v9104_v3 = vld [vmem:[%s16975_s0 + $0x88d] ss:$16 sm:%s1847_s9]   ;;  %v1845_v22 = vsel %vm11_vm1, %v9103_v0, %v1840_v2  ;;  %v89_v21 = vsel %vm7_vm0, %v8790_v18, %v8789_v15  ;;  %592 = vst.msk [vmem:[#allocation0 + $0x60] sm:$0xff] %vm522_vm4, %v11171_v28   ;;  %v8838_v55 = vld [vmem:[%s16975_s0 + $0x800] ss:$16 sm:%s338_s23]   ;;  %s1962_s9 = smov 192 }
  0xc7   :  { %v1850_v8 = vsel %vm15_vm2, %v9104_v3, %v1845_v22  ;;  %v9113_v23 = vld [vmem:[%s16975_s0 + $0x30d] ss:$16 sm:%s1903_s11]   ;;  %v94_v28 = vsel %vm11_vm1, %v8791_v19, %v89_v21  ;;  %v8839_v56 = vld [vmem:[%s16975_s0 + $0x800] ss:$16 sm:%s343_s24]   ;;  %s1939_s23 = smov 192  ;;  %s104_s24 = smov 3 }
  0xc8   :  { %1851 = vrot.lane.b32.xlu0 %v1850_v8, %s10351_s19  ;;  %v9114_v26 = vld [vmem:[%s16975_s0 + $0x30d] ss:$16 sm:%s1906_s12]   ;;  %v99_v29 = vsel %vm15_vm2, %v8792_v20, %v94_v28  ;;  %v11520_v1 = vpop.permute.xlu1 %1002   ;;  %s1980_s11 = smov 48  ;;  %s201_s12 = smov 192 }
  0xc9   :  { %v9115_v27 = vld [vmem:[%s16975_s0 + $0x30d] ss:$16 sm:%s1911_s13]   ;;  %v1909_v30 = vsel %vm7_vm0, %v9114_v26, %v9113_v23  ;;  %102 = vst.msk [vmem:[#allocation0 + $0x20] sm:$0xff] %vm17_vm3, %v99_v29   ;;  %s427_s13 = smov 48  ;;  %v8840_v58 = vld [vmem:[%s16975_s0 + $0x800] ss:$16 sm:%s348_s29]  }
  0xca   :  { %v9116_v32 = vld [vmem:[%s16975_s0 + $0x30d] ss:$16 sm:%s1916_s18]   ;;  %v1914_v34 = vsel %vm11_vm1, %v9115_v27, %v1909_v30  ;;  %546 = vst.msk [vmem:[#allocation0 + $0x20] sm:$0xff] %vm522_vm4, %v11193_v38   ;;  %v8855_v48 = vld [vmem:[%s16975_s0 + $0xa00] ss:$16 sm:%s427_s13]   ;;  %s107_s29 = smov 12 }
  0xcb   :  { %v9109_v33 = vld [vmem:[%s16975_s0 + $0x10d] ss:$16 sm:%s1880_s20]   ;;  %v1919_v38 = vsel %vm15_vm2, %v9116_v32, %v1914_v34  ;;  %s335_s20 = smov 3  ;;  %v430_v14 = vsel %vm11_vm1, %v8855_v48, %v425_v51  ;;  %v8793_v13 = vld [vmem:[%s16975_s0 + $0x280] ss:$16 sm:%s104_s24]   ;;  %s2041_s13 = smov 3 }
  0xcc   :  { %v9110_v35 = vld [vmem:[%s16975_s0 + $0x10d] ss:$16 sm:%s1883_s25]   ;;  %1920 = vrot.lane.b32.xlu1 %v1919_v38, %s10351_s19  ;;  %v435_v53 = vsel %vm15_vm2, %v8856_v50, %v430_v14  ;;  %v11548_v15 = vpop.permute.xlu0 %979   ;;  %s1998_s25 = smov 12  ;;  %s2018_s24 = smov 3 }
  0xcd   :  { %v9111_v36 = vld [vmem:[%s16975_s0 + $0x10d] ss:$16 sm:%s1888_s26]   ;;  %v1886_v39 = vsel %vm7_vm0, %v9110_v35, %v9109_v33  ;;  %v8837_v52 = vld [vmem:[%s16975_s0 + $0x800] ss:$16 sm:%s335_s20]   ;;  %438 = vst.msk [vmem:[#allocation0 + $0xa0] sm:$0xff] %vm17_vm3, %v435_v53   ;;  %s2003_s26 = smov 48 }
  0xce   :  { %v9112_v40 = vld [vmem:[%s16975_s0 + $0x10d] ss:$16 sm:%s1893_s30]   ;;  %v1891_v43 = vsel %vm11_vm1, %v9111_v36, %v1886_v39  ;;  %v341_v61 = vsel %vm7_vm0, %v8838_v55, %v8837_v52  ;;  %638 = vst.msk [vmem:[#allocation0 + $0xa0] sm:$0xff] %vm522_vm4, %v11207_v44   ;;  %v8794_v18 = vld [vmem:[%s16975_s0 + $0x280] ss:$16 sm:%s107_s29]   ;;  %s2008_s30 = smov 192 }
  0xcf   :  { %v1896_v47 = vsel %vm15_vm2, %v9112_v40, %v1891_v43  ;;  %v9121_v62 = vld [vmem:[%s16975_s0 + $0x70d] ss:$16 sm:%s1949_s6]   ;;  %v346_v44 = vsel %vm11_vm1, %v8839_v56, %v341_v61  ;;  %v8796_v21 = vld [vmem:[%s16975_s0 + $0x280] ss:$16 sm:%s117_s5]   ;;  %v110_v23 = vsel %vm7_vm0, %v8794_v18, %v8793_v13  ;;  %s191_s5 = smov 12  ;;  %s2021_s29 = smov 12 }
  0xd0   :  { %1897 = vrot.lane.b32.xlu0 %v1896_v47, %s10351_s19  ;;  %v9122_v63 = vld [vmem:[%s16975_s0 + $0x70d] ss:$16 sm:%s1952_s3]   ;;  %v351_v2 = vsel %vm15_vm2, %v8840_v58, %v346_v44  ;;  %v11563_v28 = vpop.permute.xlu1 %1048   ;;  %s2026_s6 = smov 48  ;;  %s453_s18 = smov 192 }
  0xd1   :  { %v9123_v0 = vld [vmem:[%s16975_s0 + $0x70d] ss:$16 sm:%s1957_s4]   ;;  %v1955_v3 = vsel %vm7_vm0, %v9122_v63, %v9121_v62  ;;  %354 = vst.msk [vmem:[#allocation0 + $0x80] sm:$0xff] %vm17_vm3, %v351_v2   ;;  %s112_s4 = smov 48  ;;  %v8778_v30 = vld [vmem:[%s16975_s0 + $0x80] ss:$16 sm:%s23_s14]  }
  0xd2   :  { %v9124_v4 = vld [vmem:[%s16975_s0 + $0x70d] ss:$16 sm:%s1962_s9]   ;;  %v1960_v7 = vsel %vm11_vm1, %v9123_v0, %v1955_v3  ;;  %615 = vst.msk [vmem:[#allocation0 + $0x80] sm:$0xff] %vm522_vm4, %v11229_v54   ;;  %v8795_v20 = vld [vmem:[%s16975_s0 + $0x280] ss:$16 sm:%s112_s4]   ;;  %s1985_s14 = smov 192 }
  0xd3   :  { %v9117_v22 = vld [vmem:[%s16975_s0 + $0x50d] ss:$16 sm:%s1926_s10]   ;;  %v1965_v54 = vsel %vm15_vm2, %v9124_v4, %v1960_v7  ;;  %s20_s10 = smov 3  ;;  %v115_v26 = vsel %vm11_vm1, %v8795_v20, %v110_v23  ;;  %v8779_v32 = vld [vmem:[%s16975_s0 + $0x80] ss:$16 sm:%s28_s15]   ;;  %s272_s15 = smov 3 }
  0xd4   :  { %v9118_v8 = vld [vmem:[%s16975_s0 + $0x50d] ss:$16 sm:%s1929_s16]   ;;  %1966 = vrot.lane.b32.xlu1 %v1965_v54, %s10351_s19  ;;  %v120_v29 = vsel %vm15_vm2, %v8796_v21, %v115_v26  ;;  %v11585_v36 = vpop.permute.xlu0 %1025   ;;  %v1094_v47 = vpop.permute.xlu1 %1093   ;;  %s2044_s16 = smov 12  ;;  %s364_s28 = smov 48 }
  0xd5   :  { %v9119_v9 = vld [vmem:[%s16975_s0 + $0x50d] ss:$16 sm:%s1934_s17]   ;;  %v1932_v10 = vsel %vm7_vm0, %v9118_v8, %v9117_v22  ;;  %v8777_v27 = vld [vmem:[%s16975_s0 + $0x80] ss:$16 sm:%s20_s10]   ;;  %123 = vst.msk [vmem:[#allocation0 + $0x28] sm:$0xff] %vm17_vm3, %v120_v29   ;;  %s2049_s17 = smov 48 }
  0xd6   :  { %v9120_v11 = vld [vmem:[%s16975_s0 + $0x50d] ss:$16 sm:%s1939_s23]   ;;  %v1937_v17 = vsel %vm11_vm1, %v9119_v9, %v1932_v10  ;;  %v8780_v33 = vld [vmem:[%s16975_s0 + $0x80] ss:$16 sm:%s33_s21]   ;;  %v26_v34 = vsel %vm7_vm0, %v8778_v30, %v8777_v27  ;;  %684 = vst.msk [vmem:[#allocation0 + $0x28] sm:$0xff] %vm522_vm4, %v11243_v60   ;;  %s275_s21 = smov 12 }
  0xd7   :  { %v1942_v19 = vsel %vm15_vm2, %v9120_v11, %v1937_v17  ;;  %v9129_v35 = vld [vmem:[%s16975_s0 + $0xb0d] ss:$16 sm:%s1995_s22]   ;;  %v31_v60 = vsel %vm11_vm1, %v8779_v32, %v26_v34  ;;  %1097 = vst.msk [vmem:[#allocation0 + $0x20] sm:$0xff] %vm1073_vm5, %v1094_v47   ;;  %v8825_v53 = vld [vmem:[%s16975_s0 + $0x680] ss:$16 sm:%s272_s15]   ;;  %s2054_s23 = smov 192 }
  0xd8   :  { %1943 = vrot.lane.b32.xlu0 %v1942_v19, %s10351_s19  ;;  %v9130_v38 = vld [vmem:[%s16975_s0 + $0xb0d] ss:$16 sm:%s1998_s25]   ;;  %v36_v40 = vsel %vm15_vm2, %v8780_v33, %v31_v60  ;;  %v1072_v58 = vpop.permute.xlu0 %1071   ;;  %v1140_v3 = vpop.permute.xlu1 %1139   ;;  %s369_s3 = smov 192  ;;  %s2087_s4 = smov 3 }
  0xd9   :  { %v9131_v39 = vld [vmem:[%s16975_s0 + $0xb0d] ss:$16 sm:%s2003_s26]   ;;  %v2001_v41 = vsel %vm7_vm0, %v9130_v38, %v9129_v35  ;;  %39 = vst.msk [vmem:[#allocation0 + $0x8] sm:$0xff] %vm17_vm3, %v36_v40   ;;  %s280_s26 = smov 48  ;;  %v8826_v56 = vld [vmem:[%s16975_s0 + $0x680] ss:$16 sm:%s275_s21]  }
  0xda   :  { %v9132_v43 = vld [vmem:[%s16975_s0 + $0xb0d] ss:$16 sm:%s2008_s30]   ;;  %v2006_v48 = vsel %vm11_vm1, %v9131_v39, %v2001_v41  ;;  %661 = vst.msk [vmem:[#allocation0 + $0x8] sm:$0xff] %vm522_vm4, %v11265_v6   ;;  %v8827_v62 = vld [vmem:[%s16975_s0 + $0x680] ss:$16 sm:%s280_s26]   ;;  %v278_v63 = vsel %vm7_vm0, %v8826_v56, %v8825_v53  ;;  %s2064_s15 = smov 3 }
  0xdb   :  { %v9125_v45 = vld [vmem:[%s16975_s0 + $0x90d] ss:$16 sm:%s1972_s2]   ;;  %v2011_v6 = vsel %vm15_vm2, %v9132_v43, %v2006_v48  ;;  %s188_s2 = smov 3  ;;  %v8828_v44 = vld [vmem:[%s16975_s0 + $0x680] ss:$16 sm:%s285_s27]   ;;  %1074 = vst.msk [vmem:[#allocation0] sm:$0xff] %vm1073_vm5, %v1072_v58   ;;  %v283_v0 = vsel %vm11_vm1, %v8827_v62, %v278_v63 }
  0xdc   :  { %v9126_v50 = vld [vmem:[%s16975_s0 + $0x90d] ss:$16 sm:%s1975_s8]   ;;  %2012 = vrot.lane.b32.xlu1 %v2011_v6, %s10351_s19  ;;  %v288_v4 = vsel %vm15_vm2, %v8828_v44, %v283_v0  ;;  %1143 = vst.msk [vmem:[#allocation0 + $0x60] sm:$0xff] %vm1073_vm5, %v1140_v3   ;;  %v1117_v13 = vpop.permute.xlu0 %1116   ;;  %v1186_v27 = vpop.permute.xlu1 %1185   ;;  %s359_s27 = smov 12  ;;  %s2090_s8 = smov 12 }
  0xdd   :  { %v9127_v51 = vld [vmem:[%s16975_s0 + $0x90d] ss:$16 sm:%s1980_s11]   ;;  %v1978_v14 = vsel %vm7_vm0, %v9126_v50, %v9125_v45  ;;  %v8809_v2 = vld [vmem:[%s16975_s0 + $0x480] ss:$16 sm:%s188_s2]   ;;  %291 = vst.msk [vmem:[#allocation0 + $0x68] sm:$0xff] %vm17_vm3, %v288_v4   ;;  %s2095_s11 = smov 48 }
  0xde   :  { %v9128_v52 = vld [vmem:[%s16975_s0 + $0x90d] ss:$16 sm:%s1985_s14]   ;;  %v1983_v55 = vsel %vm11_vm1, %v9127_v51, %v1978_v14  ;;  %v8810_v22 = vld [vmem:[%s16975_s0 + $0x480] ss:$16 sm:%s191_s5]   ;;  %730 = vst.msk [vmem:[#allocation0 + $0x68] sm:$0xff] %vm522_vm4, %v11279_v12   ;;  %s2031_s5 = smov 192 }
  0xdf   :  { %v1988_v61 = vsel %vm15_vm2, %v9128_v52, %v1983_v55  ;;  %v8811_v7 = vld [vmem:[%s16975_s0 + $0x480] ss:$16 sm:%s196_s7]   ;;  %v194_v9 = vsel %vm7_vm0, %v8810_v22, %v8809_v2  ;;  %v9137_v54 = vld [vmem:[%s16975_s0 + $0x38d] ss:$16 sm:%s2041_s13]   ;;  %s440_s7 = smov 3  ;;  %1120 = vst.msk [vmem:[#allocation0 + $0x40] sm:$0xff] %vm1073_vm5, %v1117_v13  }
  0xe0   :  { %1989 = vrot.lane.b32.xlu0 %v1988_v61, %s10351_s19  ;;  %v8812_v8 = vld [vmem:[%s16975_s0 + $0x480] ss:$16 sm:%s201_s12]   ;;  %v199_v12 = vsel %vm11_vm1, %v8811_v7, %v194_v9  ;;  %s443_s12 = smov 12  ;;  %1189 = vst.msk [vmem:[#allocation0 + $0xa0] sm:$0xff] %vm1073_vm5, %v1186_v27   ;;  %v1163_v40 = vpop.permute.xlu0 %1162   ;;  %s2100_s14 = smov 192  ;;  %v1232_v50 = vpop.permute.xlu1 %1231  }
  0xe1   :  { %v9138_v10 = vld [vmem:[%s16975_s0 + $0x38d] ss:$16 sm:%s2044_s16]   ;;  %v204_v17 = vsel %vm15_vm2, %v8812_v8, %v199_v12  ;;  %v8857_v32 = vld [vmem:[%s16975_s0 + $0xa80] ss:$16 sm:%s440_s7]   ;;  %1166 = vst.msk [vmem:[#allocation0 + $0x80] sm:$0xff] %vm1073_vm5, %v1163_v40   ;;  %s2067_s21 = smov 12 }
  0xe2   :  { %v9139_v11 = vld [vmem:[%s16975_s0 + $0x38d] ss:$16 sm:%s2049_s17]   ;;  %v2047_v18 = vsel %vm7_vm0, %v9138_v10, %v9137_v54  ;;  %207 = vst.msk [vmem:[#allocation0 + $0x48] sm:$0xff] %vm17_vm3, %v204_v17   ;;  %s448_s17 = smov 48  ;;  %v8858_v34 = vld [vmem:[%s16975_s0 + $0xa80] ss:$16 sm:%s443_s12]  }
  0xe3   :  { %v9140_v19 = vld [vmem:[%s16975_s0 + $0x38d] ss:$16 sm:%s2054_s23]   ;;  %v2052_v21 = vsel %vm11_vm1, %v9139_v11, %v2047_v18  ;;  %707 = vst.msk [vmem:[#allocation0 + $0x48] sm:$0xff] %vm522_vm4, %v11301_v24   ;;  %v8859_v60 = vld [vmem:[%s16975_s0 + $0xa80] ss:$16 sm:%s448_s17]   ;;  %v446_v39 = vsel %vm7_vm0, %v8858_v34, %v8857_v32  ;;  %s2072_s22 = smov 48 }
  0xe4   :  { %v9133_v20 = vld [vmem:[%s16975_s0 + $0x18d] ss:$16 sm:%s2018_s24]   ;;  %v2057_v24 = vsel %vm15_vm2, %v9140_v19, %v2052_v21  ;;  %s356_s24 = smov 3  ;;  %v8860_v38 = vld [vmem:[%s16975_s0 + $0xa80] ss:$16 sm:%s453_s18]   ;;  %v451_v41 = vsel %vm11_vm1, %v8859_v60, %v446_v39  ;;  %1235 = vst.msk [vmem:[#allocation0 + $0x28] sm:$0xff] %vm1073_vm5, %v1232_v50   ;;  %v1209_v62 = vpop.permute.xlu0 %1208   ;;  %v1278_v22 = vpop.permute.xlu1 %1277  }
  0xe5   :  { %v9134_v23 = vld [vmem:[%s16975_s0 + $0x18d] ss:$16 sm:%s2021_s29]   ;;  %2058 = vrot.lane.b32.xlu1 %v2057_v24, %s10351_s19  ;;  %v456_v45 = vsel %vm15_vm2, %v8860_v38, %v451_v41  ;;  %s138_s9 = smov 192  ;;  %1212 = vst.msk [vmem:[#allocation0 + $0x8] sm:$0xff] %vm1073_vm5, %v1209_v62   ;;  %s44_s18 = smov 12  ;;  %1281 = vst.msk [vmem:[#allocation0 + $0x68] sm:$0xff] %vm1073_vm5, %v1278_v22  }
  0xe6   :  { %v9135_v26 = vld [vmem:[%s16975_s0 + $0x18d] ss:$16 sm:%s2026_s6]   ;;  %v2024_v29 = vsel %vm7_vm0, %v9134_v23, %v9133_v20  ;;  %v8841_v43 = vld [vmem:[%s16975_s0 + $0x880] ss:$16 sm:%s356_s24]   ;;  %459 = vst.msk [vmem:[#allocation0 + $0xa8] sm:$0xff] %vm17_vm3, %v456_v45   ;;  %s49_s20 = smov 48 }
  0xe7   :  { %v9136_v30 = vld [vmem:[%s16975_s0 + $0x18d] ss:$16 sm:%s2031_s5]   ;;  %v2029_v33 = vsel %vm11_vm1, %v9135_v26, %v2024_v29  ;;  %v8842_v47 = vld [vmem:[%s16975_s0 + $0x880] ss:$16 sm:%s359_s27]   ;;  %776 = vst.msk [vmem:[#allocation0 + $0xa8] sm:$0xff] %vm522_vm4, %v11315_v31   ;;  %s2077_s27 = smov 192 }
  0xe8   :  { %v2034_v35 = vsel %vm15_vm2, %v9136_v30, %v2029_v33  ;;  %v8843_v48 = vld [vmem:[%s16975_s0 + $0x880] ss:$16 sm:%s364_s28]   ;;  %v362_v6 = vsel %vm7_vm0, %v8842_v47, %v8841_v43  ;;  %v9145_v14 = vld [vmem:[%s16975_s0 + $0x78d] ss:$16 sm:%s2087_s4]   ;;  %s125_s28 = smov 3  ;;  %s54_s25 = smov 192  ;;  %v1255_v17 = vpop.permute.xlu0 %1254  }
  0xe9   :  { %2035 = vrot.lane.b32.xlu0 %v2034_v35, %s10351_s19  ;;  %v8844_v51 = vld [vmem:[%s16975_s0 + $0x880] ss:$16 sm:%s369_s3]   ;;  %v367_v31 = vsel %vm11_vm1, %v8843_v48, %v362_v6  ;;  %s128_s3 = smov 12  ;;  %s2133_s26 = smov 3  ;;  %1258 = vst.msk [vmem:[#allocation0 + $0x48] sm:$0xff] %vm1073_vm5, %v1255_v17  }
  0xea   :  { %v9146_v52 = vld [vmem:[%s16975_s0 + $0x78d] ss:$16 sm:%s2090_s8]   ;;  %v372_v55 = vsel %vm15_vm2, %v8844_v51, %v367_v31  ;;  %v8797_v4 = vld [vmem:[%s16975_s0 + $0x300] ss:$16 sm:%s125_s28]   ;;  %s2136_s29 = smov 12  ;;  %s2141_s6 = smov 48  ;;  %v1324_v27 = vpop.permute.xlu1 %1323  }
  0xeb   :  { %v9147_v53 = vld [vmem:[%s16975_s0 + $0x78d] ss:$16 sm:%s2095_s11]   ;;  %v2093_v56 = vsel %vm7_vm0, %v9146_v52, %v9145_v14  ;;  %375 = vst.msk [vmem:[#allocation0 + $0x88] sm:$0xff] %vm17_vm3, %v372_v55   ;;  %s133_s11 = smov 48  ;;  %v8798_v8 = vld [vmem:[%s16975_s0 + $0x300] ss:$16 sm:%s128_s3]  }
  0xec   :  { %v9148_v58 = vld [vmem:[%s16975_s0 + $0x78d] ss:$16 sm:%s2100_s14]   ;;  %v2098_v44 = vsel %vm11_vm1, %v9147_v53, %v2093_v56  ;;  %753 = vst.msk [vmem:[#allocation0 + $0x88] sm:$0xff] %vm522_vm4, %v11337_v42   ;;  %v8799_v54 = vld [vmem:[%s16975_s0 + $0x300] ss:$16 sm:%s133_s11]   ;;  %v131_v10 = vsel %vm7_vm0, %v8798_v8, %v8797_v4  ;;  %s2146_s5 = smov 192 }
  0xed   :  { %v9141_v61 = vld [vmem:[%s16975_s0 + $0x58d] ss:$16 sm:%s2064_s15]   ;;  %v2103_v42 = vsel %vm15_vm2, %v9148_v58, %v2098_v44  ;;  %s41_s15 = smov 3  ;;  %v8800_v12 = vld [vmem:[%s16975_s0 + $0x300] ss:$16 sm:%s138_s9]   ;;  %v136_v11 = vsel %vm11_vm1, %v8799_v54, %v131_v10  ;;  %s2110_s7 = smov 3 }
  0xee   :  { %v9142_v63 = vld [vmem:[%s16975_s0 + $0x58d] ss:$16 sm:%s2067_s21]   ;;  %2104 = vrot.lane.b32.xlu1 %v2103_v42, %s10351_s19  ;;  %v141_v18 = vsel %vm15_vm2, %v8800_v12, %v136_v11  ;;  %s2113_s12 = smov 12  ;;  %s2118_s13 = smov 48  ;;  %1327 = vst.msk [vmem:[#allocation0 + $0xa8] sm:$0xff] %vm1073_vm5, %v1324_v27   ;;  %v1301_v39 = vpop.permute.xlu0 %1300  }
  0xef   :  { %v9143_v0 = vld [vmem:[%s16975_s0 + $0x58d] ss:$16 sm:%s2072_s22]   ;;  %v2070_v2 = vsel %vm7_vm0, %v9142_v63, %v9141_v61  ;;  %v8781_v13 = vld [vmem:[%s16975_s0 + $0x100] ss:$16 sm:%s41_s15]   ;;  %144 = vst.msk [vmem:[#allocation0 + $0x30] sm:$0xff] %vm17_vm3, %v141_v18   ;;  %s306_s30 = smov 192 }
  0xf0   :  { %v9144_v3 = vld [vmem:[%s16975_s0 + $0x58d] ss:$16 sm:%s2077_s27]   ;;  %v2075_v7 = vsel %vm11_vm1, %v9143_v0, %v2070_v2  ;;  %v8782_v19 = vld [vmem:[%s16975_s0 + $0x100] ss:$16 sm:%s44_s18]   ;;  %822 = vst.msk [vmem:[#allocation0 + $0x30] sm:$0xff] %vm522_vm4, %v11351_v49   ;;  %s2123_s18 = smov 192 }
  0xf1   :  { %v2080_v9 = vsel %vm15_vm2, %v9144_v3, %v2075_v7  ;;  %v8783_v20 = vld [vmem:[%s16975_s0 + $0x100] ss:$16 sm:%s49_s20]   ;;  %v47_v23 = vsel %vm7_vm0, %v8782_v19, %v8781_v13  ;;  %v9153_v26 = vld [vmem:[%s16975_s0 + $0xb8d] ss:$16 sm:%s2133_s26]   ;;  %s293_s20 = smov 3  ;;  %1304 = vst.msk [vmem:[#allocation0 + $0x88] sm:$0xff] %vm1073_vm5, %v1301_v39  }
  0xf2   :  { %2081 = vrot.lane.b32.xlu0 %v2080_v9, %s10351_s19  ;;  %v8784_v21 = vld [vmem:[%s16975_s0 + $0x100] ss:$16 sm:%s54_s25]   ;;  %v52_v49 = vsel %vm11_vm1, %v8783_v20, %v47_v23  ;;  %s296_s25 = smov 12  ;;  %s212_s9 = smov 12  ;;  %v1370_v48 = vpop.permute.xlu1 %1369  }
  0xf3   :  { %v9154_v24 = vld [vmem:[%s16975_s0 + $0xb8d] ss:$16 sm:%s2136_s29]   ;;  %v57_v30 = vsel %vm15_vm2, %v8784_v21, %v52_v49  ;;  %v8829_v43 = vld [vmem:[%s16975_s0 + $0x700] ss:$16 sm:%s293_s20]   ;;  %s217_s10 = smov 48  ;;  %s222_s16 = smov 192 }
  0xf4   :  { %v9155_v29 = vld [vmem:[%s16975_s0 + $0xb8d] ss:$16 sm:%s2141_s6]   ;;  %v2139_v32 = vsel %vm7_vm0, %v9154_v24, %v9153_v26  ;;  %60 = vst.msk [vmem:[#allocation0 + $0x10] sm:$0xff] %vm17_vm3, %v57_v30   ;;  %s301_s6 = smov 48  ;;  %v8830_v47 = vld [vmem:[%s16975_s0 + $0x700] ss:$16 sm:%s296_s25]  }
  0xf5   :  { %v9156_v33 = vld [vmem:[%s16975_s0 + $0xb8d] ss:$16 sm:%s2146_s5]   ;;  %v2144_v35 = vsel %vm11_vm1, %v9155_v29, %v2139_v32  ;;  %799 = vst.msk [vmem:[#allocation0 + $0x10] sm:$0xff] %vm522_vm4, %v11377_v59   ;;  %v8831_v51 = vld [vmem:[%s16975_s0 + $0x700] ss:$16 sm:%s301_s6]   ;;  %v299_v14 = vsel %vm7_vm0, %v8830_v47, %v8829_v43  ;;  %s2178_s17 = smov 3 }
  0xf6   :  { %v9149_v34 = vld [vmem:[%s16975_s0 + $0x98d] ss:$16 sm:%s2110_s7]   ;;  %v2149_v59 = vsel %vm15_vm2, %v9156_v33, %v2144_v35  ;;  %s209_s7 = smov 3  ;;  %v8832_v6 = vld [vmem:[%s16975_s0 + $0x700] ss:$16 sm:%s306_s30]   ;;  %1373 = vst.msk [vmem:[#allocation0 + $0x30] sm:$0xff] %vm1073_vm5, %v1370_v48   ;;  %v304_v31 = vsel %vm11_vm1, %v8831_v51, %v299_v14  ;;  %v1347_v58 = vpop.permute.xlu0 %1346  }
  0xf7   :  { %v9150_v60 = vld [vmem:[%s16975_s0 + $0x98d] ss:$16 sm:%s2113_s12]   ;;  %2150 = vrot.lane.b32.xlu1 %v2149_v59, %s10351_s19  ;;  %s2181_s20 = smov 12  ;;  %s2186_s21 = smov 48  ;;  %v309_v53 = vsel %vm15_vm2, %v8832_v6, %v304_v31  ;;  %1350 = vst.msk [vmem:[#allocation0 + $0x10] sm:$0xff] %vm1073_vm5, %v1347_v58  }
  0xf8   :  { %v9151_v38 = vld [vmem:[%s16975_s0 + $0x98d] ss:$16 sm:%s2118_s13]   ;;  %v2116_v40 = vsel %vm7_vm0, %v9150_v60, %v9149_v34  ;;  %v8813_v52 = vld [vmem:[%s16975_s0 + $0x500] ss:$16 sm:%s209_s7]   ;;  %s2191_s26 = smov 192  ;;  %s2156_s27 = smov 3 }
  0xf9   :  { %v9152_v41 = vld [vmem:[%s16975_s0 + $0x98d] ss:$16 sm:%s2123_s18]   ;;  %v2121_v45 = vsel %vm11_vm1, %v9151_v38, %v2116_v40  ;;  %v8814_v55 = vld [vmem:[%s16975_s0 + $0x500] ss:$16 sm:%s212_s9]   ;;  %312 = vst.msk [vmem:[#allocation0 + $0x70] sm:$0xff] %vm17_vm3, %v309_v53   ;;  %s2159_s2 = smov 12 }
  0xfa   :  { %v2126_v50 = vsel %vm15_vm2, %v9152_v41, %v2121_v45  ;;  %v8815_v56 = vld [vmem:[%s16975_s0 + $0x500] ss:$16 sm:%s217_s10]   ;;  %v215_v62 = vsel %vm7_vm0, %v8814_v55, %v8813_v52  ;;  %v9161_v44 = vld [vmem:[%s16975_s0 + $0x20c] ss:$16 sm:%s2178_s17]   ;;  %s2164_s3 = smov 48  ;;  %868 = vst.msk [vmem:[#allocation0 + $0x70] sm:$0xff] %vm522_vm4, %v11396_v5   ;;  %v1416_v42 = vpop.permute.xlu1 %1415  }
  0xfb   :  { %2127 = vrot.lane.b32.xlu0 %v2126_v50, %s10351_s19  ;;  %v8816_v61 = vld [vmem:[%s16975_s0 + $0x500] ss:$16 sm:%s222_s16]   ;;  %v220_v5 = vsel %vm11_vm1, %v8815_v56, %v215_v62  ;;  %s2169_s11 = smov 192  ;;  %s461_s9 = smov 3  ;;  %1419 = vst.msk [vmem:[#allocation0 + $0x70] sm:$0xff] %vm1073_vm5, %v1416_v42  }
  0xfc   :  { %v9162_v63 = vld [vmem:[%s16975_s0 + $0x20c] ss:$16 sm:%s2181_s20]   ;;  %v225_v2 = vsel %vm15_vm2, %v8816_v61, %v220_v5  ;;  %s464_s15 = smov 12  ;;  %s469_s20 = smov 48  ;;  %v8861_v10 = vld [vmem:[%s16975_s0 + $0xb00] ss:$16 sm:%s461_s9]  }
  0xfd   :  { %v9163_v0 = vld [vmem:[%s16975_s0 + $0x20c] ss:$16 sm:%s2186_s21]   ;;  %v2184_v3 = vsel %vm7_vm0, %v9162_v63, %v9161_v44  ;;  %228 = vst.msk [vmem:[#allocation0 + $0x50] sm:$0xff] %vm17_vm3, %v225_v2   ;;  %s474_s21 = smov 192  ;;  %v8862_v17 = vld [vmem:[%s16975_s0 + $0xb00] ss:$16 sm:%s464_s15]  }
  0xfe   :  { %v9164_v4 = vld [vmem:[%s16975_s0 + $0x20c] ss:$16 sm:%s2191_s26]   ;;  %v2189_v7 = vsel %vm11_vm1, %v9163_v0, %v2184_v3  ;;  %845 = vst.msk [vmem:[#allocation0 + $0x50] sm:$0xff] %vm522_vm4, %v11418_v16   ;;  %s377_s26 = smov 3  ;;  %v1393_v11 = vpop.permute.xlu0 %1392   ;;  %s380_s6 = smov 12  ;;  %v467_v21 = vsel %vm7_vm0, %v8862_v17, %v8861_v10 }
  0xff   :  { %v9157_v22 = vld [vmem:[%s16975_s0 + $0xc] ss:$16 sm:%s2156_s27]   ;;  %v2194_v16 = vsel %vm15_vm2, %v9164_v4, %v2189_v7  ;;  %s10352_s27 = smov 24   ;;  %s385_s30 = smov 48  ;;  %1396 = vst.msk [vmem:[#allocation0 + $0x50] sm:$0xff] %vm1073_vm5, %v1393_v11  }
 0x100   :  { %v9158_v8 = vld [vmem:[%s16975_s0 + $0xc] ss:$16 sm:%s2159_s2]   ;;  %2195 = vrot.lane.b32.xlu1 %v2194_v16, %s10352_s27  ;;  %s390_s7 = smov 192  ;;  %s2224_s8 = smov 3 }
 0x101   :  { %v9159_v9 = vld [vmem:[%s16975_s0 + $0xc] ss:$16 sm:%s2164_s3]   ;;  %v2162_v54 = vsel %vm7_vm0, %v9158_v8, %v9157_v22  ;;  %v8863_v19 = vld [vmem:[%s16975_s0 + $0xb00] ss:$16 sm:%s469_s20]   ;;  %s2227_s10 = smov 12  ;;  %s2232_s12 = smov 48 }
 0x102   :  { %v9160_v12 = vld [vmem:[%s16975_s0 + $0xc] ss:$16 sm:%s2169_s11]   ;;  %v2167_v13 = vsel %vm11_vm1, %v9159_v9, %v2162_v54  ;;  %v8864_v20 = vld [vmem:[%s16975_s0 + $0xb00] ss:$16 sm:%s474_s21]   ;;  %v1462_v23 = vpop.permute.xlu1 %1461   ;;  %v472_v26 = vsel %vm11_vm1, %v8863_v19, %v467_v21  ;;  %s2237_s17 = smov 192  ;;  %s2201_s19 = smov 3 }
 0x103   :  { %v2172_v18 = vsel %vm15_vm2, %v9160_v12, %v2167_v13  ;;  %v8845_v27 = vld [vmem:[%s16975_s0 + $0x900] ss:$16 sm:%s377_s26]   ;;  %v477_v49 = vsel %vm15_vm2, %v8864_v20, %v472_v26  ;;  %v9169_v33 = vld [vmem:[%s16975_s0 + $0x60c] ss:$16 sm:%s2224_s8]   ;;  %s2204_s23 = smov 12  ;;  %s2209_s24 = smov 48 }
 0x104   :  { %2173 = vrot.lane.b32.xlu0 %v2172_v18, %s10352_s27  ;;  %v8846_v24 = vld [vmem:[%s16975_s0 + $0x900] ss:$16 sm:%s380_s6]   ;;  %480 = vst.msk [vmem:[#allocation0 + $0xb0] sm:$0xff] %vm17_vm3, %v477_v49   ;;  %s2214_s6 = smov 192  ;;  %s159_s13 = smov 192 }
 0x105   :  { %v8847_v29 = vld [vmem:[%s16975_s0 + $0x900] ss:$16 sm:%s385_s30]   ;;  %v383_v32 = vsel %vm7_vm0, %v8846_v24, %v8845_v27  ;;  %914 = vst.msk [vmem:[#allocation0 + $0xb0] sm:$0xff] %vm522_vm4, %v11435_v25   ;;  %v9170_v35 = vld [vmem:[%s16975_s0 + $0x60c] ss:$16 sm:%s2227_s10]   ;;  %s146_s30 = smov 3 }
 0x106   :  { %v8848_v30 = vld [vmem:[%s16975_s0 + $0x900] ss:$16 sm:%s390_s7]   ;;  %v1439_v34 = vpop.permute.xlu0 %1438   ;;  %v388_v25 = vsel %vm11_vm1, %v8847_v29, %v383_v32  ;;  %v9171_v60 = vld [vmem:[%s16975_s0 + $0x60c] ss:$16 sm:%s2232_s12]   ;;  %v2230_v39 = vsel %vm7_vm0, %v9170_v35, %v9169_v33  ;;  %s149_s7 = smov 12  ;;  %1465 = vst.msk [vmem:[#allocation0 + $0xb0] sm:$0xff] %vm1073_vm5, %v1462_v23  }
 0x107   :  { %v393_v38 = vsel %vm15_vm2, %v8848_v30, %v388_v25  ;;  %v9172_v59 = vld [vmem:[%s16975_s0 + $0x60c] ss:$16 sm:%s2237_s17]   ;;  %v2235_v43 = vsel %vm11_vm1, %v9171_v60, %v2230_v39  ;;  %s154_s12 = smov 48  ;;  %v8801_v51 = vld [vmem:[%s16975_s0 + $0x380] ss:$16 sm:%s146_s30]   ;;  %s65_s21 = smov 12 }
 0x108   :  { %v9165_v40 = vld [vmem:[%s16975_s0 + $0x40c] ss:$16 sm:%s2201_s19]   ;;  %396 = vst.msk [vmem:[#allocation0 + $0x90] sm:$0xff] %vm17_vm3, %v393_v38   ;;  %s62_s19 = smov 3  ;;  %v8802_v14 = vld [vmem:[%s16975_s0 + $0x380] ss:$16 sm:%s149_s7]  }
 0x109   :  { %v9166_v45 = vld [vmem:[%s16975_s0 + $0x40c] ss:$16 sm:%s2204_s23]   ;;  %891 = vst.msk [vmem:[#allocation0 + $0x90] sm:$0xff] %vm522_vm4, %v11462_v37   ;;  %v2240_v37 = vsel %vm15_vm2, %v9172_v59, %v2235_v43  ;;  %s70_s22 = smov 48  ;;  %v8803_v53 = vld [vmem:[%s16975_s0 + $0x380] ss:$16 sm:%s154_s12]   ;;  %v152_v56 = vsel %vm7_vm0, %v8802_v14, %v8801_v51 }
 0x10a   :  { %v1508_v41 = vpop.permute.xlu1 %1507   ;;  %v9167_v47 = vld [vmem:[%s16975_s0 + $0x40c] ss:$16 sm:%s2209_s24]   ;;  %v2207_v48 = vsel %vm7_vm0, %v9166_v45, %v9165_v40  ;;  %2241 = vrot.lane.b32.xlu1 %v2240_v37, %s10352_s27  ;;  %1442 = vst.msk [vmem:[#allocation0 + $0x90] sm:$0xff] %vm1073_vm5, %v1439_v34   ;;  %s75_s28 = smov 192  ;;  %s2270_s29 = smov 3  ;;  %v157_v58 = vsel %vm11_vm1, %v8803_v53, %v152_v56 }
 0x10b   :  { %v9168_v50 = vld [vmem:[%s16975_s0 + $0x40c] ss:$16 sm:%s2214_s6]   ;;  %v2212_v6 = vsel %vm11_vm1, %v9167_v47, %v2207_v48  ;;  %v8804_v55 = vld [vmem:[%s16975_s0 + $0x380] ss:$16 sm:%s159_s13]   ;;  %s2273_s2 = smov 12  ;;  %s2278_s3 = smov 48 }
 0x10c   :  { %v2217_v52 = vsel %vm15_vm2, %v9168_v50, %v2212_v6  ;;  %v8785_v61 = vld [vmem:[%s16975_s0 + $0x180] ss:$16 sm:%s62_s19]   ;;  %v162_v44 = vsel %vm15_vm2, %v8804_v55, %v157_v58  ;;  %s2283_s11 = smov 192  ;;  %s2247_s9 = smov 3  ;;  %v9177_v2 = vld [vmem:[%s16975_s0 + $0xa0c] ss:$16 sm:%s2270_s29]  }
 0x10d   :  { %2218 = vrot.lane.b32.xlu0 %v2217_v52, %s10352_s27  ;;  %v8786_v5 = vld [vmem:[%s16975_s0 + $0x180] ss:$16 sm:%s65_s21]   ;;  %165 = vst.msk [vmem:[#allocation0 + $0x38] sm:$0xff] %vm17_vm3, %v162_v44   ;;  %s2250_s15 = smov 12  ;;  %s2255_s16 = smov 48 }
 0x10e   :  { %v1485_v31 = vpop.permute.xlu0 %1484   ;;  %v8787_v63 = vld [vmem:[%s16975_s0 + $0x180] ss:$16 sm:%s70_s22]   ;;  %v68_v42 = vsel %vm7_vm0, %v8786_v5, %v8785_v61  ;;  %960 = vst.msk [vmem:[#allocation0 + $0x38] sm:$0xff] %vm522_vm4, %v11479_v46   ;;  %v9178_v3 = vld [vmem:[%s16975_s0 + $0xa0c] ss:$16 sm:%s2273_s2]   ;;  %s2260_s21 = smov 192 }
 0x10f   :  { %v8788_v0 = vld [vmem:[%s16975_s0 + $0x180] ss:$16 sm:%s75_s28]   ;;  %v73_v46 = vsel %vm11_vm1, %v8787_v63, %v68_v42  ;;  %v9179_v4 = vld [vmem:[%s16975_s0 + $0xa0c] ss:$16 sm:%s2278_s3]   ;;  %s314_s22 = smov 3  ;;  %v2276_v8 = vsel %vm7_vm0, %v9178_v3, %v9177_v2  ;;  %s317_s28 = smov 12 }
 0x110   :  { %v78_v7 = vsel %vm15_vm2, %v8788_v0, %v73_v46  ;;  %v9180_v9 = vld [vmem:[%s16975_s0 + $0xa0c] ss:$16 sm:%s2283_s11]   ;;  %1511 = vst.msk [vmem:[#allocation0 + $0x38] sm:$0xff] %vm1073_vm5, %v1508_v41   ;;  %v2281_v54 = vsel %vm11_vm1, %v9179_v4, %v2276_v8  ;;  %s322_s3 = smov 48  ;;  %s327_s4 = smov 192 }
 0x111   :  { %v9173_v16 = vld [vmem:[%s16975_s0 + $0x80c] ss:$16 sm:%s2247_s9]   ;;  %81 = vst.msk [vmem:[#allocation0 + $0x18] sm:$0xff] %vm17_vm3, %v78_v7   ;;  %v8833_v18 = vld [vmem:[%s16975_s0 + $0x780] ss:$16 sm:%s314_s22]   ;;  %s230_s9 = smov 3 }
 0x112   :  { %v11998_v62 = vpop.permute.xlu1 %1553   ;;  %v9174_v12 = vld [vmem:[%s16975_s0 + $0x80c] ss:$16 sm:%s2250_s15]   ;;  %937 = vst.msk [vmem:[#allocation0 + $0x18] sm:$0xff] %vm522_vm4, %v11501_v57   ;;  %v2286_v57 = vsel %vm15_vm2, %v9180_v9, %v2281_v54  ;;  %v8834_v20 = vld [vmem:[%s16975_s0 + $0x780] ss:$16 sm:%s317_s28]   ;;  %s233_s13 = smov 12 }
 0x113   :  { %v9175_v10 = vld [vmem:[%s16975_s0 + $0x80c] ss:$16 sm:%s2255_s16]   ;;  %v2253_v13 = vsel %vm7_vm0, %v9174_v12, %v9173_v16  ;;  %2287 = vrot.lane.b32.xlu1 %v2286_v57, %s10352_s27  ;;  %s238_s14 = smov 48  ;;  %1488 = vst.msk [vmem:[#allocation0 + $0x18] sm:$0xff] %vm1073_vm5, %v1485_v31   ;;  %v320_v27 = vsel %vm7_vm0, %v8834_v20, %v8833_v18  ;;  %s243_s18 = smov 192 }
 0x114   :  { %v9176_v17 = vld [vmem:[%s16975_s0 + $0x80c] ss:$16 sm:%s2260_s21]   ;;  %v2258_v19 = vsel %vm11_vm1, %v9175_v10, %v2253_v13  ;;  %v8835_v23 = vld [vmem:[%s16975_s0 + $0x780] ss:$16 sm:%s322_s3]   ;;  %s2316_s20 = smov 3  ;;  %s2319_s23 = smov 12 }
 0x115   :  { %v2263_v21 = vsel %vm15_vm2, %v9176_v17, %v2258_v19  ;;  %v8836_v26 = vld [vmem:[%s16975_s0 + $0x780] ss:$16 sm:%s327_s4]   ;;  %v325_v24 = vsel %vm11_vm1, %v8835_v23, %v320_v27  ;;  %s2324_s24 = smov 48  ;;  %s2329_s6 = smov 192  ;;  %v9185_v60 = vld [vmem:[%s16975_s0 + $0x28c] ss:$16 sm:%s2316_s20]  }
 0x116   :  { %v12024_v22 = vpop.permute.xlu0 %1530   ;;  %2264 = vrot.lane.b32.xlu0 %v2263_v21, %s10352_s27  ;;  %v8817_v29 = vld [vmem:[%s16975_s0 + $0x580] ss:$16 sm:%s230_s9]   ;;  %v330_v30 = vsel %vm15_vm2, %v8836_v26, %v325_v24  ;;  %s2293_s30 = smov 3  ;;  %s2296_s7 = smov 12 }
 0x117   :  { %v8818_v32 = vld [vmem:[%s16975_s0 + $0x580] ss:$16 sm:%s233_s13]   ;;  %333 = vst.msk [vmem:[#allocation0 + $0x78] sm:$0xff] %vm17_vm3, %v330_v30   ;;  %s2301_s8 = smov 48  ;;  %v9186_v38 = vld [vmem:[%s16975_s0 + $0x28c] ss:$16 sm:%s2319_s23]  }
 0x118   :  { %v8819_v33 = vld [vmem:[%s16975_s0 + $0x580] ss:$16 sm:%s238_s14]   ;;  %v236_v35 = vsel %vm7_vm0, %v8818_v32, %v8817_v29  ;;  %1006 = vst.msk [vmem:[#allocation0 + $0x78] sm:$0xff] %vm522_vm4, %v11520_v1   ;;  %v9187_v39 = vld [vmem:[%s16975_s0 + $0x28c] ss:$16 sm:%s2324_s24]   ;;  %s2306_s13 = smov 192  ;;  %v2322_v40 = vsel %vm7_vm0, %v9186_v38, %v9185_v60 }
 0x119   :  { %v8820_v25 = vld [vmem:[%s16975_s0 + $0x580] ss:$16 sm:%s243_s18]   ;;  %v241_v1 = vsel %vm11_vm1, %v8819_v33, %v236_v35  ;;  %s482_s14 = smov 3  ;;  %v9188_v41 = vld [vmem:[%s16975_s0 + $0x28c] ss:$16 sm:%s2329_s6]   ;;  %s485_s18 = smov 12  ;;  %v2327_v47 = vsel %vm11_vm1, %v9187_v39, %v2322_v40 }
 0x11a   :  { %v12043_v11 = vpop.permute.xlu1 %1599   ;;  %v246_v59 = vsel %vm15_vm2, %v8820_v25, %v241_v1  ;;  %v9181_v43 = vld [vmem:[%s16975_s0 + $0x8c] ss:$16 sm:%s2293_s30]   ;;  %1557 = vst.msk [vmem:[#allocation0 + $0x78] sm:$0xff] %vm1073_vm5, %v11998_v62   ;;  %s490_s24 = smov 48  ;;  %s495_s25 = smov 192 }
 0x11b   :  { %249 = vst.msk [vmem:[#allocation0 + $0x58] sm:$0xff] %vm17_vm3, %v246_v59   ;;  %v9182_v37 = vld [vmem:[%s16975_s0 + $0x8c] ss:$16 sm:%s2296_s7]   ;;  %v8865_v6 = vld [vmem:[%s16975_s0 + $0xb80] ss:$16 sm:%s482_s14]   ;;  %s398_s30 = smov 3 }
 0x11c   :  { %v9183_v48 = vld [vmem:[%s16975_s0 + $0x8c] ss:$16 sm:%s2301_s8]   ;;  %983 = vst.msk [vmem:[#allocation0 + $0x58] sm:$0xff] %vm522_vm4, %v11548_v15   ;;  %v2332_v15 = vsel %vm15_vm2, %v9188_v41, %v2327_v47  ;;  %v2299_v50 = vsel %vm7_vm0, %v9182_v37, %v9181_v43  ;;  %v8866_v52 = vld [vmem:[%s16975_s0 + $0xb80] ss:$16 sm:%s485_s18]   ;;  %s401_s4 = smov 12 }
 0x11d   :  { %v9184_v51 = vld [vmem:[%s16975_s0 + $0x8c] ss:$16 sm:%s2306_s13]   ;;  %2333 = vrot.lane.b32.xlu1 %v2332_v15, %s10352_s27  ;;  %v2304_v31 = vsel %vm11_vm1, %v9183_v48, %v2299_v50  ;;  %s406_s5 = smov 48  ;;  %1534 = vst.msk [vmem:[#allocation0 + $0x58] sm:$0xff] %vm1073_vm5, %v12024_v22   ;;  %v488_v58 = vsel %vm7_vm0, %v8866_v52, %v8865_v6  ;;  %s411_s10 = smov 192 }
 0x11e   :  { %v12069_v49 = vpop.permute.xlu0 %1576   ;;  %v1645_v34 = vpop.permute.xlu1 %1644   ;;  %v2309_v53 = vsel %vm15_vm2, %v9184_v51, %v2304_v31  ;;  %v8867_v55 = vld [vmem:[%s16975_s0 + $0xb80] ss:$16 sm:%s490_s24]   ;;  %s2362_s12 = smov 3  ;;  %s2365_s15 = smov 12 }
 0x11f   :  { %1648 = vst.msk [vmem:[#allocation0 + $0x20] sm:$0xff] %vm1624_vm6, %v1645_v34   ;;  %v8868_v56 = vld [vmem:[%s16975_s0 + $0xb80] ss:$16 sm:%s495_s25]   ;;  %2310 = vrot.lane.b32.xlu0 %v2309_v53, %s10352_s27  ;;  %v493_v61 = vsel %vm11_vm1, %v8867_v55, %v488_v58  ;;  %s2370_s16 = smov 48  ;;  %s2375_s21 = smov 192 }
 0x120   :  { %v8849_v62 = vld [vmem:[%s16975_s0 + $0x980] ss:$16 sm:%s398_s30]   ;;  %v498_v5 = vsel %vm15_vm2, %v8868_v56, %v493_v61  ;;  %s2339_s22 = smov 3  ;;  %v9193_v46 = vld [vmem:[%s16975_s0 + $0x68c] ss:$16 sm:%s2362_s12]   ;;  %s2342_s28 = smov 12 }
 0x121   :  { %v8850_v63 = vld [vmem:[%s16975_s0 + $0x980] ss:$16 sm:%s401_s4]   ;;  %501 = vst.msk [vmem:[#allocation0 + $0xb8] sm:$0xff] %vm17_vm3, %v498_v5   ;;  %s2347_s29 = smov 48  ;;  %v9194_v4 = vld [vmem:[%s16975_s0 + $0x68c] ss:$16 sm:%s2365_s15]  }
 0x122   :  { %v1623_v45 = vpop.permute.xlu0 %1622   ;;  %v1691_v14 = vpop.permute.xlu1 %1690   ;;  %v8851_v0 = vld [vmem:[%s16975_s0 + $0x980] ss:$16 sm:%s406_s5]   ;;  %v404_v2 = vsel %vm7_vm0, %v8850_v63, %v8849_v62  ;;  %1052 = vst.msk [vmem:[#allocation0 + $0xb8] sm:$0xff] %vm522_vm4, %v11563_v28   ;;  %v9195_v22 = vld [vmem:[%s16975_s0 + $0x68c] ss:$16 sm:%s2370_s16]   ;;  %s2352_s4 = smov 192  ;;  %v2368_v8 = vsel %vm7_vm0, %v9194_v4, %v9193_v46 }
 0x123   :  { %1625 = vst.msk [vmem:[#allocation0] sm:$0xff] %vm1624_vm6, %v1623_v45   ;;  %1694 = vst.msk [vmem:[#allocation0 + $0x60] sm:$0xff] %vm1624_vm6, %v1691_v14   ;;  %v8852_v42 = vld [vmem:[%s16975_s0 + $0x980] ss:$16 sm:%s411_s10]   ;;  %v409_v28 = vsel %vm11_vm1, %v8851_v0, %v404_v2  ;;  %s2408_s5 = smov 3  ;;  %s2411_s10 = smov 12  ;;  %v2373_v54 = vsel %vm11_vm1, %v9195_v22, %v2368_v8 }
 0x124   :  { %v414_v7 = vsel %vm15_vm2, %v8852_v42, %v409_v28  ;;  %v9196_v9 = vld [vmem:[%s16975_s0 + $0x68c] ss:$16 sm:%s2375_s21]   ;;  %1603 = vst.msk [vmem:[#allocation0 + $0xb8] sm:$0xff] %vm1073_vm5, %v12043_v11   ;;  %s2416_s16 = smov 48  ;;  %s2421_s17 = smov 192 }
 0x125   :  { %v9189_v16 = vld [vmem:[%s16975_s0 + $0x48c] ss:$16 sm:%s2339_s22]   ;;  %417 = vst.msk [vmem:[#allocation0 + $0x98] sm:$0xff] %vm17_vm3, %v414_v7   ;;  %s2385_s22 = smov 3  ;;  %s2388_s25 = smov 12  ;;  %vm7134_vm3 = vcmask 64560  }
 0x126   :  { %v1668_v44 = vpop.permute.xlu0 %1667   ;;  %v1737_v3 = vpop.permute.xlu1 %1736   ;;  %v9190_v12 = vld [vmem:[%s16975_s0 + $0x48c] ss:$16 sm:%s2342_s28]   ;;  %1029 = vst.msk [vmem:[#allocation0 + $0x98] sm:$0xff] %vm522_vm4, %v11585_v36   ;;  %v2378_v36 = vsel %vm15_vm2, %v9196_v9, %v2373_v54  ;;  %s2393_s26 = smov 48  ;;  %s2398_s2 = smov 192  ;;  %vm7685_vm4 = vcmask 48160  }
 0x127   :  { %1671 = vst.msk [vmem:[#allocation0 + $0x40] sm:$0xff] %vm1624_vm6, %v1668_v44   ;;  %1740 = vst.msk [vmem:[#allocation0 + $0xa0] sm:$0xff] %vm1624_vm6, %v1737_v3   ;;  %v9191_v10 = vld [vmem:[%s16975_s0 + $0x48c] ss:$16 sm:%s2347_s29]   ;;  %v2345_v57 = vsel %vm7_vm0, %v9190_v12, %v9189_v16  ;;  %2379 = vrot.lane.b32.xlu1 %v2378_v36, %s10352_s27  ;;  %s2457_s7 = smov 12  ;;  %s2462_s12 = smov 48 }
 0x128   :  { %v9192_v13 = vld [vmem:[%s16975_s0 + $0x48c] ss:$16 sm:%s2352_s4]   ;;  %v2350_v18 = vsel %vm11_vm1, %v9191_v10, %v2345_v57  ;;  %1580 = vst.msk [vmem:[#allocation0 + $0x98] sm:$0xff] %vm1073_vm5, %v12069_v49   ;;  %s2467_s13 = smov 192  ;;  %s2434_s21 = smov 12 }
 0x129   :  { %v9201_v17 = vld [vmem:[%s16975_s0 + $0xa8c] ss:$16 sm:%s2408_s5]   ;;  %v2355_v21 = vsel %vm15_vm2, %v9192_v13, %v2350_v18  ;;  %s2454_s5 = smov 3  ;;  %s2444_s28 = smov 192 }
 0x12a   :  { %v1714_v11 = vpop.permute.xlu0 %1713   ;;  %v9202_v19 = vld [vmem:[%s16975_s0 + $0xa8c] ss:$16 sm:%s2411_s10]   ;;  %v1783_v20 = vpop.permute.xlu1 %1782   ;;  %2356 = vrot.lane.b32.xlu0 %v2355_v21, %s10352_s27  ;;  %s2500_s30 = smov 3  ;;  %s2508_s8 = smov 48 }
 0x12b   :  { %1717 = vst.msk [vmem:[#allocation0 + $0x80] sm:$0xff] %vm1624_vm6, %v1714_v11   ;;  %v2414_v23 = vsel %vm7_vm0, %v9202_v19, %v9201_v17  ;;  %v9203_v26 = vld [vmem:[%s16975_s0 + $0xa8c] ss:$16 sm:%s2416_s16]   ;;  %1786 = vst.msk [vmem:[#allocation0 + $0x28] sm:$0xff] %vm1624_vm6, %v1783_v20   ;;  %s2431_s16 = smov 3  ;;  %s2513_s11 = smov 192 }
 0x12c   :  { %v9204_v27 = vld [vmem:[%s16975_s0 + $0xa8c] ss:$16 sm:%s2421_s17]   ;;  %v2419_v49 = vsel %vm11_vm1, %v9203_v26, %v2414_v23  ;;  %s2480_s17 = smov 12  ;;  %s2485_s19 = smov 48 }
 0x12d   :  { %v9197_v24 = vld [vmem:[%s16975_s0 + $0x88c] ss:$16 sm:%s2385_s22]   ;;  %v2424_v29 = vsel %vm15_vm2, %v9204_v27, %v2419_v49  ;;  %s2439_s22 = smov 48  ;;  %s2490_s23 = smov 192 }
 0x12e   :  { %v9198_v30 = vld [vmem:[%s16975_s0 + $0x88c] ss:$16 sm:%s2388_s25]   ;;  %v1760_v33 = vpop.permute.xlu0 %1759   ;;  %2425 = vrot.lane.b32.xlu1 %v2424_v29, %s10352_s27  ;;  %v1829_v38 = vpop.permute.xlu1 %1828   ;;  %s2554_s3 = smov 48  ;;  %s2559_s4 = smov 192 }
 0x12f   :  { %v9199_v32 = vld [vmem:[%s16975_s0 + $0x88c] ss:$16 sm:%s2393_s26]   ;;  %v2391_v34 = vsel %vm7_vm0, %v9198_v30, %v9197_v24  ;;  %1763 = vst.msk [vmem:[#allocation0 + $0x8] sm:$0xff] %vm1624_vm6, %v1760_v33   ;;  %1832 = vst.msk [vmem:[#allocation0 + $0x68] sm:$0xff] %vm1624_vm6, %v1829_v38   ;;  %s2546_s26 = smov 3  ;;  %s2531_s14 = smov 48 }
 0x130   :  { %v9200_v25 = vld [vmem:[%s16975_s0 + $0x88c] ss:$16 sm:%s2398_s2]   ;;  %v2396_v35 = vsel %vm11_vm1, %v9199_v32, %v2391_v34  ;;  %s2503_s2 = smov 12  ;;  %s2536_s18 = smov 192 }
 0x131   :  { %v9209_v60 = vld [vmem:[%s16975_s0 + $0x30c] ss:$16 sm:%s2454_s5]   ;;  %v2401_v39 = vsel %vm15_vm2, %v9200_v25, %v2396_v35  ;;  %s2600_s29 = smov 48  ;;  %s2605_s6 = smov 192 }
 0x132   :  { %v9210_v1 = vld [vmem:[%s16975_s0 + $0x30c] ss:$16 sm:%s2457_s7]   ;;  %2402 = vrot.lane.b32.xlu0 %v2401_v39, %s10352_s27  ;;  %v1806_v15 = vpop.permute.xlu0 %1805   ;;  %s2577_s9 = smov 48  ;;  %s2582_s15 = smov 192 }
 0x133   :  { %v2460_v59 = vsel %vm7_vm0, %v9210_v1, %v9209_v60  ;;  %v9211_v40 = vld [vmem:[%s16975_s0 + $0x30c] ss:$16 sm:%s2462_s12]   ;;  %s2477_s12 = smov 3  ;;  %1809 = vst.msk [vmem:[#allocation0 + $0x48] sm:$0xff] %vm1624_vm6, %v1806_v15   ;;  %s2646_s24 = smov 48 }
 0x134   :  { %v9212_v41 = vld [vmem:[%s16975_s0 + $0x30c] ss:$16 sm:%s2467_s13]   ;;  %v2465_v43 = vsel %vm11_vm1, %v9211_v40, %v2460_v59  ;;  %s2526_s13 = smov 12  ;;  %s2651_s25 = smov 192 }
 0x135   :  { %v9205_v45 = vld [vmem:[%s16975_s0 + $0x10c] ss:$16 sm:%s2431_s16]   ;;  %v2470_v47 = vsel %vm15_vm2, %v9212_v41, %v2465_v43  ;;  %s2623_s5 = smov 48  ;;  %s2628_s10 = smov 192 }
 0x136   :  { %v9206_v37 = vld [vmem:[%s16975_s0 + $0x10c] ss:$16 sm:%s2434_s21]   ;;  %2471 = vrot.lane.b32.xlu1 %v2470_v47, %s10352_s27  ;;  %v1875_v3 = vpop.permute.xlu1 %1874   ;;  %s2692_s20 = smov 48  ;;  %s2697_s21 = smov 192 }
 0x137   :  { %v9207_v48 = vld [vmem:[%s16975_s0 + $0x10c] ss:$16 sm:%s2439_s22]   ;;  %v2437_v50 = vsel %vm7_vm0, %v9206_v37, %v9205_v45  ;;  %1878 = vst.msk [vmem:[#allocation0 + $0xa8] sm:$0xff] %vm1624_vm6, %v1875_v3   ;;  %s2592_s22 = smov 3  ;;  %s2674_s7 = smov 192 }
 0x138   :  { %v9208_v51 = vld [vmem:[%s16975_s0 + $0x10c] ss:$16 sm:%s2444_s28]   ;;  %v2442_v6 = vsel %vm11_vm1, %v9207_v48, %v2437_v50  ;;  %s2549_s28 = smov 12  ;;  %s2737_s16 = smov 48 }
 0x139   :  { %v9217_v14 = vld [vmem:[%s16975_s0 + $0x70c] ss:$16 sm:%s2500_s30]   ;;  %v2447_v52 = vsel %vm15_vm2, %v9208_v51, %v2442_v6  ;;  %s2669_s30 = smov 48  ;;  %v9259_v3 = vld [vmem:[%s16975_s0 + $0x20b] ss:$16 sm:%s2737_s16]   ;;  %s2752_s16 = smov 3 }
 0x13a   :  { %v9218_v31 = vld [vmem:[%s16975_s0 + $0x70c] ss:$16 sm:%s2503_s2]   ;;  %2448 = vrot.lane.b32.xlu0 %v2447_v52, %s10352_s27  ;;  %v1852_v16 = vpop.permute.xlu0 %1851   ;;  %s2720_s2 = smov 192 }
 0x13b   :  { %v2506_v53 = vsel %vm7_vm0, %v9218_v31, %v9217_v14  ;;  %v9219_v55 = vld [vmem:[%s16975_s0 + $0x70c] ss:$16 sm:%s2508_s8]   ;;  %s2523_s8 = smov 3  ;;  %1855 = vst.msk [vmem:[#allocation0 + $0x88] sm:$0xff] %vm1624_vm6, %v1852_v16  }
 0x13c   :  { %v9220_v56 = vld [vmem:[%s16975_s0 + $0x70c] ss:$16 sm:%s2513_s11]   ;;  %v2511_v58 = vsel %vm11_vm1, %v9219_v55, %v2506_v53  ;;  %s2572_s11 = smov 12 }
 0x13d   :  { %v9213_v61 = vld [vmem:[%s16975_s0 + $0x50c] ss:$16 sm:%s2477_s12]   ;;  %v2516_v62 = vsel %vm15_vm2, %v9220_v56, %v2511_v58  ;;  %s2788_s12 = smov 192 }
 0x13e   :  { %v9214_v44 = vld [vmem:[%s16975_s0 + $0x50c] ss:$16 sm:%s2480_s17]   ;;  %2517 = vrot.lane.b32.xlu1 %v2516_v62, %s10352_s27  ;;  %v1921_v32 = vpop.permute.xlu1 %1920   ;;  %s2742_s17 = smov 192 }
 0x13f   :  { %v9215_v5 = vld [vmem:[%s16975_s0 + $0x50c] ss:$16 sm:%s2485_s19]   ;;  %v2483_v63 = vsel %vm7_vm0, %v9214_v44, %v9213_v61  ;;  %s2638_s19 = smov 3  ;;  %1924 = vst.msk [vmem:[#allocation0 + $0x30] sm:$0xff] %vm1624_vm6, %v1921_v32  }
 0x140   :  { %v9216_v0 = vld [vmem:[%s16975_s0 + $0x50c] ss:$16 sm:%s2490_s23]   ;;  %v2488_v42 = vsel %vm11_vm1, %v9215_v5, %v2483_v63  ;;  %s2595_s23 = smov 12 }
 0x141   :  { %v9225_v2 = vld [vmem:[%s16975_s0 + $0xb0c] ss:$16 sm:%s2546_s26]   ;;  %v2493_v28 = vsel %vm15_vm2, %v9216_v0, %v2488_v42  ;;  %s2715_s26 = smov 48 }
 0x142   :  { %v9226_v46 = vld [vmem:[%s16975_s0 + $0xb0c] ss:$16 sm:%s2549_s28]   ;;  %2494 = vrot.lane.b32.xlu0 %v2493_v28, %s10352_s27  ;;  %v1898_v39 = vpop.permute.xlu0 %1897   ;;  %s2765_s28 = smov 192 }
 0x143   :  { %v2552_v4 = vsel %vm7_vm0, %v9226_v46, %v9225_v2  ;;  %v9227_v22 = vld [vmem:[%s16975_s0 + $0xb0c] ss:$16 sm:%s2554_s3]   ;;  %s2569_s3 = smov 3  ;;  %1901 = vst.msk [vmem:[#allocation0 + $0x10] sm:$0xff] %vm1624_vm6, %v1898_v39   ;;  %v9260_v28 = vld [vmem:[%s16975_s0 + $0x20b] ss:$16 sm:%s2742_s17]  }
 0x144   :  { %v9228_v7 = vld [vmem:[%s16975_s0 + $0xb0c] ss:$16 sm:%s2559_s4]   ;;  %v2557_v8 = vsel %vm11_vm1, %v9227_v22, %v2552_v4  ;;  %s2618_s4 = smov 12  ;;  %s2801_s17 = smov 12 }
 0x145   :  { %v9221_v9 = vld [vmem:[%s16975_s0 + $0x90c] ss:$16 sm:%s2523_s8]   ;;  %v2562_v54 = vsel %vm15_vm2, %v9228_v7, %v2557_v8  ;;  %s2834_s8 = smov 192  ;;  %v9270_v39 = vld [vmem:[%s16975_s0 + $0x80b] ss:$16 sm:%s2801_s17]   ;;  %s3064_s17 = smov 192 }
 0x146   :  { %v9222_v12 = vld [vmem:[%s16975_s0 + $0x90c] ss:$16 sm:%s2526_s13]   ;;  %2563 = vrot.lane.b32.xlu1 %v2562_v54, %s10352_s27  ;;  %v1967_v61 = vpop.permute.xlu1 %1966   ;;  %s10353_s13 = smov 22  }
 0x147   :  { %v9223_v10 = vld [vmem:[%s16975_s0 + $0x90c] ss:$16 sm:%s2531_s14]   ;;  %v2529_v11 = vsel %vm7_vm0, %v9222_v12, %v9221_v9  ;;  %s2684_s14 = smov 3  ;;  %1970 = vst.msk [vmem:[#allocation0 + $0x70] sm:$0xff] %vm1624_vm6, %v1967_v61   ;;  %v9255_v9 = vld [vmem:[%s16975_s0 + $0xb] ss:$16 sm:%s2715_s26]  }
 0x148   :  { %v9224_v36 = vld [vmem:[%s16975_s0 + $0x90c] ss:$16 sm:%s2536_s18]   ;;  %v2534_v57 = vsel %vm11_vm1, %v9223_v10, %v2529_v11  ;;  %s2641_s18 = smov 12  ;;  %v9256_v54 = vld [vmem:[%s16975_s0 + $0xb] ss:$16 sm:%s2720_s2]   ;;  %s2824_s2 = smov 12 }
 0x149   :  { %v9233_v13 = vld [vmem:[%s16975_s0 + $0x38c] ss:$16 sm:%s2592_s22]   ;;  %v2539_v18 = vsel %vm15_vm2, %v9224_v36, %v2534_v57  ;;  %s2760_s22 = smov 48  ;;  %v9274_v32 = vld [vmem:[%s16975_s0 + $0xa0b] ss:$16 sm:%s2824_s2]   ;;  %s2867_s26 = smov 3 }
 0x14a   :  { %v9234_v17 = vld [vmem:[%s16975_s0 + $0x38c] ss:$16 sm:%s2595_s23]   ;;  %2540 = vrot.lane.b32.xlu0 %v2539_v18, %s10352_s27  ;;  %v1944_v42 = vpop.permute.xlu0 %1943   ;;  %s2811_s23 = smov 192  ;;  %s3041_s2 = smov 192 }
 0x14b   :  { %v2598_v19 = vsel %vm7_vm0, %v9234_v17, %v9233_v13  ;;  %v9235_v20 = vld [vmem:[%s16975_s0 + $0x38c] ss:$16 sm:%s2600_s29]   ;;  %s2615_s29 = smov 3  ;;  %1947 = vst.msk [vmem:[#allocation0 + $0x50] sm:$0xff] %vm1624_vm6, %v1944_v42   ;;  %v9268_v17 = vld [vmem:[%s16975_s0 + $0x60b] ss:$16 sm:%s2788_s12]  }
 0x14c   :  { %v9236_v21 = vld [vmem:[%s16975_s0 + $0x38c] ss:$16 sm:%s2605_s6]   ;;  %v2603_v23 = vsel %vm11_vm1, %v9235_v20, %v2598_v19  ;;  %s2664_s6 = smov 12  ;;  %v9261_v19 = vld [vmem:[%s16975_s0 + $0x40b] ss:$16 sm:%s2752_s16]   ;;  %s2847_s12 = smov 12 }
 0x14d   :  { %v9229_v26 = vld [vmem:[%s16975_s0 + $0x18c] ss:$16 sm:%s2569_s3]   ;;  %v2608_v27 = vsel %vm15_vm2, %v9236_v21, %v2603_v23  ;;  %s2880_s3 = smov 192  ;;  %s3059_s16 = smov 48 }
 0x14e   :  { %v9230_v49 = vld [vmem:[%s16975_s0 + $0x18c] ss:$16 sm:%s2572_s11]   ;;  %2609 = vrot.lane.b32.xlu1 %v2608_v27, %s10352_s27  ;;  %v2013_v20 = vpop.permute.xlu1 %2012   ;;  %s2898_s11 = smov 48 }
 0x14f   :  { %v9231_v24 = vld [vmem:[%s16975_s0 + $0x18c] ss:$16 sm:%s2577_s9]   ;;  %v2575_v29 = vsel %vm7_vm0, %v9230_v49, %v9229_v26  ;;  %s2729_s9 = smov 3  ;;  %v9263_v26 = vld [vmem:[%s16975_s0 + $0x40b] ss:$16 sm:%s2760_s22]   ;;  %2016 = vst.msk [vmem:[#allocation0 + $0xb0] sm:$0xff] %vm1624_vm6, %v2013_v20  }
 0x150   :  { %v9232_v30 = vld [vmem:[%s16975_s0 + $0x18c] ss:$16 sm:%s2582_s15]   ;;  %v2580_v33 = vsel %vm11_vm1, %v9231_v24, %v2575_v29  ;;  %s2687_s15 = smov 12  ;;  %v9257_v63 = vld [vmem:[%s16975_s0 + $0x20b] ss:$16 sm:%s2729_s9]   ;;  %s2913_s22 = smov 3 }
 0x151   :  { %v9241_v34 = vld [vmem:[%s16975_s0 + $0x78c] ss:$16 sm:%s2638_s19]   ;;  %v2585_v35 = vsel %vm15_vm2, %v9232_v30, %v2580_v33  ;;  %v9264_v49 = vld [vmem:[%s16975_s0 + $0x40b] ss:$16 sm:%s2765_s28]   ;;  %s2806_s19 = smov 48  ;;  %s2870_s28 = smov 12 }
 0x152   :  { %v9242_v25 = vld [vmem:[%s16975_s0 + $0x78c] ss:$16 sm:%s2641_s18]   ;;  %2586 = vrot.lane.b32.xlu0 %v2585_v35, %s10352_s27  ;;  %v1990_v24 = vpop.permute.xlu0 %1989   ;;  %s2857_s18 = smov 192  ;;  %s2949_s9 = smov 192 }
 0x153   :  { %v2644_v60 = vsel %vm7_vm0, %v9242_v25, %v9241_v34  ;;  %v9243_v1 = vld [vmem:[%s16975_s0 + $0x78c] ss:$16 sm:%s2646_s24]   ;;  %s2661_s24 = smov 3  ;;  %1993 = vst.msk [vmem:[#allocation0 + $0x90] sm:$0xff] %vm1624_vm6, %v1990_v24   ;;  %v9276_v35 = vld [vmem:[%s16975_s0 + $0xa0b] ss:$16 sm:%s2834_s8]  }
 0x154   :  { %v9244_v38 = vld [vmem:[%s16975_s0 + $0x78c] ss:$16 sm:%s2651_s25]   ;;  %v2649_v59 = vsel %vm11_vm1, %v9243_v1, %v2644_v60  ;;  %s2710_s25 = smov 12  ;;  %s2893_s8 = smov 12 }
 0x155   :  { %v9237_v40 = vld [vmem:[%s16975_s0 + $0x58c] ss:$16 sm:%s2615_s29]   ;;  %v2654_v41 = vsel %vm15_vm2, %v9244_v38, %v2649_v59  ;;  %v9254_v8 = vld [vmem:[%s16975_s0 + $0xb] ss:$16 sm:%s2710_s25]   ;;  %s2921_s29 = smov 48  ;;  %s2972_s25 = smov 192 }
 0x156   :  { %v9238_v43 = vld [vmem:[%s16975_s0 + $0x58c] ss:$16 sm:%s2618_s4]   ;;  %2655 = vrot.lane.b32.xlu1 %v2654_v41, %s10352_s27  ;;  %s2775_s4 = smov 3 }
 0x157   :  { %v9239_v45 = vld [vmem:[%s16975_s0 + $0x58c] ss:$16 sm:%s2623_s5]   ;;  %v2621_v47 = vsel %vm7_vm0, %v9238_v43, %v9237_v40  ;;  %s2778_s5 = smov 12  ;;  %v9265_v10 = vld [vmem:[%s16975_s0 + $0x60b] ss:$16 sm:%s2775_s4]   ;;  %s2944_s4 = smov 48 }
 0x158   :  { %v9240_v37 = vld [vmem:[%s16975_s0 + $0x58c] ss:$16 sm:%s2628_s10]   ;;  %v2626_v48 = vsel %vm11_vm1, %v9239_v45, %v2621_v47  ;;  %s2732_s10 = smov 12  ;;  %v9266_v11 = vld [vmem:[%s16975_s0 + $0x60b] ss:$16 sm:%s2778_s5]   ;;  %s2995_s5 = smov 192 }
 0x159   :  { %v9249_v15 = vld [vmem:[%s16975_s0 + $0xb8c] ss:$16 sm:%s2684_s14]   ;;  %v2631_v51 = vsel %vm15_vm2, %v9240_v37, %v2626_v48  ;;  %v9258_v0 = vld [vmem:[%s16975_s0 + $0x20b] ss:$16 sm:%s2732_s10]   ;;  %s2783_s10 = smov 48  ;;  %v2781_v57 = vsel %vm7_vm0, %v9266_v11, %v9265_v10  ;;  %s2852_s14 = smov 48 }
 0x15a   :  { %v9250_v50 = vld [vmem:[%s16975_s0 + $0xb8c] ss:$16 sm:%s2687_s15]   ;;  %2632 = vrot.lane.b32.xlu0 %v2631_v51, %s10352_s27  ;;  %v2735_v46 = vsel %vm7_vm0, %v9258_v0, %v9257_v63  ;;  %v2059_v51 = vpop.permute.xlu1 %2058   ;;  %s2903_s15 = smov 192 }
 0x15b   :  { %v2690_v6 = vsel %vm7_vm0, %v9250_v50, %v9249_v15  ;;  %v9251_v14 = vld [vmem:[%s16975_s0 + $0xb8c] ss:$16 sm:%s2692_s20]   ;;  %s2707_s20 = smov 3  ;;  %v2740_v4 = vsel %vm11_vm1, %v9259_v3, %v2735_v46  ;;  %v9267_v13 = vld [vmem:[%s16975_s0 + $0x60b] ss:$16 sm:%s2783_s10]   ;;  %s2798_s10 = smov 3 }
 0x15c   :  { %v9252_v31 = vld [vmem:[%s16975_s0 + $0xb8c] ss:$16 sm:%s2697_s21]   ;;  %v2695_v52 = vsel %vm11_vm1, %v9251_v14, %v2690_v6  ;;  %v9253_v22 = vld [vmem:[%s16975_s0 + $0xb] ss:$16 sm:%s2707_s20]   ;;  %v2745_v7 = vsel %vm15_vm2, %v9260_v28, %v2740_v4  ;;  %s2755_s21 = smov 12  ;;  %v2786_v18 = vsel %vm11_vm1, %v9267_v13, %v2781_v57  ;;  %2062 = vst.msk [vmem:[#allocation0 + $0x38] sm:$0xff] %vm1624_vm6, %v2059_v51  }
 0x15d   :  { %v9245_v53 = vld [vmem:[%s16975_s0 + $0x98c] ss:$16 sm:%s2661_s24]   ;;  %v2700_v55 = vsel %vm15_vm2, %v9252_v31, %v2695_v52  ;;  %v2713_v16 = vsel %vm7_vm0, %v9254_v8, %v9253_v22  ;;  %v2791_v21 = vsel %vm15_vm2, %v9268_v17, %v2786_v18  ;;  %v9262_v23 = vld [vmem:[%s16975_s0 + $0x40b] ss:$16 sm:%s2755_s21]   ;;  %s2967_s24 = smov 48  ;;  %s3013_s20 = smov 48 }
 0x15e   :  { %v9246_v56 = vld [vmem:[%s16975_s0 + $0x98c] ss:$16 sm:%s2664_s6]   ;;  %2701 = vrot.lane.b32.xlu1 %v2700_v55, %s10352_s27  ;;  %v2718_v12 = vsel %vm11_vm1, %v9255_v9, %v2713_v16  ;;  %v2758_v27 = vsel %vm7_vm0, %v9262_v23, %v9261_v19  ;;  %s2926_s6 = smov 192  ;;  %v2036_v55 = vpop.permute.xlu0 %2035   ;;  %s3018_s21 = smov 192 }
 0x15f   :  { %v9247_v58 = vld [vmem:[%s16975_s0 + $0x98c] ss:$16 sm:%s2669_s30]   ;;  %v2667_v62 = vsel %vm7_vm0, %v9246_v56, %v9245_v53  ;;  %v2723_v36 = vsel %vm15_vm2, %v9256_v54, %v2718_v12  ;;  %s2821_s30 = smov 3  ;;  %v2763_v29 = vsel %vm11_vm1, %v9263_v26, %v2758_v27  ;;  %v9269_v1 = vld [vmem:[%s16975_s0 + $0x80b] ss:$16 sm:%s2798_s10]   ;;  %2039 = vst.msk [vmem:[#allocation0 + $0x18] sm:$0xff] %vm1624_vm6, %v2036_v55  }
 0x160   :  { %v9248_v44 = vld [vmem:[%s16975_s0 + $0x98c] ss:$16 sm:%s2674_s7]   ;;  %v2672_v5 = vsel %vm11_vm1, %v9247_v58, %v2667_v62  ;;  %s2829_s7 = smov 48  ;;  %v9273_v30 = vld [vmem:[%s16975_s0 + $0xa0b] ss:$16 sm:%s2821_s30]   ;;  %v2768_v33 = vsel %vm15_vm2, %v9264_v49, %v2763_v29  ;;  %v2804_v40 = vsel %vm7_vm0, %v9270_v39, %v9269_v1  ;;  %v2105_v54 = vpop.permute.xlu1 %2104   ;;  %s2990_s30 = smov 48 }
 0x161   :  { %v2677_v2 = vsel %vm15_vm2, %v9248_v44, %v2672_v5  ;;  %v2827_v34 = vsel %vm7_vm0, %v9274_v32, %v9273_v30  ;;  %v9275_v25 = vld [vmem:[%s16975_s0 + $0xa0b] ss:$16 sm:%s2829_s7]   ;;  %s2844_s7 = smov 3  ;;  %2108 = vst.msk [vmem:[#allocation0 + $0x78] sm:$0xff] %vm1624_vm6, %v2105_v54   ;;  %s3105_s10 = smov 48 }
 0x162   :  { %2678 = vrot.lane.b32.xlu0 %v2677_v2, %s10352_s27  ;;  %2746 = vrot.lane.b32.xlu1 %v2745_v7, %s10353_s13  ;;  %v2832_v60 = vsel %vm11_vm1, %v9275_v25, %v2827_v34  ;;  %v9271_v59 = vld [vmem:[%s16975_s0 + $0x80b] ss:$16 sm:%s2806_s19]   ;;  %s2875_s27 = smov 48  ;;  %s2959_s19 = smov 3 }
 0x163   :  { %v2837_v38 = vsel %vm15_vm2, %v9276_v35, %v2832_v60  ;;  %v9272_v41 = vld [vmem:[%s16975_s0 + $0x80b] ss:$16 sm:%s2811_s23]   ;;  %v2809_v43 = vsel %vm11_vm1, %v9271_v59, %v2804_v40  ;;  %s2916_s23 = smov 12 }
 0x164   :  { %v9281_v45 = vld [vmem:[%s16975_s0 + $0x28b] ss:$16 sm:%s2867_s26]   ;;  %v2814_v37 = vsel %vm15_vm2, %v9272_v41, %v2809_v43  ;;  %v2082_v17 = vpop.permute.xlu0 %2081   ;;  %s3036_s26 = smov 48 }
 0x165   :  { %v9282_v47 = vld [vmem:[%s16975_s0 + $0x28b] ss:$16 sm:%s2870_s28]   ;;  %2085 = vst.msk [vmem:[#allocation0 + $0x58] sm:$0xff] %vm1624_vm6, %v2082_v17   ;;  %s3087_s28 = smov 192 }
 0x166   :  { %2724 = vrot.lane.b32.xlu0 %v2723_v36, %s10353_s13  ;;  %2792 = vrot.lane.b32.xlu1 %v2791_v21, %s10353_s13  ;;  %v2873_v48 = vsel %vm7_vm0, %v9282_v47, %v9281_v45  ;;  %v9283_v15 = vld [vmem:[%s16975_s0 + $0x28b] ss:$16 sm:%s2875_s27]   ;;  %s2890_s27 = smov 3 }
 0x167   :  { %v9284_v50 = vld [vmem:[%s16975_s0 + $0x28b] ss:$16 sm:%s2880_s3]   ;;  %v2878_v6 = vsel %vm11_vm1, %v9283_v15, %v2873_v48  ;;  %s2939_s3 = smov 12 }
 0x168   :  { %v9277_v14 = vld [vmem:[%s16975_s0 + $0x8b] ss:$16 sm:%s2844_s7]   ;;  %v2883_v31 = vsel %vm15_vm2, %v9284_v50, %v2878_v6  ;;  %s3151_s7 = smov 48 }
 0x169   :  { %v9278_v52 = vld [vmem:[%s16975_s0 + $0x8b] ss:$16 sm:%s2847_s12]   ;;  %v2151_v39 = vpop.permute.xlu1 %2150   ;;  %s3110_s12 = smov 192 }
 0x16a   :  { %2769 = vrot.lane.b32.xlu0 %v2768_v33, %s10353_s13  ;;  %2838 = vrot.lane.b32.xlu1 %v2837_v38, %s10353_s13  ;;  %v9279_v53 = vld [vmem:[%s16975_s0 + $0x8b] ss:$16 sm:%s2852_s14]   ;;  %v2850_v56 = vsel %vm7_vm0, %v9278_v52, %v9277_v14  ;;  %s3005_s14 = smov 3  ;;  %2154 = vst.msk [vmem:[#allocation0 + $0xb8] sm:$0xff] %vm1624_vm6, %v2151_v39  }
 0x16b   :  { %v9280_v58 = vld [vmem:[%s16975_s0 + $0x8b] ss:$16 sm:%s2857_s18]   ;;  %v2855_v61 = vsel %vm11_vm1, %v9279_v53, %v2850_v56  ;;  %s2962_s18 = smov 12 }
 0x16c   :  { %v9289_v62 = vld [vmem:[%s16975_s0 + $0x68b] ss:$16 sm:%s2913_s22]   ;;  %v2860_v5 = vsel %vm15_vm2, %v9280_v58, %v2855_v61  ;;  %s3082_s22 = smov 48 }
 0x16d   :  { %v9290_v44 = vld [vmem:[%s16975_s0 + $0x68b] ss:$16 sm:%s2916_s23]   ;;  %v2128_v48 = vpop.permute.xlu0 %2127   ;;  %s3133_s23 = smov 192 }
 0x16e   :  { %2815 = vrot.lane.b32.xlu0 %v2814_v37, %s10353_s13  ;;  %2884 = vrot.lane.b32.xlu1 %v2883_v31, %s10353_s13  ;;  %v2919_v63 = vsel %vm7_vm0, %v9290_v44, %v9289_v62  ;;  %v9291_v0 = vld [vmem:[%s16975_s0 + $0x68b] ss:$16 sm:%s2921_s29]   ;;  %s2936_s29 = smov 3  ;;  %2131 = vst.msk [vmem:[#allocation0 + $0x98] sm:$0xff] %vm1624_vm6, %v2128_v48  }
 0x16f   :  { %v9292_v42 = vld [vmem:[%s16975_s0 + $0x68b] ss:$16 sm:%s2926_s6]   ;;  %v2924_v2 = vsel %vm11_vm1, %v9291_v0, %v2919_v63  ;;  %s2985_s6 = smov 12 }
 0x170   :  { %v9285_v46 = vld [vmem:[%s16975_s0 + $0x48b] ss:$16 sm:%s2890_s27]   ;;  %v2929_v3 = vsel %vm15_vm2, %v9292_v42, %v2924_v2  ;;  %s3197_s27 = smov 48 }
 0x171   :  { %v9286_v28 = vld [vmem:[%s16975_s0 + $0x48b] ss:$16 sm:%s2893_s8]   ;;  %s3156_s8 = smov 192 }
 0x172   :  { %2861 = vrot.lane.b32.xlu0 %v2860_v5, %s10353_s13  ;;  %v9287_v4 = vld [vmem:[%s16975_s0 + $0x48b] ss:$16 sm:%s2898_s11]   ;;  %2930 = vrot.lane.b32.xlu1 %v2929_v3, %s10353_s13  ;;  %v2896_v22 = vsel %vm7_vm0, %v9286_v28, %v9285_v46  ;;  %s3051_s11 = smov 3  ;;  %v2196_v46 = vpop.permute.xlu1 %2195  }
 0x173   :  { %v9288_v7 = vld [vmem:[%s16975_s0 + $0x48b] ss:$16 sm:%s2903_s15]   ;;  %v2901_v8 = vsel %vm11_vm1, %v9287_v4, %v2896_v22  ;;  %s3008_s15 = smov 12  ;;  %2199 = vst.msk [vmem:[#allocation0 + $0x20] sm:$0xff] %vm2175_vm7, %v2196_v46  }
 0x174   :  { %v9297_v9 = vld [vmem:[%s16975_s0 + $0xa8b] ss:$16 sm:%s2959_s19]   ;;  %v2906_v12 = vsel %vm15_vm2, %v9288_v7, %v2901_v8  ;;  %s3128_s19 = smov 48 }
 0x175   :  { %v9298_v16 = vld [vmem:[%s16975_s0 + $0xa8b] ss:$16 sm:%s2962_s18]   ;;  %s3179_s18 = smov 192 }
 0x176   :  { %v2965_v10 = vsel %vm7_vm0, %v9298_v16, %v9297_v9  ;;  %v9299_v11 = vld [vmem:[%s16975_s0 + $0xa8b] ss:$16 sm:%s2967_s24]   ;;  %2907 = vrot.lane.b32.xlu0 %v2906_v12, %s10353_s13  ;;  %s2982_s24 = smov 3  ;;  %v2174_v8 = vpop.permute.xlu0 %2173  }
 0x177   :  { %v9300_v36 = vld [vmem:[%s16975_s0 + $0xa8b] ss:$16 sm:%s2972_s25]   ;;  %v2970_v57 = vsel %vm11_vm1, %v9299_v11, %v2965_v10  ;;  %s3031_s25 = smov 12  ;;  %2176 = vst.msk [vmem:[#allocation0] sm:$0xff] %vm2175_vm7, %v2174_v8  }
 0x178   :  { %v9293_v13 = vld [vmem:[%s16975_s0 + $0x88b] ss:$16 sm:%s2936_s29]   ;;  %v2975_v18 = vsel %vm15_vm2, %v9300_v36, %v2970_v57  ;;  %s3243_s29 = smov 48 }
 0x179   :  { %v9294_v19 = vld [vmem:[%s16975_s0 + $0x88b] ss:$16 sm:%s2939_s3]   ;;  %2976 = vrot.lane.b32.xlu1 %v2975_v18, %s10353_s13  ;;  %s3202_s3 = smov 192 }
 0x17a   :  { %v9295_v20 = vld [vmem:[%s16975_s0 + $0x88b] ss:$16 sm:%s2944_s4]   ;;  %v2942_v21 = vsel %vm7_vm0, %v9294_v19, %v9293_v13  ;;  %s3097_s4 = smov 3 }
 0x17b   :  { %v9296_v23 = vld [vmem:[%s16975_s0 + $0x88b] ss:$16 sm:%s2949_s9]   ;;  %v2947_v26 = vsel %vm11_vm1, %v9295_v20, %v2942_v21  ;;  %s3054_s9 = smov 12 }
 0x17c   :  { %v9305_v27 = vld [vmem:[%s16975_s0 + $0x30b] ss:$16 sm:%s3005_s14]   ;;  %v2952_v24 = vsel %vm15_vm2, %v9296_v23, %v2947_v26  ;;  %s3174_s14 = smov 48 }
 0x17d   :  { %v9306_v49 = vld [vmem:[%s16975_s0 + $0x30b] ss:$16 sm:%s3008_s15]   ;;  %2953 = vrot.lane.b32.xlu0 %v2952_v24, %s10353_s13  ;;  %s3225_s15 = smov 192 }
 0x17e   :  { %v3011_v29 = vsel %vm7_vm0, %v9306_v49, %v9305_v27  ;;  %v9307_v30 = vld [vmem:[%s16975_s0 + $0x30b] ss:$16 sm:%s3013_s20]   ;;  %s3028_s20 = smov 3 }
 0x17f   :  { %v9308_v32 = vld [vmem:[%s16975_s0 + $0x30b] ss:$16 sm:%s3018_s21]   ;;  %v3016_v33 = vsel %vm11_vm1, %v9307_v30, %v3011_v29  ;;  %s3077_s21 = smov 12  ;;  %v2242_v30 = vpop.permute.xlu1 %2241  }
 0x180   :  { %v9301_v34 = vld [vmem:[%s16975_s0 + $0x10b] ss:$16 sm:%s2982_s24]   ;;  %v3021_v25 = vsel %vm15_vm2, %v9308_v32, %v3016_v33  ;;  %2245 = vst.msk [vmem:[#allocation0 + $0x60] sm:$0xff] %vm2175_vm7, %v2242_v30   ;;  %s3288_s24 = smov 48 }
 0x181   :  { %v9302_v35 = vld [vmem:[%s16975_s0 + $0x10b] ss:$16 sm:%s2985_s6]   ;;  %3022 = vrot.lane.b32.xlu1 %v3021_v25, %s10353_s13  ;;  %s3248_s6 = smov 192 }
 0x182   :  { %v9303_v60 = vld [vmem:[%s16975_s0 + $0x10b] ss:$16 sm:%s2990_s30]   ;;  %v2988_v1 = vsel %vm7_vm0, %v9302_v35, %v9301_v34  ;;  %s3143_s30 = smov 3 }
 0x183   :  { %v9304_v38 = vld [vmem:[%s16975_s0 + $0x10b] ss:$16 sm:%s2995_s5]   ;;  %v2993_v59 = vsel %vm11_vm1, %v9303_v60, %v2988_v1  ;;  %s3100_s5 = smov 12  ;;  %v2219_v60 = vpop.permute.xlu0 %2218  }
 0x184   :  { %v9313_v40 = vld [vmem:[%s16975_s0 + $0x70b] ss:$16 sm:%s3051_s11]   ;;  %v2998_v43 = vsel %vm15_vm2, %v9304_v38, %v2993_v59  ;;  %s3220_s11 = smov 48  ;;  %2222 = vst.msk [vmem:[#allocation0 + $0x40] sm:$0xff] %vm2175_vm7, %v2219_v60  }
 0x185   :  { %v9314_v41 = vld [vmem:[%s16975_s0 + $0x70b] ss:$16 sm:%s3054_s9]   ;;  %2999 = vrot.lane.b32.xlu0 %v2998_v43, %s10353_s13  ;;  %s3271_s9 = smov 192 }
 0x186   :  { %v3057_v45 = vsel %vm7_vm0, %v9314_v41, %v9313_v40  ;;  %v9315_v47 = vld [vmem:[%s16975_s0 + $0x70b] ss:$16 sm:%s3059_s16]   ;;  %s3074_s16 = smov 3 }
 0x187   :  { %v9316_v37 = vld [vmem:[%s16975_s0 + $0x70b] ss:$16 sm:%s3064_s17]   ;;  %v3062_v15 = vsel %vm11_vm1, %v9315_v47, %v3057_v45  ;;  %s3123_s17 = smov 12 }
 0x188   :  { %v9309_v50 = vld [vmem:[%s16975_s0 + $0x50b] ss:$16 sm:%s3028_s20]   ;;  %v3067_v51 = vsel %vm15_vm2, %v9316_v37, %v3062_v15  ;;  %s3339_s20 = smov 192 }
 0x189   :  { %v9310_v6 = vld [vmem:[%s16975_s0 + $0x50b] ss:$16 sm:%s3031_s25]   ;;  %3068 = vrot.lane.b32.xlu1 %v3067_v51, %s10353_s13  ;;  %s3293_s25 = smov 192 }
 0x18a   :  { %v9311_v14 = vld [vmem:[%s16975_s0 + $0x50b] ss:$16 sm:%s3036_s26]   ;;  %v3034_v31 = vsel %vm7_vm0, %v9310_v6, %v9309_v50  ;;  %s3189_s26 = smov 3  ;;  %v9364_v8 = vld [vmem:[%s16975_s0 + $0x60a] ss:$16 sm:%s3339_s20]   ;;  %s3398_s20 = smov 12 }
 0x18b   :  { %v9312_v52 = vld [vmem:[%s16975_s0 + $0x50b] ss:$16 sm:%s3041_s2]   ;;  %v3039_v53 = vsel %vm11_vm1, %v9311_v14, %v3034_v31  ;;  %s3146_s2 = smov 12 }
 0x18c   :  { %v9321_v55 = vld [vmem:[%s16975_s0 + $0xb0b] ss:$16 sm:%s3097_s4]   ;;  %v3044_v58 = vsel %vm15_vm2, %v9312_v52, %v3039_v53  ;;  %s3266_s4 = smov 48 }
 0x18d   :  { %v9322_v56 = vld [vmem:[%s16975_s0 + $0xb0b] ss:$16 sm:%s3100_s5]   ;;  %3045 = vrot.lane.b32.xlu0 %v3044_v58, %s10353_s13  ;;  %v2288_v58 = vpop.permute.xlu1 %2287   ;;  %s3316_s5 = smov 192 }
 0x18e   :  { %v3103_v61 = vsel %vm7_vm0, %v9322_v56, %v9321_v55  ;;  %v9323_v62 = vld [vmem:[%s16975_s0 + $0xb0b] ss:$16 sm:%s3105_s10]   ;;  %s3120_s10 = smov 3  ;;  %v9355_v55 = vld [vmem:[%s16975_s0 + $0x20a] ss:$16 sm:%s3288_s24]   ;;  %2291 = vst.msk [vmem:[#allocation0 + $0xa0] sm:$0xff] %vm2175_vm7, %v2288_v58  }
 0x18f   :  { %v9324_v44 = vld [vmem:[%s16975_s0 + $0xb0b] ss:$16 sm:%s3110_s12]   ;;  %v3108_v5 = vsel %vm11_vm1, %v9323_v62, %v3103_v61  ;;  %s3169_s12 = smov 12  ;;  %v9356_v56 = vld [vmem:[%s16975_s0 + $0x20a] ss:$16 sm:%s3293_s25]   ;;  %s3303_s24 = smov 3 }
 0x190   :  { %v9317_v63 = vld [vmem:[%s16975_s0 + $0x90b] ss:$16 sm:%s3074_s16]   ;;  %v3113_v0 = vsel %vm15_vm2, %v9324_v44, %v3108_v5  ;;  %s3385_s16 = smov 192  ;;  %s3352_s25 = smov 12 }
 0x191   :  { %v9318_v42 = vld [vmem:[%s16975_s0 + $0x90b] ss:$16 sm:%s3077_s21]   ;;  %3114 = vrot.lane.b32.xlu1 %v3113_v0, %s10353_s13  ;;  %v2265_v0 = vpop.permute.xlu0 %2264   ;;  %s10354_s21 = smov 20  }
 0x192   :  { %v9319_v2 = vld [vmem:[%s16975_s0 + $0x90b] ss:$16 sm:%s3082_s22]   ;;  %v3080_v3 = vsel %vm7_vm0, %v9318_v42, %v9317_v63  ;;  %s3235_s22 = smov 3  ;;  %v9351_v63 = vld [vmem:[%s16975_s0 + $0xa] ss:$16 sm:%s3266_s4]   ;;  %2268 = vst.msk [vmem:[#allocation0 + $0x80] sm:$0xff] %vm2175_vm7, %v2265_v0  }
 0x193   :  { %v9320_v28 = vld [vmem:[%s16975_s0 + $0x90b] ss:$16 sm:%s3087_s28]   ;;  %v3085_v4 = vsel %vm11_vm1, %v9319_v2, %v3080_v3  ;;  %s3192_s28 = smov 12  ;;  %v9352_v2 = vld [vmem:[%s16975_s0 + $0xa] ss:$16 sm:%s3271_s9]   ;;  %s3375_s9 = smov 12 }
 0x194   :  { %v9329_v22 = vld [vmem:[%s16975_s0 + $0x38b] ss:$16 sm:%s3143_s30]   ;;  %v3090_v9 = vsel %vm15_vm2, %v9320_v28, %v3085_v4  ;;  %s3311_s30 = smov 48  ;;  %s3418_s4 = smov 3 }
 0x195   :  { %v9330_v7 = vld [vmem:[%s16975_s0 + $0x38b] ss:$16 sm:%s3146_s2]   ;;  %3091 = vrot.lane.b32.xlu0 %v3090_v9, %s10353_s13  ;;  %s3362_s2 = smov 192 }
 0x196   :  { %v3149_v16 = vsel %vm7_vm0, %v9330_v7, %v9329_v22  ;;  %v9331_v54 = vld [vmem:[%s16975_s0 + $0x38b] ss:$16 sm:%s3151_s7]   ;;  %s3166_s7 = smov 3 }
 0x197   :  { %v9332_v12 = vld [vmem:[%s16975_s0 + $0x38b] ss:$16 sm:%s3156_s8]   ;;  %v3154_v10 = vsel %vm11_vm1, %v9331_v54, %v3149_v16  ;;  %s3215_s8 = smov 12  ;;  %v9357_v16 = vld [vmem:[%s16975_s0 + $0x40a] ss:$16 sm:%s3303_s24]   ;;  %s3610_s24 = smov 48 }
 0x198   :  { %v9325_v11 = vld [vmem:[%s16975_s0 + $0x18b] ss:$16 sm:%s3120_s10]   ;;  %v3159_v36 = vsel %vm15_vm2, %v9332_v12, %v3154_v10  ;;  %v9359_v10 = vld [vmem:[%s16975_s0 + $0x40a] ss:$16 sm:%s3311_s30]   ;;  %s3431_s10 = smov 192  ;;  %s3464_s30 = smov 3 }
 0x199   :  { %v9326_v57 = vld [vmem:[%s16975_s0 + $0x18b] ss:$16 sm:%s3123_s17]   ;;  %3160 = vrot.lane.b32.xlu1 %v3159_v36, %s10353_s13  ;;  %s3449_s17 = smov 48 }
 0x19a   :  { %v9327_v13 = vld [vmem:[%s16975_s0 + $0x18b] ss:$16 sm:%s3128_s19]   ;;  %v3126_v17 = vsel %vm7_vm0, %v9326_v57, %v9325_v11  ;;  %s3280_s19 = smov 3  ;;  %v9360_v36 = vld [vmem:[%s16975_s0 + $0x40a] ss:$16 sm:%s3316_s5]   ;;  %s3421_s5 = smov 12 }
 0x19b   :  { %v9328_v18 = vld [vmem:[%s16975_s0 + $0x18b] ss:$16 sm:%s3133_s23]   ;;  %v3131_v19 = vsel %vm11_vm1, %v9327_v13, %v3126_v17  ;;  %s3238_s23 = smov 12  ;;  %v9353_v14 = vld [vmem:[%s16975_s0 + $0x20a] ss:$16 sm:%s3280_s19]   ;;  %s3500_s19 = smov 192 }
 0x19c   :  { %v9337_v20 = vld [vmem:[%s16975_s0 + $0x78b] ss:$16 sm:%s3189_s26]   ;;  %v3136_v23 = vsel %vm15_vm2, %v9328_v18, %v3131_v19  ;;  %v9370_v17 = vld [vmem:[%s16975_s0 + $0xa0a] ss:$16 sm:%s3375_s9]   ;;  %s3357_s26 = smov 48  ;;  %v2334_v18 = vpop.permute.xlu1 %2333   ;;  %s3592_s9 = smov 192 }
 0x19d   :  { %v9338_v21 = vld [vmem:[%s16975_s0 + $0x78b] ss:$16 sm:%s3192_s28]   ;;  %3137 = vrot.lane.b32.xlu0 %v3136_v23, %s10353_s13  ;;  %2337 = vst.msk [vmem:[#allocation0 + $0x28] sm:$0xff] %vm2175_vm7, %v2334_v18   ;;  %s3408_s28 = smov 192 }
 0x19e   :  { %v3195_v26 = vsel %vm7_vm0, %v9338_v21, %v9337_v20  ;;  %v9339_v27 = vld [vmem:[%s16975_s0 + $0x78b] ss:$16 sm:%s3197_s27]   ;;  %s3212_s27 = smov 3  ;;  %v9372_v23 = vld [vmem:[%s16975_s0 + $0xa0a] ss:$16 sm:%s3385_s16]   ;;  %s3444_s16 = smov 12 }
 0x19f   :  { %v9340_v49 = vld [vmem:[%s16975_s0 + $0x78b] ss:$16 sm:%s3202_s3]   ;;  %v3200_v24 = vsel %vm11_vm1, %v9339_v27, %v3195_v26  ;;  %s3261_s3 = smov 12  ;;  %v9367_v30 = vld [vmem:[%s16975_s0 + $0x80a] ss:$16 sm:%s3357_s26]   ;;  %s3510_s26 = smov 3 }
 0x1a0   :  { %v9333_v29 = vld [vmem:[%s16975_s0 + $0x58b] ss:$16 sm:%s3166_s7]   ;;  %v3205_v32 = vsel %vm15_vm2, %v9340_v49, %v3200_v24  ;;  %v9350_v5 = vld [vmem:[%s16975_s0 + $0xa] ss:$16 sm:%s3261_s3]   ;;  %v2311_v49 = vpop.permute.xlu0 %2310   ;;  %s3472_s7 = smov 48  ;;  %s3523_s3 = smov 192 }
 0x1a1   :  { %v9334_v33 = vld [vmem:[%s16975_s0 + $0x58b] ss:$16 sm:%s3169_s12]   ;;  %3206 = vrot.lane.b32.xlu1 %v3205_v32, %s10353_s13  ;;  %s3326_s12 = smov 3  ;;  %2314 = vst.msk [vmem:[#allocation0 + $0x8] sm:$0xff] %vm2175_vm7, %v2311_v49  }
 0x1a2   :  { %v9335_v34 = vld [vmem:[%s16975_s0 + $0x58b] ss:$16 sm:%s3174_s14]   ;;  %v3172_v25 = vsel %vm7_vm0, %v9334_v33, %v9333_v29  ;;  %s3329_s14 = smov 12  ;;  %v9361_v3 = vld [vmem:[%s16975_s0 + $0x60a] ss:$16 sm:%s3326_s12]   ;;  %s3495_s12 = smov 48 }
 0x1a3   :  { %v9336_v35 = vld [vmem:[%s16975_s0 + $0x58b] ss:$16 sm:%s3179_s18]   ;;  %v3177_v1 = vsel %vm11_vm1, %v9335_v34, %v3172_v25  ;;  %s3283_s18 = smov 12  ;;  %v9362_v28 = vld [vmem:[%s16975_s0 + $0x60a] ss:$16 sm:%s3329_s14]   ;;  %s3546_s14 = smov 192 }
 0x1a4   :  { %v9345_v38 = vld [vmem:[%s16975_s0 + $0xb8b] ss:$16 sm:%s3235_s22]   ;;  %v3182_v59 = vsel %vm15_vm2, %v9336_v35, %v3177_v1  ;;  %v9354_v31 = vld [vmem:[%s16975_s0 + $0x20a] ss:$16 sm:%s3283_s18]   ;;  %s3334_s18 = smov 48  ;;  %v3332_v22 = vsel %vm7_vm0, %v9362_v28, %v9361_v3  ;;  %s3403_s22 = smov 48 }
 0x1a5   :  { %v9346_v39 = vld [vmem:[%s16975_s0 + $0xb8b] ss:$16 sm:%s3238_s23]   ;;  %3183 = vrot.lane.b32.xlu0 %v3182_v59, %s10353_s13  ;;  %v3286_v53 = vsel %vm7_vm0, %v9354_v31, %v9353_v14  ;;  %s3454_s23 = smov 192 }
 0x1a6   :  { %v3241_v40 = vsel %vm7_vm0, %v9346_v39, %v9345_v38  ;;  %v9347_v41 = vld [vmem:[%s16975_s0 + $0xb8b] ss:$16 sm:%s3243_s29]   ;;  %s3258_s29 = smov 3  ;;  %v3291_v61 = vsel %vm11_vm1, %v9355_v55, %v3286_v53  ;;  %v9363_v7 = vld [vmem:[%s16975_s0 + $0x60a] ss:$16 sm:%s3334_s18]   ;;  %s3349_s18 = smov 3  ;;  %v2357_v53 = vpop.permute.xlu0 %2356  }
 0x1a7   :  { %v9348_v43 = vld [vmem:[%s16975_s0 + $0xb8b] ss:$16 sm:%s3248_s6]   ;;  %v3246_v45 = vsel %vm11_vm1, %v9347_v41, %v3241_v40  ;;  %v9349_v62 = vld [vmem:[%s16975_s0 + $0xa] ss:$16 sm:%s3258_s29]   ;;  %v3296_v44 = vsel %vm15_vm2, %v9356_v56, %v3291_v61  ;;  %s3306_s6 = smov 12  ;;  %v3337_v9 = vsel %vm11_vm1, %v9363_v7, %v3332_v22  ;;  %2360 = vst.msk [vmem:[#allocation0 + $0x48] sm:$0xff] %vm2175_vm7, %v2357_v53  }
 0x1a8   :  { %v9341_v47 = vld [vmem:[%s16975_s0 + $0x98b] ss:$16 sm:%s3212_s27]   ;;  %v3251_v37 = vsel %vm15_vm2, %v9348_v43, %v3246_v45  ;;  %v3264_v42 = vsel %vm7_vm0, %v9350_v5, %v9349_v62  ;;  %v3342_v54 = vsel %vm15_vm2, %v9364_v8, %v3337_v9  ;;  %v9358_v12 = vld [vmem:[%s16975_s0 + $0x40a] ss:$16 sm:%s3306_s6]   ;;  %s3518_s27 = smov 48  ;;  %s3564_s29 = smov 48 }
 0x1a9   :  { %v9342_v48 = vld [vmem:[%s16975_s0 + $0x98b] ss:$16 sm:%s3215_s8]   ;;  %3252 = vrot.lane.b32.xlu1 %v3251_v37, %s10353_s13  ;;  %v3269_v46 = vsel %vm11_vm1, %v9351_v63, %v3264_v42  ;;  %v3309_v11 = vsel %vm7_vm0, %v9358_v12, %v9357_v16  ;;  %s3477_s8 = smov 192  ;;  %s3569_s6 = smov 192 }
 0x1aa   :  { %v9343_v15 = vld [vmem:[%s16975_s0 + $0x98b] ss:$16 sm:%s3220_s11]   ;;  %v3218_v50 = vsel %vm7_vm0, %v9342_v48, %v9341_v47  ;;  %v3274_v4 = vsel %vm15_vm2, %v9352_v2, %v3269_v46  ;;  %s3372_s11 = smov 3  ;;  %v3314_v57 = vsel %vm11_vm1, %v9359_v10, %v3309_v11  ;;  %v9365_v27 = vld [vmem:[%s16975_s0 + $0x80a] ss:$16 sm:%s3349_s18]   ;;  %v2380_v48 = vpop.permute.xlu1 %2379   ;;  %v2403_v22 = vpop.permute.xlu0 %2402   ;;  %s3656_s18 = smov 48 }
 0x1ab   :  { %v9344_v51 = vld [vmem:[%s16975_s0 + $0x98b] ss:$16 sm:%s3225_s15]   ;;  %v3223_v6 = vsel %vm11_vm1, %v9343_v15, %v3218_v50  ;;  %s3380_s15 = smov 48  ;;  %v9369_v13 = vld [vmem:[%s16975_s0 + $0xa0a] ss:$16 sm:%s3372_s11]   ;;  %v3319_v19 = vsel %vm15_vm2, %v9360_v36, %v3314_v57  ;;  %2383 = vst.msk [vmem:[#allocation0 + $0x68] sm:$0xff] %vm2175_vm7, %v2380_v48  }
 0x1ac   :  { %v3228_v52 = vsel %vm15_vm2, %v9344_v51, %v3223_v6  ;;  %v3378_v20 = vsel %vm7_vm0, %v9370_v17, %v9369_v13  ;;  %v9371_v21 = vld [vmem:[%s16975_s0 + $0xa0a] ss:$16 sm:%s3380_s15]   ;;  %s3395_s15 = smov 3  ;;  %2406 = vst.msk [vmem:[#allocation0 + $0x88] sm:$0xff] %vm2175_vm7, %v2403_v22   ;;  %s3541_s11 = smov 48 }
 0x1ad   :  { %3229 = vrot.lane.b32.xlu0 %v3228_v52, %s10353_s13  ;;  %3297 = vrot.lane.b32.xlu1 %v3296_v44, %s10354_s21  ;;  %v3383_v26 = vsel %vm11_vm1, %v9371_v21, %v3378_v20  ;;  %v9366_v29 = vld [vmem:[%s16975_s0 + $0x80a] ss:$16 sm:%s3352_s25]   ;;  %s3426_s13 = smov 48  ;;  %s3615_s25 = smov 192 }
 0x1ae   :  { %v3388_v24 = vsel %vm15_vm2, %v9372_v23, %v3383_v26  ;;  %v3355_v32 = vsel %vm7_vm0, %v9366_v29, %v9365_v27  ;;  %v9368_v33 = vld [vmem:[%s16975_s0 + $0x80a] ss:$16 sm:%s3362_s2]   ;;  %s3467_s2 = smov 12  ;;  %v2426_v44 = vpop.permute.xlu1 %2425   ;;  %v2449_v21 = vpop.permute.xlu0 %2448  }
 0x1af   :  { %v3360_v34 = vsel %vm11_vm1, %v9367_v30, %v3355_v32  ;;  %v9377_v25 = vld [vmem:[%s16975_s0 + $0x28a] ss:$16 sm:%s3418_s4]   ;;  %2429 = vst.msk [vmem:[#allocation0 + $0xa8] sm:$0xff] %vm2175_vm7, %v2426_v44   ;;  %2452 = vst.msk [vmem:[#allocation0 + $0x10] sm:$0xff] %vm2175_vm7, %v2449_v21   ;;  %s3587_s4 = smov 48 }
 0x1b0   :  { %v9378_v35 = vld [vmem:[%s16975_s0 + $0x28a] ss:$16 sm:%s3421_s5]   ;;  %v3365_v60 = vsel %vm15_vm2, %v9368_v33, %v3360_v34  ;;  %s3638_s5 = smov 192 }
 0x1b1   :  { %3275 = vrot.lane.b32.xlu0 %v3274_v4, %s10354_s21  ;;  %3343 = vrot.lane.b32.xlu1 %v3342_v54, %s10354_s21  ;;  %v3424_v1 = vsel %vm7_vm0, %v9378_v35, %v9377_v25  ;;  %v9379_v38 = vld [vmem:[%s16975_s0 + $0x28a] ss:$16 sm:%s3426_s13]   ;;  %s3441_s13 = smov 3 }
 0x1b2   :  { %v9380_v39 = vld [vmem:[%s16975_s0 + $0x28a] ss:$16 sm:%s3431_s10]   ;;  %v3429_v59 = vsel %vm11_vm1, %v9379_v38, %v3424_v1  ;;  %s3490_s10 = smov 12  ;;  %v2472_v12 = vpop.permute.xlu1 %2471  }
 0x1b3   :  { %v9373_v40 = vld [vmem:[%s16975_s0 + $0x8a] ss:$16 sm:%s3395_s15]   ;;  %v3434_v41 = vsel %vm15_vm2, %v9380_v39, %v3429_v59  ;;  %2475 = vst.msk [vmem:[#allocation0 + $0x30] sm:$0xff] %vm2175_vm7, %v2472_v12   ;;  %s3702_s15 = smov 48 }
 0x1b4   :  { %v9374_v43 = vld [vmem:[%s16975_s0 + $0x8a] ss:$16 sm:%s3398_s20]   ;;  %v2495_v39 = vpop.permute.xlu0 %2494   ;;  %s3661_s20 = smov 192 }
 0x1b5   :  { %3320 = vrot.lane.b32.xlu0 %v3319_v19, %s10354_s21  ;;  %3389 = vrot.lane.b32.xlu1 %v3388_v24, %s10354_s21  ;;  %v9375_v45 = vld [vmem:[%s16975_s0 + $0x8a] ss:$16 sm:%s3403_s22]   ;;  %v3401_v47 = vsel %vm7_vm0, %v9374_v43, %v9373_v40  ;;  %s3556_s22 = smov 3  ;;  %2498 = vst.msk [vmem:[#allocation0 + $0x50] sm:$0xff] %vm2175_vm7, %v2495_v39  }
 0x1b6   :  { %v9376_v37 = vld [vmem:[%s16975_s0 + $0x8a] ss:$16 sm:%s3408_s28]   ;;  %v3406_v15 = vsel %vm11_vm1, %v9375_v45, %v3401_v47  ;;  %s3513_s28 = smov 12  ;;  %v2518_v29 = vpop.permute.xlu1 %2517  }
 0x1b7   :  { %v9385_v50 = vld [vmem:[%s16975_s0 + $0x68a] ss:$16 sm:%s3464_s30]   ;;  %v3411_v6 = vsel %vm15_vm2, %v9376_v37, %v3406_v15  ;;  %2521 = vst.msk [vmem:[#allocation0 + $0x70] sm:$0xff] %vm2175_vm7, %v2518_v29   ;;  %s3633_s30 = smov 48 }
 0x1b8   :  { %v9386_v51 = vld [vmem:[%s16975_s0 + $0x68a] ss:$16 sm:%s3467_s2]   ;;  %s3684_s2 = smov 192 }
 0x1b9   :  { %3366 = vrot.lane.b32.xlu0 %v3365_v60, %s10354_s21  ;;  %3435 = vrot.lane.b32.xlu1 %v3434_v41, %s10354_s21  ;;  %v3470_v14 = vsel %vm7_vm0, %v9386_v51, %v9385_v50  ;;  %v9387_v31 = vld [vmem:[%s16975_s0 + $0x68a] ss:$16 sm:%s3472_s7]   ;;  %s3487_s7 = smov 3 }
 0x1ba   :  { %v9388_v52 = vld [vmem:[%s16975_s0 + $0x68a] ss:$16 sm:%s3477_s8]   ;;  %v3475_v55 = vsel %vm11_vm1, %v9387_v31, %v3470_v14  ;;  %s3536_s8 = smov 12  ;;  %v2564_v47 = vpop.permute.xlu1 %2563  }
 0x1bb   :  { %v9381_v56 = vld [vmem:[%s16975_s0 + $0x48a] ss:$16 sm:%s3441_s13]   ;;  %v3480_v58 = vsel %vm15_vm2, %v9388_v52, %v3475_v55  ;;  %2567 = vst.msk [vmem:[#allocation0 + $0xb0] sm:$0xff] %vm2175_vm7, %v2564_v47   ;;  %s3748_s13 = smov 48 }
 0x1bc   :  { %v9382_v61 = vld [vmem:[%s16975_s0 + $0x48a] ss:$16 sm:%s3444_s16]   ;;  %v2541_v53 = vpop.permute.xlu0 %2540   ;;  %s3707_s16 = smov 192 }
 0x1bd   :  { %3412 = vrot.lane.b32.xlu0 %v3411_v6, %s10354_s21  ;;  %v9383_v62 = vld [vmem:[%s16975_s0 + $0x48a] ss:$16 sm:%s3449_s17]   ;;  %3481 = vrot.lane.b32.xlu1 %v3480_v58, %s10354_s21  ;;  %v3447_v5 = vsel %vm7_vm0, %v9382_v61, %v9381_v56  ;;  %s3602_s17 = smov 3  ;;  %2544 = vst.msk [vmem:[#allocation0 + $0x90] sm:$0xff] %vm2175_vm7, %v2541_v53  }
 0x1be   :  { %v9384_v63 = vld [vmem:[%s16975_s0 + $0x48a] ss:$16 sm:%s3454_s23]   ;;  %v3452_v0 = vsel %vm11_vm1, %v9383_v62, %v3447_v5  ;;  %s3559_s23 = smov 12 }
 0x1bf   :  { %v9393_v42 = vld [vmem:[%s16975_s0 + $0xa8a] ss:$16 sm:%s3510_s26]   ;;  %v3457_v46 = vsel %vm15_vm2, %v9384_v63, %v3452_v0  ;;  %s3679_s26 = smov 48 }
 0x1c0   :  { %v9394_v2 = vld [vmem:[%s16975_s0 + $0xa8a] ss:$16 sm:%s3513_s28]   ;;  %v2610_v44 = vpop.permute.xlu1 %2609   ;;  %s3730_s28 = smov 192 }
 0x1c1   :  { %v3516_v3 = vsel %vm7_vm0, %v9394_v2, %v9393_v42  ;;  %v9395_v28 = vld [vmem:[%s16975_s0 + $0xa8a] ss:$16 sm:%s3518_s27]   ;;  %3458 = vrot.lane.b32.xlu0 %v3457_v46, %s10354_s21  ;;  %s3533_s27 = smov 3  ;;  %2613 = vst.msk [vmem:[#allocation0 + $0x38] sm:$0xff] %vm2175_vm7, %v2610_v44  }
 0x1c2   :  { %v9396_v4 = vld [vmem:[%s16975_s0 + $0xa8a] ss:$16 sm:%s3523_s3]   ;;  %v3521_v7 = vsel %vm11_vm1, %v9395_v28, %v3516_v3  ;;  %s3582_s3 = smov 12 }
 0x1c3   :  { %v9389_v8 = vld [vmem:[%s16975_s0 + $0x88a] ss:$16 sm:%s3487_s7]   ;;  %v3526_v9 = vsel %vm15_vm2, %v9396_v4, %v3521_v7  ;;  %s3794_s7 = smov 48 }
 0x1c4   :  { %v9390_v16 = vld [vmem:[%s16975_s0 + $0x88a] ss:$16 sm:%s3490_s10]   ;;  %3527 = vrot.lane.b32.xlu1 %v3526_v9, %s10354_s21  ;;  %v2587_v22 = vpop.permute.xlu0 %2586   ;;  %s3753_s10 = smov 192 }
 0x1c5   :  { %v9391_v54 = vld [vmem:[%s16975_s0 + $0x88a] ss:$16 sm:%s3495_s12]   ;;  %v3493_v10 = vsel %vm7_vm0, %v9390_v16, %v9389_v8  ;;  %s3648_s12 = smov 3  ;;  %2590 = vst.msk [vmem:[#allocation0 + $0x18] sm:$0xff] %vm2175_vm7, %v2587_v22  }
 0x1c6   :  { %v9392_v11 = vld [vmem:[%s16975_s0 + $0x88a] ss:$16 sm:%s3500_s19]   ;;  %v3498_v36 = vsel %vm11_vm1, %v9391_v54, %v3493_v10  ;;  %s3605_s19 = smov 12 }
 0x1c7   :  { %v9401_v57 = vld [vmem:[%s16975_s0 + $0x30a] ss:$16 sm:%s3556_s22]   ;;  %v3503_v17 = vsel %vm15_vm2, %v9392_v11, %v3498_v36  ;;  %s3725_s22 = smov 48 }
 0x1c8   :  { %v9402_v13 = vld [vmem:[%s16975_s0 + $0x30a] ss:$16 sm:%s3559_s23]   ;;  %3504 = vrot.lane.b32.xlu0 %v3503_v17, %s10354_s21  ;;  %v2656_v12 = vpop.permute.xlu1 %2655   ;;  %s3776_s23 = smov 192 }
 0x1c9   :  { %v3562_v18 = vsel %vm7_vm0, %v9402_v13, %v9401_v57  ;;  %v9403_v19 = vld [vmem:[%s16975_s0 + $0x30a] ss:$16 sm:%s3564_s29]   ;;  %s3579_s29 = smov 3  ;;  %2659 = vst.msk [vmem:[#allocation0 + $0x78] sm:$0xff] %vm2175_vm7, %v2656_v12  }
 0x1ca   :  { %v9404_v20 = vld [vmem:[%s16975_s0 + $0x30a] ss:$16 sm:%s3569_s6]   ;;  %v3567_v23 = vsel %vm11_vm1, %v9403_v19, %v3562_v18  ;;  %s3628_s6 = smov 12 }
 0x1cb   :  { %v9397_v26 = vld [vmem:[%s16975_s0 + $0x10a] ss:$16 sm:%s3533_s27]   ;;  %v3572_v27 = vsel %vm15_vm2, %v9404_v20, %v3567_v23  ;;  %s3839_s27 = smov 48 }
 0x1cc   :  { %v9398_v49 = vld [vmem:[%s16975_s0 + $0x10a] ss:$16 sm:%s3536_s8]   ;;  %3573 = vrot.lane.b32.xlu1 %v3572_v27, %s10354_s21  ;;  %v2633_v21 = vpop.permute.xlu0 %2632   ;;  %s3799_s8 = smov 192 }
 0x1cd   :  { %v9399_v24 = vld [vmem:[%s16975_s0 + $0x10a] ss:$16 sm:%s3541_s11]   ;;  %v3539_v30 = vsel %vm7_vm0, %v9398_v49, %v9397_v26  ;;  %s3694_s11 = smov 3  ;;  %2636 = vst.msk [vmem:[#allocation0 + $0x58] sm:$0xff] %vm2175_vm7, %v2633_v21  }
 0x1ce   :  { %v9400_v32 = vld [vmem:[%s16975_s0 + $0x10a] ss:$16 sm:%s3546_s14]   ;;  %v3544_v33 = vsel %vm11_vm1, %v9399_v24, %v3539_v30  ;;  %s3651_s14 = smov 12 }
 0x1cf   :  { %v9409_v34 = vld [vmem:[%s16975_s0 + $0x70a] ss:$16 sm:%s3602_s17]   ;;  %v3549_v35 = vsel %vm15_vm2, %v9400_v32, %v3544_v33  ;;  %s3771_s17 = smov 48 }
 0x1d0   :  { %v9410_v25 = vld [vmem:[%s16975_s0 + $0x70a] ss:$16 sm:%s3605_s19]   ;;  %3550 = vrot.lane.b32.xlu0 %v3549_v35, %s10354_s21  ;;  %v2702_v29 = vpop.permute.xlu1 %2701   ;;  %s3822_s19 = smov 192 }
 0x1d1   :  { %v3608_v60 = vsel %vm7_vm0, %v9410_v25, %v9409_v34  ;;  %v9411_v1 = vld [vmem:[%s16975_s0 + $0x70a] ss:$16 sm:%s3610_s24]   ;;  %s3625_s24 = smov 3  ;;  %2705 = vst.msk [vmem:[#allocation0 + $0xb8] sm:$0xff] %vm2175_vm7, %v2702_v29  }
 0x1d2   :  { %v9412_v38 = vld [vmem:[%s16975_s0 + $0x70a] ss:$16 sm:%s3615_s25]   ;;  %v3613_v59 = vsel %vm11_vm1, %v9411_v1, %v3608_v60  ;;  %s3674_s25 = smov 12 }
 0x1d3   :  { %v9405_v40 = vld [vmem:[%s16975_s0 + $0x50a] ss:$16 sm:%s3579_s29]   ;;  %v3618_v41 = vsel %vm15_vm2, %v9412_v38, %v3613_v59  ;;  %s3890_s29 = smov 192 }
 0x1d4   :  { %v9406_v43 = vld [vmem:[%s16975_s0 + $0x50a] ss:$16 sm:%s3582_s3]   ;;  %3619 = vrot.lane.b32.xlu1 %v3618_v41, %s10354_s21  ;;  %v2679_v39 = vpop.permute.xlu0 %2678   ;;  %s3844_s3 = smov 192  ;;  %v2747_v47 = vpop.permute.xlu1 %2746  }
 0x1d5   :  { %v9407_v45 = vld [vmem:[%s16975_s0 + $0x50a] ss:$16 sm:%s3587_s4]   ;;  %v3585_v37 = vsel %vm7_vm0, %v9406_v43, %v9405_v40  ;;  %s3740_s4 = smov 3  ;;  %2682 = vst.msk [vmem:[#allocation0 + $0x98] sm:$0xff] %vm2175_vm7, %v2679_v39  }
 0x1d6   :  { %v9408_v48 = vld [vmem:[%s16975_s0 + $0x50a] ss:$16 sm:%s3592_s9]   ;;  %v3590_v15 = vsel %vm11_vm1, %v9407_v45, %v3585_v37  ;;  %s3697_s9 = smov 12  ;;  %2750 = vst.msk [vmem:[#allocation0 + $0x20] sm:$0xff] %vm2726_vm8, %v2747_v47  }
 0x1d7   :  { %v9417_v50 = vld [vmem:[%s16975_s0 + $0xb0a] ss:$16 sm:%s3648_s12]   ;;  %v3595_v6 = vsel %vm15_vm2, %v9408_v48, %v3590_v15  ;;  %s3817_s12 = smov 48 }
 0x1d8   :  { %v9418_v51 = vld [vmem:[%s16975_s0 + $0xb0a] ss:$16 sm:%s3651_s14]   ;;  %3596 = vrot.lane.b32.xlu0 %v3595_v6, %s10354_s21  ;;  %v2725_v53 = vpop.permute.xlu0 %2724   ;;  %v2793_v44 = vpop.permute.xlu1 %2792   ;;  %s3867_s14 = smov 192 }
 0x1d9   :  { %v3654_v14 = vsel %vm7_vm0, %v9418_v51, %v9417_v50  ;;  %v9419_v31 = vld [vmem:[%s16975_s0 + $0xb0a] ss:$16 sm:%s3656_s18]   ;;  %s3671_s18 = smov 3  ;;  %2727 = vst.msk [vmem:[#allocation0] sm:$0xff] %vm2726_vm8, %v2725_v53   ;;  %2796 = vst.msk [vmem:[#allocation0 + $0x60] sm:$0xff] %vm2726_vm8, %v2793_v44  }
 0x1da   :  { %v9420_v52 = vld [vmem:[%s16975_s0 + $0xb0a] ss:$16 sm:%s3661_s20]   ;;  %v3659_v55 = vsel %vm11_vm1, %v9419_v31, %v3654_v14  ;;  %s3720_s20 = smov 12  ;;  %v9451_v31 = vld [vmem:[%s16975_s0 + $0x209] ss:$16 sm:%s3839_s27]   ;;  %s3854_s27 = smov 3 }
 0x1db   :  { %v9413_v56 = vld [vmem:[%s16975_s0 + $0x90a] ss:$16 sm:%s3625_s24]   ;;  %v3664_v58 = vsel %vm15_vm2, %v9420_v52, %v3659_v55  ;;  %v9452_v52 = vld [vmem:[%s16975_s0 + $0x209] ss:$16 sm:%s3844_s3]   ;;  %s3936_s24 = smov 192  ;;  %s3903_s3 = smov 12 }
 0x1dc   :  { %v9414_v61 = vld [vmem:[%s16975_s0 + $0x90a] ss:$16 sm:%s3628_s6]   ;;  %3665 = vrot.lane.b32.xlu1 %v3664_v58, %s10354_s21  ;;  %s10355_s6 = smov 18   ;;  %v2770_v22 = vpop.permute.xlu0 %2769   ;;  %v2839_v12 = vpop.permute.xlu1 %2838  }
 0x1dd   :  { %v9415_v62 = vld [vmem:[%s16975_s0 + $0x90a] ss:$16 sm:%s3633_s30]   ;;  %v3631_v5 = vsel %vm7_vm0, %v9414_v61, %v9413_v56  ;;  %s3786_s30 = smov 3  ;;  %2773 = vst.msk [vmem:[#allocation0 + $0x40] sm:$0xff] %vm2726_vm8, %v2770_v22   ;;  %2842 = vst.msk [vmem:[#allocation0 + $0xa0] sm:$0xff] %vm2726_vm8, %v2839_v12  }
 0x1de   :  { %v9416_v63 = vld [vmem:[%s16975_s0 + $0x90a] ss:$16 sm:%s3638_s5]   ;;  %v3636_v0 = vsel %vm11_vm1, %v9415_v62, %v3631_v5  ;;  %s3743_s5 = smov 12  ;;  %v9447_v62 = vld [vmem:[%s16975_s0 + $0x9] ss:$16 sm:%s3817_s12]   ;;  %s3969_s12 = smov 3 }
 0x1df   :  { %v9425_v42 = vld [vmem:[%s16975_s0 + $0x38a] ss:$16 sm:%s3694_s11]   ;;  %v3641_v46 = vsel %vm15_vm2, %v9416_v63, %v3636_v0  ;;  %v9448_v63 = vld [vmem:[%s16975_s0 + $0x9] ss:$16 sm:%s3822_s19]   ;;  %s3862_s11 = smov 48  ;;  %s3926_s19 = smov 12 }
 0x1e0   :  { %v9426_v2 = vld [vmem:[%s16975_s0 + $0x38a] ss:$16 sm:%s3697_s9]   ;;  %3642 = vrot.lane.b32.xlu0 %v3641_v46, %s10354_s21  ;;  %s3913_s9 = smov 192  ;;  %v2816_v21 = vpop.permute.xlu0 %2815   ;;  %v2885_v29 = vpop.permute.xlu1 %2884  }
 0x1e1   :  { %v3700_v3 = vsel %vm7_vm0, %v9426_v2, %v9425_v42  ;;  %v9427_v28 = vld [vmem:[%s16975_s0 + $0x38a] ss:$16 sm:%s3702_s15]   ;;  %s3717_s15 = smov 3  ;;  %2819 = vst.msk [vmem:[#allocation0 + $0x80] sm:$0xff] %vm2726_vm8, %v2816_v21   ;;  %2888 = vst.msk [vmem:[#allocation0 + $0x28] sm:$0xff] %vm2726_vm8, %v2885_v29  }
 0x1e2   :  { %v9428_v4 = vld [vmem:[%s16975_s0 + $0x38a] ss:$16 sm:%s3707_s16]   ;;  %v3705_v7 = vsel %vm11_vm1, %v9427_v28, %v3700_v3  ;;  %s3766_s16 = smov 12 }
 0x1e3   :  { %v9421_v8 = vld [vmem:[%s16975_s0 + $0x18a] ss:$16 sm:%s3671_s18]   ;;  %v3710_v9 = vsel %vm15_vm2, %v9428_v4, %v3705_v7  ;;  %v9460_v4 = vld [vmem:[%s16975_s0 + $0x609] ss:$16 sm:%s3890_s29]   ;;  %s3982_s18 = smov 192  ;;  %s3949_s29 = smov 12 }
 0x1e4   :  { %v9422_v16 = vld [vmem:[%s16975_s0 + $0x18a] ss:$16 sm:%s3674_s25]   ;;  %3711 = vrot.lane.b32.xlu1 %v3710_v9, %s10354_s21  ;;  %v2862_v39 = vpop.permute.xlu0 %2861   ;;  %v2931_v47 = vpop.permute.xlu1 %2930   ;;  %s4000_s25 = smov 48 }
 0x1e5   :  { %v9423_v54 = vld [vmem:[%s16975_s0 + $0x18a] ss:$16 sm:%s3679_s26]   ;;  %v3677_v10 = vsel %vm7_vm0, %v9422_v16, %v9421_v8  ;;  %s3831_s26 = smov 3  ;;  %v9453_v8 = vld [vmem:[%s16975_s0 + $0x409] ss:$16 sm:%s3854_s27]   ;;  %2865 = vst.msk [vmem:[#allocation0 + $0x8] sm:$0xff] %vm2726_vm8, %v2862_v39  }
 0x1e6   :  { %v9424_v11 = vld [vmem:[%s16975_s0 + $0x18a] ss:$16 sm:%s3684_s2]   ;;  %v3682_v36 = vsel %vm11_vm1, %v9423_v54, %v3677_v10  ;;  %s3789_s2 = smov 12  ;;  %v9449_v50 = vld [vmem:[%s16975_s0 + $0x209] ss:$16 sm:%s3831_s26]   ;;  %2934 = vst.msk [vmem:[#allocation0 + $0x68] sm:$0xff] %vm2726_vm8, %v2931_v47  }
 0x1e7   :  { %v9433_v57 = vld [vmem:[%s16975_s0 + $0x78a] ss:$16 sm:%s3740_s4]   ;;  %v3687_v17 = vsel %vm15_vm2, %v9424_v11, %v3682_v36  ;;  %v9455_v54 = vld [vmem:[%s16975_s0 + $0x409] ss:$16 sm:%s3862_s11]   ;;  %s3908_s4 = smov 48  ;;  %s4015_s11 = smov 3 }
 0x1e8   :  { %v9434_v13 = vld [vmem:[%s16975_s0 + $0x78a] ss:$16 sm:%s3743_s5]   ;;  %3688 = vrot.lane.b32.xlu0 %v3687_v17, %s10354_s21  ;;  %s3959_s5 = smov 192  ;;  %v2908_v53 = vpop.permute.xlu0 %2907   ;;  %s4051_s26 = smov 192 }
 0x1e9   :  { %v3746_v18 = vsel %vm7_vm0, %v9434_v13, %v9433_v57  ;;  %v9435_v19 = vld [vmem:[%s16975_s0 + $0x78a] ss:$16 sm:%s3748_s13]   ;;  %s3763_s13 = smov 3  ;;  %v9456_v11 = vld [vmem:[%s16975_s0 + $0x409] ss:$16 sm:%s3867_s14]   ;;  %s3972_s14 = smov 12 }
 0x1ea   :  { %v9436_v20 = vld [vmem:[%s16975_s0 + $0x78a] ss:$16 sm:%s3753_s10]   ;;  %v3751_v23 = vsel %vm11_vm1, %v9435_v19, %v3746_v18  ;;  %s3812_s10 = smov 12  ;;  %v9466_v13 = vld [vmem:[%s16975_s0 + $0xa09] ss:$16 sm:%s3926_s19]   ;;  %2911 = vst.msk [vmem:[#allocation0 + $0x48] sm:$0xff] %vm2726_vm8, %v2908_v53  }
 0x1eb   :  { %v9429_v26 = vld [vmem:[%s16975_s0 + $0x58a] ss:$16 sm:%s3717_s15]   ;;  %v3756_v27 = vsel %vm15_vm2, %v9436_v20, %v3751_v23  ;;  %v9446_v61 = vld [vmem:[%s16975_s0 + $0x9] ss:$16 sm:%s3812_s10]   ;;  %s4023_s15 = smov 48  ;;  %s4074_s10 = smov 192  ;;  %v2977_v44 = vpop.permute.xlu1 %2976  }
 0x1ec   :  { %v9430_v49 = vld [vmem:[%s16975_s0 + $0x58a] ss:$16 sm:%s3720_s20]   ;;  %3757 = vrot.lane.b32.xlu1 %v3756_v27, %s10354_s21  ;;  %s3877_s20 = smov 3  ;;  %2980 = vst.msk [vmem:[#allocation0 + $0xa8] sm:$0xff] %vm2726_vm8, %v2977_v44   ;;  %s4161_s27 = smov 48 }
 0x1ed   :  { %v9431_v24 = vld [vmem:[%s16975_s0 + $0x58a] ss:$16 sm:%s3725_s22]   ;;  %v3723_v30 = vsel %vm7_vm0, %v9430_v49, %v9429_v26  ;;  %s3880_s22 = smov 12  ;;  %v9457_v42 = vld [vmem:[%s16975_s0 + $0x609] ss:$16 sm:%s3877_s20]   ;;  %s4046_s20 = smov 48 }
 0x1ee   :  { %v9432_v32 = vld [vmem:[%s16975_s0 + $0x58a] ss:$16 sm:%s3730_s28]   ;;  %v3728_v33 = vsel %vm11_vm1, %v9431_v24, %v3723_v30  ;;  %s3834_s28 = smov 12  ;;  %v9458_v2 = vld [vmem:[%s16975_s0 + $0x609] ss:$16 sm:%s3880_s22]   ;;  %s4097_s22 = smov 192 }
 0x1ef   :  { %v9441_v34 = vld [vmem:[%s16975_s0 + $0xb8a] ss:$16 sm:%s3786_s30]   ;;  %v3733_v35 = vsel %vm15_vm2, %v9432_v32, %v3728_v33  ;;  %v9450_v51 = vld [vmem:[%s16975_s0 + $0x209] ss:$16 sm:%s3834_s28]   ;;  %s3885_s28 = smov 48  ;;  %v3883_v3 = vsel %vm7_vm0, %v9458_v2, %v9457_v42  ;;  %s3954_s30 = smov 48  ;;  %v2954_v22 = vpop.permute.xlu0 %2953  }
 0x1f0   :  { %v9442_v25 = vld [vmem:[%s16975_s0 + $0xb8a] ss:$16 sm:%s3789_s2]   ;;  %3734 = vrot.lane.b32.xlu0 %v3733_v35, %s10354_s21  ;;  %v3837_v14 = vsel %vm7_vm0, %v9450_v51, %v9449_v50  ;;  %s4005_s2 = smov 192  ;;  %2957 = vst.msk [vmem:[#allocation0 + $0x88] sm:$0xff] %vm2726_vm8, %v2954_v22   ;;  %s4143_s19 = smov 192 }
 0x1f1   :  { %v3792_v60 = vsel %vm7_vm0, %v9442_v25, %v9441_v34  ;;  %v9443_v1 = vld [vmem:[%s16975_s0 + $0xb8a] ss:$16 sm:%s3794_s7]   ;;  %s3809_s7 = smov 3  ;;  %v3842_v55 = vsel %vm11_vm1, %v9451_v31, %v3837_v14  ;;  %v9459_v28 = vld [vmem:[%s16975_s0 + $0x609] ss:$16 sm:%s3885_s28]   ;;  %s3900_s28 = smov 3 }
 0x1f2   :  { %v9444_v38 = vld [vmem:[%s16975_s0 + $0xb8a] ss:$16 sm:%s3799_s8]   ;;  %v3797_v59 = vsel %vm11_vm1, %v9443_v1, %v3792_v60  ;;  %v9445_v56 = vld [vmem:[%s16975_s0 + $0x9] ss:$16 sm:%s3809_s7]   ;;  %v3847_v58 = vsel %vm15_vm2, %v9452_v52, %v3842_v55  ;;  %s3857_s8 = smov 12  ;;  %v3888_v7 = vsel %vm11_vm1, %v9459_v28, %v3883_v3  ;;  %s4115_s7 = smov 48 }
 0x1f3   :  { %v9437_v40 = vld [vmem:[%s16975_s0 + $0x98a] ss:$16 sm:%s3763_s13]   ;;  %v3802_v41 = vsel %vm15_vm2, %v9444_v38, %v3797_v59  ;;  %v3815_v5 = vsel %vm7_vm0, %v9446_v61, %v9445_v56  ;;  %v3893_v9 = vsel %vm15_vm2, %v9460_v4, %v3888_v7  ;;  %v9454_v16 = vld [vmem:[%s16975_s0 + $0x409] ss:$16 sm:%s3857_s8]   ;;  %s4069_s13 = smov 48  ;;  %s4120_s8 = smov 192  ;;  %v3023_v12 = vpop.permute.xlu1 %3022  }
 0x1f4   :  { %v9438_v43 = vld [vmem:[%s16975_s0 + $0x98a] ss:$16 sm:%s3766_s16]   ;;  %3803 = vrot.lane.b32.xlu1 %v3802_v41, %s10354_s21  ;;  %v3820_v0 = vsel %vm11_vm1, %v9447_v62, %v3815_v5  ;;  %v3860_v10 = vsel %vm7_vm0, %v9454_v16, %v9453_v8  ;;  %s4028_s16 = smov 192  ;;  %3026 = vst.msk [vmem:[#allocation0 + $0x30] sm:$0xff] %vm2726_vm8, %v3023_v12  }
 0x1f5   :  { %v9439_v45 = vld [vmem:[%s16975_s0 + $0x98a] ss:$16 sm:%s3771_s17]   ;;  %v3769_v37 = vsel %vm7_vm0, %v9438_v43, %v9437_v40  ;;  %v3825_v46 = vsel %vm15_vm2, %v9448_v63, %v3820_v0  ;;  %s3923_s17 = smov 3  ;;  %v3865_v36 = vsel %vm11_vm1, %v9455_v54, %v3860_v10  ;;  %v9468_v20 = vld [vmem:[%s16975_s0 + $0xa09] ss:$16 sm:%s3936_s24]   ;;  %s3995_s24 = smov 12 }
 0x1f6   :  { %v9440_v48 = vld [vmem:[%s16975_s0 + $0x98a] ss:$16 sm:%s3776_s23]   ;;  %v3774_v15 = vsel %vm11_vm1, %v9439_v45, %v3769_v37  ;;  %s3931_s23 = smov 48  ;;  %v9465_v57 = vld [vmem:[%s16975_s0 + $0xa09] ss:$16 sm:%s3923_s17]   ;;  %v3870_v17 = vsel %vm15_vm2, %v9456_v11, %v3865_v36  ;;  %s4092_s17 = smov 48 }
 0x1f7   :  { %v3779_v6 = vsel %vm15_vm2, %v9440_v48, %v3774_v15  ;;  %v3929_v18 = vsel %vm7_vm0, %v9466_v13, %v9465_v57  ;;  %v9467_v19 = vld [vmem:[%s16975_s0 + $0xa09] ss:$16 sm:%s3931_s23]   ;;  %s3946_s23 = smov 3  ;;  %v3000_v21 = vpop.permute.xlu0 %2999  }
 0x1f8   :  { %3780 = vrot.lane.b32.xlu0 %v3779_v6, %s10354_s21  ;;  %3848 = vrot.lane.b32.xlu1 %v3847_v58, %s10355_s6  ;;  %v3934_v23 = vsel %vm11_vm1, %v9467_v19, %v3929_v18  ;;  %v9461_v26 = vld [vmem:[%s16975_s0 + $0x809] ss:$16 sm:%s3900_s28]   ;;  %s3977_s21 = smov 48  ;;  %3003 = vst.msk [vmem:[#allocation0 + $0x10] sm:$0xff] %vm2726_vm8, %v3000_v21   ;;  %s4207_s28 = smov 48 }
 0x1f9   :  { %v3939_v27 = vsel %vm15_vm2, %v9468_v20, %v3934_v23  ;;  %v9462_v49 = vld [vmem:[%s16975_s0 + $0x809] ss:$16 sm:%s3903_s3]   ;;  %s4166_s3 = smov 192 }
 0x1fa   :  { %v9463_v24 = vld [vmem:[%s16975_s0 + $0x809] ss:$16 sm:%s3908_s4]   ;;  %v3906_v30 = vsel %vm7_vm0, %v9462_v49, %v9461_v26  ;;  %s4061_s4 = smov 3 }
 0x1fb   :  { %v9464_v32 = vld [vmem:[%s16975_s0 + $0x809] ss:$16 sm:%s3913_s9]   ;;  %v3911_v33 = vsel %vm11_vm1, %v9463_v24, %v3906_v30  ;;  %s4018_s9 = smov 12  ;;  %v3069_v29 = vpop.permute.xlu1 %3068  }
 0x1fc   :  { %3826 = vrot.lane.b32.xlu0 %v3825_v46, %s10355_s6  ;;  %3894 = vrot.lane.b32.xlu1 %v3893_v9, %s10355_s6  ;;  %v9473_v34 = vld [vmem:[%s16975_s0 + $0x289] ss:$16 sm:%s3969_s12]   ;;  %v3916_v35 = vsel %vm15_vm2, %v9464_v32, %v3911_v33  ;;  %3072 = vst.msk [vmem:[#allocation0 + $0x70] sm:$0xff] %vm2726_vm8, %v3069_v29   ;;  %s4138_s12 = smov 48 }
 0x1fd   :  { %v9474_v25 = vld [vmem:[%s16975_s0 + $0x289] ss:$16 sm:%s3972_s14]   ;;  %s4189_s14 = smov 192 }
 0x1fe   :  { %v3975_v60 = vsel %vm7_vm0, %v9474_v25, %v9473_v34  ;;  %v9475_v1 = vld [vmem:[%s16975_s0 + $0x289] ss:$16 sm:%s3977_s21]   ;;  %s3992_s21 = smov 3 }
 0x1ff   :  { %v9476_v38 = vld [vmem:[%s16975_s0 + $0x289] ss:$16 sm:%s3982_s18]   ;;  %v3980_v59 = vsel %vm11_vm1, %v9475_v1, %v3975_v60  ;;  %s4041_s18 = smov 12  ;;  %v3046_v39 = vpop.permute.xlu0 %3045  }
 0x200   :  { %3871 = vrot.lane.b32.xlu0 %v3870_v17, %s10355_s6  ;;  %3940 = vrot.lane.b32.xlu1 %v3939_v27, %s10355_s6  ;;  %v9469_v40 = vld [vmem:[%s16975_s0 + $0x89] ss:$16 sm:%s3946_s23]   ;;  %v3985_v41 = vsel %vm15_vm2, %v9476_v38, %v3980_v59  ;;  %3049 = vst.msk [vmem:[#allocation0 + $0x50] sm:$0xff] %vm2726_vm8, %v3046_v39   ;;  %s4253_s23 = smov 48 }
 0x201   :  { %v9470_v43 = vld [vmem:[%s16975_s0 + $0x89] ss:$16 sm:%s3949_s29]   ;;  %s4212_s29 = smov 192 }
 0x202   :  { %v9471_v45 = vld [vmem:[%s16975_s0 + $0x89] ss:$16 sm:%s3954_s30]   ;;  %v3952_v37 = vsel %vm7_vm0, %v9470_v43, %v9469_v40  ;;  %s4107_s30 = smov 3 }
 0x203   :  { %v9472_v48 = vld [vmem:[%s16975_s0 + $0x89] ss:$16 sm:%s3959_s5]   ;;  %v3957_v15 = vsel %vm11_vm1, %v9471_v45, %v3952_v37  ;;  %s4064_s5 = smov 12  ;;  %v3115_v47 = vpop.permute.xlu1 %3114  }
 0x204   :  { %3917 = vrot.lane.b32.xlu0 %v3916_v35, %s10355_s6  ;;  %3986 = vrot.lane.b32.xlu1 %v3985_v41, %s10355_s6  ;;  %v9481_v50 = vld [vmem:[%s16975_s0 + $0x689] ss:$16 sm:%s4015_s11]   ;;  %v3962_v6 = vsel %vm15_vm2, %v9472_v48, %v3957_v15  ;;  %3118 = vst.msk [vmem:[#allocation0 + $0xb0] sm:$0xff] %vm2726_vm8, %v3115_v47   ;;  %s4184_s11 = smov 48 }
 0x205   :  { %v9482_v51 = vld [vmem:[%s16975_s0 + $0x689] ss:$16 sm:%s4018_s9]   ;;  %s4235_s9 = smov 192 }
 0x206   :  { %v4021_v14 = vsel %vm7_vm0, %v9482_v51, %v9481_v50  ;;  %v9483_v31 = vld [vmem:[%s16975_s0 + $0x689] ss:$16 sm:%s4023_s15]   ;;  %s4038_s15 = smov 3 }
 0x207   :  { %v9484_v52 = vld [vmem:[%s16975_s0 + $0x689] ss:$16 sm:%s4028_s16]   ;;  %v4026_v55 = vsel %vm11_vm1, %v9483_v31, %v4021_v14  ;;  %s4087_s16 = smov 12  ;;  %v3092_v53 = vpop.permute.xlu0 %3091  }
 0x208   :  { %3963 = vrot.lane.b32.xlu0 %v3962_v6, %s10355_s6  ;;  %v9477_v56 = vld [vmem:[%s16975_s0 + $0x489] ss:$16 sm:%s3992_s21]   ;;  %v4031_v58 = vsel %vm15_vm2, %v9484_v52, %v4026_v55  ;;  %3095 = vst.msk [vmem:[#allocation0 + $0x90] sm:$0xff] %vm2726_vm8, %v3092_v53   ;;  %s4299_s21 = smov 48 }
 0x209   :  { %v9478_v61 = vld [vmem:[%s16975_s0 + $0x489] ss:$16 sm:%s3995_s24]   ;;  %4032 = vrot.lane.b32.xlu1 %v4031_v58, %s10355_s6  ;;  %s4258_s24 = smov 192 }
 0x20a   :  { %v9479_v62 = vld [vmem:[%s16975_s0 + $0x489] ss:$16 sm:%s4000_s25]   ;;  %v3998_v5 = vsel %vm7_vm0, %v9478_v61, %v9477_v56  ;;  %s4153_s25 = smov 3 }
 0x20b   :  { %v9480_v63 = vld [vmem:[%s16975_s0 + $0x489] ss:$16 sm:%s4005_s2]   ;;  %v4003_v0 = vsel %vm11_vm1, %v9479_v62, %v3998_v5  ;;  %s4110_s2 = smov 12  ;;  %v3161_v44 = vpop.permute.xlu1 %3160  }
 0x20c   :  { %v9489_v42 = vld [vmem:[%s16975_s0 + $0xa89] ss:$16 sm:%s4061_s4]   ;;  %v4008_v46 = vsel %vm15_vm2, %v9480_v63, %v4003_v0  ;;  %3164 = vst.msk [vmem:[#allocation0 + $0x38] sm:$0xff] %vm2726_vm8, %v3161_v44   ;;  %s4230_s4 = smov 48 }
 0x20d   :  { %v9490_v2 = vld [vmem:[%s16975_s0 + $0xa89] ss:$16 sm:%s4064_s5]   ;;  %4009 = vrot.lane.b32.xlu0 %v4008_v46, %s10355_s6  ;;  %s4281_s5 = smov 192 }
 0x20e   :  { %v4067_v3 = vsel %vm7_vm0, %v9490_v2, %v9489_v42  ;;  %v9491_v28 = vld [vmem:[%s16975_s0 + $0xa89] ss:$16 sm:%s4069_s13]   ;;  %s4084_s13 = smov 3 }
 0x20f   :  { %v9492_v4 = vld [vmem:[%s16975_s0 + $0xa89] ss:$16 sm:%s4074_s10]   ;;  %v4072_v7 = vsel %vm11_vm1, %v9491_v28, %v4067_v3  ;;  %s4133_s10 = smov 12  ;;  %v3138_v22 = vpop.permute.xlu0 %3137  }
 0x210   :  { %v9485_v8 = vld [vmem:[%s16975_s0 + $0x889] ss:$16 sm:%s4038_s15]   ;;  %v4077_v9 = vsel %vm15_vm2, %v9492_v4, %v4072_v7  ;;  %3141 = vst.msk [vmem:[#allocation0 + $0x18] sm:$0xff] %vm2726_vm8, %v3138_v22   ;;  %s4345_s15 = smov 48 }
 0x211   :  { %v9486_v16 = vld [vmem:[%s16975_s0 + $0x889] ss:$16 sm:%s4041_s18]   ;;  %4078 = vrot.lane.b32.xlu1 %v4077_v9, %s10355_s6  ;;  %s4304_s18 = smov 192 }
 0x212   :  { %v9487_v54 = vld [vmem:[%s16975_s0 + $0x889] ss:$16 sm:%s4046_s20]   ;;  %v4044_v10 = vsel %vm7_vm0, %v9486_v16, %v9485_v8  ;;  %s4199_s20 = smov 3 }
 0x213   :  { %v9488_v11 = vld [vmem:[%s16975_s0 + $0x889] ss:$16 sm:%s4051_s26]   ;;  %v4049_v36 = vsel %vm11_vm1, %v9487_v54, %v4044_v10  ;;  %s4156_s26 = smov 12  ;;  %v3207_v12 = vpop.permute.xlu1 %3206  }
 0x214   :  { %v9497_v57 = vld [vmem:[%s16975_s0 + $0x309] ss:$16 sm:%s4107_s30]   ;;  %v4054_v17 = vsel %vm15_vm2, %v9488_v11, %v4049_v36  ;;  %3210 = vst.msk [vmem:[#allocation0 + $0x78] sm:$0xff] %vm2726_vm8, %v3207_v12   ;;  %s4276_s30 = smov 48 }
 0x215   :  { %v9498_v13 = vld [vmem:[%s16975_s0 + $0x309] ss:$16 sm:%s4110_s2]   ;;  %4055 = vrot.lane.b32.xlu0 %v4054_v17, %s10355_s6  ;;  %s4327_s2 = smov 192 }
 0x216   :  { %v4113_v18 = vsel %vm7_vm0, %v9498_v13, %v9497_v57  ;;  %v9499_v19 = vld [vmem:[%s16975_s0 + $0x309] ss:$16 sm:%s4115_s7]   ;;  %s4130_s7 = smov 3 }
 0x217   :  { %v9500_v20 = vld [vmem:[%s16975_s0 + $0x309] ss:$16 sm:%s4120_s8]   ;;  %v4118_v23 = vsel %vm11_vm1, %v9499_v19, %v4113_v18  ;;  %s4179_s8 = smov 12  ;;  %v3184_v21 = vpop.permute.xlu0 %3183  }
 0x218   :  { %v9493_v26 = vld [vmem:[%s16975_s0 + $0x109] ss:$16 sm:%s4084_s13]   ;;  %v4123_v27 = vsel %vm15_vm2, %v9500_v20, %v4118_v23  ;;  %3187 = vst.msk [vmem:[#allocation0 + $0x58] sm:$0xff] %vm2726_vm8, %v3184_v21   ;;  %s4390_s13 = smov 48 }
 0x219   :  { %v9494_v49 = vld [vmem:[%s16975_s0 + $0x109] ss:$16 sm:%s4087_s16]   ;;  %4124 = vrot.lane.b32.xlu1 %v4123_v27, %s10355_s6  ;;  %s4350_s16 = smov 192 }
 0x21a   :  { %v9495_v24 = vld [vmem:[%s16975_s0 + $0x109] ss:$16 sm:%s4092_s17]   ;;  %v4090_v30 = vsel %vm7_vm0, %v9494_v49, %v9493_v26  ;;  %s4245_s17 = smov 3 }
 0x21b   :  { %v9496_v32 = vld [vmem:[%s16975_s0 + $0x109] ss:$16 sm:%s4097_s22]   ;;  %v4095_v33 = vsel %vm11_vm1, %v9495_v24, %v4090_v30  ;;  %s4202_s22 = smov 12  ;;  %v3253_v29 = vpop.permute.xlu1 %3252  }
 0x21c   :  { %v9505_v34 = vld [vmem:[%s16975_s0 + $0x709] ss:$16 sm:%s4153_s25]   ;;  %v4100_v35 = vsel %vm15_vm2, %v9496_v32, %v4095_v33  ;;  %3256 = vst.msk [vmem:[#allocation0 + $0xb8] sm:$0xff] %vm2726_vm8, %v3253_v29   ;;  %s4322_s25 = smov 48 }
 0x21d   :  { %v9506_v25 = vld [vmem:[%s16975_s0 + $0x709] ss:$16 sm:%s4156_s26]   ;;  %4101 = vrot.lane.b32.xlu0 %v4100_v35, %s10355_s6  ;;  %s4373_s26 = smov 192 }
 0x21e   :  { %v4159_v60 = vsel %vm7_vm0, %v9506_v25, %v9505_v34  ;;  %v9507_v1 = vld [vmem:[%s16975_s0 + $0x709] ss:$16 sm:%s4161_s27]   ;;  %s4176_s27 = smov 3 }
 0x21f   :  { %v9508_v38 = vld [vmem:[%s16975_s0 + $0x709] ss:$16 sm:%s4166_s3]   ;;  %v4164_v59 = vsel %vm11_vm1, %v9507_v1, %v4159_v60  ;;  %s4225_s3 = smov 12  ;;  %v3230_v39 = vpop.permute.xlu0 %3229   ;;  %v3298_v47 = vpop.permute.xlu1 %3297  }
 0x220   :  { %v9501_v40 = vld [vmem:[%s16975_s0 + $0x509] ss:$16 sm:%s4130_s7]   ;;  %v4169_v41 = vsel %vm15_vm2, %v9508_v38, %v4164_v59  ;;  %3233 = vst.msk [vmem:[#allocation0 + $0x98] sm:$0xff] %vm2726_vm8, %v3230_v39   ;;  %s4441_s7 = smov 192 }
 0x221   :  { %v9502_v43 = vld [vmem:[%s16975_s0 + $0x509] ss:$16 sm:%s4133_s10]   ;;  %4170 = vrot.lane.b32.xlu1 %v4169_v41, %s10355_s6  ;;  %s4395_s10 = smov 192  ;;  %3301 = vst.msk [vmem:[#allocation0 + $0x20] sm:$0xff] %vm3277_vm9, %v3298_v47  }
 0x222   :  { %v9503_v45 = vld [vmem:[%s16975_s0 + $0x509] ss:$16 sm:%s4138_s12]   ;;  %v4136_v37 = vsel %vm7_vm0, %v9502_v43, %v9501_v40  ;;  %s4291_s12 = smov 3 }
 0x223   :  { %v9504_v48 = vld [vmem:[%s16975_s0 + $0x509] ss:$16 sm:%s4143_s19]   ;;  %v4141_v15 = vsel %vm11_vm1, %v9503_v45, %v4136_v37  ;;  %s4248_s19 = smov 12  ;;  %v3276_v53 = vpop.permute.xlu0 %3275   ;;  %v3344_v44 = vpop.permute.xlu1 %3343  }
 0x224   :  { %v9513_v50 = vld [vmem:[%s16975_s0 + $0xb09] ss:$16 sm:%s4199_s20]   ;;  %v4146_v6 = vsel %vm15_vm2, %v9504_v48, %v4141_v15  ;;  %s4368_s20 = smov 48  ;;  %3278 = vst.msk [vmem:[#allocation0] sm:$0xff] %vm3277_vm9, %v3276_v53   ;;  %3347 = vst.msk [vmem:[#allocation0 + $0x60] sm:$0xff] %vm3277_vm9, %v3344_v44  }
 0x225   :  { %v9514_v51 = vld [vmem:[%s16975_s0 + $0xb09] ss:$16 sm:%s4202_s22]   ;;  %4147 = vrot.lane.b32.xlu0 %v4146_v6, %s10355_s6  ;;  %s4418_s22 = smov 192 }
 0x226   :  { %v4205_v14 = vsel %vm7_vm0, %v9514_v51, %v9513_v50  ;;  %v9515_v31 = vld [vmem:[%s16975_s0 + $0xb09] ss:$16 sm:%s4207_s28]   ;;  %s4222_s28 = smov 3 }
 0x227   :  { %v9516_v52 = vld [vmem:[%s16975_s0 + $0xb09] ss:$16 sm:%s4212_s29]   ;;  %v4210_v55 = vsel %vm11_vm1, %v9515_v31, %v4205_v14  ;;  %s4271_s29 = smov 12  ;;  %v9547_v31 = vld [vmem:[%s16975_s0 + $0x208] ss:$16 sm:%s4390_s13]   ;;  %s4405_s13 = smov 3  ;;  %v3321_v22 = vpop.permute.xlu0 %3320   ;;  %v3390_v12 = vpop.permute.xlu1 %3389  }
 0x228   :  { %v9509_v56 = vld [vmem:[%s16975_s0 + $0x909] ss:$16 sm:%s4176_s27]   ;;  %v4215_v58 = vsel %vm15_vm2, %v9516_v52, %v4210_v55  ;;  %v9548_v52 = vld [vmem:[%s16975_s0 + $0x208] ss:$16 sm:%s4395_s10]   ;;  %3324 = vst.msk [vmem:[#allocation0 + $0x40] sm:$0xff] %vm3277_vm9, %v3321_v22   ;;  %s4487_s27 = smov 192 }
 0x229   :  { %v9510_v61 = vld [vmem:[%s16975_s0 + $0x909] ss:$16 sm:%s4179_s8]   ;;  %4216 = vrot.lane.b32.xlu1 %v4215_v58, %s10355_s6  ;;  %s10356_s8 = smov 16   ;;  %3393 = vst.msk [vmem:[#allocation0 + $0xa0] sm:$0xff] %vm3277_vm9, %v3390_v12   ;;  %s4454_s10 = smov 12 }
 0x22a   :  { %v9511_v62 = vld [vmem:[%s16975_s0 + $0x909] ss:$16 sm:%s4184_s11]   ;;  %v4182_v5 = vsel %vm7_vm0, %v9510_v61, %v9509_v56  ;;  %s4337_s11 = smov 3 }
 0x22b   :  { %v9512_v63 = vld [vmem:[%s16975_s0 + $0x909] ss:$16 sm:%s4189_s14]   ;;  %v4187_v0 = vsel %vm11_vm1, %v9511_v62, %v4182_v5  ;;  %s4294_s14 = smov 12  ;;  %v9543_v62 = vld [vmem:[%s16975_s0 + $0x8] ss:$16 sm:%s4368_s20]   ;;  %v3367_v21 = vpop.permute.xlu0 %3366   ;;  %s4520_s20 = smov 3  ;;  %v3436_v29 = vpop.permute.xlu1 %3435  }
 0x22c   :  { %v9521_v42 = vld [vmem:[%s16975_s0 + $0x389] ss:$16 sm:%s4245_s17]   ;;  %v4192_v46 = vsel %vm15_vm2, %v9512_v63, %v4187_v0  ;;  %v9544_v63 = vld [vmem:[%s16975_s0 + $0x8] ss:$16 sm:%s4373_s26]   ;;  %s4413_s17 = smov 48  ;;  %s4477_s26 = smov 12 }
 0x22d   :  { %v9522_v2 = vld [vmem:[%s16975_s0 + $0x389] ss:$16 sm:%s4248_s19]   ;;  %4193 = vrot.lane.b32.xlu0 %v4192_v46, %s10355_s6  ;;  %s4464_s19 = smov 192  ;;  %3370 = vst.msk [vmem:[#allocation0 + $0x80] sm:$0xff] %vm3277_vm9, %v3367_v21   ;;  %3439 = vst.msk [vmem:[#allocation0 + $0x28] sm:$0xff] %vm3277_vm9, %v3436_v29  }
 0x22e   :  { %v4251_v3 = vsel %vm7_vm0, %v9522_v2, %v9521_v42  ;;  %v9523_v28 = vld [vmem:[%s16975_s0 + $0x389] ss:$16 sm:%s4253_s23]   ;;  %s4268_s23 = smov 3 }
 0x22f   :  { %v9524_v4 = vld [vmem:[%s16975_s0 + $0x389] ss:$16 sm:%s4258_s24]   ;;  %v4256_v7 = vsel %vm11_vm1, %v9523_v28, %v4251_v3  ;;  %s4317_s24 = smov 12  ;;  %v3413_v39 = vpop.permute.xlu0 %3412   ;;  %v3482_v47 = vpop.permute.xlu1 %3481  }
 0x230   :  { %v9517_v8 = vld [vmem:[%s16975_s0 + $0x189] ss:$16 sm:%s4222_s28]   ;;  %v4261_v9 = vsel %vm15_vm2, %v9524_v4, %v4256_v7  ;;  %v9556_v4 = vld [vmem:[%s16975_s0 + $0x608] ss:$16 sm:%s4441_s7]   ;;  %s4533_s28 = smov 192  ;;  %s4500_s7 = smov 12 }
 0x231   :  { %v9518_v16 = vld [vmem:[%s16975_s0 + $0x189] ss:$16 sm:%s4225_s3]   ;;  %4262 = vrot.lane.b32.xlu1 %v4261_v9, %s10355_s6  ;;  %3416 = vst.msk [vmem:[#allocation0 + $0x8] sm:$0xff] %vm3277_vm9, %v3413_v39   ;;  %3485 = vst.msk [vmem:[#allocation0 + $0x68] sm:$0xff] %vm3277_vm9, %v3482_v47   ;;  %s4551_s3 = smov 48 }
 0x232   :  { %v9519_v54 = vld [vmem:[%s16975_s0 + $0x189] ss:$16 sm:%s4230_s4]   ;;  %v4228_v10 = vsel %vm7_vm0, %v9518_v16, %v9517_v8  ;;  %s4382_s4 = smov 3  ;;  %v9549_v8 = vld [vmem:[%s16975_s0 + $0x408] ss:$16 sm:%s4405_s13]   ;;  %s4712_s13 = smov 48 }
 0x233   :  { %v9520_v11 = vld [vmem:[%s16975_s0 + $0x189] ss:$16 sm:%s4235_s9]   ;;  %v4233_v36 = vsel %vm11_vm1, %v9519_v54, %v4228_v10  ;;  %s4340_s9 = smov 12  ;;  %v9545_v50 = vld [vmem:[%s16975_s0 + $0x208] ss:$16 sm:%s4382_s4]   ;;  %v3459_v53 = vpop.permute.xlu0 %3458   ;;  %s4602_s4 = smov 192 }
 0x234   :  { %v9529_v57 = vld [vmem:[%s16975_s0 + $0x789] ss:$16 sm:%s4291_s12]   ;;  %v4238_v17 = vsel %vm15_vm2, %v9520_v11, %v4233_v36  ;;  %v9551_v54 = vld [vmem:[%s16975_s0 + $0x408] ss:$16 sm:%s4413_s17]   ;;  %s4459_s12 = smov 48  ;;  %s4566_s17 = smov 3 }
 0x235   :  { %v9530_v13 = vld [vmem:[%s16975_s0 + $0x789] ss:$16 sm:%s4294_s14]   ;;  %4239 = vrot.lane.b32.xlu0 %v4238_v17, %s10355_s6  ;;  %s4510_s14 = smov 192  ;;  %3462 = vst.msk [vmem:[#allocation0 + $0x48] sm:$0xff] %vm3277_vm9, %v3459_v53  }
 0x236   :  { %v4297_v18 = vsel %vm7_vm0, %v9530_v13, %v9529_v57  ;;  %v9531_v19 = vld [vmem:[%s16975_s0 + $0x789] ss:$16 sm:%s4299_s21]   ;;  %s4314_s21 = smov 3  ;;  %v9552_v11 = vld [vmem:[%s16975_s0 + $0x408] ss:$16 sm:%s4418_s22]   ;;  %s4523_s22 = smov 12  ;;  %v3528_v44 = vpop.permute.xlu1 %3527  }
 0x237   :  { %v9532_v20 = vld [vmem:[%s16975_s0 + $0x789] ss:$16 sm:%s4304_s18]   ;;  %v4302_v23 = vsel %vm11_vm1, %v9531_v19, %v4297_v18  ;;  %s4363_s18 = smov 12  ;;  %v9562_v13 = vld [vmem:[%s16975_s0 + $0xa08] ss:$16 sm:%s4477_s26]   ;;  %3531 = vst.msk [vmem:[#allocation0 + $0xa8] sm:$0xff] %vm3277_vm9, %v3528_v44  }
 0x238   :  { %v9525_v26 = vld [vmem:[%s16975_s0 + $0x589] ss:$16 sm:%s4268_s23]   ;;  %v4307_v27 = vsel %vm15_vm2, %v9532_v20, %v4302_v23  ;;  %v9542_v61 = vld [vmem:[%s16975_s0 + $0x8] ss:$16 sm:%s4363_s18]   ;;  %s4574_s23 = smov 48  ;;  %s4625_s18 = smov 192 }
 0x239   :  { %v9526_v49 = vld [vmem:[%s16975_s0 + $0x589] ss:$16 sm:%s4271_s29]   ;;  %4308 = vrot.lane.b32.xlu1 %v4307_v27, %s10355_s6  ;;  %s4428_s29 = smov 3  ;;  %s4694_s26 = smov 192 }
 0x23a   :  { %v9527_v24 = vld [vmem:[%s16975_s0 + $0x589] ss:$16 sm:%s4276_s30]   ;;  %v4274_v30 = vsel %vm7_vm0, %v9526_v49, %v9525_v26  ;;  %s4431_s30 = smov 12  ;;  %v9553_v42 = vld [vmem:[%s16975_s0 + $0x608] ss:$16 sm:%s4428_s29]   ;;  %s4597_s29 = smov 48  ;;  %v3505_v22 = vpop.permute.xlu0 %3504  }
 0x23b   :  { %v9528_v32 = vld [vmem:[%s16975_s0 + $0x589] ss:$16 sm:%s4281_s5]   ;;  %v4279_v33 = vsel %vm11_vm1, %v9527_v24, %v4274_v30  ;;  %s4385_s5 = smov 12  ;;  %v9554_v2 = vld [vmem:[%s16975_s0 + $0x608] ss:$16 sm:%s4431_s30]   ;;  %3508 = vst.msk [vmem:[#allocation0 + $0x88] sm:$0xff] %vm3277_vm9, %v3505_v22  }
 0x23c   :  { %v9537_v34 = vld [vmem:[%s16975_s0 + $0xb89] ss:$16 sm:%s4337_s11]   ;;  %v4284_v35 = vsel %vm15_vm2, %v9528_v32, %v4279_v33  ;;  %v9546_v51 = vld [vmem:[%s16975_s0 + $0x208] ss:$16 sm:%s4385_s5]   ;;  %s4436_s5 = smov 48  ;;  %v4434_v3 = vsel %vm7_vm0, %v9554_v2, %v9553_v42  ;;  %s4505_s11 = smov 48 }
 0x23d   :  { %v9538_v25 = vld [vmem:[%s16975_s0 + $0xb89] ss:$16 sm:%s4340_s9]   ;;  %4285 = vrot.lane.b32.xlu0 %v4284_v35, %s10355_s6  ;;  %v4388_v14 = vsel %vm7_vm0, %v9546_v51, %v9545_v50  ;;  %s4556_s9 = smov 192  ;;  %s4648_s30 = smov 192 }
 0x23e   :  { %v4343_v60 = vsel %vm7_vm0, %v9538_v25, %v9537_v34  ;;  %v9539_v1 = vld [vmem:[%s16975_s0 + $0xb89] ss:$16 sm:%s4345_s15]   ;;  %s4360_s15 = smov 3  ;;  %v4393_v55 = vsel %vm11_vm1, %v9547_v31, %v4388_v14  ;;  %v9555_v28 = vld [vmem:[%s16975_s0 + $0x608] ss:$16 sm:%s4436_s5]   ;;  %s4451_s5 = smov 3  ;;  %v3574_v12 = vpop.permute.xlu1 %3573  }
 0x23f   :  { %v9540_v38 = vld [vmem:[%s16975_s0 + $0xb89] ss:$16 sm:%s4350_s16]   ;;  %v4348_v59 = vsel %vm11_vm1, %v9539_v1, %v4343_v60  ;;  %v9541_v56 = vld [vmem:[%s16975_s0 + $0x8] ss:$16 sm:%s4360_s15]   ;;  %v4398_v58 = vsel %vm15_vm2, %v9548_v52, %v4393_v55  ;;  %s4408_s16 = smov 12  ;;  %v4439_v7 = vsel %vm11_vm1, %v9555_v28, %v4434_v3  ;;  %s4666_s15 = smov 48 }
 0x240   :  { %v9533_v40 = vld [vmem:[%s16975_s0 + $0x989] ss:$16 sm:%s4314_s21]   ;;  %v4353_v41 = vsel %vm15_vm2, %v9540_v38, %v4348_v59  ;;  %v4366_v5 = vsel %vm7_vm0, %v9542_v61, %v9541_v56  ;;  %v4444_v9 = vsel %vm15_vm2, %v9556_v4, %v4439_v7  ;;  %v9550_v16 = vld [vmem:[%s16975_s0 + $0x408] ss:$16 sm:%s4408_s16]   ;;  %s4620_s21 = smov 48  ;;  %s4671_s16 = smov 192 }
 0x241   :  { %v9534_v43 = vld [vmem:[%s16975_s0 + $0x989] ss:$16 sm:%s4317_s24]   ;;  %4354 = vrot.lane.b32.xlu1 %v4353_v41, %s10355_s6  ;;  %v4371_v0 = vsel %vm11_vm1, %v9543_v62, %v4366_v5  ;;  %v4411_v10 = vsel %vm7_vm0, %v9550_v16, %v9549_v8  ;;  %s4579_s24 = smov 192  ;;  %3577 = vst.msk [vmem:[#allocation0 + $0x30] sm:$0xff] %vm3277_vm9, %v3574_v12  }
 0x242   :  { %v9535_v45 = vld [vmem:[%s16975_s0 + $0x989] ss:$16 sm:%s4322_s25]   ;;  %v4320_v37 = vsel %vm7_vm0, %v9534_v43, %v9533_v40  ;;  %v4376_v46 = vsel %vm15_vm2, %v9544_v63, %v4371_v0  ;;  %s4474_s25 = smov 3  ;;  %v4416_v36 = vsel %vm11_vm1, %v9551_v54, %v4411_v10  ;;  %v9564_v20 = vld [vmem:[%s16975_s0 + $0xa08] ss:$16 sm:%s4487_s27]   ;;  %s4546_s27 = smov 12  ;;  %v3551_v21 = vpop.permute.xlu0 %3550  }
 0x243   :  { %v9536_v48 = vld [vmem:[%s16975_s0 + $0x989] ss:$16 sm:%s4327_s2]   ;;  %v4325_v15 = vsel %vm11_vm1, %v9535_v45, %v4320_v37  ;;  %s4482_s2 = smov 48  ;;  %v9561_v57 = vld [vmem:[%s16975_s0 + $0xa08] ss:$16 sm:%s4474_s25]   ;;  %v4421_v17 = vsel %vm15_vm2, %v9552_v11, %v4416_v36  ;;  %s4643_s25 = smov 48 }
 0x244   :  { %v4330_v6 = vsel %vm15_vm2, %v9536_v48, %v4325_v15  ;;  %v4480_v18 = vsel %vm7_vm0, %v9562_v13, %v9561_v57  ;;  %v9563_v19 = vld [vmem:[%s16975_s0 + $0xa08] ss:$16 sm:%s4482_s2]   ;;  %s4497_s2 = smov 3  ;;  %3554 = vst.msk [vmem:[#allocation0 + $0x10] sm:$0xff] %vm3277_vm9, %v3551_v21  }
 0x245   :  { %4331 = vrot.lane.b32.xlu0 %v4330_v6, %s10355_s6  ;;  %4399 = vrot.lane.b32.xlu1 %v4398_v58, %s10356_s8  ;;  %v4485_v23 = vsel %vm11_vm1, %v9563_v19, %v4480_v18  ;;  %v9557_v26 = vld [vmem:[%s16975_s0 + $0x808] ss:$16 sm:%s4451_s5]   ;;  %s4528_s6 = smov 48  ;;  %s4758_s5 = smov 48 }
 0x246   :  { %v4490_v27 = vsel %vm15_vm2, %v9564_v20, %v4485_v23  ;;  %v9558_v49 = vld [vmem:[%s16975_s0 + $0x808] ss:$16 sm:%s4454_s10]   ;;  %s4717_s10 = smov 192  ;;  %v3620_v29 = vpop.permute.xlu1 %3619  }
 0x247   :  { %v9559_v24 = vld [vmem:[%s16975_s0 + $0x808] ss:$16 sm:%s4459_s12]   ;;  %v4457_v30 = vsel %vm7_vm0, %v9558_v49, %v9557_v26  ;;  %s4612_s12 = smov 3  ;;  %3623 = vst.msk [vmem:[#allocation0 + $0x70] sm:$0xff] %vm3277_vm9, %v3620_v29  }
 0x248   :  { %v9560_v32 = vld [vmem:[%s16975_s0 + $0x808] ss:$16 sm:%s4464_s19]   ;;  %v4462_v33 = vsel %vm11_vm1, %v9559_v24, %v4457_v30  ;;  %s4569_s19 = smov 12 }
 0x249   :  { %4377 = vrot.lane.b32.xlu0 %v4376_v46, %s10356_s8  ;;  %4445 = vrot.lane.b32.xlu1 %v4444_v9, %s10356_s8  ;;  %v9569_v34 = vld [vmem:[%s16975_s0 + $0x288] ss:$16 sm:%s4520_s20]   ;;  %v4467_v35 = vsel %vm15_vm2, %v9560_v32, %v4462_v33  ;;  %s4689_s20 = smov 48 }
 0x24a   :  { %v9570_v25 = vld [vmem:[%s16975_s0 + $0x288] ss:$16 sm:%s4523_s22]   ;;  %v3597_v39 = vpop.permute.xlu0 %3596   ;;  %s4740_s22 = smov 192 }
 0x24b   :  { %v4526_v60 = vsel %vm7_vm0, %v9570_v25, %v9569_v34  ;;  %v9571_v1 = vld [vmem:[%s16975_s0 + $0x288] ss:$16 sm:%s4528_s6]   ;;  %s4543_s6 = smov 3  ;;  %3600 = vst.msk [vmem:[#allocation0 + $0x50] sm:$0xff] %vm3277_vm9, %v3597_v39  }
 0x24c   :  { %v9572_v38 = vld [vmem:[%s16975_s0 + $0x288] ss:$16 sm:%s4533_s28]   ;;  %v4531_v59 = vsel %vm11_vm1, %v9571_v1, %v4526_v60  ;;  %s4592_s28 = smov 12 }
 0x24d   :  { %4422 = vrot.lane.b32.xlu0 %v4421_v17, %s10356_s8  ;;  %4491 = vrot.lane.b32.xlu1 %v4490_v27, %s10356_s8  ;;  %v9565_v40 = vld [vmem:[%s16975_s0 + $0x88] ss:$16 sm:%s4497_s2]   ;;  %v4536_v41 = vsel %vm15_vm2, %v9572_v38, %v4531_v59  ;;  %s4804_s2 = smov 48 }
 0x24e   :  { %v9566_v43 = vld [vmem:[%s16975_s0 + $0x88] ss:$16 sm:%s4500_s7]   ;;  %s4763_s7 = smov 192  ;;  %v3666_v47 = vpop.permute.xlu1 %3665  }
 0x24f   :  { %v9567_v45 = vld [vmem:[%s16975_s0 + $0x88] ss:$16 sm:%s4505_s11]   ;;  %v4503_v37 = vsel %vm7_vm0, %v9566_v43, %v9565_v40  ;;  %s4658_s11 = smov 3  ;;  %3669 = vst.msk [vmem:[#allocation0 + $0xb0] sm:$0xff] %vm3277_vm9, %v3666_v47  }
 0x250   :  { %v9568_v48 = vld [vmem:[%s16975_s0 + $0x88] ss:$16 sm:%s4510_s14]   ;;  %v4508_v15 = vsel %vm11_vm1, %v9567_v45, %v4503_v37  ;;  %s4615_s14 = smov 12 }
 0x251   :  { %4468 = vrot.lane.b32.xlu0 %v4467_v35, %s10356_s8  ;;  %4537 = vrot.lane.b32.xlu1 %v4536_v41, %s10356_s8  ;;  %v9577_v50 = vld [vmem:[%s16975_s0 + $0x688] ss:$16 sm:%s4566_s17]   ;;  %v4513_v6 = vsel %vm15_vm2, %v9568_v48, %v4508_v15  ;;  %s4735_s17 = smov 48 }
 0x252   :  { %v9578_v51 = vld [vmem:[%s16975_s0 + $0x688] ss:$16 sm:%s4569_s19]   ;;  %v3643_v53 = vpop.permute.xlu0 %3642   ;;  %s4786_s19 = smov 192 }
 0x253   :  { %v4572_v14 = vsel %vm7_vm0, %v9578_v51, %v9577_v50  ;;  %v9579_v31 = vld [vmem:[%s16975_s0 + $0x688] ss:$16 sm:%s4574_s23]   ;;  %s4589_s23 = smov 3  ;;  %3646 = vst.msk [vmem:[#allocation0 + $0x90] sm:$0xff] %vm3277_vm9, %v3643_v53  }
 0x254   :  { %v9580_v52 = vld [vmem:[%s16975_s0 + $0x688] ss:$16 sm:%s4579_s24]   ;;  %v4577_v55 = vsel %vm11_vm1, %v9579_v31, %v4572_v14  ;;  %s4638_s24 = smov 12 }
 0x255   :  { %4514 = vrot.lane.b32.xlu0 %v4513_v6, %s10356_s8  ;;  %v9573_v56 = vld [vmem:[%s16975_s0 + $0x488] ss:$16 sm:%s4543_s6]   ;;  %v4582_v58 = vsel %vm15_vm2, %v9580_v52, %v4577_v55  ;;  %s4850_s6 = smov 48 }
 0x256   :  { %v9574_v61 = vld [vmem:[%s16975_s0 + $0x488] ss:$16 sm:%s4546_s27]   ;;  %4583 = vrot.lane.b32.xlu1 %v4582_v58, %s10356_s8  ;;  %s4809_s27 = smov 192  ;;  %v3712_v44 = vpop.permute.xlu1 %3711  }
 0x257   :  { %v9575_v62 = vld [vmem:[%s16975_s0 + $0x488] ss:$16 sm:%s4551_s3]   ;;  %v4549_v5 = vsel %vm7_vm0, %v9574_v61, %v9573_v56  ;;  %s4704_s3 = smov 3  ;;  %3715 = vst.msk [vmem:[#allocation0 + $0x38] sm:$0xff] %vm3277_vm9, %v3712_v44  }
 0x258   :  { %v9576_v63 = vld [vmem:[%s16975_s0 + $0x488] ss:$16 sm:%s4556_s9]   ;;  %v4554_v0 = vsel %vm11_vm1, %v9575_v62, %v4549_v5  ;;  %s4661_s9 = smov 12 }
 0x259   :  { %v9585_v42 = vld [vmem:[%s16975_s0 + $0xa88] ss:$16 sm:%s4612_s12]   ;;  %v4559_v46 = vsel %vm15_vm2, %v9576_v63, %v4554_v0  ;;  %s4781_s12 = smov 48 }
 0x25a   :  { %v9586_v2 = vld [vmem:[%s16975_s0 + $0xa88] ss:$16 sm:%s4615_s14]   ;;  %4560 = vrot.lane.b32.xlu0 %v4559_v46, %s10356_s8  ;;  %v3689_v22 = vpop.permute.xlu0 %3688   ;;  %s4832_s14 = smov 192 }
 0x25b   :  { %v4618_v3 = vsel %vm7_vm0, %v9586_v2, %v9585_v42  ;;  %v9587_v28 = vld [vmem:[%s16975_s0 + $0xa88] ss:$16 sm:%s4620_s21]   ;;  %s4635_s21 = smov 3  ;;  %3692 = vst.msk [vmem:[#allocation0 + $0x18] sm:$0xff] %vm3277_vm9, %v3689_v22  }
 0x25c   :  { %v9588_v4 = vld [vmem:[%s16975_s0 + $0xa88] ss:$16 sm:%s4625_s18]   ;;  %v4623_v7 = vsel %vm11_vm1, %v9587_v28, %v4618_v3  ;;  %s4684_s18 = smov 12 }
 0x25d   :  { %v9581_v8 = vld [vmem:[%s16975_s0 + $0x888] ss:$16 sm:%s4589_s23]   ;;  %v4628_v9 = vsel %vm15_vm2, %v9588_v4, %v4623_v7  ;;  %s4896_s23 = smov 48 }
 0x25e   :  { %v9582_v16 = vld [vmem:[%s16975_s0 + $0x888] ss:$16 sm:%s4592_s28]   ;;  %4629 = vrot.lane.b32.xlu1 %v4628_v9, %s10356_s8  ;;  %s4855_s28 = smov 192  ;;  %v3758_v12 = vpop.permute.xlu1 %3757  }
 0x25f   :  { %v9583_v54 = vld [vmem:[%s16975_s0 + $0x888] ss:$16 sm:%s4597_s29]   ;;  %v4595_v10 = vsel %vm7_vm0, %v9582_v16, %v9581_v8  ;;  %s4750_s29 = smov 3  ;;  %3761 = vst.msk [vmem:[#allocation0 + $0x78] sm:$0xff] %vm3277_vm9, %v3758_v12  }
 0x260   :  { %v9584_v11 = vld [vmem:[%s16975_s0 + $0x888] ss:$16 sm:%s4602_s4]   ;;  %v4600_v36 = vsel %vm11_vm1, %v9583_v54, %v4595_v10  ;;  %s4707_s4 = smov 12 }
 0x261   :  { %v9593_v57 = vld [vmem:[%s16975_s0 + $0x308] ss:$16 sm:%s4658_s11]   ;;  %v4605_v17 = vsel %vm15_vm2, %v9584_v11, %v4600_v36  ;;  %s4827_s11 = smov 48 }
 0x262   :  { %v9594_v13 = vld [vmem:[%s16975_s0 + $0x308] ss:$16 sm:%s4661_s9]   ;;  %4606 = vrot.lane.b32.xlu0 %v4605_v17, %s10356_s8  ;;  %v3735_v21 = vpop.permute.xlu0 %3734   ;;  %s4878_s9 = smov 192 }
 0x263   :  { %v4664_v18 = vsel %vm7_vm0, %v9594_v13, %v9593_v57  ;;  %v9595_v19 = vld [vmem:[%s16975_s0 + $0x308] ss:$16 sm:%s4666_s15]   ;;  %s4681_s15 = smov 3  ;;  %3738 = vst.msk [vmem:[#allocation0 + $0x58] sm:$0xff] %vm3277_vm9, %v3735_v21  }
 0x264   :  { %v9596_v20 = vld [vmem:[%s16975_s0 + $0x308] ss:$16 sm:%s4671_s16]   ;;  %v4669_v23 = vsel %vm11_vm1, %v9595_v19, %v4664_v18  ;;  %s4730_s16 = smov 12 }
 0x265   :  { %v9589_v26 = vld [vmem:[%s16975_s0 + $0x108] ss:$16 sm:%s4635_s21]   ;;  %v4674_v27 = vsel %vm15_vm2, %v9596_v20, %v4669_v23  ;;  %s4941_s21 = smov 48 }
 0x266   :  { %v9590_v49 = vld [vmem:[%s16975_s0 + $0x108] ss:$16 sm:%s4638_s24]   ;;  %4675 = vrot.lane.b32.xlu1 %v4674_v27, %s10356_s8  ;;  %s4901_s24 = smov 192  ;;  %v3804_v29 = vpop.permute.xlu1 %3803  }
 0x267   :  { %v9591_v24 = vld [vmem:[%s16975_s0 + $0x108] ss:$16 sm:%s4643_s25]   ;;  %v4641_v30 = vsel %vm7_vm0, %v9590_v49, %v9589_v26  ;;  %s4796_s25 = smov 3  ;;  %3807 = vst.msk [vmem:[#allocation0 + $0xb8] sm:$0xff] %vm3277_vm9, %v3804_v29  }
 0x268   :  { %v9592_v32 = vld [vmem:[%s16975_s0 + $0x108] ss:$16 sm:%s4648_s30]   ;;  %v4646_v33 = vsel %vm11_vm1, %v9591_v24, %v4641_v30  ;;  %s4753_s30 = smov 12 }
 0x269   :  { %v9601_v34 = vld [vmem:[%s16975_s0 + $0x708] ss:$16 sm:%s4704_s3]   ;;  %v4651_v35 = vsel %vm15_vm2, %v9592_v32, %v4646_v33  ;;  %s4873_s3 = smov 48 }
 0x26a   :  { %v9602_v25 = vld [vmem:[%s16975_s0 + $0x708] ss:$16 sm:%s4707_s4]   ;;  %4652 = vrot.lane.b32.xlu0 %v4651_v35, %s10356_s8  ;;  %v3781_v39 = vpop.permute.xlu0 %3780   ;;  %v3849_v47 = vpop.permute.xlu1 %3848   ;;  %s4924_s4 = smov 192 }
 0x26b   :  { %v4710_v60 = vsel %vm7_vm0, %v9602_v25, %v9601_v34  ;;  %v9603_v1 = vld [vmem:[%s16975_s0 + $0x708] ss:$16 sm:%s4712_s13]   ;;  %s4727_s13 = smov 3  ;;  %3784 = vst.msk [vmem:[#allocation0 + $0x98] sm:$0xff] %vm3277_vm9, %v3781_v39  }
 0x26c   :  { %v9604_v38 = vld [vmem:[%s16975_s0 + $0x708] ss:$16 sm:%s4717_s10]   ;;  %v4715_v59 = vsel %vm11_vm1, %v9603_v1, %v4710_v60  ;;  %s4776_s10 = smov 12  ;;  %3852 = vst.msk [vmem:[#allocation0 + $0x20] sm:$0xff] %vm3828_vm10, %v3849_v47  }
 0x26d   :  { %v9597_v40 = vld [vmem:[%s16975_s0 + $0x508] ss:$16 sm:%s4681_s15]   ;;  %v4720_v41 = vsel %vm15_vm2, %v9604_v38, %v4715_v59  ;;  %s4992_s15 = smov 192 }
 0x26e   :  { %v9598_v43 = vld [vmem:[%s16975_s0 + $0x508] ss:$16 sm:%s4684_s18]   ;;  %4721 = vrot.lane.b32.xlu1 %v4720_v41, %s10356_s8  ;;  %s4946_s18 = smov 192  ;;  %v3827_v53 = vpop.permute.xlu0 %3826   ;;  %v3895_v44 = vpop.permute.xlu1 %3894  }
 0x26f   :  { %v9599_v45 = vld [vmem:[%s16975_s0 + $0x508] ss:$16 sm:%s4689_s20]   ;;  %v4687_v37 = vsel %vm7_vm0, %v9598_v43, %v9597_v40  ;;  %s4842_s20 = smov 3  ;;  %3829 = vst.msk [vmem:[#allocation0] sm:$0xff] %vm3828_vm10, %v3827_v53   ;;  %3898 = vst.msk [vmem:[#allocation0 + $0x60] sm:$0xff] %vm3828_vm10, %v3895_v44  }
 0x270   :  { %v9600_v48 = vld [vmem:[%s16975_s0 + $0x508] ss:$16 sm:%s4694_s26]   ;;  %v4692_v15 = vsel %vm11_vm1, %v9599_v45, %v4687_v37  ;;  %s4799_s26 = smov 12 }
 0x271   :  { %v9609_v50 = vld [vmem:[%s16975_s0 + $0xb08] ss:$16 sm:%s4750_s29]   ;;  %v4697_v6 = vsel %vm15_vm2, %v9600_v48, %v4692_v15  ;;  %s4919_s29 = smov 48 }
 0x272   :  { %v9610_v51 = vld [vmem:[%s16975_s0 + $0xb08] ss:$16 sm:%s4753_s30]   ;;  %4698 = vrot.lane.b32.xlu0 %v4697_v6, %s10356_s8  ;;  %s4969_s30 = smov 192  ;;  %v3872_v22 = vpop.permute.xlu0 %3871   ;;  %v3941_v12 = vpop.permute.xlu1 %3940  }
 0x273   :  { %v4756_v14 = vsel %vm7_vm0, %v9610_v51, %v9609_v50  ;;  %v9611_v31 = vld [vmem:[%s16975_s0 + $0xb08] ss:$16 sm:%s4758_s5]   ;;  %s4773_s5 = smov 3  ;;  %3875 = vst.msk [vmem:[#allocation0 + $0x40] sm:$0xff] %vm3828_vm10, %v3872_v22   ;;  %3944 = vst.msk [vmem:[#allocation0 + $0xa0] sm:$0xff] %vm3828_vm10, %v3941_v12  }
 0x274   :  { %v9612_v52 = vld [vmem:[%s16975_s0 + $0xb08] ss:$16 sm:%s4763_s7]   ;;  %v4761_v55 = vsel %vm11_vm1, %v9611_v31, %v4756_v14  ;;  %s4822_s7 = smov 12  ;;  %v9643_v31 = vld [vmem:[%s16975_s0 + $0x207] ss:$16 sm:%s4941_s21]   ;;  %s4956_s21 = smov 3 }
 0x275   :  { %v9605_v56 = vld [vmem:[%s16975_s0 + $0x908] ss:$16 sm:%s4727_s13]   ;;  %v4766_v58 = vsel %vm15_vm2, %v9612_v52, %v4761_v55  ;;  %v9644_v52 = vld [vmem:[%s16975_s0 + $0x207] ss:$16 sm:%s4946_s18]   ;;  %s5038_s13 = smov 192  ;;  %s5005_s18 = smov 12 }
 0x276   :  { %v9606_v61 = vld [vmem:[%s16975_s0 + $0x908] ss:$16 sm:%s4730_s16]   ;;  %4767 = vrot.lane.b32.xlu1 %v4766_v58, %s10356_s8  ;;  %s10357_s16 = smov 14   ;;  %v3918_v21 = vpop.permute.xlu0 %3917   ;;  %v3987_v29 = vpop.permute.xlu1 %3986  }
 0x277   :  { %v9607_v62 = vld [vmem:[%s16975_s0 + $0x908] ss:$16 sm:%s4735_s17]   ;;  %v4733_v5 = vsel %vm7_vm0, %v9606_v61, %v9605_v56  ;;  %s4888_s17 = smov 3  ;;  %3921 = vst.msk [vmem:[#allocation0 + $0x80] sm:$0xff] %vm3828_vm10, %v3918_v21   ;;  %3990 = vst.msk [vmem:[#allocation0 + $0x28] sm:$0xff] %vm3828_vm10, %v3987_v29  }
 0x278   :  { %v9608_v63 = vld [vmem:[%s16975_s0 + $0x908] ss:$16 sm:%s4740_s22]   ;;  %v4738_v0 = vsel %vm11_vm1, %v9607_v62, %v4733_v5  ;;  %s4845_s22 = smov 12  ;;  %v9639_v62 = vld [vmem:[%s16975_s0 + $0x7] ss:$16 sm:%s4919_s29]   ;;  %s5071_s29 = smov 3 }
 0x279   :  { %v9617_v42 = vld [vmem:[%s16975_s0 + $0x388] ss:$16 sm:%s4796_s25]   ;;  %v4743_v46 = vsel %vm15_vm2, %v9608_v63, %v4738_v0  ;;  %v9640_v63 = vld [vmem:[%s16975_s0 + $0x7] ss:$16 sm:%s4924_s4]   ;;  %s4964_s25 = smov 48  ;;  %s5028_s4 = smov 12 }
 0x27a   :  { %v9618_v2 = vld [vmem:[%s16975_s0 + $0x388] ss:$16 sm:%s4799_s26]   ;;  %4744 = vrot.lane.b32.xlu0 %v4743_v46, %s10356_s8  ;;  %s5015_s26 = smov 192  ;;  %v3964_v39 = vpop.permute.xlu0 %3963  }
 0x27b   :  { %v4802_v3 = vsel %vm7_vm0, %v9618_v2, %v9617_v42  ;;  %v9619_v28 = vld [vmem:[%s16975_s0 + $0x388] ss:$16 sm:%s4804_s2]   ;;  %s4819_s2 = smov 3  ;;  %3967 = vst.msk [vmem:[#allocation0 + $0x8] sm:$0xff] %vm3828_vm10, %v3964_v39   ;;  %v4033_v47 = vpop.permute.xlu1 %4032  }
 0x27c   :  { %v9620_v4 = vld [vmem:[%s16975_s0 + $0x388] ss:$16 sm:%s4809_s27]   ;;  %v4807_v7 = vsel %vm11_vm1, %v9619_v28, %v4802_v3  ;;  %s4868_s27 = smov 12  ;;  %4036 = vst.msk [vmem:[#allocation0 + $0x68] sm:$0xff] %vm3828_vm10, %v4033_v47  }
 0x27d   :  { %v9613_v8 = vld [vmem:[%s16975_s0 + $0x188] ss:$16 sm:%s4773_s5]   ;;  %v4812_v9 = vsel %vm15_vm2, %v9620_v4, %v4807_v7  ;;  %v9652_v4 = vld [vmem:[%s16975_s0 + $0x607] ss:$16 sm:%s4992_s15]   ;;  %s5084_s5 = smov 192  ;;  %s5051_s15 = smov 12 }
 0x27e   :  { %v9614_v16 = vld [vmem:[%s16975_s0 + $0x188] ss:$16 sm:%s4776_s10]   ;;  %4813 = vrot.lane.b32.xlu1 %v4812_v9, %s10356_s8  ;;  %s5102_s10 = smov 48 }
 0x27f   :  { %v9615_v54 = vld [vmem:[%s16975_s0 + $0x188] ss:$16 sm:%s4781_s12]   ;;  %v4779_v10 = vsel %vm7_vm0, %v9614_v16, %v9613_v8  ;;  %s4933_s12 = smov 3  ;;  %v9645_v8 = vld [vmem:[%s16975_s0 + $0x407] ss:$16 sm:%s4956_s21]   ;;  %v4010_v53 = vpop.permute.xlu0 %4009   ;;  %s5263_s21 = smov 48 }
 0x280   :  { %v9616_v11 = vld [vmem:[%s16975_s0 + $0x188] ss:$16 sm:%s4786_s19]   ;;  %v4784_v36 = vsel %vm11_vm1, %v9615_v54, %v4779_v10  ;;  %s4891_s19 = smov 12  ;;  %v9641_v50 = vld [vmem:[%s16975_s0 + $0x207] ss:$16 sm:%s4933_s12]   ;;  %4013 = vst.msk [vmem:[#allocation0 + $0x48] sm:$0xff] %vm3828_vm10, %v4010_v53  }
 0x281   :  { %v9625_v57 = vld [vmem:[%s16975_s0 + $0x788] ss:$16 sm:%s4842_s20]   ;;  %v4789_v17 = vsel %vm15_vm2, %v9616_v11, %v4784_v36  ;;  %v9647_v54 = vld [vmem:[%s16975_s0 + $0x407] ss:$16 sm:%s4964_s25]   ;;  %s5010_s20 = smov 48  ;;  %s5117_s25 = smov 3 }
 0x282   :  { %v9626_v13 = vld [vmem:[%s16975_s0 + $0x788] ss:$16 sm:%s4845_s22]   ;;  %4790 = vrot.lane.b32.xlu0 %v4789_v17, %s10356_s8  ;;  %s5061_s22 = smov 192  ;;  %s5153_s12 = smov 192 }
 0x283   :  { %v4848_v18 = vsel %vm7_vm0, %v9626_v13, %v9625_v57  ;;  %v9627_v19 = vld [vmem:[%s16975_s0 + $0x788] ss:$16 sm:%s4850_s6]   ;;  %s4865_s6 = smov 3  ;;  %v9648_v11 = vld [vmem:[%s16975_s0 + $0x407] ss:$16 sm:%s4969_s30]   ;;  %s5074_s30 = smov 12  ;;  %v4079_v44 = vpop.permute.xlu1 %4078  }
 0x284   :  { %v9628_v20 = vld [vmem:[%s16975_s0 + $0x788] ss:$16 sm:%s4855_s28]   ;;  %v4853_v23 = vsel %vm11_vm1, %v9627_v19, %v4848_v18  ;;  %s4914_s28 = smov 12  ;;  %v9658_v13 = vld [vmem:[%s16975_s0 + $0xa07] ss:$16 sm:%s5028_s4]   ;;  %4082 = vst.msk [vmem:[#allocation0 + $0xa8] sm:$0xff] %vm3828_vm10, %v4079_v44  }
 0x285   :  { %v9621_v26 = vld [vmem:[%s16975_s0 + $0x588] ss:$16 sm:%s4819_s2]   ;;  %v4858_v27 = vsel %vm15_vm2, %v9628_v20, %v4853_v23  ;;  %v9638_v61 = vld [vmem:[%s16975_s0 + $0x7] ss:$16 sm:%s4914_s28]   ;;  %s5125_s2 = smov 48  ;;  %s5176_s28 = smov 192 }
 0x286   :  { %v9622_v49 = vld [vmem:[%s16975_s0 + $0x588] ss:$16 sm:%s4822_s7]   ;;  %4859 = vrot.lane.b32.xlu1 %v4858_v27, %s10356_s8  ;;  %s4979_s7 = smov 3  ;;  %s5245_s4 = smov 192 }
 0x287   :  { %v9623_v24 = vld [vmem:[%s16975_s0 + $0x588] ss:$16 sm:%s4827_s11]   ;;  %v4825_v30 = vsel %vm7_vm0, %v9622_v49, %v9621_v26  ;;  %s4982_s11 = smov 12  ;;  %v9649_v42 = vld [vmem:[%s16975_s0 + $0x607] ss:$16 sm:%s4979_s7]   ;;  %s5148_s7 = smov 48  ;;  %v4056_v22 = vpop.permute.xlu0 %4055  }
 0x288   :  { %v9624_v32 = vld [vmem:[%s16975_s0 + $0x588] ss:$16 sm:%s4832_s14]   ;;  %v4830_v33 = vsel %vm11_vm1, %v9623_v24, %v4825_v30  ;;  %s4936_s14 = smov 12  ;;  %v9650_v2 = vld [vmem:[%s16975_s0 + $0x607] ss:$16 sm:%s4982_s11]   ;;  %4059 = vst.msk [vmem:[#allocation0 + $0x88] sm:$0xff] %vm3828_vm10, %v4056_v22  }
 0x289   :  { %v9633_v34 = vld [vmem:[%s16975_s0 + $0xb88] ss:$16 sm:%s4888_s17]   ;;  %v4835_v35 = vsel %vm15_vm2, %v9624_v32, %v4830_v33  ;;  %v9642_v51 = vld [vmem:[%s16975_s0 + $0x207] ss:$16 sm:%s4936_s14]   ;;  %s4987_s14 = smov 48  ;;  %v4985_v3 = vsel %vm7_vm0, %v9650_v2, %v9649_v42  ;;  %s5056_s17 = smov 48 }
 0x28a   :  { %v9634_v25 = vld [vmem:[%s16975_s0 + $0xb88] ss:$16 sm:%s4891_s19]   ;;  %4836 = vrot.lane.b32.xlu0 %v4835_v35, %s10356_s8  ;;  %v4939_v14 = vsel %vm7_vm0, %v9642_v51, %v9641_v50  ;;  %s5107_s19 = smov 192  ;;  %s5199_s11 = smov 192 }
 0x28b   :  { %v4894_v60 = vsel %vm7_vm0, %v9634_v25, %v9633_v34  ;;  %v9635_v1 = vld [vmem:[%s16975_s0 + $0xb88] ss:$16 sm:%s4896_s23]   ;;  %s4911_s23 = smov 3  ;;  %v4944_v55 = vsel %vm11_vm1, %v9643_v31, %v4939_v14  ;;  %v9651_v28 = vld [vmem:[%s16975_s0 + $0x607] ss:$16 sm:%s4987_s14]   ;;  %s5002_s14 = smov 3  ;;  %v4125_v12 = vpop.permute.xlu1 %4124  }
 0x28c   :  { %v9636_v38 = vld [vmem:[%s16975_s0 + $0xb88] ss:$16 sm:%s4901_s24]   ;;  %v4899_v59 = vsel %vm11_vm1, %v9635_v1, %v4894_v60  ;;  %v9637_v56 = vld [vmem:[%s16975_s0 + $0x7] ss:$16 sm:%s4911_s23]   ;;  %v4949_v58 = vsel %vm15_vm2, %v9644_v52, %v4944_v55  ;;  %s4959_s24 = smov 12  ;;  %v4990_v7 = vsel %vm11_vm1, %v9651_v28, %v4985_v3  ;;  %s5217_s23 = smov 48 }
 0x28d   :  { %v9629_v40 = vld [vmem:[%s16975_s0 + $0x988] ss:$16 sm:%s4865_s6]   ;;  %v4904_v41 = vsel %vm15_vm2, %v9636_v38, %v4899_v59  ;;  %v4917_v5 = vsel %vm7_vm0, %v9638_v61, %v9637_v56  ;;  %v4995_v9 = vsel %vm15_vm2, %v9652_v4, %v4990_v7  ;;  %v9646_v16 = vld [vmem:[%s16975_s0 + $0x407] ss:$16 sm:%s4959_s24]   ;;  %s5171_s6 = smov 48  ;;  %s5222_s24 = smov 192 }
 0x28e   :  { %v9630_v43 = vld [vmem:[%s16975_s0 + $0x988] ss:$16 sm:%s4868_s27]   ;;  %4905 = vrot.lane.b32.xlu1 %v4904_v41, %s10356_s8  ;;  %v4922_v0 = vsel %vm11_vm1, %v9639_v62, %v4917_v5  ;;  %v4962_v10 = vsel %vm7_vm0, %v9646_v16, %v9645_v8  ;;  %s5130_s27 = smov 192  ;;  %4128 = vst.msk [vmem:[#allocation0 + $0x30] sm:$0xff] %vm3828_vm10, %v4125_v12  }
 0x28f   :  { %v9631_v45 = vld [vmem:[%s16975_s0 + $0x988] ss:$16 sm:%s4873_s3]   ;;  %v4871_v37 = vsel %vm7_vm0, %v9630_v43, %v9629_v40  ;;  %v4927_v46 = vsel %vm15_vm2, %v9640_v63, %v4922_v0  ;;  %s5025_s3 = smov 3  ;;  %v4967_v36 = vsel %vm11_vm1, %v9647_v54, %v4962_v10  ;;  %v9660_v20 = vld [vmem:[%s16975_s0 + $0xa07] ss:$16 sm:%s5038_s13]   ;;  %s5097_s13 = smov 12  ;;  %v4102_v21 = vpop.permute.xlu0 %4101  }
 0x290   :  { %v9632_v48 = vld [vmem:[%s16975_s0 + $0x988] ss:$16 sm:%s4878_s9]   ;;  %v4876_v15 = vsel %vm11_vm1, %v9631_v45, %v4871_v37  ;;  %s5033_s9 = smov 48  ;;  %v9657_v57 = vld [vmem:[%s16975_s0 + $0xa07] ss:$16 sm:%s5025_s3]   ;;  %v4972_v17 = vsel %vm15_vm2, %v9648_v11, %v4967_v36  ;;  %s5194_s3 = smov 48 }
 0x291   :  { %v4881_v6 = vsel %vm15_vm2, %v9632_v48, %v4876_v15  ;;  %v5031_v18 = vsel %vm7_vm0, %v9658_v13, %v9657_v57  ;;  %v9659_v19 = vld [vmem:[%s16975_s0 + $0xa07] ss:$16 sm:%s5033_s9]   ;;  %s5048_s9 = smov 3  ;;  %4105 = vst.msk [vmem:[#allocation0 + $0x10] sm:$0xff] %vm3828_vm10, %v4102_v21  }
 0x292   :  { %4882 = vrot.lane.b32.xlu0 %v4881_v6, %s10356_s8  ;;  %4950 = vrot.lane.b32.xlu1 %v4949_v58, %s10357_s16  ;;  %v5036_v23 = vsel %vm11_vm1, %v9659_v19, %v5031_v18  ;;  %v9653_v26 = vld [vmem:[%s16975_s0 + $0x807] ss:$16 sm:%s5002_s14]   ;;  %s5079_s8 = smov 48  ;;  %s5309_s14 = smov 48 }
 0x293   :  { %v5041_v27 = vsel %vm15_vm2, %v9660_v20, %v5036_v23  ;;  %v9654_v49 = vld [vmem:[%s16975_s0 + $0x807] ss:$16 sm:%s5005_s18]   ;;  %s5268_s18 = smov 192  ;;  %v4171_v29 = vpop.permute.xlu1 %4170  }
 0x294   :  { %v9655_v24 = vld [vmem:[%s16975_s0 + $0x807] ss:$16 sm:%s5010_s20]   ;;  %v5008_v30 = vsel %vm7_vm0, %v9654_v49, %v9653_v26  ;;  %s5163_s20 = smov 3  ;;  %4174 = vst.msk [vmem:[#allocation0 + $0x70] sm:$0xff] %vm3828_vm10, %v4171_v29  }
 0x295   :  { %v9656_v32 = vld [vmem:[%s16975_s0 + $0x807] ss:$16 sm:%s5015_s26]   ;;  %v5013_v33 = vsel %vm11_vm1, %v9655_v24, %v5008_v30  ;;  %s5120_s26 = smov 12 }
 0x296   :  { %4928 = vrot.lane.b32.xlu0 %v4927_v46, %s10357_s16  ;;  %4996 = vrot.lane.b32.xlu1 %v4995_v9, %s10357_s16  ;;  %v9665_v34 = vld [vmem:[%s16975_s0 + $0x287] ss:$16 sm:%s5071_s29]   ;;  %v5018_v35 = vsel %vm15_vm2, %v9656_v32, %v5013_v33  ;;  %s5240_s29 = smov 48 }
 0x297   :  { %v9666_v25 = vld [vmem:[%s16975_s0 + $0x287] ss:$16 sm:%s5074_s30]   ;;  %v4148_v39 = vpop.permute.xlu0 %4147   ;;  %s5291_s30 = smov 192 }
 0x298   :  { %v5077_v60 = vsel %vm7_vm0, %v9666_v25, %v9665_v34  ;;  %v9667_v1 = vld [vmem:[%s16975_s0 + $0x287] ss:$16 sm:%s5079_s8]   ;;  %s5094_s8 = smov 3  ;;  %4151 = vst.msk [vmem:[#allocation0 + $0x50] sm:$0xff] %vm3828_vm10, %v4148_v39  }
 0x299   :  { %v9668_v38 = vld [vmem:[%s16975_s0 + $0x287] ss:$16 sm:%s5084_s5]   ;;  %v5082_v59 = vsel %vm11_vm1, %v9667_v1, %v5077_v60  ;;  %s5143_s5 = smov 12 }
 0x29a   :  { %4973 = vrot.lane.b32.xlu0 %v4972_v17, %s10357_s16  ;;  %5042 = vrot.lane.b32.xlu1 %v5041_v27, %s10357_s16  ;;  %v9661_v40 = vld [vmem:[%s16975_s0 + $0x87] ss:$16 sm:%s5048_s9]   ;;  %v5087_v41 = vsel %vm15_vm2, %v9668_v38, %v5082_v59  ;;  %s5355_s9 = smov 48 }
 0x29b   :  { %v9662_v43 = vld [vmem:[%s16975_s0 + $0x87] ss:$16 sm:%s5051_s15]   ;;  %s5314_s15 = smov 192  ;;  %v4217_v47 = vpop.permute.xlu1 %4216  }
 0x29c   :  { %v9663_v45 = vld [vmem:[%s16975_s0 + $0x87] ss:$16 sm:%s5056_s17]   ;;  %v5054_v37 = vsel %vm7_vm0, %v9662_v43, %v9661_v40  ;;  %s5209_s17 = smov 3  ;;  %4220 = vst.msk [vmem:[#allocation0 + $0xb0] sm:$0xff] %vm3828_vm10, %v4217_v47  }
 0x29d   :  { %v9664_v48 = vld [vmem:[%s16975_s0 + $0x87] ss:$16 sm:%s5061_s22]   ;;  %v5059_v15 = vsel %vm11_vm1, %v9663_v45, %v5054_v37  ;;  %s5166_s22 = smov 12 }
 0x29e   :  { %5019 = vrot.lane.b32.xlu0 %v5018_v35, %s10357_s16  ;;  %5088 = vrot.lane.b32.xlu1 %v5087_v41, %s10357_s16  ;;  %v9673_v50 = vld [vmem:[%s16975_s0 + $0x687] ss:$16 sm:%s5117_s25]   ;;  %v5064_v6 = vsel %vm15_vm2, %v9664_v48, %v5059_v15  ;;  %s5286_s25 = smov 48 }
 0x29f   :  { %v9674_v51 = vld [vmem:[%s16975_s0 + $0x687] ss:$16 sm:%s5120_s26]   ;;  %v4194_v53 = vpop.permute.xlu0 %4193   ;;  %s5337_s26 = smov 192 }
 0x2a0   :  { %v5123_v14 = vsel %vm7_vm0, %v9674_v51, %v9673_v50  ;;  %v9675_v31 = vld [vmem:[%s16975_s0 + $0x687] ss:$16 sm:%s5125_s2]   ;;  %s5140_s2 = smov 3  ;;  %4197 = vst.msk [vmem:[#allocation0 + $0x90] sm:$0xff] %vm3828_vm10, %v4194_v53  }
 0x2a1   :  { %v9676_v52 = vld [vmem:[%s16975_s0 + $0x687] ss:$16 sm:%s5130_s27]   ;;  %v5128_v55 = vsel %vm11_vm1, %v9675_v31, %v5123_v14  ;;  %s5189_s27 = smov 12 }
 0x2a2   :  { %5065 = vrot.lane.b32.xlu0 %v5064_v6, %s10357_s16  ;;  %v9669_v56 = vld [vmem:[%s16975_s0 + $0x487] ss:$16 sm:%s5094_s8]   ;;  %v5133_v58 = vsel %vm15_vm2, %v9676_v52, %v5128_v55  ;;  %s5401_s8 = smov 48 }
 0x2a3   :  { %v9670_v61 = vld [vmem:[%s16975_s0 + $0x487] ss:$16 sm:%s5097_s13]   ;;  %5134 = vrot.lane.b32.xlu1 %v5133_v58, %s10357_s16  ;;  %s5360_s13 = smov 192  ;;  %v4263_v44 = vpop.permute.xlu1 %4262  }
 0x2a4   :  { %v9671_v62 = vld [vmem:[%s16975_s0 + $0x487] ss:$16 sm:%s5102_s10]   ;;  %v5100_v5 = vsel %vm7_vm0, %v9670_v61, %v9669_v56  ;;  %s5255_s10 = smov 3  ;;  %4266 = vst.msk [vmem:[#allocation0 + $0x38] sm:$0xff] %vm3828_vm10, %v4263_v44  }
 0x2a5   :  { %v9672_v63 = vld [vmem:[%s16975_s0 + $0x487] ss:$16 sm:%s5107_s19]   ;;  %v5105_v0 = vsel %vm11_vm1, %v9671_v62, %v5100_v5  ;;  %s5212_s19 = smov 12 }
 0x2a6   :  { %v9681_v42 = vld [vmem:[%s16975_s0 + $0xa87] ss:$16 sm:%s5163_s20]   ;;  %v5110_v46 = vsel %vm15_vm2, %v9672_v63, %v5105_v0  ;;  %s5332_s20 = smov 48 }
 0x2a7   :  { %v9682_v2 = vld [vmem:[%s16975_s0 + $0xa87] ss:$16 sm:%s5166_s22]   ;;  %5111 = vrot.lane.b32.xlu0 %v5110_v46, %s10357_s16  ;;  %v4240_v22 = vpop.permute.xlu0 %4239   ;;  %s5383_s22 = smov 192 }
 0x2a8   :  { %v5169_v3 = vsel %vm7_vm0, %v9682_v2, %v9681_v42  ;;  %v9683_v28 = vld [vmem:[%s16975_s0 + $0xa87] ss:$16 sm:%s5171_s6]   ;;  %s5186_s6 = smov 3  ;;  %4243 = vst.msk [vmem:[#allocation0 + $0x18] sm:$0xff] %vm3828_vm10, %v4240_v22  }
 0x2a9   :  { %v9684_v4 = vld [vmem:[%s16975_s0 + $0xa87] ss:$16 sm:%s5176_s28]   ;;  %v5174_v7 = vsel %vm11_vm1, %v9683_v28, %v5169_v3  ;;  %s5235_s28 = smov 12 }
 0x2aa   :  { %v9677_v8 = vld [vmem:[%s16975_s0 + $0x887] ss:$16 sm:%s5140_s2]   ;;  %v5179_v9 = vsel %vm15_vm2, %v9684_v4, %v5174_v7  ;;  %s5447_s2 = smov 48 }
 0x2ab   :  { %v9678_v16 = vld [vmem:[%s16975_s0 + $0x887] ss:$16 sm:%s5143_s5]   ;;  %5180 = vrot.lane.b32.xlu1 %v5179_v9, %s10357_s16  ;;  %s5406_s5 = smov 192  ;;  %v4309_v12 = vpop.permute.xlu1 %4308  }
 0x2ac   :  { %v9679_v54 = vld [vmem:[%s16975_s0 + $0x887] ss:$16 sm:%s5148_s7]   ;;  %v5146_v10 = vsel %vm7_vm0, %v9678_v16, %v9677_v8  ;;  %s5301_s7 = smov 3  ;;  %4312 = vst.msk [vmem:[#allocation0 + $0x78] sm:$0xff] %vm3828_vm10, %v4309_v12  }
 0x2ad   :  { %v9680_v11 = vld [vmem:[%s16975_s0 + $0x887] ss:$16 sm:%s5153_s12]   ;;  %v5151_v36 = vsel %vm11_vm1, %v9679_v54, %v5146_v10  ;;  %s5258_s12 = smov 12 }
 0x2ae   :  { %v9689_v57 = vld [vmem:[%s16975_s0 + $0x307] ss:$16 sm:%s5209_s17]   ;;  %v5156_v17 = vsel %vm15_vm2, %v9680_v11, %v5151_v36  ;;  %s5378_s17 = smov 48 }
 0x2af   :  { %v9690_v13 = vld [vmem:[%s16975_s0 + $0x307] ss:$16 sm:%s5212_s19]   ;;  %5157 = vrot.lane.b32.xlu0 %v5156_v17, %s10357_s16  ;;  %v4286_v21 = vpop.permute.xlu0 %4285   ;;  %s5429_s19 = smov 192 }
 0x2b0   :  { %v5215_v18 = vsel %vm7_vm0, %v9690_v13, %v9689_v57  ;;  %v9691_v19 = vld [vmem:[%s16975_s0 + $0x307] ss:$16 sm:%s5217_s23]   ;;  %s5232_s23 = smov 3  ;;  %4289 = vst.msk [vmem:[#allocation0 + $0x58] sm:$0xff] %vm3828_vm10, %v4286_v21  }
 0x2b1   :  { %v9692_v20 = vld [vmem:[%s16975_s0 + $0x307] ss:$16 sm:%s5222_s24]   ;;  %v5220_v23 = vsel %vm11_vm1, %v9691_v19, %v5215_v18  ;;  %s5281_s24 = smov 12 }
 0x2b2   :  { %v9685_v26 = vld [vmem:[%s16975_s0 + $0x107] ss:$16 sm:%s5186_s6]   ;;  %v5225_v27 = vsel %vm15_vm2, %v9692_v20, %v5220_v23  ;;  %s5492_s6 = smov 48 }
 0x2b3   :  { %v9686_v49 = vld [vmem:[%s16975_s0 + $0x107] ss:$16 sm:%s5189_s27]   ;;  %5226 = vrot.lane.b32.xlu1 %v5225_v27, %s10357_s16  ;;  %s5452_s27 = smov 192  ;;  %v4355_v29 = vpop.permute.xlu1 %4354  }
 0x2b4   :  { %v9687_v24 = vld [vmem:[%s16975_s0 + $0x107] ss:$16 sm:%s5194_s3]   ;;  %v5192_v30 = vsel %vm7_vm0, %v9686_v49, %v9685_v26  ;;  %s5347_s3 = smov 3  ;;  %4358 = vst.msk [vmem:[#allocation0 + $0xb8] sm:$0xff] %vm3828_vm10, %v4355_v29  }
 0x2b5   :  { %v9688_v32 = vld [vmem:[%s16975_s0 + $0x107] ss:$16 sm:%s5199_s11]   ;;  %v5197_v33 = vsel %vm11_vm1, %v9687_v24, %v5192_v30  ;;  %s5304_s11 = smov 12 }
 0x2b6   :  { %v9697_v34 = vld [vmem:[%s16975_s0 + $0x707] ss:$16 sm:%s5255_s10]   ;;  %v5202_v35 = vsel %vm15_vm2, %v9688_v32, %v5197_v33  ;;  %s5424_s10 = smov 48 }
 0x2b7   :  { %v9698_v25 = vld [vmem:[%s16975_s0 + $0x707] ss:$16 sm:%s5258_s12]   ;;  %5203 = vrot.lane.b32.xlu0 %v5202_v35, %s10357_s16  ;;  %v4332_v39 = vpop.permute.xlu0 %4331   ;;  %v4400_v47 = vpop.permute.xlu1 %4399   ;;  %s5475_s12 = smov 192 }
 0x2b8   :  { %v5261_v60 = vsel %vm7_vm0, %v9698_v25, %v9697_v34  ;;  %v9699_v1 = vld [vmem:[%s16975_s0 + $0x707] ss:$16 sm:%s5263_s21]   ;;  %s5278_s21 = smov 3  ;;  %4335 = vst.msk [vmem:[#allocation0 + $0x98] sm:$0xff] %vm3828_vm10, %v4332_v39  }
 0x2b9   :  { %v9700_v38 = vld [vmem:[%s16975_s0 + $0x707] ss:$16 sm:%s5268_s18]   ;;  %v5266_v59 = vsel %vm11_vm1, %v9699_v1, %v5261_v60  ;;  %s5327_s18 = smov 12  ;;  %4403 = vst.msk [vmem:[#allocation0 + $0x20] sm:$0xff] %vm4379_vm11, %v4400_v47  }
 0x2ba   :  { %v9693_v40 = vld [vmem:[%s16975_s0 + $0x507] ss:$16 sm:%s5232_s23]   ;;  %v5271_v41 = vsel %vm15_vm2, %v9700_v38, %v5266_v59  ;;  %s5543_s23 = smov 192 }
 0x2bb   :  { %v9694_v43 = vld [vmem:[%s16975_s0 + $0x507] ss:$16 sm:%s5235_s28]   ;;  %5272 = vrot.lane.b32.xlu1 %v5271_v41, %s10357_s16  ;;  %s5497_s28 = smov 192  ;;  %v4378_v53 = vpop.permute.xlu0 %4377   ;;  %v4446_v44 = vpop.permute.xlu1 %4445  }
 0x2bc   :  { %v9695_v45 = vld [vmem:[%s16975_s0 + $0x507] ss:$16 sm:%s5240_s29]   ;;  %v5238_v37 = vsel %vm7_vm0, %v9694_v43, %v9693_v40  ;;  %s5393_s29 = smov 3  ;;  %4380 = vst.msk [vmem:[#allocation0] sm:$0xff] %vm4379_vm11, %v4378_v53   ;;  %4449 = vst.msk [vmem:[#allocation0 + $0x60] sm:$0xff] %vm4379_vm11, %v4446_v44  }
 0x2bd   :  { %v9696_v48 = vld [vmem:[%s16975_s0 + $0x507] ss:$16 sm:%s5245_s4]   ;;  %v5243_v15 = vsel %vm11_vm1, %v9695_v45, %v5238_v37  ;;  %s5350_s4 = smov 12 }
 0x2be   :  { %v9705_v50 = vld [vmem:[%s16975_s0 + $0xb07] ss:$16 sm:%s5301_s7]   ;;  %v5248_v6 = vsel %vm15_vm2, %v9696_v48, %v5243_v15  ;;  %s5470_s7 = smov 48 }
 0x2bf   :  { %v9706_v51 = vld [vmem:[%s16975_s0 + $0xb07] ss:$16 sm:%s5304_s11]   ;;  %5249 = vrot.lane.b32.xlu0 %v5248_v6, %s10357_s16  ;;  %s5520_s11 = smov 192  ;;  %v4423_v22 = vpop.permute.xlu0 %4422   ;;  %v4492_v12 = vpop.permute.xlu1 %4491  }
 0x2c0   :  { %v5307_v14 = vsel %vm7_vm0, %v9706_v51, %v9705_v50  ;;  %v9707_v31 = vld [vmem:[%s16975_s0 + $0xb07] ss:$16 sm:%s5309_s14]   ;;  %s5324_s14 = smov 3  ;;  %4426 = vst.msk [vmem:[#allocation0 + $0x40] sm:$0xff] %vm4379_vm11, %v4423_v22   ;;  %4495 = vst.msk [vmem:[#allocation0 + $0xa0] sm:$0xff] %vm4379_vm11, %v4492_v12  }
 0x2c1   :  { %v9708_v52 = vld [vmem:[%s16975_s0 + $0xb07] ss:$16 sm:%s5314_s15]   ;;  %v5312_v55 = vsel %vm11_vm1, %v9707_v31, %v5307_v14  ;;  %s5373_s15 = smov 12  ;;  %v9739_v31 = vld [vmem:[%s16975_s0 + $0x206] ss:$16 sm:%s5492_s6]   ;;  %s5507_s6 = smov 3 }
 0x2c2   :  { %v9701_v56 = vld [vmem:[%s16975_s0 + $0x907] ss:$16 sm:%s5278_s21]   ;;  %v5317_v58 = vsel %vm15_vm2, %v9708_v52, %v5312_v55  ;;  %v9740_v52 = vld [vmem:[%s16975_s0 + $0x206] ss:$16 sm:%s5497_s28]   ;;  %s5589_s21 = smov 192  ;;  %s5556_s28 = smov 12 }
 0x2c3   :  { %v9702_v61 = vld [vmem:[%s16975_s0 + $0x907] ss:$16 sm:%s5281_s24]   ;;  %5318 = vrot.lane.b32.xlu1 %v5317_v58, %s10357_s16  ;;  %s10358_s24 = smov 12   ;;  %v4469_v21 = vpop.permute.xlu0 %4468   ;;  %v4538_v29 = vpop.permute.xlu1 %4537  }
 0x2c4   :  { %v9703_v62 = vld [vmem:[%s16975_s0 + $0x907] ss:$16 sm:%s5286_s25]   ;;  %v5284_v5 = vsel %vm7_vm0, %v9702_v61, %v9701_v56  ;;  %s5439_s25 = smov 3  ;;  %4472 = vst.msk [vmem:[#allocation0 + $0x80] sm:$0xff] %vm4379_vm11, %v4469_v21   ;;  %4541 = vst.msk [vmem:[#allocation0 + $0x28] sm:$0xff] %vm4379_vm11, %v4538_v29  }
 0x2c5   :  { %v9704_v63 = vld [vmem:[%s16975_s0 + $0x907] ss:$16 sm:%s5291_s30]   ;;  %v5289_v0 = vsel %vm11_vm1, %v9703_v62, %v5284_v5  ;;  %s5396_s30 = smov 12  ;;  %v9735_v62 = vld [vmem:[%s16975_s0 + $0x6] ss:$16 sm:%s5470_s7]   ;;  %s5622_s7 = smov 3 }
 0x2c6   :  { %v9713_v42 = vld [vmem:[%s16975_s0 + $0x387] ss:$16 sm:%s5347_s3]   ;;  %v5294_v46 = vsel %vm15_vm2, %v9704_v63, %v5289_v0  ;;  %v9736_v63 = vld [vmem:[%s16975_s0 + $0x6] ss:$16 sm:%s5475_s12]   ;;  %s5515_s3 = smov 48  ;;  %s5579_s12 = smov 12 }
 0x2c7   :  { %v9714_v2 = vld [vmem:[%s16975_s0 + $0x387] ss:$16 sm:%s5350_s4]   ;;  %5295 = vrot.lane.b32.xlu0 %v5294_v46, %s10357_s16  ;;  %s5566_s4 = smov 192  ;;  %v4515_v39 = vpop.permute.xlu0 %4514  }
 0x2c8   :  { %v5353_v3 = vsel %vm7_vm0, %v9714_v2, %v9713_v42  ;;  %v9715_v28 = vld [vmem:[%s16975_s0 + $0x387] ss:$16 sm:%s5355_s9]   ;;  %s5370_s9 = smov 3  ;;  %4518 = vst.msk [vmem:[#allocation0 + $0x8] sm:$0xff] %vm4379_vm11, %v4515_v39   ;;  %v4584_v47 = vpop.permute.xlu1 %4583  }
 0x2c9   :  { %v9716_v4 = vld [vmem:[%s16975_s0 + $0x387] ss:$16 sm:%s5360_s13]   ;;  %v5358_v7 = vsel %vm11_vm1, %v9715_v28, %v5353_v3  ;;  %s5419_s13 = smov 12  ;;  %4587 = vst.msk [vmem:[#allocation0 + $0x68] sm:$0xff] %vm4379_vm11, %v4584_v47  }
 0x2ca   :  { %v9709_v8 = vld [vmem:[%s16975_s0 + $0x187] ss:$16 sm:%s5324_s14]   ;;  %v5363_v9 = vsel %vm15_vm2, %v9716_v4, %v5358_v7  ;;  %v9748_v4 = vld [vmem:[%s16975_s0 + $0x606] ss:$16 sm:%s5543_s23]   ;;  %s5635_s14 = smov 192  ;;  %s5602_s23 = smov 12 }
 0x2cb   :  { %v9710_v16 = vld [vmem:[%s16975_s0 + $0x187] ss:$16 sm:%s5327_s18]   ;;  %5364 = vrot.lane.b32.xlu1 %v5363_v9, %s10357_s16  ;;  %s5653_s18 = smov 48 }
 0x2cc   :  { %v9711_v54 = vld [vmem:[%s16975_s0 + $0x187] ss:$16 sm:%s5332_s20]   ;;  %v5330_v10 = vsel %vm7_vm0, %v9710_v16, %v9709_v8  ;;  %s5484_s20 = smov 3  ;;  %v9741_v8 = vld [vmem:[%s16975_s0 + $0x406] ss:$16 sm:%s5507_s6]   ;;  %v4561_v53 = vpop.permute.xlu0 %4560   ;;  %s5814_s6 = smov 48 }
 0x2cd   :  { %v9712_v11 = vld [vmem:[%s16975_s0 + $0x187] ss:$16 sm:%s5337_s26]   ;;  %v5335_v36 = vsel %vm11_vm1, %v9711_v54, %v5330_v10  ;;  %s5442_s26 = smov 12  ;;  %v9737_v50 = vld [vmem:[%s16975_s0 + $0x206] ss:$16 sm:%s5484_s20]   ;;  %4564 = vst.msk [vmem:[#allocation0 + $0x48] sm:$0xff] %vm4379_vm11, %v4561_v53  }
 0x2ce   :  { %v9721_v57 = vld [vmem:[%s16975_s0 + $0x787] ss:$16 sm:%s5393_s29]   ;;  %v5340_v17 = vsel %vm15_vm2, %v9712_v11, %v5335_v36  ;;  %v9743_v54 = vld [vmem:[%s16975_s0 + $0x406] ss:$16 sm:%s5515_s3]   ;;  %s5561_s29 = smov 48  ;;  %s5668_s3 = smov 3 }
 0x2cf   :  { %v9722_v13 = vld [vmem:[%s16975_s0 + $0x787] ss:$16 sm:%s5396_s30]   ;;  %5341 = vrot.lane.b32.xlu0 %v5340_v17, %s10357_s16  ;;  %s5612_s30 = smov 192  ;;  %s5704_s20 = smov 192 }
 0x2d0   :  { %v5399_v18 = vsel %vm7_vm0, %v9722_v13, %v9721_v57  ;;  %v9723_v19 = vld [vmem:[%s16975_s0 + $0x787] ss:$16 sm:%s5401_s8]   ;;  %s5416_s8 = smov 3  ;;  %v9744_v11 = vld [vmem:[%s16975_s0 + $0x406] ss:$16 sm:%s5520_s11]   ;;  %s5625_s11 = smov 12  ;;  %v4630_v44 = vpop.permute.xlu1 %4629  }
 0x2d1   :  { %v9724_v20 = vld [vmem:[%s16975_s0 + $0x787] ss:$16 sm:%s5406_s5]   ;;  %v5404_v23 = vsel %vm11_vm1, %v9723_v19, %v5399_v18  ;;  %s5465_s5 = smov 12  ;;  %v9754_v13 = vld [vmem:[%s16975_s0 + $0xa06] ss:$16 sm:%s5579_s12]   ;;  %4633 = vst.msk [vmem:[#allocation0 + $0xa8] sm:$0xff] %vm4379_vm11, %v4630_v44  }
 0x2d2   :  { %v9717_v26 = vld [vmem:[%s16975_s0 + $0x587] ss:$16 sm:%s5370_s9]   ;;  %v5409_v27 = vsel %vm15_vm2, %v9724_v20, %v5404_v23  ;;  %v9734_v61 = vld [vmem:[%s16975_s0 + $0x6] ss:$16 sm:%s5465_s5]   ;;  %s5676_s9 = smov 48  ;;  %s5727_s5 = smov 192 }
 0x2d3   :  { %v9718_v49 = vld [vmem:[%s16975_s0 + $0x587] ss:$16 sm:%s5373_s15]   ;;  %5410 = vrot.lane.b32.xlu1 %v5409_v27, %s10357_s16  ;;  %s5530_s15 = smov 3  ;;  %s5796_s12 = smov 192 }
 0x2d4   :  { %v9719_v24 = vld [vmem:[%s16975_s0 + $0x587] ss:$16 sm:%s5378_s17]   ;;  %v5376_v30 = vsel %vm7_vm0, %v9718_v49, %v9717_v26  ;;  %s5533_s17 = smov 12  ;;  %v9745_v42 = vld [vmem:[%s16975_s0 + $0x606] ss:$16 sm:%s5530_s15]   ;;  %s5699_s15 = smov 48  ;;  %v4607_v22 = vpop.permute.xlu0 %4606  }
 0x2d5   :  { %v9720_v32 = vld [vmem:[%s16975_s0 + $0x587] ss:$16 sm:%s5383_s22]   ;;  %v5381_v33 = vsel %vm11_vm1, %v9719_v24, %v5376_v30  ;;  %s5487_s22 = smov 12  ;;  %v9746_v2 = vld [vmem:[%s16975_s0 + $0x606] ss:$16 sm:%s5533_s17]   ;;  %4610 = vst.msk [vmem:[#allocation0 + $0x88] sm:$0xff] %vm4379_vm11, %v4607_v22  }
 0x2d6   :  { %v9729_v34 = vld [vmem:[%s16975_s0 + $0xb87] ss:$16 sm:%s5439_s25]   ;;  %v5386_v35 = vsel %vm15_vm2, %v9720_v32, %v5381_v33  ;;  %v9738_v51 = vld [vmem:[%s16975_s0 + $0x206] ss:$16 sm:%s5487_s22]   ;;  %s5538_s22 = smov 48  ;;  %v5536_v3 = vsel %vm7_vm0, %v9746_v2, %v9745_v42  ;;  %s5607_s25 = smov 48 }
 0x2d7   :  { %v9730_v25 = vld [vmem:[%s16975_s0 + $0xb87] ss:$16 sm:%s5442_s26]   ;;  %5387 = vrot.lane.b32.xlu0 %v5386_v35, %s10357_s16  ;;  %v5490_v14 = vsel %vm7_vm0, %v9738_v51, %v9737_v50  ;;  %s5658_s26 = smov 192  ;;  %s5750_s17 = smov 192 }
 0x2d8   :  { %v5445_v60 = vsel %vm7_vm0, %v9730_v25, %v9729_v34  ;;  %v9731_v1 = vld [vmem:[%s16975_s0 + $0xb87] ss:$16 sm:%s5447_s2]   ;;  %s5462_s2 = smov 3  ;;  %v5495_v55 = vsel %vm11_vm1, %v9739_v31, %v5490_v14  ;;  %v9747_v28 = vld [vmem:[%s16975_s0 + $0x606] ss:$16 sm:%s5538_s22]   ;;  %s5553_s22 = smov 3  ;;  %v4676_v12 = vpop.permute.xlu1 %4675  }
 0x2d9   :  { %v9732_v38 = vld [vmem:[%s16975_s0 + $0xb87] ss:$16 sm:%s5452_s27]   ;;  %v5450_v59 = vsel %vm11_vm1, %v9731_v1, %v5445_v60  ;;  %v9733_v56 = vld [vmem:[%s16975_s0 + $0x6] ss:$16 sm:%s5462_s2]   ;;  %v5500_v58 = vsel %vm15_vm2, %v9740_v52, %v5495_v55  ;;  %s5510_s27 = smov 12  ;;  %v5541_v7 = vsel %vm11_vm1, %v9747_v28, %v5536_v3  ;;  %s5768_s2 = smov 48 }
 0x2da   :  { %v9725_v40 = vld [vmem:[%s16975_s0 + $0x987] ss:$16 sm:%s5416_s8]   ;;  %v5455_v41 = vsel %vm15_vm2, %v9732_v38, %v5450_v59  ;;  %v5468_v5 = vsel %vm7_vm0, %v9734_v61, %v9733_v56  ;;  %v5546_v9 = vsel %vm15_vm2, %v9748_v4, %v5541_v7  ;;  %v9742_v16 = vld [vmem:[%s16975_s0 + $0x406] ss:$16 sm:%s5510_s27]   ;;  %s5722_s8 = smov 48  ;;  %s5773_s27 = smov 192 }
 0x2db   :  { %v9726_v43 = vld [vmem:[%s16975_s0 + $0x987] ss:$16 sm:%s5419_s13]   ;;  %5456 = vrot.lane.b32.xlu1 %v5455_v41, %s10357_s16  ;;  %v5473_v0 = vsel %vm11_vm1, %v9735_v62, %v5468_v5  ;;  %v5513_v10 = vsel %vm7_vm0, %v9742_v16, %v9741_v8  ;;  %s5681_s13 = smov 192  ;;  %4679 = vst.msk [vmem:[#allocation0 + $0x30] sm:$0xff] %vm4379_vm11, %v4676_v12  }
 0x2dc   :  { %v9727_v45 = vld [vmem:[%s16975_s0 + $0x987] ss:$16 sm:%s5424_s10]   ;;  %v5422_v37 = vsel %vm7_vm0, %v9726_v43, %v9725_v40  ;;  %v5478_v46 = vsel %vm15_vm2, %v9736_v63, %v5473_v0  ;;  %s5576_s10 = smov 3  ;;  %v5518_v36 = vsel %vm11_vm1, %v9743_v54, %v5513_v10  ;;  %v9756_v20 = vld [vmem:[%s16975_s0 + $0xa06] ss:$16 sm:%s5589_s21]   ;;  %s5648_s21 = smov 12  ;;  %v4653_v21 = vpop.permute.xlu0 %4652  }
 0x2dd   :  { %v9728_v48 = vld [vmem:[%s16975_s0 + $0x987] ss:$16 sm:%s5429_s19]   ;;  %v5427_v15 = vsel %vm11_vm1, %v9727_v45, %v5422_v37  ;;  %s5584_s19 = smov 48  ;;  %v9753_v57 = vld [vmem:[%s16975_s0 + $0xa06] ss:$16 sm:%s5576_s10]   ;;  %v5523_v17 = vsel %vm15_vm2, %v9744_v11, %v5518_v36  ;;  %s5745_s10 = smov 48 }
 0x2de   :  { %v5432_v6 = vsel %vm15_vm2, %v9728_v48, %v5427_v15  ;;  %v5582_v18 = vsel %vm7_vm0, %v9754_v13, %v9753_v57  ;;  %v9755_v19 = vld [vmem:[%s16975_s0 + $0xa06] ss:$16 sm:%s5584_s19]   ;;  %s5599_s19 = smov 3  ;;  %4656 = vst.msk [vmem:[#allocation0 + $0x10] sm:$0xff] %vm4379_vm11, %v4653_v21  }
 0x2df   :  { %5433 = vrot.lane.b32.xlu0 %v5432_v6, %s10357_s16  ;;  %5501 = vrot.lane.b32.xlu1 %v5500_v58, %s10358_s24  ;;  %v5587_v23 = vsel %vm11_vm1, %v9755_v19, %v5582_v18  ;;  %v9749_v26 = vld [vmem:[%s16975_s0 + $0x806] ss:$16 sm:%s5553_s22]   ;;  %s5630_s16 = smov 48  ;;  %s5860_s22 = smov 48 }
 0x2e0   :  { %v5592_v27 = vsel %vm15_vm2, %v9756_v20, %v5587_v23  ;;  %v9750_v49 = vld [vmem:[%s16975_s0 + $0x806] ss:$16 sm:%s5556_s28]   ;;  %s5819_s28 = smov 192  ;;  %v4722_v29 = vpop.permute.xlu1 %4721  }
 0x2e1   :  { %v9751_v24 = vld [vmem:[%s16975_s0 + $0x806] ss:$16 sm:%s5561_s29]   ;;  %v5559_v30 = vsel %vm7_vm0, %v9750_v49, %v9749_v26  ;;  %s5714_s29 = smov 3  ;;  %4725 = vst.msk [vmem:[#allocation0 + $0x70] sm:$0xff] %vm4379_vm11, %v4722_v29  }
 0x2e2   :  { %v9752_v32 = vld [vmem:[%s16975_s0 + $0x806] ss:$16 sm:%s5566_s4]   ;;  %v5564_v33 = vsel %vm11_vm1, %v9751_v24, %v5559_v30  ;;  %s5671_s4 = smov 12 }
 0x2e3   :  { %5479 = vrot.lane.b32.xlu0 %v5478_v46, %s10358_s24  ;;  %5547 = vrot.lane.b32.xlu1 %v5546_v9, %s10358_s24  ;;  %v9761_v34 = vld [vmem:[%s16975_s0 + $0x286] ss:$16 sm:%s5622_s7]   ;;  %v5569_v35 = vsel %vm15_vm2, %v9752_v32, %v5564_v33  ;;  %s5791_s7 = smov 48 }
 0x2e4   :  { %v9762_v25 = vld [vmem:[%s16975_s0 + $0x286] ss:$16 sm:%s5625_s11]   ;;  %v4699_v39 = vpop.permute.xlu0 %4698   ;;  %s5842_s11 = smov 192 }
 0x2e5   :  { %v5628_v60 = vsel %vm7_vm0, %v9762_v25, %v9761_v34  ;;  %v9763_v1 = vld [vmem:[%s16975_s0 + $0x286] ss:$16 sm:%s5630_s16]   ;;  %s5645_s16 = smov 3  ;;  %4702 = vst.msk [vmem:[#allocation0 + $0x50] sm:$0xff] %vm4379_vm11, %v4699_v39  }
 0x2e6   :  { %v9764_v38 = vld [vmem:[%s16975_s0 + $0x286] ss:$16 sm:%s5635_s14]   ;;  %v5633_v59 = vsel %vm11_vm1, %v9763_v1, %v5628_v60  ;;  %s5694_s14 = smov 12 }
 0x2e7   :  { %5524 = vrot.lane.b32.xlu0 %v5523_v17, %s10358_s24  ;;  %5593 = vrot.lane.b32.xlu1 %v5592_v27, %s10358_s24  ;;  %v9757_v40 = vld [vmem:[%s16975_s0 + $0x86] ss:$16 sm:%s5599_s19]   ;;  %v5638_v41 = vsel %vm15_vm2, %v9764_v38, %v5633_v59  ;;  %s5906_s19 = smov 48 }
 0x2e8   :  { %v9758_v43 = vld [vmem:[%s16975_s0 + $0x86] ss:$16 sm:%s5602_s23]   ;;  %s5865_s23 = smov 192  ;;  %v4768_v47 = vpop.permute.xlu1 %4767  }
 0x2e9   :  { %v9759_v45 = vld [vmem:[%s16975_s0 + $0x86] ss:$16 sm:%s5607_s25]   ;;  %v5605_v37 = vsel %vm7_vm0, %v9758_v43, %v9757_v40  ;;  %s5760_s25 = smov 3  ;;  %4771 = vst.msk [vmem:[#allocation0 + $0xb0] sm:$0xff] %vm4379_vm11, %v4768_v47  }
 0x2ea   :  { %v9760_v48 = vld [vmem:[%s16975_s0 + $0x86] ss:$16 sm:%s5612_s30]   ;;  %v5610_v15 = vsel %vm11_vm1, %v9759_v45, %v5605_v37  ;;  %s5717_s30 = smov 12 }
 0x2eb   :  { %5570 = vrot.lane.b32.xlu0 %v5569_v35, %s10358_s24  ;;  %5639 = vrot.lane.b32.xlu1 %v5638_v41, %s10358_s24  ;;  %v9769_v50 = vld [vmem:[%s16975_s0 + $0x686] ss:$16 sm:%s5668_s3]   ;;  %v5615_v6 = vsel %vm15_vm2, %v9760_v48, %v5610_v15  ;;  %s5837_s3 = smov 48 }
 0x2ec   :  { %v9770_v51 = vld [vmem:[%s16975_s0 + $0x686] ss:$16 sm:%s5671_s4]   ;;  %v4745_v53 = vpop.permute.xlu0 %4744   ;;  %s5888_s4 = smov 192 }
 0x2ed   :  { %v5674_v14 = vsel %vm7_vm0, %v9770_v51, %v9769_v50  ;;  %v9771_v31 = vld [vmem:[%s16975_s0 + $0x686] ss:$16 sm:%s5676_s9]   ;;  %s5691_s9 = smov 3  ;;  %4748 = vst.msk [vmem:[#allocation0 + $0x90] sm:$0xff] %vm4379_vm11, %v4745_v53  }
 0x2ee   :  { %v9772_v52 = vld [vmem:[%s16975_s0 + $0x686] ss:$16 sm:%s5681_s13]   ;;  %v5679_v55 = vsel %vm11_vm1, %v9771_v31, %v5674_v14  ;;  %s5740_s13 = smov 12 }
 0x2ef   :  { %5616 = vrot.lane.b32.xlu0 %v5615_v6, %s10358_s24  ;;  %v9765_v56 = vld [vmem:[%s16975_s0 + $0x486] ss:$16 sm:%s5645_s16]   ;;  %v5684_v58 = vsel %vm15_vm2, %v9772_v52, %v5679_v55  ;;  %s5952_s16 = smov 48 }
 0x2f0   :  { %v9766_v61 = vld [vmem:[%s16975_s0 + $0x486] ss:$16 sm:%s5648_s21]   ;;  %5685 = vrot.lane.b32.xlu1 %v5684_v58, %s10358_s24  ;;  %s5911_s21 = smov 192  ;;  %v4814_v44 = vpop.permute.xlu1 %4813  }
 0x2f1   :  { %v9767_v62 = vld [vmem:[%s16975_s0 + $0x486] ss:$16 sm:%s5653_s18]   ;;  %v5651_v5 = vsel %vm7_vm0, %v9766_v61, %v9765_v56  ;;  %s5806_s18 = smov 3  ;;  %4817 = vst.msk [vmem:[#allocation0 + $0x38] sm:$0xff] %vm4379_vm11, %v4814_v44  }
 0x2f2   :  { %v9768_v63 = vld [vmem:[%s16975_s0 + $0x486] ss:$16 sm:%s5658_s26]   ;;  %v5656_v0 = vsel %vm11_vm1, %v9767_v62, %v5651_v5  ;;  %s5763_s26 = smov 12 }
 0x2f3   :  { %v9777_v42 = vld [vmem:[%s16975_s0 + $0xa86] ss:$16 sm:%s5714_s29]   ;;  %v5661_v46 = vsel %vm15_vm2, %v9768_v63, %v5656_v0  ;;  %s5883_s29 = smov 48 }
 0x2f4   :  { %v9778_v2 = vld [vmem:[%s16975_s0 + $0xa86] ss:$16 sm:%s5717_s30]   ;;  %5662 = vrot.lane.b32.xlu0 %v5661_v46, %s10358_s24  ;;  %v4791_v22 = vpop.permute.xlu0 %4790   ;;  %s5934_s30 = smov 192 }
 0x2f5   :  { %v5720_v3 = vsel %vm7_vm0, %v9778_v2, %v9777_v42  ;;  %v9779_v28 = vld [vmem:[%s16975_s0 + $0xa86] ss:$16 sm:%s5722_s8]   ;;  %s5737_s8 = smov 3  ;;  %4794 = vst.msk [vmem:[#allocation0 + $0x18] sm:$0xff] %vm4379_vm11, %v4791_v22  }
 0x2f6   :  { %v9780_v4 = vld [vmem:[%s16975_s0 + $0xa86] ss:$16 sm:%s5727_s5]   ;;  %v5725_v7 = vsel %vm11_vm1, %v9779_v28, %v5720_v3  ;;  %s5786_s5 = smov 12 }
 0x2f7   :  { %v9773_v8 = vld [vmem:[%s16975_s0 + $0x886] ss:$16 sm:%s5691_s9]   ;;  %v5730_v9 = vsel %vm15_vm2, %v9780_v4, %v5725_v7  ;;  %s5998_s9 = smov 48 }
 0x2f8   :  { %v9774_v16 = vld [vmem:[%s16975_s0 + $0x886] ss:$16 sm:%s5694_s14]   ;;  %5731 = vrot.lane.b32.xlu1 %v5730_v9, %s10358_s24  ;;  %s5957_s14 = smov 192  ;;  %v4860_v12 = vpop.permute.xlu1 %4859  }
 0x2f9   :  { %v9775_v54 = vld [vmem:[%s16975_s0 + $0x886] ss:$16 sm:%s5699_s15]   ;;  %v5697_v10 = vsel %vm7_vm0, %v9774_v16, %v9773_v8  ;;  %s5852_s15 = smov 3  ;;  %4863 = vst.msk [vmem:[#allocation0 + $0x78] sm:$0xff] %vm4379_vm11, %v4860_v12  }
 0x2fa   :  { %v9776_v11 = vld [vmem:[%s16975_s0 + $0x886] ss:$16 sm:%s5704_s20]   ;;  %v5702_v36 = vsel %vm11_vm1, %v9775_v54, %v5697_v10  ;;  %s5809_s20 = smov 12 }
 0x2fb   :  { %v9785_v57 = vld [vmem:[%s16975_s0 + $0x306] ss:$16 sm:%s5760_s25]   ;;  %v5707_v17 = vsel %vm15_vm2, %v9776_v11, %v5702_v36  ;;  %s5929_s25 = smov 48 }
 0x2fc   :  { %v9786_v13 = vld [vmem:[%s16975_s0 + $0x306] ss:$16 sm:%s5763_s26]   ;;  %5708 = vrot.lane.b32.xlu0 %v5707_v17, %s10358_s24  ;;  %v4837_v21 = vpop.permute.xlu0 %4836   ;;  %s5980_s26 = smov 192 }
 0x2fd   :  { %v5766_v18 = vsel %vm7_vm0, %v9786_v13, %v9785_v57  ;;  %v9787_v19 = vld [vmem:[%s16975_s0 + $0x306] ss:$16 sm:%s5768_s2]   ;;  %s5783_s2 = smov 3  ;;  %4840 = vst.msk [vmem:[#allocation0 + $0x58] sm:$0xff] %vm4379_vm11, %v4837_v21  }
 0x2fe   :  { %v9788_v20 = vld [vmem:[%s16975_s0 + $0x306] ss:$16 sm:%s5773_s27]   ;;  %v5771_v23 = vsel %vm11_vm1, %v9787_v19, %v5766_v18  ;;  %s5832_s27 = smov 12 }
 0x2ff   :  { %v9781_v26 = vld [vmem:[%s16975_s0 + $0x106] ss:$16 sm:%s5737_s8]   ;;  %v5776_v27 = vsel %vm15_vm2, %v9788_v20, %v5771_v23  ;;  %s6043_s8 = smov 48 }
 0x300   :  { %v9782_v49 = vld [vmem:[%s16975_s0 + $0x106] ss:$16 sm:%s5740_s13]   ;;  %5777 = vrot.lane.b32.xlu1 %v5776_v27, %s10358_s24  ;;  %s6003_s13 = smov 192  ;;  %v4906_v29 = vpop.permute.xlu1 %4905  }
 0x301   :  { %v9783_v24 = vld [vmem:[%s16975_s0 + $0x106] ss:$16 sm:%s5745_s10]   ;;  %v5743_v30 = vsel %vm7_vm0, %v9782_v49, %v9781_v26  ;;  %s5898_s10 = smov 3  ;;  %4909 = vst.msk [vmem:[#allocation0 + $0xb8] sm:$0xff] %vm4379_vm11, %v4906_v29  }
 0x302   :  { %v9784_v32 = vld [vmem:[%s16975_s0 + $0x106] ss:$16 sm:%s5750_s17]   ;;  %v5748_v33 = vsel %vm11_vm1, %v9783_v24, %v5743_v30  ;;  %s5855_s17 = smov 12 }
 0x303   :  { %v9793_v34 = vld [vmem:[%s16975_s0 + $0x706] ss:$16 sm:%s5806_s18]   ;;  %v5753_v35 = vsel %vm15_vm2, %v9784_v32, %v5748_v33  ;;  %s5975_s18 = smov 48 }
 0x304   :  { %v9794_v25 = vld [vmem:[%s16975_s0 + $0x706] ss:$16 sm:%s5809_s20]   ;;  %5754 = vrot.lane.b32.xlu0 %v5753_v35, %s10358_s24  ;;  %v4883_v39 = vpop.permute.xlu0 %4882   ;;  %v4951_v47 = vpop.permute.xlu1 %4950   ;;  %s6026_s20 = smov 192 }
 0x305   :  { %v5812_v60 = vsel %vm7_vm0, %v9794_v25, %v9793_v34  ;;  %v9795_v1 = vld [vmem:[%s16975_s0 + $0x706] ss:$16 sm:%s5814_s6]   ;;  %s5829_s6 = smov 3  ;;  %4886 = vst.msk [vmem:[#allocation0 + $0x98] sm:$0xff] %vm4379_vm11, %v4883_v39  }
 0x306   :  { %v9796_v38 = vld [vmem:[%s16975_s0 + $0x706] ss:$16 sm:%s5819_s28]   ;;  %v5817_v59 = vsel %vm11_vm1, %v9795_v1, %v5812_v60  ;;  %s5878_s28 = smov 12  ;;  %4954 = vst.msk [vmem:[#allocation0 + $0x20] sm:$0xff] %vm4930_vm12, %v4951_v47  }
 0x307   :  { %v9789_v40 = vld [vmem:[%s16975_s0 + $0x506] ss:$16 sm:%s5783_s2]   ;;  %v5822_v41 = vsel %vm15_vm2, %v9796_v38, %v5817_v59  ;;  %s6094_s2 = smov 192 }
 0x308   :  { %v9790_v43 = vld [vmem:[%s16975_s0 + $0x506] ss:$16 sm:%s5786_s5]   ;;  %5823 = vrot.lane.b32.xlu1 %v5822_v41, %s10358_s24  ;;  %s6048_s5 = smov 192  ;;  %v4929_v53 = vpop.permute.xlu0 %4928   ;;  %v4997_v44 = vpop.permute.xlu1 %4996  }
 0x309   :  { %v9791_v45 = vld [vmem:[%s16975_s0 + $0x506] ss:$16 sm:%s5791_s7]   ;;  %v5789_v37 = vsel %vm7_vm0, %v9790_v43, %v9789_v40  ;;  %s5944_s7 = smov 3  ;;  %4931 = vst.msk [vmem:[#allocation0] sm:$0xff] %vm4930_vm12, %v4929_v53   ;;  %5000 = vst.msk [vmem:[#allocation0 + $0x60] sm:$0xff] %vm4930_vm12, %v4997_v44  }
 0x30a   :  { %v9792_v48 = vld [vmem:[%s16975_s0 + $0x506] ss:$16 sm:%s5796_s12]   ;;  %v5794_v15 = vsel %vm11_vm1, %v9791_v45, %v5789_v37  ;;  %s5901_s12 = smov 12 }
 0x30b   :  { %v9801_v50 = vld [vmem:[%s16975_s0 + $0xb06] ss:$16 sm:%s5852_s15]   ;;  %v5799_v6 = vsel %vm15_vm2, %v9792_v48, %v5794_v15  ;;  %s6021_s15 = smov 48 }
 0x30c   :  { %v9802_v51 = vld [vmem:[%s16975_s0 + $0xb06] ss:$16 sm:%s5855_s17]   ;;  %5800 = vrot.lane.b32.xlu0 %v5799_v6, %s10358_s24  ;;  %s6071_s17 = smov 192  ;;  %v4974_v22 = vpop.permute.xlu0 %4973   ;;  %v5043_v12 = vpop.permute.xlu1 %5042  }
 0x30d   :  { %v5858_v14 = vsel %vm7_vm0, %v9802_v51, %v9801_v50  ;;  %v9803_v31 = vld [vmem:[%s16975_s0 + $0xb06] ss:$16 sm:%s5860_s22]   ;;  %s5875_s22 = smov 3  ;;  %4977 = vst.msk [vmem:[#allocation0 + $0x40] sm:$0xff] %vm4930_vm12, %v4974_v22   ;;  %5046 = vst.msk [vmem:[#allocation0 + $0xa0] sm:$0xff] %vm4930_vm12, %v5043_v12  }
 0x30e   :  { %v9804_v52 = vld [vmem:[%s16975_s0 + $0xb06] ss:$16 sm:%s5865_s23]   ;;  %v5863_v55 = vsel %vm11_vm1, %v9803_v31, %v5858_v14  ;;  %s5924_s23 = smov 12  ;;  %v9835_v31 = vld [vmem:[%s16975_s0 + $0x205] ss:$16 sm:%s6043_s8]   ;;  %s6058_s8 = smov 3 }
 0x30f   :  { %v9797_v56 = vld [vmem:[%s16975_s0 + $0x906] ss:$16 sm:%s5829_s6]   ;;  %v5868_v58 = vsel %vm15_vm2, %v9804_v52, %v5863_v55  ;;  %v9836_v52 = vld [vmem:[%s16975_s0 + $0x205] ss:$16 sm:%s6048_s5]   ;;  %s6140_s6 = smov 192  ;;  %s6107_s5 = smov 12 }
 0x310   :  { %v9798_v61 = vld [vmem:[%s16975_s0 + $0x906] ss:$16 sm:%s5832_s27]   ;;  %5869 = vrot.lane.b32.xlu1 %v5868_v58, %s10358_s24  ;;  %s10359_s27 = smov 10   ;;  %v5020_v21 = vpop.permute.xlu0 %5019   ;;  %v5089_v29 = vpop.permute.xlu1 %5088  }
 0x311   :  { %v9799_v62 = vld [vmem:[%s16975_s0 + $0x906] ss:$16 sm:%s5837_s3]   ;;  %v5835_v5 = vsel %vm7_vm0, %v9798_v61, %v9797_v56  ;;  %s5990_s3 = smov 3  ;;  %5023 = vst.msk [vmem:[#allocation0 + $0x80] sm:$0xff] %vm4930_vm12, %v5020_v21   ;;  %5092 = vst.msk [vmem:[#allocation0 + $0x28] sm:$0xff] %vm4930_vm12, %v5089_v29  }
 0x312   :  { %v9800_v63 = vld [vmem:[%s16975_s0 + $0x906] ss:$16 sm:%s5842_s11]   ;;  %v5840_v0 = vsel %vm11_vm1, %v9799_v62, %v5835_v5  ;;  %s5947_s11 = smov 12  ;;  %v9831_v62 = vld [vmem:[%s16975_s0 + $0x5] ss:$16 sm:%s6021_s15]   ;;  %s6173_s15 = smov 3 }
 0x313   :  { %v9809_v42 = vld [vmem:[%s16975_s0 + $0x386] ss:$16 sm:%s5898_s10]   ;;  %v5845_v46 = vsel %vm15_vm2, %v9800_v63, %v5840_v0  ;;  %v9832_v63 = vld [vmem:[%s16975_s0 + $0x5] ss:$16 sm:%s6026_s20]   ;;  %s6066_s10 = smov 48  ;;  %s6130_s20 = smov 12 }
 0x314   :  { %v9810_v2 = vld [vmem:[%s16975_s0 + $0x386] ss:$16 sm:%s5901_s12]   ;;  %5846 = vrot.lane.b32.xlu0 %v5845_v46, %s10358_s24  ;;  %s6117_s12 = smov 192  ;;  %v5066_v39 = vpop.permute.xlu0 %5065  }
 0x315   :  { %v5904_v3 = vsel %vm7_vm0, %v9810_v2, %v9809_v42  ;;  %v9811_v28 = vld [vmem:[%s16975_s0 + $0x386] ss:$16 sm:%s5906_s19]   ;;  %s5921_s19 = smov 3  ;;  %5069 = vst.msk [vmem:[#allocation0 + $0x8] sm:$0xff] %vm4930_vm12, %v5066_v39   ;;  %v5135_v47 = vpop.permute.xlu1 %5134  }
 0x316   :  { %v9812_v4 = vld [vmem:[%s16975_s0 + $0x386] ss:$16 sm:%s5911_s21]   ;;  %v5909_v7 = vsel %vm11_vm1, %v9811_v28, %v5904_v3  ;;  %s5970_s21 = smov 12  ;;  %5138 = vst.msk [vmem:[#allocation0 + $0x68] sm:$0xff] %vm4930_vm12, %v5135_v47  }
 0x317   :  { %v9805_v8 = vld [vmem:[%s16975_s0 + $0x186] ss:$16 sm:%s5875_s22]   ;;  %v5914_v9 = vsel %vm15_vm2, %v9812_v4, %v5909_v7  ;;  %v9844_v4 = vld [vmem:[%s16975_s0 + $0x605] ss:$16 sm:%s6094_s2]   ;;  %s6186_s22 = smov 192  ;;  %s6153_s2 = smov 12 }
 0x318   :  { %v9806_v16 = vld [vmem:[%s16975_s0 + $0x186] ss:$16 sm:%s5878_s28]   ;;  %5915 = vrot.lane.b32.xlu1 %v5914_v9, %s10358_s24  ;;  %s6204_s28 = smov 48 }
 0x319   :  { %v9807_v54 = vld [vmem:[%s16975_s0 + $0x186] ss:$16 sm:%s5883_s29]   ;;  %v5881_v10 = vsel %vm7_vm0, %v9806_v16, %v9805_v8  ;;  %s6035_s29 = smov 3  ;;  %v9837_v8 = vld [vmem:[%s16975_s0 + $0x405] ss:$16 sm:%s6058_s8]   ;;  %v5112_v53 = vpop.permute.xlu0 %5111   ;;  %s6365_s8 = smov 48 }
 0x31a   :  { %v9808_v11 = vld [vmem:[%s16975_s0 + $0x186] ss:$16 sm:%s5888_s4]   ;;  %v5886_v36 = vsel %vm11_vm1, %v9807_v54, %v5881_v10  ;;  %s5993_s4 = smov 12  ;;  %v9833_v50 = vld [vmem:[%s16975_s0 + $0x205] ss:$16 sm:%s6035_s29]   ;;  %5115 = vst.msk [vmem:[#allocation0 + $0x48] sm:$0xff] %vm4930_vm12, %v5112_v53  }
 0x31b   :  { %v9817_v57 = vld [vmem:[%s16975_s0 + $0x786] ss:$16 sm:%s5944_s7]   ;;  %v5891_v17 = vsel %vm15_vm2, %v9808_v11, %v5886_v36  ;;  %v9839_v54 = vld [vmem:[%s16975_s0 + $0x405] ss:$16 sm:%s6066_s10]   ;;  %s6112_s7 = smov 48  ;;  %s6219_s10 = smov 3 }
 0x31c   :  { %v9818_v13 = vld [vmem:[%s16975_s0 + $0x786] ss:$16 sm:%s5947_s11]   ;;  %5892 = vrot.lane.b32.xlu0 %v5891_v17, %s10358_s24  ;;  %s6163_s11 = smov 192  ;;  %s6255_s29 = smov 192 }
 0x31d   :  { %v5950_v18 = vsel %vm7_vm0, %v9818_v13, %v9817_v57  ;;  %v9819_v19 = vld [vmem:[%s16975_s0 + $0x786] ss:$16 sm:%s5952_s16]   ;;  %s5967_s16 = smov 3  ;;  %v9840_v11 = vld [vmem:[%s16975_s0 + $0x405] ss:$16 sm:%s6071_s17]   ;;  %s6176_s17 = smov 12  ;;  %v5181_v44 = vpop.permute.xlu1 %5180  }
 0x31e   :  { %v9820_v20 = vld [vmem:[%s16975_s0 + $0x786] ss:$16 sm:%s5957_s14]   ;;  %v5955_v23 = vsel %vm11_vm1, %v9819_v19, %v5950_v18  ;;  %s6016_s14 = smov 12  ;;  %v9850_v13 = vld [vmem:[%s16975_s0 + $0xa05] ss:$16 sm:%s6130_s20]   ;;  %5184 = vst.msk [vmem:[#allocation0 + $0xa8] sm:$0xff] %vm4930_vm12, %v5181_v44  }
 0x31f   :  { %v9813_v26 = vld [vmem:[%s16975_s0 + $0x586] ss:$16 sm:%s5921_s19]   ;;  %v5960_v27 = vsel %vm15_vm2, %v9820_v20, %v5955_v23  ;;  %v9830_v61 = vld [vmem:[%s16975_s0 + $0x5] ss:$16 sm:%s6016_s14]   ;;  %s6227_s19 = smov 48  ;;  %s6278_s14 = smov 192 }
 0x320   :  { %v9814_v49 = vld [vmem:[%s16975_s0 + $0x586] ss:$16 sm:%s5924_s23]   ;;  %5961 = vrot.lane.b32.xlu1 %v5960_v27, %s10358_s24  ;;  %s6081_s23 = smov 3  ;;  %s6347_s20 = smov 192 }
 0x321   :  { %v9815_v24 = vld [vmem:[%s16975_s0 + $0x586] ss:$16 sm:%s5929_s25]   ;;  %v5927_v30 = vsel %vm7_vm0, %v9814_v49, %v9813_v26  ;;  %s6084_s25 = smov 12  ;;  %v9841_v42 = vld [vmem:[%s16975_s0 + $0x605] ss:$16 sm:%s6081_s23]   ;;  %s6250_s23 = smov 48  ;;  %v5158_v22 = vpop.permute.xlu0 %5157  }
 0x322   :  { %v9816_v32 = vld [vmem:[%s16975_s0 + $0x586] ss:$16 sm:%s5934_s30]   ;;  %v5932_v33 = vsel %vm11_vm1, %v9815_v24, %v5927_v30  ;;  %s6038_s30 = smov 12  ;;  %v9842_v2 = vld [vmem:[%s16975_s0 + $0x605] ss:$16 sm:%s6084_s25]   ;;  %5161 = vst.msk [vmem:[#allocation0 + $0x88] sm:$0xff] %vm4930_vm12, %v5158_v22  }
 0x323   :  { %v9825_v34 = vld [vmem:[%s16975_s0 + $0xb86] ss:$16 sm:%s5990_s3]   ;;  %v5937_v35 = vsel %vm15_vm2, %v9816_v32, %v5932_v33  ;;  %v9834_v51 = vld [vmem:[%s16975_s0 + $0x205] ss:$16 sm:%s6038_s30]   ;;  %s6089_s30 = smov 48  ;;  %v6087_v3 = vsel %vm7_vm0, %v9842_v2, %v9841_v42  ;;  %s6158_s3 = smov 48 }
 0x324   :  { %v9826_v25 = vld [vmem:[%s16975_s0 + $0xb86] ss:$16 sm:%s5993_s4]   ;;  %5938 = vrot.lane.b32.xlu0 %v5937_v35, %s10358_s24  ;;  %v6041_v14 = vsel %vm7_vm0, %v9834_v51, %v9833_v50  ;;  %s6209_s4 = smov 192  ;;  %s6301_s25 = smov 192 }
 0x325   :  { %v5996_v60 = vsel %vm7_vm0, %v9826_v25, %v9825_v34  ;;  %v9827_v1 = vld [vmem:[%s16975_s0 + $0xb86] ss:$16 sm:%s5998_s9]   ;;  %s6013_s9 = smov 3  ;;  %v6046_v55 = vsel %vm11_vm1, %v9835_v31, %v6041_v14  ;;  %v9843_v28 = vld [vmem:[%s16975_s0 + $0x605] ss:$16 sm:%s6089_s30]   ;;  %s6104_s30 = smov 3  ;;  %v5227_v12 = vpop.permute.xlu1 %5226  }
 0x326   :  { %v9828_v38 = vld [vmem:[%s16975_s0 + $0xb86] ss:$16 sm:%s6003_s13]   ;;  %v6001_v59 = vsel %vm11_vm1, %v9827_v1, %v5996_v60  ;;  %v9829_v56 = vld [vmem:[%s16975_s0 + $0x5] ss:$16 sm:%s6013_s9]   ;;  %v6051_v58 = vsel %vm15_vm2, %v9836_v52, %v6046_v55  ;;  %s6061_s13 = smov 12  ;;  %v6092_v7 = vsel %vm11_vm1, %v9843_v28, %v6087_v3  ;;  %s6319_s9 = smov 48 }
 0x327   :  { %v9821_v40 = vld [vmem:[%s16975_s0 + $0x986] ss:$16 sm:%s5967_s16]   ;;  %v6006_v41 = vsel %vm15_vm2, %v9828_v38, %v6001_v59  ;;  %v6019_v5 = vsel %vm7_vm0, %v9830_v61, %v9829_v56  ;;  %v6097_v9 = vsel %vm15_vm2, %v9844_v4, %v6092_v7  ;;  %v9838_v16 = vld [vmem:[%s16975_s0 + $0x405] ss:$16 sm:%s6061_s13]   ;;  %s6273_s16 = smov 48  ;;  %s6324_s13 = smov 192 }
 0x328   :  { %v9822_v43 = vld [vmem:[%s16975_s0 + $0x986] ss:$16 sm:%s5970_s21]   ;;  %6007 = vrot.lane.b32.xlu1 %v6006_v41, %s10358_s24  ;;  %v6024_v0 = vsel %vm11_vm1, %v9831_v62, %v6019_v5  ;;  %v6064_v10 = vsel %vm7_vm0, %v9838_v16, %v9837_v8  ;;  %s6232_s21 = smov 192  ;;  %5230 = vst.msk [vmem:[#allocation0 + $0x30] sm:$0xff] %vm4930_vm12, %v5227_v12  }
 0x329   :  { %v9823_v45 = vld [vmem:[%s16975_s0 + $0x986] ss:$16 sm:%s5975_s18]   ;;  %v5973_v37 = vsel %vm7_vm0, %v9822_v43, %v9821_v40  ;;  %v6029_v46 = vsel %vm15_vm2, %v9832_v63, %v6024_v0  ;;  %s6127_s18 = smov 3  ;;  %v6069_v36 = vsel %vm11_vm1, %v9839_v54, %v6064_v10  ;;  %v9852_v20 = vld [vmem:[%s16975_s0 + $0xa05] ss:$16 sm:%s6140_s6]   ;;  %s6199_s6 = smov 12  ;;  %v5204_v21 = vpop.permute.xlu0 %5203  }
 0x32a   :  { %v9824_v48 = vld [vmem:[%s16975_s0 + $0x986] ss:$16 sm:%s5980_s26]   ;;  %v5978_v15 = vsel %vm11_vm1, %v9823_v45, %v5973_v37  ;;  %s6135_s26 = smov 48  ;;  %v9849_v57 = vld [vmem:[%s16975_s0 + $0xa05] ss:$16 sm:%s6127_s18]   ;;  %v6074_v17 = vsel %vm15_vm2, %v9840_v11, %v6069_v36  ;;  %s6296_s18 = smov 48 }
 0x32b   :  { %v5983_v6 = vsel %vm15_vm2, %v9824_v48, %v5978_v15  ;;  %v6133_v18 = vsel %vm7_vm0, %v9850_v13, %v9849_v57  ;;  %v9851_v19 = vld [vmem:[%s16975_s0 + $0xa05] ss:$16 sm:%s6135_s26]   ;;  %s6150_s26 = smov 3  ;;  %5207 = vst.msk [vmem:[#allocation0 + $0x10] sm:$0xff] %vm4930_vm12, %v5204_v21  }
 0x32c   :  { %5984 = vrot.lane.b32.xlu0 %v5983_v6, %s10358_s24  ;;  %6052 = vrot.lane.b32.xlu1 %v6051_v58, %s10359_s27  ;;  %v6138_v23 = vsel %vm11_vm1, %v9851_v19, %v6133_v18  ;;  %v9845_v26 = vld [vmem:[%s16975_s0 + $0x805] ss:$16 sm:%s6104_s30]   ;;  %s6181_s24 = smov 48  ;;  %s6411_s30 = smov 48 }
 0x32d   :  { %v6143_v27 = vsel %vm15_vm2, %v9852_v20, %v6138_v23  ;;  %v9846_v49 = vld [vmem:[%s16975_s0 + $0x805] ss:$16 sm:%s6107_s5]   ;;  %s6370_s5 = smov 192  ;;  %v5273_v29 = vpop.permute.xlu1 %5272  }
 0x32e   :  { %v9847_v24 = vld [vmem:[%s16975_s0 + $0x805] ss:$16 sm:%s6112_s7]   ;;  %v6110_v30 = vsel %vm7_vm0, %v9846_v49, %v9845_v26  ;;  %s6265_s7 = smov 3  ;;  %5276 = vst.msk [vmem:[#allocation0 + $0x70] sm:$0xff] %vm4930_vm12, %v5273_v29  }
 0x32f   :  { %v9848_v32 = vld [vmem:[%s16975_s0 + $0x805] ss:$16 sm:%s6117_s12]   ;;  %v6115_v33 = vsel %vm11_vm1, %v9847_v24, %v6110_v30  ;;  %s6222_s12 = smov 12 }
 0x330   :  { %6030 = vrot.lane.b32.xlu0 %v6029_v46, %s10359_s27  ;;  %6098 = vrot.lane.b32.xlu1 %v6097_v9, %s10359_s27  ;;  %v9857_v34 = vld [vmem:[%s16975_s0 + $0x285] ss:$16 sm:%s6173_s15]   ;;  %v6120_v35 = vsel %vm15_vm2, %v9848_v32, %v6115_v33  ;;  %s6342_s15 = smov 48 }
 0x331   :  { %v9858_v25 = vld [vmem:[%s16975_s0 + $0x285] ss:$16 sm:%s6176_s17]   ;;  %v5250_v39 = vpop.permute.xlu0 %5249   ;;  %s6393_s17 = smov 192 }
 0x332   :  { %v6179_v60 = vsel %vm7_vm0, %v9858_v25, %v9857_v34  ;;  %v9859_v1 = vld [vmem:[%s16975_s0 + $0x285] ss:$16 sm:%s6181_s24]   ;;  %s6196_s24 = smov 3  ;;  %5253 = vst.msk [vmem:[#allocation0 + $0x50] sm:$0xff] %vm4930_vm12, %v5250_v39  }
 0x333   :  { %v9860_v38 = vld [vmem:[%s16975_s0 + $0x285] ss:$16 sm:%s6186_s22]   ;;  %v6184_v59 = vsel %vm11_vm1, %v9859_v1, %v6179_v60  ;;  %s6245_s22 = smov 12 }
 0x334   :  { %6075 = vrot.lane.b32.xlu0 %v6074_v17, %s10359_s27  ;;  %6144 = vrot.lane.b32.xlu1 %v6143_v27, %s10359_s27  ;;  %v9853_v40 = vld [vmem:[%s16975_s0 + $0x85] ss:$16 sm:%s6150_s26]   ;;  %v6189_v41 = vsel %vm15_vm2, %v9860_v38, %v6184_v59  ;;  %s6457_s26 = smov 48 }
 0x335   :  { %v9854_v43 = vld [vmem:[%s16975_s0 + $0x85] ss:$16 sm:%s6153_s2]   ;;  %s6416_s2 = smov 192  ;;  %v5319_v47 = vpop.permute.xlu1 %5318  }
 0x336   :  { %v9855_v45 = vld [vmem:[%s16975_s0 + $0x85] ss:$16 sm:%s6158_s3]   ;;  %v6156_v37 = vsel %vm7_vm0, %v9854_v43, %v9853_v40  ;;  %s6311_s3 = smov 3  ;;  %5322 = vst.msk [vmem:[#allocation0 + $0xb0] sm:$0xff] %vm4930_vm12, %v5319_v47  }
 0x337   :  { %v9856_v48 = vld [vmem:[%s16975_s0 + $0x85] ss:$16 sm:%s6163_s11]   ;;  %v6161_v15 = vsel %vm11_vm1, %v9855_v45, %v6156_v37  ;;  %s6268_s11 = smov 12 }
 0x338   :  { %6121 = vrot.lane.b32.xlu0 %v6120_v35, %s10359_s27  ;;  %6190 = vrot.lane.b32.xlu1 %v6189_v41, %s10359_s27  ;;  %v9865_v50 = vld [vmem:[%s16975_s0 + $0x685] ss:$16 sm:%s6219_s10]   ;;  %v6166_v6 = vsel %vm15_vm2, %v9856_v48, %v6161_v15  ;;  %s6388_s10 = smov 48 }
 0x339   :  { %v9866_v51 = vld [vmem:[%s16975_s0 + $0x685] ss:$16 sm:%s6222_s12]   ;;  %v5296_v53 = vpop.permute.xlu0 %5295   ;;  %s6439_s12 = smov 192 }
 0x33a   :  { %v6225_v14 = vsel %vm7_vm0, %v9866_v51, %v9865_v50  ;;  %v9867_v31 = vld [vmem:[%s16975_s0 + $0x685] ss:$16 sm:%s6227_s19]   ;;  %s6242_s19 = smov 3  ;;  %5299 = vst.msk [vmem:[#allocation0 + $0x90] sm:$0xff] %vm4930_vm12, %v5296_v53  }
 0x33b   :  { %v9868_v52 = vld [vmem:[%s16975_s0 + $0x685] ss:$16 sm:%s6232_s21]   ;;  %v6230_v55 = vsel %vm11_vm1, %v9867_v31, %v6225_v14  ;;  %s6291_s21 = smov 12 }
 0x33c   :  { %6167 = vrot.lane.b32.xlu0 %v6166_v6, %s10359_s27  ;;  %v9861_v56 = vld [vmem:[%s16975_s0 + $0x485] ss:$16 sm:%s6196_s24]   ;;  %v6235_v58 = vsel %vm15_vm2, %v9868_v52, %v6230_v55  ;;  %s6503_s24 = smov 48 }
 0x33d   :  { %v9862_v61 = vld [vmem:[%s16975_s0 + $0x485] ss:$16 sm:%s6199_s6]   ;;  %6236 = vrot.lane.b32.xlu1 %v6235_v58, %s10359_s27  ;;  %s6462_s6 = smov 192  ;;  %v5365_v44 = vpop.permute.xlu1 %5364  }
 0x33e   :  { %v9863_v62 = vld [vmem:[%s16975_s0 + $0x485] ss:$16 sm:%s6204_s28]   ;;  %v6202_v5 = vsel %vm7_vm0, %v9862_v61, %v9861_v56  ;;  %s6357_s28 = smov 3  ;;  %5368 = vst.msk [vmem:[#allocation0 + $0x38] sm:$0xff] %vm4930_vm12, %v5365_v44  }
 0x33f   :  { %v9864_v63 = vld [vmem:[%s16975_s0 + $0x485] ss:$16 sm:%s6209_s4]   ;;  %v6207_v0 = vsel %vm11_vm1, %v9863_v62, %v6202_v5  ;;  %s6314_s4 = smov 12 }
 0x340   :  { %v9873_v42 = vld [vmem:[%s16975_s0 + $0xa85] ss:$16 sm:%s6265_s7]   ;;  %v6212_v46 = vsel %vm15_vm2, %v9864_v63, %v6207_v0  ;;  %s6434_s7 = smov 48 }
 0x341   :  { %v9874_v2 = vld [vmem:[%s16975_s0 + $0xa85] ss:$16 sm:%s6268_s11]   ;;  %6213 = vrot.lane.b32.xlu0 %v6212_v46, %s10359_s27  ;;  %v5342_v22 = vpop.permute.xlu0 %5341   ;;  %s6485_s11 = smov 192 }
 0x342   :  { %v6271_v3 = vsel %vm7_vm0, %v9874_v2, %v9873_v42  ;;  %v9875_v28 = vld [vmem:[%s16975_s0 + $0xa85] ss:$16 sm:%s6273_s16]   ;;  %s6288_s16 = smov 3  ;;  %5345 = vst.msk [vmem:[#allocation0 + $0x18] sm:$0xff] %vm4930_vm12, %v5342_v22  }
 0x343   :  { %v9876_v4 = vld [vmem:[%s16975_s0 + $0xa85] ss:$16 sm:%s6278_s14]   ;;  %v6276_v7 = vsel %vm11_vm1, %v9875_v28, %v6271_v3  ;;  %s6337_s14 = smov 12 }
 0x344   :  { %v9869_v8 = vld [vmem:[%s16975_s0 + $0x885] ss:$16 sm:%s6242_s19]   ;;  %v6281_v9 = vsel %vm15_vm2, %v9876_v4, %v6276_v7  ;;  %s6549_s19 = smov 48 }
 0x345   :  { %v9870_v16 = vld [vmem:[%s16975_s0 + $0x885] ss:$16 sm:%s6245_s22]   ;;  %6282 = vrot.lane.b32.xlu1 %v6281_v9, %s10359_s27  ;;  %s6508_s22 = smov 192  ;;  %v5411_v12 = vpop.permute.xlu1 %5410  }
 0x346   :  { %v9871_v54 = vld [vmem:[%s16975_s0 + $0x885] ss:$16 sm:%s6250_s23]   ;;  %v6248_v10 = vsel %vm7_vm0, %v9870_v16, %v9869_v8  ;;  %s6403_s23 = smov 3  ;;  %5414 = vst.msk [vmem:[#allocation0 + $0x78] sm:$0xff] %vm4930_vm12, %v5411_v12  }
 0x347   :  { %v9872_v11 = vld [vmem:[%s16975_s0 + $0x885] ss:$16 sm:%s6255_s29]   ;;  %v6253_v36 = vsel %vm11_vm1, %v9871_v54, %v6248_v10  ;;  %s6360_s29 = smov 12 }
 0x348   :  { %v9881_v57 = vld [vmem:[%s16975_s0 + $0x305] ss:$16 sm:%s6311_s3]   ;;  %v6258_v17 = vsel %vm15_vm2, %v9872_v11, %v6253_v36  ;;  %s6480_s3 = smov 48 }
 0x349   :  { %v9882_v13 = vld [vmem:[%s16975_s0 + $0x305] ss:$16 sm:%s6314_s4]   ;;  %6259 = vrot.lane.b32.xlu0 %v6258_v17, %s10359_s27  ;;  %v5388_v21 = vpop.permute.xlu0 %5387   ;;  %s6531_s4 = smov 192 }
 0x34a   :  { %v6317_v18 = vsel %vm7_vm0, %v9882_v13, %v9881_v57  ;;  %v9883_v19 = vld [vmem:[%s16975_s0 + $0x305] ss:$16 sm:%s6319_s9]   ;;  %s6334_s9 = smov 3  ;;  %5391 = vst.msk [vmem:[#allocation0 + $0x58] sm:$0xff] %vm4930_vm12, %v5388_v21  }
 0x34b   :  { %v9884_v20 = vld [vmem:[%s16975_s0 + $0x305] ss:$16 sm:%s6324_s13]   ;;  %v6322_v23 = vsel %vm11_vm1, %v9883_v19, %v6317_v18  ;;  %s6383_s13 = smov 12 }
 0x34c   :  { %v9877_v26 = vld [vmem:[%s16975_s0 + $0x105] ss:$16 sm:%s6288_s16]   ;;  %v6327_v27 = vsel %vm15_vm2, %v9884_v20, %v6322_v23  ;;  %s6594_s16 = smov 48 }
 0x34d   :  { %v9878_v49 = vld [vmem:[%s16975_s0 + $0x105] ss:$16 sm:%s6291_s21]   ;;  %6328 = vrot.lane.b32.xlu1 %v6327_v27, %s10359_s27  ;;  %s6554_s21 = smov 192  ;;  %v5457_v29 = vpop.permute.xlu1 %5456  }
 0x34e   :  { %v9879_v24 = vld [vmem:[%s16975_s0 + $0x105] ss:$16 sm:%s6296_s18]   ;;  %v6294_v30 = vsel %vm7_vm0, %v9878_v49, %v9877_v26  ;;  %s6449_s18 = smov 3  ;;  %5460 = vst.msk [vmem:[#allocation0 + $0xb8] sm:$0xff] %vm4930_vm12, %v5457_v29  }
 0x34f   :  { %v9880_v32 = vld [vmem:[%s16975_s0 + $0x105] ss:$16 sm:%s6301_s25]   ;;  %v6299_v33 = vsel %vm11_vm1, %v9879_v24, %v6294_v30  ;;  %s6406_s25 = smov 12 }
 0x350   :  { %v9889_v34 = vld [vmem:[%s16975_s0 + $0x705] ss:$16 sm:%s6357_s28]   ;;  %v6304_v35 = vsel %vm15_vm2, %v9880_v32, %v6299_v33  ;;  %s6526_s28 = smov 48 }
 0x351   :  { %v9890_v25 = vld [vmem:[%s16975_s0 + $0x705] ss:$16 sm:%s6360_s29]   ;;  %6305 = vrot.lane.b32.xlu0 %v6304_v35, %s10359_s27  ;;  %v5434_v39 = vpop.permute.xlu0 %5433   ;;  %v5502_v47 = vpop.permute.xlu1 %5501   ;;  %s6577_s29 = smov 192 }
 0x352   :  { %v6363_v60 = vsel %vm7_vm0, %v9890_v25, %v9889_v34  ;;  %v9891_v1 = vld [vmem:[%s16975_s0 + $0x705] ss:$16 sm:%s6365_s8]   ;;  %s6380_s8 = smov 3  ;;  %5437 = vst.msk [vmem:[#allocation0 + $0x98] sm:$0xff] %vm4930_vm12, %v5434_v39  }
 0x353   :  { %v9892_v38 = vld [vmem:[%s16975_s0 + $0x705] ss:$16 sm:%s6370_s5]   ;;  %v6368_v59 = vsel %vm11_vm1, %v9891_v1, %v6363_v60  ;;  %s6429_s5 = smov 12  ;;  %5505 = vst.msk [vmem:[#allocation0 + $0x20] sm:$0xff] %vm5481_vm13, %v5502_v47  }
 0x354   :  { %v9885_v40 = vld [vmem:[%s16975_s0 + $0x505] ss:$16 sm:%s6334_s9]   ;;  %v6373_v41 = vsel %vm15_vm2, %v9892_v38, %v6368_v59  ;;  %s6645_s9 = smov 192 }
 0x355   :  { %v9886_v43 = vld [vmem:[%s16975_s0 + $0x505] ss:$16 sm:%s6337_s14]   ;;  %6374 = vrot.lane.b32.xlu1 %v6373_v41, %s10359_s27  ;;  %s6599_s14 = smov 192  ;;  %v5480_v53 = vpop.permute.xlu0 %5479   ;;  %v5548_v44 = vpop.permute.xlu1 %5547  }
 0x356   :  { %v9887_v45 = vld [vmem:[%s16975_s0 + $0x505] ss:$16 sm:%s6342_s15]   ;;  %v6340_v37 = vsel %vm7_vm0, %v9886_v43, %v9885_v40  ;;  %s6495_s15 = smov 3  ;;  %5482 = vst.msk [vmem:[#allocation0] sm:$0xff] %vm5481_vm13, %v5480_v53   ;;  %5551 = vst.msk [vmem:[#allocation0 + $0x60] sm:$0xff] %vm5481_vm13, %v5548_v44  }
 0x357   :  { %v9888_v48 = vld [vmem:[%s16975_s0 + $0x505] ss:$16 sm:%s6347_s20]   ;;  %v6345_v15 = vsel %vm11_vm1, %v9887_v45, %v6340_v37  ;;  %s6452_s20 = smov 12 }
 0x358   :  { %v9897_v50 = vld [vmem:[%s16975_s0 + $0xb05] ss:$16 sm:%s6403_s23]   ;;  %v6350_v6 = vsel %vm15_vm2, %v9888_v48, %v6345_v15  ;;  %s6572_s23 = smov 48 }
 0x359   :  { %v9898_v51 = vld [vmem:[%s16975_s0 + $0xb05] ss:$16 sm:%s6406_s25]   ;;  %6351 = vrot.lane.b32.xlu0 %v6350_v6, %s10359_s27  ;;  %s6622_s25 = smov 192  ;;  %v5525_v22 = vpop.permute.xlu0 %5524   ;;  %v5594_v12 = vpop.permute.xlu1 %5593  }
 0x35a   :  { %v6409_v14 = vsel %vm7_vm0, %v9898_v51, %v9897_v50  ;;  %v9899_v31 = vld [vmem:[%s16975_s0 + $0xb05] ss:$16 sm:%s6411_s30]   ;;  %s6426_s30 = smov 3  ;;  %5528 = vst.msk [vmem:[#allocation0 + $0x40] sm:$0xff] %vm5481_vm13, %v5525_v22   ;;  %5597 = vst.msk [vmem:[#allocation0 + $0xa0] sm:$0xff] %vm5481_vm13, %v5594_v12  }
 0x35b   :  { %v9900_v52 = vld [vmem:[%s16975_s0 + $0xb05] ss:$16 sm:%s6416_s2]   ;;  %v6414_v55 = vsel %vm11_vm1, %v9899_v31, %v6409_v14  ;;  %s6475_s2 = smov 12  ;;  %v9931_v31 = vld [vmem:[%s16975_s0 + $0x204] ss:$16 sm:%s6594_s16]   ;;  %s6609_s16 = smov 3 }
 0x35c   :  { %v9893_v56 = vld [vmem:[%s16975_s0 + $0x905] ss:$16 sm:%s6380_s8]   ;;  %v6419_v58 = vsel %vm15_vm2, %v9900_v52, %v6414_v55  ;;  %v9932_v52 = vld [vmem:[%s16975_s0 + $0x204] ss:$16 sm:%s6599_s14]   ;;  %s6691_s8 = smov 192  ;;  %s6658_s14 = smov 12 }
 0x35d   :  { %v9894_v61 = vld [vmem:[%s16975_s0 + $0x905] ss:$16 sm:%s6383_s13]   ;;  %6420 = vrot.lane.b32.xlu1 %v6419_v58, %s10359_s27  ;;  %s10360_s13 = smov 8   ;;  %v5571_v21 = vpop.permute.xlu0 %5570   ;;  %v5640_v29 = vpop.permute.xlu1 %5639  }
 0x35e   :  { %v9895_v62 = vld [vmem:[%s16975_s0 + $0x905] ss:$16 sm:%s6388_s10]   ;;  %v6386_v5 = vsel %vm7_vm0, %v9894_v61, %v9893_v56  ;;  %s6541_s10 = smov 3  ;;  %5574 = vst.msk [vmem:[#allocation0 + $0x80] sm:$0xff] %vm5481_vm13, %v5571_v21   ;;  %5643 = vst.msk [vmem:[#allocation0 + $0x28] sm:$0xff] %vm5481_vm13, %v5640_v29  }
 0x35f   :  { %v9896_v63 = vld [vmem:[%s16975_s0 + $0x905] ss:$16 sm:%s6393_s17]   ;;  %v6391_v0 = vsel %vm11_vm1, %v9895_v62, %v6386_v5  ;;  %s6498_s17 = smov 12  ;;  %v9927_v62 = vld [vmem:[%s16975_s0 + $0x4] ss:$16 sm:%s6572_s23]   ;;  %s6724_s23 = smov 3 }
 0x360   :  { %v9905_v42 = vld [vmem:[%s16975_s0 + $0x385] ss:$16 sm:%s6449_s18]   ;;  %v6396_v46 = vsel %vm15_vm2, %v9896_v63, %v6391_v0  ;;  %v9928_v63 = vld [vmem:[%s16975_s0 + $0x4] ss:$16 sm:%s6577_s29]   ;;  %s6617_s18 = smov 48  ;;  %s6681_s29 = smov 12 }
 0x361   :  { %v9906_v2 = vld [vmem:[%s16975_s0 + $0x385] ss:$16 sm:%s6452_s20]   ;;  %6397 = vrot.lane.b32.xlu0 %v6396_v46, %s10359_s27  ;;  %s6668_s20 = smov 192  ;;  %v5617_v39 = vpop.permute.xlu0 %5616  }
 0x362   :  { %v6455_v3 = vsel %vm7_vm0, %v9906_v2, %v9905_v42  ;;  %v9907_v28 = vld [vmem:[%s16975_s0 + $0x385] ss:$16 sm:%s6457_s26]   ;;  %s6472_s26 = smov 3  ;;  %5620 = vst.msk [vmem:[#allocation0 + $0x8] sm:$0xff] %vm5481_vm13, %v5617_v39   ;;  %v5686_v47 = vpop.permute.xlu1 %5685  }
 0x363   :  { %v9908_v4 = vld [vmem:[%s16975_s0 + $0x385] ss:$16 sm:%s6462_s6]   ;;  %v6460_v7 = vsel %vm11_vm1, %v9907_v28, %v6455_v3  ;;  %s6521_s6 = smov 12  ;;  %5689 = vst.msk [vmem:[#allocation0 + $0x68] sm:$0xff] %vm5481_vm13, %v5686_v47  }
 0x364   :  { %v9901_v8 = vld [vmem:[%s16975_s0 + $0x185] ss:$16 sm:%s6426_s30]   ;;  %v6465_v9 = vsel %vm15_vm2, %v9908_v4, %v6460_v7  ;;  %v9940_v4 = vld [vmem:[%s16975_s0 + $0x604] ss:$16 sm:%s6645_s9]   ;;  %s6737_s30 = smov 192  ;;  %s6704_s9 = smov 12 }
 0x365   :  { %v9902_v16 = vld [vmem:[%s16975_s0 + $0x185] ss:$16 sm:%s6429_s5]   ;;  %6466 = vrot.lane.b32.xlu1 %v6465_v9, %s10359_s27  ;;  %s6755_s5 = smov 48 }
 0x366   :  { %v9903_v54 = vld [vmem:[%s16975_s0 + $0x185] ss:$16 sm:%s6434_s7]   ;;  %v6432_v10 = vsel %vm7_vm0, %v9902_v16, %v9901_v8  ;;  %s6586_s7 = smov 3  ;;  %v9933_v8 = vld [vmem:[%s16975_s0 + $0x404] ss:$16 sm:%s6609_s16]   ;;  %v5663_v53 = vpop.permute.xlu0 %5662   ;;  %s6916_s16 = smov 48 }
 0x367   :  { %v9904_v11 = vld [vmem:[%s16975_s0 + $0x185] ss:$16 sm:%s6439_s12]   ;;  %v6437_v36 = vsel %vm11_vm1, %v9903_v54, %v6432_v10  ;;  %s6544_s12 = smov 12  ;;  %v9929_v50 = vld [vmem:[%s16975_s0 + $0x204] ss:$16 sm:%s6586_s7]   ;;  %5666 = vst.msk [vmem:[#allocation0 + $0x48] sm:$0xff] %vm5481_vm13, %v5663_v53  }
 0x368   :  { %v9913_v57 = vld [vmem:[%s16975_s0 + $0x785] ss:$16 sm:%s6495_s15]   ;;  %v6442_v17 = vsel %vm15_vm2, %v9904_v11, %v6437_v36  ;;  %v9935_v54 = vld [vmem:[%s16975_s0 + $0x404] ss:$16 sm:%s6617_s18]   ;;  %s6663_s15 = smov 48  ;;  %s6770_s18 = smov 3 }
 0x369   :  { %v9914_v13 = vld [vmem:[%s16975_s0 + $0x785] ss:$16 sm:%s6498_s17]   ;;  %6443 = vrot.lane.b32.xlu0 %v6442_v17, %s10359_s27  ;;  %s6714_s17 = smov 192  ;;  %s6806_s7 = smov 192 }
 0x36a   :  { %v6501_v18 = vsel %vm7_vm0, %v9914_v13, %v9913_v57  ;;  %v9915_v19 = vld [vmem:[%s16975_s0 + $0x785] ss:$16 sm:%s6503_s24]   ;;  %s6518_s24 = smov 3  ;;  %v9936_v11 = vld [vmem:[%s16975_s0 + $0x404] ss:$16 sm:%s6622_s25]   ;;  %s6727_s25 = smov 12  ;;  %v5732_v44 = vpop.permute.xlu1 %5731  }
 0x36b   :  { %v9916_v20 = vld [vmem:[%s16975_s0 + $0x785] ss:$16 sm:%s6508_s22]   ;;  %v6506_v23 = vsel %vm11_vm1, %v9915_v19, %v6501_v18  ;;  %s6567_s22 = smov 12  ;;  %v9946_v13 = vld [vmem:[%s16975_s0 + $0xa04] ss:$16 sm:%s6681_s29]   ;;  %5735 = vst.msk [vmem:[#allocation0 + $0xa8] sm:$0xff] %vm5481_vm13, %v5732_v44  }
 0x36c   :  { %v9909_v26 = vld [vmem:[%s16975_s0 + $0x585] ss:$16 sm:%s6472_s26]   ;;  %v6511_v27 = vsel %vm15_vm2, %v9916_v20, %v6506_v23  ;;  %v9926_v61 = vld [vmem:[%s16975_s0 + $0x4] ss:$16 sm:%s6567_s22]   ;;  %s6778_s26 = smov 48  ;;  %s6829_s22 = smov 192 }
 0x36d   :  { %v9910_v49 = vld [vmem:[%s16975_s0 + $0x585] ss:$16 sm:%s6475_s2]   ;;  %6512 = vrot.lane.b32.xlu1 %v6511_v27, %s10359_s27  ;;  %s6632_s2 = smov 3  ;;  %s6898_s29 = smov 192 }
 0x36e   :  { %v9911_v24 = vld [vmem:[%s16975_s0 + $0x585] ss:$16 sm:%s6480_s3]   ;;  %v6478_v30 = vsel %vm7_vm0, %v9910_v49, %v9909_v26  ;;  %s6635_s3 = smov 12  ;;  %v9937_v42 = vld [vmem:[%s16975_s0 + $0x604] ss:$16 sm:%s6632_s2]   ;;  %s6801_s2 = smov 48  ;;  %v5709_v22 = vpop.permute.xlu0 %5708  }
 0x36f   :  { %v9912_v32 = vld [vmem:[%s16975_s0 + $0x585] ss:$16 sm:%s6485_s11]   ;;  %v6483_v33 = vsel %vm11_vm1, %v9911_v24, %v6478_v30  ;;  %s6589_s11 = smov 12  ;;  %v9938_v2 = vld [vmem:[%s16975_s0 + $0x604] ss:$16 sm:%s6635_s3]   ;;  %5712 = vst.msk [vmem:[#allocation0 + $0x88] sm:$0xff] %vm5481_vm13, %v5709_v22  }
 0x370   :  { %v9921_v34 = vld [vmem:[%s16975_s0 + $0xb85] ss:$16 sm:%s6541_s10]   ;;  %v6488_v35 = vsel %vm15_vm2, %v9912_v32, %v6483_v33  ;;  %v9930_v51 = vld [vmem:[%s16975_s0 + $0x204] ss:$16 sm:%s6589_s11]   ;;  %s6640_s11 = smov 48  ;;  %v6638_v3 = vsel %vm7_vm0, %v9938_v2, %v9937_v42  ;;  %s6709_s10 = smov 48 }
 0x371   :  { %v9922_v25 = vld [vmem:[%s16975_s0 + $0xb85] ss:$16 sm:%s6544_s12]   ;;  %6489 = vrot.lane.b32.xlu0 %v6488_v35, %s10359_s27  ;;  %v6592_v14 = vsel %vm7_vm0, %v9930_v51, %v9929_v50  ;;  %s6760_s12 = smov 192  ;;  %s6852_s3 = smov 192 }
 0x372   :  { %v6547_v60 = vsel %vm7_vm0, %v9922_v25, %v9921_v34  ;;  %v9923_v1 = vld [vmem:[%s16975_s0 + $0xb85] ss:$16 sm:%s6549_s19]   ;;  %s6564_s19 = smov 3  ;;  %v6597_v55 = vsel %vm11_vm1, %v9931_v31, %v6592_v14  ;;  %v9939_v28 = vld [vmem:[%s16975_s0 + $0x604] ss:$16 sm:%s6640_s11]   ;;  %s6655_s11 = smov 3  ;;  %v5778_v12 = vpop.permute.xlu1 %5777  }
 0x373   :  { %v9924_v38 = vld [vmem:[%s16975_s0 + $0xb85] ss:$16 sm:%s6554_s21]   ;;  %v6552_v59 = vsel %vm11_vm1, %v9923_v1, %v6547_v60  ;;  %v9925_v56 = vld [vmem:[%s16975_s0 + $0x4] ss:$16 sm:%s6564_s19]   ;;  %v6602_v58 = vsel %vm15_vm2, %v9932_v52, %v6597_v55  ;;  %s6612_s21 = smov 12  ;;  %v6643_v7 = vsel %vm11_vm1, %v9939_v28, %v6638_v3  ;;  %s6870_s19 = smov 48 }
 0x374   :  { %v9917_v40 = vld [vmem:[%s16975_s0 + $0x985] ss:$16 sm:%s6518_s24]   ;;  %v6557_v41 = vsel %vm15_vm2, %v9924_v38, %v6552_v59  ;;  %v6570_v5 = vsel %vm7_vm0, %v9926_v61, %v9925_v56  ;;  %v6648_v9 = vsel %vm15_vm2, %v9940_v4, %v6643_v7  ;;  %v9934_v16 = vld [vmem:[%s16975_s0 + $0x404] ss:$16 sm:%s6612_s21]   ;;  %s6824_s24 = smov 48  ;;  %s6875_s21 = smov 192 }
 0x375   :  { %v9918_v43 = vld [vmem:[%s16975_s0 + $0x985] ss:$16 sm:%s6521_s6]   ;;  %6558 = vrot.lane.b32.xlu1 %v6557_v41, %s10359_s27  ;;  %v6575_v0 = vsel %vm11_vm1, %v9927_v62, %v6570_v5  ;;  %v6615_v10 = vsel %vm7_vm0, %v9934_v16, %v9933_v8  ;;  %s6783_s6 = smov 192  ;;  %5781 = vst.msk [vmem:[#allocation0 + $0x30] sm:$0xff] %vm5481_vm13, %v5778_v12  }
 0x376   :  { %v9919_v45 = vld [vmem:[%s16975_s0 + $0x985] ss:$16 sm:%s6526_s28]   ;;  %v6524_v37 = vsel %vm7_vm0, %v9918_v43, %v9917_v40  ;;  %v6580_v46 = vsel %vm15_vm2, %v9928_v63, %v6575_v0  ;;  %s6678_s28 = smov 3  ;;  %v6620_v36 = vsel %vm11_vm1, %v9935_v54, %v6615_v10  ;;  %v9948_v20 = vld [vmem:[%s16975_s0 + $0xa04] ss:$16 sm:%s6691_s8]   ;;  %s6750_s8 = smov 12  ;;  %v5755_v21 = vpop.permute.xlu0 %5754  }
 0x377   :  { %v9920_v48 = vld [vmem:[%s16975_s0 + $0x985] ss:$16 sm:%s6531_s4]   ;;  %v6529_v15 = vsel %vm11_vm1, %v9919_v45, %v6524_v37  ;;  %s6686_s4 = smov 48  ;;  %v9945_v57 = vld [vmem:[%s16975_s0 + $0xa04] ss:$16 sm:%s6678_s28]   ;;  %v6625_v17 = vsel %vm15_vm2, %v9936_v11, %v6620_v36  ;;  %s6847_s28 = smov 48 }
 0x378   :  { %v6534_v6 = vsel %vm15_vm2, %v9920_v48, %v6529_v15  ;;  %v6684_v18 = vsel %vm7_vm0, %v9946_v13, %v9945_v57  ;;  %v9947_v19 = vld [vmem:[%s16975_s0 + $0xa04] ss:$16 sm:%s6686_s4]   ;;  %s6701_s4 = smov 3  ;;  %5758 = vst.msk [vmem:[#allocation0 + $0x10] sm:$0xff] %vm5481_vm13, %v5755_v21  }
 0x379   :  { %6535 = vrot.lane.b32.xlu0 %v6534_v6, %s10359_s27  ;;  %6603 = vrot.lane.b32.xlu1 %v6602_v58, %s10360_s13  ;;  %v6689_v23 = vsel %vm11_vm1, %v9947_v19, %v6684_v18  ;;  %v9941_v26 = vld [vmem:[%s16975_s0 + $0x804] ss:$16 sm:%s6655_s11]   ;;  %s6732_s27 = smov 48  ;;  %s6962_s11 = smov 48 }
 0x37a   :  { %v6694_v27 = vsel %vm15_vm2, %v9948_v20, %v6689_v23  ;;  %v9942_v49 = vld [vmem:[%s16975_s0 + $0x804] ss:$16 sm:%s6658_s14]   ;;  %s6921_s14 = smov 192  ;;  %v5824_v29 = vpop.permute.xlu1 %5823  }
 0x37b   :  { %v9943_v24 = vld [vmem:[%s16975_s0 + $0x804] ss:$16 sm:%s6663_s15]   ;;  %v6661_v30 = vsel %vm7_vm0, %v9942_v49, %v9941_v26  ;;  %s6816_s15 = smov 3  ;;  %5827 = vst.msk [vmem:[#allocation0 + $0x70] sm:$0xff] %vm5481_vm13, %v5824_v29  }
 0x37c   :  { %v9944_v32 = vld [vmem:[%s16975_s0 + $0x804] ss:$16 sm:%s6668_s20]   ;;  %v6666_v33 = vsel %vm11_vm1, %v9943_v24, %v6661_v30  ;;  %s6773_s20 = smov 12 }
 0x37d   :  { %6581 = vrot.lane.b32.xlu0 %v6580_v46, %s10360_s13  ;;  %6649 = vrot.lane.b32.xlu1 %v6648_v9, %s10360_s13  ;;  %v9953_v34 = vld [vmem:[%s16975_s0 + $0x284] ss:$16 sm:%s6724_s23]   ;;  %v6671_v35 = vsel %vm15_vm2, %v9944_v32, %v6666_v33  ;;  %s6893_s23 = smov 48 }
 0x37e   :  { %v9954_v25 = vld [vmem:[%s16975_s0 + $0x284] ss:$16 sm:%s6727_s25]   ;;  %v5801_v39 = vpop.permute.xlu0 %5800   ;;  %s6944_s25 = smov 192 }
 0x37f   :  { %v6730_v60 = vsel %vm7_vm0, %v9954_v25, %v9953_v34  ;;  %v9955_v1 = vld [vmem:[%s16975_s0 + $0x284] ss:$16 sm:%s6732_s27]   ;;  %s6747_s27 = smov 3  ;;  %5804 = vst.msk [vmem:[#allocation0 + $0x50] sm:$0xff] %vm5481_vm13, %v5801_v39  }
 0x380   :  { %v9956_v38 = vld [vmem:[%s16975_s0 + $0x284] ss:$16 sm:%s6737_s30]   ;;  %v6735_v59 = vsel %vm11_vm1, %v9955_v1, %v6730_v60  ;;  %s6796_s30 = smov 12 }
 0x381   :  { %6626 = vrot.lane.b32.xlu0 %v6625_v17, %s10360_s13  ;;  %6695 = vrot.lane.b32.xlu1 %v6694_v27, %s10360_s13  ;;  %v9949_v40 = vld [vmem:[%s16975_s0 + $0x84] ss:$16 sm:%s6701_s4]   ;;  %v6740_v41 = vsel %vm15_vm2, %v9956_v38, %v6735_v59  ;;  %s7008_s4 = smov 48 }
 0x382   :  { %v9950_v43 = vld [vmem:[%s16975_s0 + $0x84] ss:$16 sm:%s6704_s9]   ;;  %s6967_s9 = smov 192  ;;  %v5870_v47 = vpop.permute.xlu1 %5869  }
 0x383   :  { %v9951_v45 = vld [vmem:[%s16975_s0 + $0x84] ss:$16 sm:%s6709_s10]   ;;  %v6707_v37 = vsel %vm7_vm0, %v9950_v43, %v9949_v40  ;;  %s6862_s10 = smov 3  ;;  %5873 = vst.msk [vmem:[#allocation0 + $0xb0] sm:$0xff] %vm5481_vm13, %v5870_v47  }
 0x384   :  { %v9952_v48 = vld [vmem:[%s16975_s0 + $0x84] ss:$16 sm:%s6714_s17]   ;;  %v6712_v15 = vsel %vm11_vm1, %v9951_v45, %v6707_v37  ;;  %s6819_s17 = smov 12 }
 0x385   :  { %6672 = vrot.lane.b32.xlu0 %v6671_v35, %s10360_s13  ;;  %6741 = vrot.lane.b32.xlu1 %v6740_v41, %s10360_s13  ;;  %v9961_v50 = vld [vmem:[%s16975_s0 + $0x684] ss:$16 sm:%s6770_s18]   ;;  %v6717_v6 = vsel %vm15_vm2, %v9952_v48, %v6712_v15  ;;  %s6939_s18 = smov 48 }
 0x386   :  { %v9962_v51 = vld [vmem:[%s16975_s0 + $0x684] ss:$16 sm:%s6773_s20]   ;;  %v5847_v53 = vpop.permute.xlu0 %5846   ;;  %s6990_s20 = smov 192 }
 0x387   :  { %v6776_v14 = vsel %vm7_vm0, %v9962_v51, %v9961_v50  ;;  %v9963_v31 = vld [vmem:[%s16975_s0 + $0x684] ss:$16 sm:%s6778_s26]   ;;  %s6793_s26 = smov 3  ;;  %5850 = vst.msk [vmem:[#allocation0 + $0x90] sm:$0xff] %vm5481_vm13, %v5847_v53  }
 0x388   :  { %v9964_v52 = vld [vmem:[%s16975_s0 + $0x684] ss:$16 sm:%s6783_s6]   ;;  %v6781_v55 = vsel %vm11_vm1, %v9963_v31, %v6776_v14  ;;  %s6842_s6 = smov 12 }
 0x389   :  { %6718 = vrot.lane.b32.xlu0 %v6717_v6, %s10360_s13  ;;  %v9957_v56 = vld [vmem:[%s16975_s0 + $0x484] ss:$16 sm:%s6747_s27]   ;;  %v6786_v58 = vsel %vm15_vm2, %v9964_v52, %v6781_v55  ;;  %s7054_s27 = smov 48 }
 0x38a   :  { %v9958_v61 = vld [vmem:[%s16975_s0 + $0x484] ss:$16 sm:%s6750_s8]   ;;  %6787 = vrot.lane.b32.xlu1 %v6786_v58, %s10360_s13  ;;  %s7013_s8 = smov 192  ;;  %v5916_v44 = vpop.permute.xlu1 %5915  }
 0x38b   :  { %v9959_v62 = vld [vmem:[%s16975_s0 + $0x484] ss:$16 sm:%s6755_s5]   ;;  %v6753_v5 = vsel %vm7_vm0, %v9958_v61, %v9957_v56  ;;  %s6908_s5 = smov 3  ;;  %5919 = vst.msk [vmem:[#allocation0 + $0x38] sm:$0xff] %vm5481_vm13, %v5916_v44  }
 0x38c   :  { %v9960_v63 = vld [vmem:[%s16975_s0 + $0x484] ss:$16 sm:%s6760_s12]   ;;  %v6758_v0 = vsel %vm11_vm1, %v9959_v62, %v6753_v5  ;;  %s6865_s12 = smov 12 }
 0x38d   :  { %v9969_v42 = vld [vmem:[%s16975_s0 + $0xa84] ss:$16 sm:%s6816_s15]   ;;  %v6763_v46 = vsel %vm15_vm2, %v9960_v63, %v6758_v0  ;;  %s6985_s15 = smov 48 }
 0x38e   :  { %v9970_v2 = vld [vmem:[%s16975_s0 + $0xa84] ss:$16 sm:%s6819_s17]   ;;  %6764 = vrot.lane.b32.xlu0 %v6763_v46, %s10360_s13  ;;  %v5893_v22 = vpop.permute.xlu0 %5892   ;;  %s7036_s17 = smov 192 }
 0x38f   :  { %v6822_v3 = vsel %vm7_vm0, %v9970_v2, %v9969_v42  ;;  %v9971_v28 = vld [vmem:[%s16975_s0 + $0xa84] ss:$16 sm:%s6824_s24]   ;;  %s6839_s24 = smov 3  ;;  %5896 = vst.msk [vmem:[#allocation0 + $0x18] sm:$0xff] %vm5481_vm13, %v5893_v22  }
 0x390   :  { %v9972_v4 = vld [vmem:[%s16975_s0 + $0xa84] ss:$16 sm:%s6829_s22]   ;;  %v6827_v7 = vsel %vm11_vm1, %v9971_v28, %v6822_v3  ;;  %s6888_s22 = smov 12 }
 0x391   :  { %v9965_v8 = vld [vmem:[%s16975_s0 + $0x884] ss:$16 sm:%s6793_s26]   ;;  %v6832_v9 = vsel %vm15_vm2, %v9972_v4, %v6827_v7  ;;  %s7100_s26 = smov 48 }
 0x392   :  { %v9966_v16 = vld [vmem:[%s16975_s0 + $0x884] ss:$16 sm:%s6796_s30]   ;;  %6833 = vrot.lane.b32.xlu1 %v6832_v9, %s10360_s13  ;;  %s7059_s30 = smov 192  ;;  %v5962_v12 = vpop.permute.xlu1 %5961  }
 0x393   :  { %v9967_v54 = vld [vmem:[%s16975_s0 + $0x884] ss:$16 sm:%s6801_s2]   ;;  %v6799_v10 = vsel %vm7_vm0, %v9966_v16, %v9965_v8  ;;  %s6954_s2 = smov 3  ;;  %5965 = vst.msk [vmem:[#allocation0 + $0x78] sm:$0xff] %vm5481_vm13, %v5962_v12  }
 0x394   :  { %v9968_v11 = vld [vmem:[%s16975_s0 + $0x884] ss:$16 sm:%s6806_s7]   ;;  %v6804_v36 = vsel %vm11_vm1, %v9967_v54, %v6799_v10  ;;  %s6911_s7 = smov 12 }
 0x395   :  { %v9977_v57 = vld [vmem:[%s16975_s0 + $0x304] ss:$16 sm:%s6862_s10]   ;;  %v6809_v17 = vsel %vm15_vm2, %v9968_v11, %v6804_v36  ;;  %s7031_s10 = smov 48 }
 0x396   :  { %v9978_v13 = vld [vmem:[%s16975_s0 + $0x304] ss:$16 sm:%s6865_s12]   ;;  %6810 = vrot.lane.b32.xlu0 %v6809_v17, %s10360_s13  ;;  %v5939_v21 = vpop.permute.xlu0 %5938   ;;  %s7082_s12 = smov 192 }
 0x397   :  { %v6868_v18 = vsel %vm7_vm0, %v9978_v13, %v9977_v57  ;;  %v9979_v19 = vld [vmem:[%s16975_s0 + $0x304] ss:$16 sm:%s6870_s19]   ;;  %s6885_s19 = smov 3  ;;  %5942 = vst.msk [vmem:[#allocation0 + $0x58] sm:$0xff] %vm5481_vm13, %v5939_v21  }
 0x398   :  { %v9980_v20 = vld [vmem:[%s16975_s0 + $0x304] ss:$16 sm:%s6875_s21]   ;;  %v6873_v23 = vsel %vm11_vm1, %v9979_v19, %v6868_v18  ;;  %s6934_s21 = smov 12 }
 0x399   :  { %v9973_v26 = vld [vmem:[%s16975_s0 + $0x104] ss:$16 sm:%s6839_s24]   ;;  %v6878_v27 = vsel %vm15_vm2, %v9980_v20, %v6873_v23  ;;  %s7145_s24 = smov 48 }
 0x39a   :  { %v9974_v49 = vld [vmem:[%s16975_s0 + $0x104] ss:$16 sm:%s6842_s6]   ;;  %6879 = vrot.lane.b32.xlu1 %v6878_v27, %s10360_s13  ;;  %s7105_s6 = smov 192  ;;  %v6008_v29 = vpop.permute.xlu1 %6007  }
 0x39b   :  { %v9975_v24 = vld [vmem:[%s16975_s0 + $0x104] ss:$16 sm:%s6847_s28]   ;;  %v6845_v30 = vsel %vm7_vm0, %v9974_v49, %v9973_v26  ;;  %s7000_s28 = smov 3  ;;  %6011 = vst.msk [vmem:[#allocation0 + $0xb8] sm:$0xff] %vm5481_vm13, %v6008_v29  }
 0x39c   :  { %v9976_v32 = vld [vmem:[%s16975_s0 + $0x104] ss:$16 sm:%s6852_s3]   ;;  %v6850_v33 = vsel %vm11_vm1, %v9975_v24, %v6845_v30  ;;  %s6957_s3 = smov 12 }
 0x39d   :  { %v9985_v34 = vld [vmem:[%s16975_s0 + $0x704] ss:$16 sm:%s6908_s5]   ;;  %v6855_v35 = vsel %vm15_vm2, %v9976_v32, %v6850_v33  ;;  %s7077_s5 = smov 48 }
 0x39e   :  { %v9986_v25 = vld [vmem:[%s16975_s0 + $0x704] ss:$16 sm:%s6911_s7]   ;;  %6856 = vrot.lane.b32.xlu0 %v6855_v35, %s10360_s13  ;;  %v5985_v39 = vpop.permute.xlu0 %5984   ;;  %v6053_v47 = vpop.permute.xlu1 %6052   ;;  %s7128_s7 = smov 192 }
 0x39f   :  { %v6914_v60 = vsel %vm7_vm0, %v9986_v25, %v9985_v34  ;;  %v9987_v1 = vld [vmem:[%s16975_s0 + $0x704] ss:$16 sm:%s6916_s16]   ;;  %s6931_s16 = smov 3  ;;  %5988 = vst.msk [vmem:[#allocation0 + $0x98] sm:$0xff] %vm5481_vm13, %v5985_v39  }
 0x3a0   :  { %v9988_v38 = vld [vmem:[%s16975_s0 + $0x704] ss:$16 sm:%s6921_s14]   ;;  %v6919_v59 = vsel %vm11_vm1, %v9987_v1, %v6914_v60  ;;  %s6980_s14 = smov 12  ;;  %6056 = vst.msk [vmem:[#allocation0 + $0x20] sm:$0xff] %vm6032_vm14, %v6053_v47  }
 0x3a1   :  { %v9981_v40 = vld [vmem:[%s16975_s0 + $0x504] ss:$16 sm:%s6885_s19]   ;;  %v6924_v41 = vsel %vm15_vm2, %v9988_v38, %v6919_v59  ;;  %s7196_s19 = smov 192 }
 0x3a2   :  { %v9982_v43 = vld [vmem:[%s16975_s0 + $0x504] ss:$16 sm:%s6888_s22]   ;;  %6925 = vrot.lane.b32.xlu1 %v6924_v41, %s10360_s13  ;;  %s7150_s22 = smov 192  ;;  %v6031_v53 = vpop.permute.xlu0 %6030   ;;  %v6099_v44 = vpop.permute.xlu1 %6098  }
 0x3a3   :  { %v9983_v45 = vld [vmem:[%s16975_s0 + $0x504] ss:$16 sm:%s6893_s23]   ;;  %v6891_v37 = vsel %vm7_vm0, %v9982_v43, %v9981_v40  ;;  %s7046_s23 = smov 3  ;;  %6033 = vst.msk [vmem:[#allocation0] sm:$0xff] %vm6032_vm14, %v6031_v53   ;;  %6102 = vst.msk [vmem:[#allocation0 + $0x60] sm:$0xff] %vm6032_vm14, %v6099_v44  }
 0x3a4   :  { %v9984_v48 = vld [vmem:[%s16975_s0 + $0x504] ss:$16 sm:%s6898_s29]   ;;  %v6896_v15 = vsel %vm11_vm1, %v9983_v45, %v6891_v37  ;;  %s7003_s29 = smov 12 }
 0x3a5   :  { %v9993_v50 = vld [vmem:[%s16975_s0 + $0xb04] ss:$16 sm:%s6954_s2]   ;;  %v6901_v6 = vsel %vm15_vm2, %v9984_v48, %v6896_v15  ;;  %s7123_s2 = smov 48 }
 0x3a6   :  { %v9994_v51 = vld [vmem:[%s16975_s0 + $0xb04] ss:$16 sm:%s6957_s3]   ;;  %6902 = vrot.lane.b32.xlu0 %v6901_v6, %s10360_s13  ;;  %s7173_s3 = smov 192  ;;  %v6076_v22 = vpop.permute.xlu0 %6075   ;;  %v6145_v12 = vpop.permute.xlu1 %6144  }
 0x3a7   :  { %v6960_v14 = vsel %vm7_vm0, %v9994_v51, %v9993_v50  ;;  %v9995_v31 = vld [vmem:[%s16975_s0 + $0xb04] ss:$16 sm:%s6962_s11]   ;;  %s6977_s11 = smov 3  ;;  %6079 = vst.msk [vmem:[#allocation0 + $0x40] sm:$0xff] %vm6032_vm14, %v6076_v22   ;;  %6148 = vst.msk [vmem:[#allocation0 + $0xa0] sm:$0xff] %vm6032_vm14, %v6145_v12  }
 0x3a8   :  { %v9996_v52 = vld [vmem:[%s16975_s0 + $0xb04] ss:$16 sm:%s6967_s9]   ;;  %v6965_v55 = vsel %vm11_vm1, %v9995_v31, %v6960_v14  ;;  %s7026_s9 = smov 12  ;;  %v10027_v31 = vld [vmem:[%s16975_s0 + $0x203] ss:$16 sm:%s7145_s24]   ;;  %s7160_s24 = smov 3 }
 0x3a9   :  { %v9989_v56 = vld [vmem:[%s16975_s0 + $0x904] ss:$16 sm:%s6931_s16]   ;;  %v6970_v58 = vsel %vm15_vm2, %v9996_v52, %v6965_v55  ;;  %v10028_v52 = vld [vmem:[%s16975_s0 + $0x203] ss:$16 sm:%s7150_s22]   ;;  %s7242_s16 = smov 192  ;;  %s7209_s22 = smov 12 }
 0x3aa   :  { %v9990_v61 = vld [vmem:[%s16975_s0 + $0x904] ss:$16 sm:%s6934_s21]   ;;  %6971 = vrot.lane.b32.xlu1 %v6970_v58, %s10360_s13  ;;  %s10361_s21 = smov 6   ;;  %v6122_v21 = vpop.permute.xlu0 %6121   ;;  %v6191_v29 = vpop.permute.xlu1 %6190  }
 0x3ab   :  { %v9991_v62 = vld [vmem:[%s16975_s0 + $0x904] ss:$16 sm:%s6939_s18]   ;;  %v6937_v5 = vsel %vm7_vm0, %v9990_v61, %v9989_v56  ;;  %s7092_s18 = smov 3  ;;  %6125 = vst.msk [vmem:[#allocation0 + $0x80] sm:$0xff] %vm6032_vm14, %v6122_v21   ;;  %6194 = vst.msk [vmem:[#allocation0 + $0x28] sm:$0xff] %vm6032_vm14, %v6191_v29  }
 0x3ac   :  { %v9992_v63 = vld [vmem:[%s16975_s0 + $0x904] ss:$16 sm:%s6944_s25]   ;;  %v6942_v0 = vsel %vm11_vm1, %v9991_v62, %v6937_v5  ;;  %s7049_s25 = smov 12  ;;  %v10023_v62 = vld [vmem:[%s16975_s0 + $0x3] ss:$16 sm:%s7123_s2]   ;;  %s7275_s2 = smov 3 }
 0x3ad   :  { %v10001_v42 = vld [vmem:[%s16975_s0 + $0x384] ss:$16 sm:%s7000_s28]   ;;  %v6947_v46 = vsel %vm15_vm2, %v9992_v63, %v6942_v0  ;;  %v10024_v63 = vld [vmem:[%s16975_s0 + $0x3] ss:$16 sm:%s7128_s7]   ;;  %s7168_s28 = smov 48  ;;  %s7232_s7 = smov 12 }
 0x3ae   :  { %v10002_v2 = vld [vmem:[%s16975_s0 + $0x384] ss:$16 sm:%s7003_s29]   ;;  %6948 = vrot.lane.b32.xlu0 %v6947_v46, %s10360_s13  ;;  %s7219_s29 = smov 192  ;;  %v6168_v39 = vpop.permute.xlu0 %6167  }
 0x3af   :  { %v7006_v3 = vsel %vm7_vm0, %v10002_v2, %v10001_v42  ;;  %v10003_v28 = vld [vmem:[%s16975_s0 + $0x384] ss:$16 sm:%s7008_s4]   ;;  %s7023_s4 = smov 3  ;;  %6171 = vst.msk [vmem:[#allocation0 + $0x8] sm:$0xff] %vm6032_vm14, %v6168_v39   ;;  %v6237_v47 = vpop.permute.xlu1 %6236  }
 0x3b0   :  { %v10004_v4 = vld [vmem:[%s16975_s0 + $0x384] ss:$16 sm:%s7013_s8]   ;;  %v7011_v7 = vsel %vm11_vm1, %v10003_v28, %v7006_v3  ;;  %s7072_s8 = smov 12  ;;  %6240 = vst.msk [vmem:[#allocation0 + $0x68] sm:$0xff] %vm6032_vm14, %v6237_v47  }
 0x3b1   :  { %v9997_v8 = vld [vmem:[%s16975_s0 + $0x184] ss:$16 sm:%s6977_s11]   ;;  %v7016_v9 = vsel %vm15_vm2, %v10004_v4, %v7011_v7  ;;  %v10036_v4 = vld [vmem:[%s16975_s0 + $0x603] ss:$16 sm:%s7196_s19]   ;;  %s7288_s11 = smov 192  ;;  %s7255_s19 = smov 12 }
 0x3b2   :  { %v9998_v16 = vld [vmem:[%s16975_s0 + $0x184] ss:$16 sm:%s6980_s14]   ;;  %7017 = vrot.lane.b32.xlu1 %v7016_v9, %s10360_s13  ;;  %s7306_s14 = smov 48 }
 0x3b3   :  { %v9999_v54 = vld [vmem:[%s16975_s0 + $0x184] ss:$16 sm:%s6985_s15]   ;;  %v6983_v10 = vsel %vm7_vm0, %v9998_v16, %v9997_v8  ;;  %s7137_s15 = smov 3  ;;  %v10029_v8 = vld [vmem:[%s16975_s0 + $0x403] ss:$16 sm:%s7160_s24]   ;;  %v6214_v53 = vpop.permute.xlu0 %6213   ;;  %s7467_s24 = smov 48 }
 0x3b4   :  { %v10000_v11 = vld [vmem:[%s16975_s0 + $0x184] ss:$16 sm:%s6990_s20]   ;;  %v6988_v36 = vsel %vm11_vm1, %v9999_v54, %v6983_v10  ;;  %s7095_s20 = smov 12  ;;  %v10025_v50 = vld [vmem:[%s16975_s0 + $0x203] ss:$16 sm:%s7137_s15]   ;;  %6217 = vst.msk [vmem:[#allocation0 + $0x48] sm:$0xff] %vm6032_vm14, %v6214_v53  }
 0x3b5   :  { %v10009_v57 = vld [vmem:[%s16975_s0 + $0x784] ss:$16 sm:%s7046_s23]   ;;  %v6993_v17 = vsel %vm15_vm2, %v10000_v11, %v6988_v36  ;;  %v10031_v54 = vld [vmem:[%s16975_s0 + $0x403] ss:$16 sm:%s7168_s28]   ;;  %s7214_s23 = smov 48  ;;  %s7321_s28 = smov 3 }
 0x3b6   :  { %v10010_v13 = vld [vmem:[%s16975_s0 + $0x784] ss:$16 sm:%s7049_s25]   ;;  %6994 = vrot.lane.b32.xlu0 %v6993_v17, %s10360_s13  ;;  %s7265_s25 = smov 192  ;;  %s7357_s15 = smov 192 }
 0x3b7   :  { %v7052_v18 = vsel %vm7_vm0, %v10010_v13, %v10009_v57  ;;  %v10011_v19 = vld [vmem:[%s16975_s0 + $0x784] ss:$16 sm:%s7054_s27]   ;;  %s7069_s27 = smov 3  ;;  %v10032_v11 = vld [vmem:[%s16975_s0 + $0x403] ss:$16 sm:%s7173_s3]   ;;  %s7278_s3 = smov 12  ;;  %v6283_v44 = vpop.permute.xlu1 %6282  }
 0x3b8   :  { %v10012_v20 = vld [vmem:[%s16975_s0 + $0x784] ss:$16 sm:%s7059_s30]   ;;  %v7057_v23 = vsel %vm11_vm1, %v10011_v19, %v7052_v18  ;;  %s7118_s30 = smov 12  ;;  %v10042_v13 = vld [vmem:[%s16975_s0 + $0xa03] ss:$16 sm:%s7232_s7]   ;;  %6286 = vst.msk [vmem:[#allocation0 + $0xa8] sm:$0xff] %vm6032_vm14, %v6283_v44  }
 0x3b9   :  { %v10005_v26 = vld [vmem:[%s16975_s0 + $0x584] ss:$16 sm:%s7023_s4]   ;;  %v7062_v27 = vsel %vm15_vm2, %v10012_v20, %v7057_v23  ;;  %v10022_v61 = vld [vmem:[%s16975_s0 + $0x3] ss:$16 sm:%s7118_s30]   ;;  %s7329_s4 = smov 48  ;;  %s7380_s30 = smov 192 }
 0x3ba   :  { %v10006_v49 = vld [vmem:[%s16975_s0 + $0x584] ss:$16 sm:%s7026_s9]   ;;  %7063 = vrot.lane.b32.xlu1 %v7062_v27, %s10360_s13  ;;  %s7183_s9 = smov 3  ;;  %s7449_s7 = smov 192 }
 0x3bb   :  { %v10007_v24 = vld [vmem:[%s16975_s0 + $0x584] ss:$16 sm:%s7031_s10]   ;;  %v7029_v30 = vsel %vm7_vm0, %v10006_v49, %v10005_v26  ;;  %s7186_s10 = smov 12  ;;  %v10033_v42 = vld [vmem:[%s16975_s0 + $0x603] ss:$16 sm:%s7183_s9]   ;;  %s7352_s9 = smov 48  ;;  %v6260_v22 = vpop.permute.xlu0 %6259  }
 0x3bc   :  { %v10008_v32 = vld [vmem:[%s16975_s0 + $0x584] ss:$16 sm:%s7036_s17]   ;;  %v7034_v33 = vsel %vm11_vm1, %v10007_v24, %v7029_v30  ;;  %s7140_s17 = smov 12  ;;  %v10034_v2 = vld [vmem:[%s16975_s0 + $0x603] ss:$16 sm:%s7186_s10]   ;;  %6263 = vst.msk [vmem:[#allocation0 + $0x88] sm:$0xff] %vm6032_vm14, %v6260_v22  }
 0x3bd   :  { %v10017_v34 = vld [vmem:[%s16975_s0 + $0xb84] ss:$16 sm:%s7092_s18]   ;;  %v7039_v35 = vsel %vm15_vm2, %v10008_v32, %v7034_v33  ;;  %v10026_v51 = vld [vmem:[%s16975_s0 + $0x203] ss:$16 sm:%s7140_s17]   ;;  %s7191_s17 = smov 48  ;;  %v7189_v3 = vsel %vm7_vm0, %v10034_v2, %v10033_v42  ;;  %s7260_s18 = smov 48 }
 0x3be   :  { %v10018_v25 = vld [vmem:[%s16975_s0 + $0xb84] ss:$16 sm:%s7095_s20]   ;;  %7040 = vrot.lane.b32.xlu0 %v7039_v35, %s10360_s13  ;;  %v7143_v14 = vsel %vm7_vm0, %v10026_v51, %v10025_v50  ;;  %s7311_s20 = smov 192  ;;  %s7403_s10 = smov 192 }
 0x3bf   :  { %v7098_v60 = vsel %vm7_vm0, %v10018_v25, %v10017_v34  ;;  %v10019_v1 = vld [vmem:[%s16975_s0 + $0xb84] ss:$16 sm:%s7100_s26]   ;;  %s7115_s26 = smov 3  ;;  %v7148_v55 = vsel %vm11_vm1, %v10027_v31, %v7143_v14  ;;  %v10035_v28 = vld [vmem:[%s16975_s0 + $0x603] ss:$16 sm:%s7191_s17]   ;;  %s7206_s17 = smov 3  ;;  %v6329_v12 = vpop.permute.xlu1 %6328  }
 0x3c0   :  { %v10020_v38 = vld [vmem:[%s16975_s0 + $0xb84] ss:$16 sm:%s7105_s6]   ;;  %v7103_v59 = vsel %vm11_vm1, %v10019_v1, %v7098_v60  ;;  %v10021_v56 = vld [vmem:[%s16975_s0 + $0x3] ss:$16 sm:%s7115_s26]   ;;  %v7153_v58 = vsel %vm15_vm2, %v10028_v52, %v7148_v55  ;;  %s7163_s6 = smov 12  ;;  %v7194_v7 = vsel %vm11_vm1, %v10035_v28, %v7189_v3  ;;  %s7421_s26 = smov 48 }
 0x3c1   :  { %v10013_v40 = vld [vmem:[%s16975_s0 + $0x984] ss:$16 sm:%s7069_s27]   ;;  %v7108_v41 = vsel %vm15_vm2, %v10020_v38, %v7103_v59  ;;  %v7121_v5 = vsel %vm7_vm0, %v10022_v61, %v10021_v56  ;;  %v7199_v9 = vsel %vm15_vm2, %v10036_v4, %v7194_v7  ;;  %v10030_v16 = vld [vmem:[%s16975_s0 + $0x403] ss:$16 sm:%s7163_s6]   ;;  %s7375_s27 = smov 48  ;;  %s7426_s6 = smov 192 }
 0x3c2   :  { %v10014_v43 = vld [vmem:[%s16975_s0 + $0x984] ss:$16 sm:%s7072_s8]   ;;  %7109 = vrot.lane.b32.xlu1 %v7108_v41, %s10360_s13  ;;  %v7126_v0 = vsel %vm11_vm1, %v10023_v62, %v7121_v5  ;;  %v7166_v10 = vsel %vm7_vm0, %v10030_v16, %v10029_v8  ;;  %s7334_s8 = smov 192  ;;  %6332 = vst.msk [vmem:[#allocation0 + $0x30] sm:$0xff] %vm6032_vm14, %v6329_v12  }
 0x3c3   :  { %v10015_v45 = vld [vmem:[%s16975_s0 + $0x984] ss:$16 sm:%s7077_s5]   ;;  %v7075_v37 = vsel %vm7_vm0, %v10014_v43, %v10013_v40  ;;  %v7131_v46 = vsel %vm15_vm2, %v10024_v63, %v7126_v0  ;;  %s7229_s5 = smov 3  ;;  %v7171_v36 = vsel %vm11_vm1, %v10031_v54, %v7166_v10  ;;  %v10044_v20 = vld [vmem:[%s16975_s0 + $0xa03] ss:$16 sm:%s7242_s16]   ;;  %s7301_s16 = smov 12  ;;  %v6306_v21 = vpop.permute.xlu0 %6305  }
 0x3c4   :  { %v10016_v48 = vld [vmem:[%s16975_s0 + $0x984] ss:$16 sm:%s7082_s12]   ;;  %v7080_v15 = vsel %vm11_vm1, %v10015_v45, %v7075_v37  ;;  %s7237_s12 = smov 48  ;;  %v10041_v57 = vld [vmem:[%s16975_s0 + $0xa03] ss:$16 sm:%s7229_s5]   ;;  %v7176_v17 = vsel %vm15_vm2, %v10032_v11, %v7171_v36  ;;  %s7398_s5 = smov 48 }
 0x3c5   :  { %v7085_v6 = vsel %vm15_vm2, %v10016_v48, %v7080_v15  ;;  %v7235_v18 = vsel %vm7_vm0, %v10042_v13, %v10041_v57  ;;  %v10043_v19 = vld [vmem:[%s16975_s0 + $0xa03] ss:$16 sm:%s7237_s12]   ;;  %s7252_s12 = smov 3  ;;  %6309 = vst.msk [vmem:[#allocation0 + $0x10] sm:$0xff] %vm6032_vm14, %v6306_v21  }
 0x3c6   :  { %7086 = vrot.lane.b32.xlu0 %v7085_v6, %s10360_s13  ;;  %7154 = vrot.lane.b32.xlu1 %v7153_v58, %s10361_s21  ;;  %v7240_v23 = vsel %vm11_vm1, %v10043_v19, %v7235_v18  ;;  %v10037_v26 = vld [vmem:[%s16975_s0 + $0x803] ss:$16 sm:%s7206_s17]   ;;  %s7283_s13 = smov 48  ;;  %s7513_s17 = smov 48 }
 0x3c7   :  { %v7245_v27 = vsel %vm15_vm2, %v10044_v20, %v7240_v23  ;;  %v10038_v49 = vld [vmem:[%s16975_s0 + $0x803] ss:$16 sm:%s7209_s22]   ;;  %s7472_s22 = smov 192  ;;  %v6375_v29 = vpop.permute.xlu1 %6374  }
 0x3c8   :  { %v10039_v24 = vld [vmem:[%s16975_s0 + $0x803] ss:$16 sm:%s7214_s23]   ;;  %v7212_v30 = vsel %vm7_vm0, %v10038_v49, %v10037_v26  ;;  %s7367_s23 = smov 3  ;;  %6378 = vst.msk [vmem:[#allocation0 + $0x70] sm:$0xff] %vm6032_vm14, %v6375_v29  }
 0x3c9   :  { %v10040_v32 = vld [vmem:[%s16975_s0 + $0x803] ss:$16 sm:%s7219_s29]   ;;  %v7217_v33 = vsel %vm11_vm1, %v10039_v24, %v7212_v30  ;;  %s7324_s29 = smov 12 }
 0x3ca   :  { %7132 = vrot.lane.b32.xlu0 %v7131_v46, %s10361_s21  ;;  %7200 = vrot.lane.b32.xlu1 %v7199_v9, %s10361_s21  ;;  %v10049_v34 = vld [vmem:[%s16975_s0 + $0x283] ss:$16 sm:%s7275_s2]   ;;  %v7222_v35 = vsel %vm15_vm2, %v10040_v32, %v7217_v33  ;;  %s7444_s2 = smov 48 }
 0x3cb   :  { %v10050_v25 = vld [vmem:[%s16975_s0 + $0x283] ss:$16 sm:%s7278_s3]   ;;  %v6352_v39 = vpop.permute.xlu0 %6351   ;;  %s7495_s3 = smov 192 }
 0x3cc   :  { %v7281_v60 = vsel %vm7_vm0, %v10050_v25, %v10049_v34  ;;  %v10051_v1 = vld [vmem:[%s16975_s0 + $0x283] ss:$16 sm:%s7283_s13]   ;;  %s7298_s13 = smov 3  ;;  %6355 = vst.msk [vmem:[#allocation0 + $0x50] sm:$0xff] %vm6032_vm14, %v6352_v39  }
 0x3cd   :  { %v10052_v38 = vld [vmem:[%s16975_s0 + $0x283] ss:$16 sm:%s7288_s11]   ;;  %v7286_v59 = vsel %vm11_vm1, %v10051_v1, %v7281_v60  ;;  %s7347_s11 = smov 12 }
 0x3ce   :  { %7177 = vrot.lane.b32.xlu0 %v7176_v17, %s10361_s21  ;;  %7246 = vrot.lane.b32.xlu1 %v7245_v27, %s10361_s21  ;;  %v10045_v40 = vld [vmem:[%s16975_s0 + $0x83] ss:$16 sm:%s7252_s12]   ;;  %v7291_v41 = vsel %vm15_vm2, %v10052_v38, %v7286_v59  ;;  %s7559_s12 = smov 48 }
 0x3cf   :  { %v10046_v43 = vld [vmem:[%s16975_s0 + $0x83] ss:$16 sm:%s7255_s19]   ;;  %s7518_s19 = smov 192  ;;  %v6421_v47 = vpop.permute.xlu1 %6420  }
 0x3d0   :  { %v10047_v45 = vld [vmem:[%s16975_s0 + $0x83] ss:$16 sm:%s7260_s18]   ;;  %v7258_v37 = vsel %vm7_vm0, %v10046_v43, %v10045_v40  ;;  %s7413_s18 = smov 3  ;;  %6424 = vst.msk [vmem:[#allocation0 + $0xb0] sm:$0xff] %vm6032_vm14, %v6421_v47  }
 0x3d1   :  { %v10048_v48 = vld [vmem:[%s16975_s0 + $0x83] ss:$16 sm:%s7265_s25]   ;;  %v7263_v15 = vsel %vm11_vm1, %v10047_v45, %v7258_v37  ;;  %s7370_s25 = smov 12 }
 0x3d2   :  { %7223 = vrot.lane.b32.xlu0 %v7222_v35, %s10361_s21  ;;  %7292 = vrot.lane.b32.xlu1 %v7291_v41, %s10361_s21  ;;  %v10057_v50 = vld [vmem:[%s16975_s0 + $0x683] ss:$16 sm:%s7321_s28]   ;;  %v7268_v6 = vsel %vm15_vm2, %v10048_v48, %v7263_v15  ;;  %s7490_s28 = smov 48 }
 0x3d3   :  { %v10058_v51 = vld [vmem:[%s16975_s0 + $0x683] ss:$16 sm:%s7324_s29]   ;;  %v6398_v53 = vpop.permute.xlu0 %6397   ;;  %s7541_s29 = smov 192 }
 0x3d4   :  { %v7327_v14 = vsel %vm7_vm0, %v10058_v51, %v10057_v50  ;;  %v10059_v31 = vld [vmem:[%s16975_s0 + $0x683] ss:$16 sm:%s7329_s4]   ;;  %s7344_s4 = smov 3  ;;  %6401 = vst.msk [vmem:[#allocation0 + $0x90] sm:$0xff] %vm6032_vm14, %v6398_v53  }
 0x3d5   :  { %v10060_v52 = vld [vmem:[%s16975_s0 + $0x683] ss:$16 sm:%s7334_s8]   ;;  %v7332_v55 = vsel %vm11_vm1, %v10059_v31, %v7327_v14  ;;  %s7393_s8 = smov 12 }
 0x3d6   :  { %7269 = vrot.lane.b32.xlu0 %v7268_v6, %s10361_s21  ;;  %v10053_v56 = vld [vmem:[%s16975_s0 + $0x483] ss:$16 sm:%s7298_s13]   ;;  %v7337_v58 = vsel %vm15_vm2, %v10060_v52, %v7332_v55  ;;  %s7605_s13 = smov 48 }
 0x3d7   :  { %v10054_v61 = vld [vmem:[%s16975_s0 + $0x483] ss:$16 sm:%s7301_s16]   ;;  %7338 = vrot.lane.b32.xlu1 %v7337_v58, %s10361_s21  ;;  %s7564_s16 = smov 192  ;;  %v6467_v44 = vpop.permute.xlu1 %6466  }
 0x3d8   :  { %v10055_v62 = vld [vmem:[%s16975_s0 + $0x483] ss:$16 sm:%s7306_s14]   ;;  %v7304_v5 = vsel %vm7_vm0, %v10054_v61, %v10053_v56  ;;  %s7459_s14 = smov 3  ;;  %6470 = vst.msk [vmem:[#allocation0 + $0x38] sm:$0xff] %vm6032_vm14, %v6467_v44  }
 0x3d9   :  { %v10056_v63 = vld [vmem:[%s16975_s0 + $0x483] ss:$16 sm:%s7311_s20]   ;;  %v7309_v0 = vsel %vm11_vm1, %v10055_v62, %v7304_v5  ;;  %s7416_s20 = smov 12 }
 0x3da   :  { %v10065_v42 = vld [vmem:[%s16975_s0 + $0xa83] ss:$16 sm:%s7367_s23]   ;;  %v7314_v46 = vsel %vm15_vm2, %v10056_v63, %v7309_v0  ;;  %s7536_s23 = smov 48 }
 0x3db   :  { %v10066_v2 = vld [vmem:[%s16975_s0 + $0xa83] ss:$16 sm:%s7370_s25]   ;;  %7315 = vrot.lane.b32.xlu0 %v7314_v46, %s10361_s21  ;;  %v6444_v22 = vpop.permute.xlu0 %6443   ;;  %s7587_s25 = smov 192 }
 0x3dc   :  { %v7373_v3 = vsel %vm7_vm0, %v10066_v2, %v10065_v42  ;;  %v10067_v28 = vld [vmem:[%s16975_s0 + $0xa83] ss:$16 sm:%s7375_s27]   ;;  %s7390_s27 = smov 3  ;;  %6447 = vst.msk [vmem:[#allocation0 + $0x18] sm:$0xff] %vm6032_vm14, %v6444_v22  }
 0x3dd   :  { %v10068_v4 = vld [vmem:[%s16975_s0 + $0xa83] ss:$16 sm:%s7380_s30]   ;;  %v7378_v7 = vsel %vm11_vm1, %v10067_v28, %v7373_v3  ;;  %s7439_s30 = smov 12 }
 0x3de   :  { %v10061_v8 = vld [vmem:[%s16975_s0 + $0x883] ss:$16 sm:%s7344_s4]   ;;  %v7383_v9 = vsel %vm15_vm2, %v10068_v4, %v7378_v7  ;;  %s7651_s4 = smov 48 }
 0x3df   :  { %v10062_v16 = vld [vmem:[%s16975_s0 + $0x883] ss:$16 sm:%s7347_s11]   ;;  %7384 = vrot.lane.b32.xlu1 %v7383_v9, %s10361_s21  ;;  %s7610_s11 = smov 192  ;;  %v6513_v12 = vpop.permute.xlu1 %6512  }
 0x3e0   :  { %v10063_v54 = vld [vmem:[%s16975_s0 + $0x883] ss:$16 sm:%s7352_s9]   ;;  %v7350_v10 = vsel %vm7_vm0, %v10062_v16, %v10061_v8  ;;  %s7505_s9 = smov 3  ;;  %6516 = vst.msk [vmem:[#allocation0 + $0x78] sm:$0xff] %vm6032_vm14, %v6513_v12  }
 0x3e1   :  { %v10064_v11 = vld [vmem:[%s16975_s0 + $0x883] ss:$16 sm:%s7357_s15]   ;;  %v7355_v36 = vsel %vm11_vm1, %v10063_v54, %v7350_v10  ;;  %s7462_s15 = smov 12 }
 0x3e2   :  { %v10073_v57 = vld [vmem:[%s16975_s0 + $0x303] ss:$16 sm:%s7413_s18]   ;;  %v7360_v17 = vsel %vm15_vm2, %v10064_v11, %v7355_v36  ;;  %s7582_s18 = smov 48 }
 0x3e3   :  { %v10074_v13 = vld [vmem:[%s16975_s0 + $0x303] ss:$16 sm:%s7416_s20]   ;;  %7361 = vrot.lane.b32.xlu0 %v7360_v17, %s10361_s21  ;;  %v6490_v21 = vpop.permute.xlu0 %6489   ;;  %s7633_s20 = smov 192 }
 0x3e4   :  { %v7419_v18 = vsel %vm7_vm0, %v10074_v13, %v10073_v57  ;;  %v10075_v19 = vld [vmem:[%s16975_s0 + $0x303] ss:$16 sm:%s7421_s26]   ;;  %s7436_s26 = smov 3  ;;  %6493 = vst.msk [vmem:[#allocation0 + $0x58] sm:$0xff] %vm6032_vm14, %v6490_v21  }
 0x3e5   :  { %v10076_v20 = vld [vmem:[%s16975_s0 + $0x303] ss:$16 sm:%s7426_s6]   ;;  %v7424_v23 = vsel %vm11_vm1, %v10075_v19, %v7419_v18  ;;  %s7485_s6 = smov 12 }
 0x3e6   :  { %v10069_v26 = vld [vmem:[%s16975_s0 + $0x103] ss:$16 sm:%s7390_s27]   ;;  %v7429_v27 = vsel %vm15_vm2, %v10076_v20, %v7424_v23  ;;  %s7696_s27 = smov 48 }
 0x3e7   :  { %v10070_v49 = vld [vmem:[%s16975_s0 + $0x103] ss:$16 sm:%s7393_s8]   ;;  %7430 = vrot.lane.b32.xlu1 %v7429_v27, %s10361_s21  ;;  %s7656_s8 = smov 192  ;;  %v6559_v29 = vpop.permute.xlu1 %6558  }
 0x3e8   :  { %v10071_v24 = vld [vmem:[%s16975_s0 + $0x103] ss:$16 sm:%s7398_s5]   ;;  %v7396_v30 = vsel %vm7_vm0, %v10070_v49, %v10069_v26  ;;  %s7551_s5 = smov 3  ;;  %6562 = vst.msk [vmem:[#allocation0 + $0xb8] sm:$0xff] %vm6032_vm14, %v6559_v29  }
 0x3e9   :  { %v10072_v32 = vld [vmem:[%s16975_s0 + $0x103] ss:$16 sm:%s7403_s10]   ;;  %v7401_v33 = vsel %vm11_vm1, %v10071_v24, %v7396_v30  ;;  %s7508_s10 = smov 12 }
 0x3ea   :  { %v10081_v34 = vld [vmem:[%s16975_s0 + $0x703] ss:$16 sm:%s7459_s14]   ;;  %v7406_v35 = vsel %vm15_vm2, %v10072_v32, %v7401_v33  ;;  %s7628_s14 = smov 48 }
 0x3eb   :  { %v10082_v25 = vld [vmem:[%s16975_s0 + $0x703] ss:$16 sm:%s7462_s15]   ;;  %7407 = vrot.lane.b32.xlu0 %v7406_v35, %s10361_s21  ;;  %v6536_v39 = vpop.permute.xlu0 %6535   ;;  %v6604_v47 = vpop.permute.xlu1 %6603   ;;  %s7679_s15 = smov 192 }
 0x3ec   :  { %v7465_v60 = vsel %vm7_vm0, %v10082_v25, %v10081_v34  ;;  %v10083_v1 = vld [vmem:[%s16975_s0 + $0x703] ss:$16 sm:%s7467_s24]   ;;  %s7482_s24 = smov 3  ;;  %6539 = vst.msk [vmem:[#allocation0 + $0x98] sm:$0xff] %vm6032_vm14, %v6536_v39  }
 0x3ed   :  { %v10084_v38 = vld [vmem:[%s16975_s0 + $0x703] ss:$16 sm:%s7472_s22]   ;;  %v7470_v59 = vsel %vm11_vm1, %v10083_v1, %v7465_v60  ;;  %s7531_s22 = smov 12  ;;  %6607 = vst.msk [vmem:[#allocation0 + $0x20] sm:$0xff] %vm6583_vm15, %v6604_v47  }
 0x3ee   :  { %v10077_v40 = vld [vmem:[%s16975_s0 + $0x503] ss:$16 sm:%s7436_s26]   ;;  %v7475_v41 = vsel %vm15_vm2, %v10084_v38, %v7470_v59  ;;  %s7747_s26 = smov 192 }
 0x3ef   :  { %v10078_v43 = vld [vmem:[%s16975_s0 + $0x503] ss:$16 sm:%s7439_s30]   ;;  %7476 = vrot.lane.b32.xlu1 %v7475_v41, %s10361_s21  ;;  %s7701_s30 = smov 192  ;;  %v6582_v53 = vpop.permute.xlu0 %6581   ;;  %v6650_v44 = vpop.permute.xlu1 %6649  }
 0x3f0   :  { %v10079_v45 = vld [vmem:[%s16975_s0 + $0x503] ss:$16 sm:%s7444_s2]   ;;  %v7442_v37 = vsel %vm7_vm0, %v10078_v43, %v10077_v40  ;;  %s7597_s2 = smov 3  ;;  %6584 = vst.msk [vmem:[#allocation0] sm:$0xff] %vm6583_vm15, %v6582_v53   ;;  %6653 = vst.msk [vmem:[#allocation0 + $0x60] sm:$0xff] %vm6583_vm15, %v6650_v44  }
 0x3f1   :  { %v10080_v48 = vld [vmem:[%s16975_s0 + $0x503] ss:$16 sm:%s7449_s7]   ;;  %v7447_v15 = vsel %vm11_vm1, %v10079_v45, %v7442_v37  ;;  %s7554_s7 = smov 12 }
 0x3f2   :  { %v10089_v50 = vld [vmem:[%s16975_s0 + $0xb03] ss:$16 sm:%s7505_s9]   ;;  %v7452_v6 = vsel %vm15_vm2, %v10080_v48, %v7447_v15  ;;  %s7674_s9 = smov 48 }
 0x3f3   :  { %v10090_v51 = vld [vmem:[%s16975_s0 + $0xb03] ss:$16 sm:%s7508_s10]   ;;  %7453 = vrot.lane.b32.xlu0 %v7452_v6, %s10361_s21  ;;  %s7724_s10 = smov 192  ;;  %v6627_v22 = vpop.permute.xlu0 %6626   ;;  %v6696_v12 = vpop.permute.xlu1 %6695  }
 0x3f4   :  { %v7511_v14 = vsel %vm7_vm0, %v10090_v51, %v10089_v50  ;;  %v10091_v31 = vld [vmem:[%s16975_s0 + $0xb03] ss:$16 sm:%s7513_s17]   ;;  %s7528_s17 = smov 3  ;;  %6630 = vst.msk [vmem:[#allocation0 + $0x40] sm:$0xff] %vm6583_vm15, %v6627_v22   ;;  %6699 = vst.msk [vmem:[#allocation0 + $0xa0] sm:$0xff] %vm6583_vm15, %v6696_v12  }
 0x3f5   :  { %v10092_v52 = vld [vmem:[%s16975_s0 + $0xb03] ss:$16 sm:%s7518_s19]   ;;  %v7516_v55 = vsel %vm11_vm1, %v10091_v31, %v7511_v14  ;;  %s7577_s19 = smov 12  ;;  %v10123_v31 = vld [vmem:[%s16975_s0 + $0x202] ss:$16 sm:%s7696_s27]   ;;  %s7711_s27 = smov 3 }
 0x3f6   :  { %v10085_v56 = vld [vmem:[%s16975_s0 + $0x903] ss:$16 sm:%s7482_s24]   ;;  %v7521_v58 = vsel %vm15_vm2, %v10092_v52, %v7516_v55  ;;  %v10124_v52 = vld [vmem:[%s16975_s0 + $0x202] ss:$16 sm:%s7701_s30]   ;;  %s7793_s24 = smov 192  ;;  %s7760_s30 = smov 12 }
 0x3f7   :  { %v10086_v61 = vld [vmem:[%s16975_s0 + $0x903] ss:$16 sm:%s7485_s6]   ;;  %7522 = vrot.lane.b32.xlu1 %v7521_v58, %s10361_s21  ;;  %s10362_s6 = smov 4   ;;  %v6673_v21 = vpop.permute.xlu0 %6672   ;;  %v6742_v29 = vpop.permute.xlu1 %6741  }
 0x3f8   :  { %v10087_v62 = vld [vmem:[%s16975_s0 + $0x903] ss:$16 sm:%s7490_s28]   ;;  %v7488_v5 = vsel %vm7_vm0, %v10086_v61, %v10085_v56  ;;  %s7643_s28 = smov 3  ;;  %6676 = vst.msk [vmem:[#allocation0 + $0x80] sm:$0xff] %vm6583_vm15, %v6673_v21   ;;  %6745 = vst.msk [vmem:[#allocation0 + $0x28] sm:$0xff] %vm6583_vm15, %v6742_v29  }
 0x3f9   :  { %v10088_v63 = vld [vmem:[%s16975_s0 + $0x903] ss:$16 sm:%s7495_s3]   ;;  %v7493_v0 = vsel %vm11_vm1, %v10087_v62, %v7488_v5  ;;  %s7600_s3 = smov 12  ;;  %v10119_v62 = vld [vmem:[%s16975_s0 + $0x2] ss:$16 sm:%s7674_s9]   ;;  %s7826_s9 = smov 3 }
 0x3fa   :  { %v10097_v42 = vld [vmem:[%s16975_s0 + $0x383] ss:$16 sm:%s7551_s5]   ;;  %v7498_v46 = vsel %vm15_vm2, %v10088_v63, %v7493_v0  ;;  %v10120_v63 = vld [vmem:[%s16975_s0 + $0x2] ss:$16 sm:%s7679_s15]   ;;  %s7719_s5 = smov 48  ;;  %s7783_s15 = smov 12 }
 0x3fb   :  { %v10098_v2 = vld [vmem:[%s16975_s0 + $0x383] ss:$16 sm:%s7554_s7]   ;;  %7499 = vrot.lane.b32.xlu0 %v7498_v46, %s10361_s21  ;;  %s7770_s7 = smov 192  ;;  %v6719_v39 = vpop.permute.xlu0 %6718  }
 0x3fc   :  { %v7557_v3 = vsel %vm7_vm0, %v10098_v2, %v10097_v42  ;;  %v10099_v28 = vld [vmem:[%s16975_s0 + $0x383] ss:$16 sm:%s7559_s12]   ;;  %s7574_s12 = smov 3  ;;  %6722 = vst.msk [vmem:[#allocation0 + $0x8] sm:$0xff] %vm6583_vm15, %v6719_v39   ;;  %v6788_v47 = vpop.permute.xlu1 %6787  }
 0x3fd   :  { %v10100_v4 = vld [vmem:[%s16975_s0 + $0x383] ss:$16 sm:%s7564_s16]   ;;  %v7562_v7 = vsel %vm11_vm1, %v10099_v28, %v7557_v3  ;;  %s7623_s16 = smov 12  ;;  %6791 = vst.msk [vmem:[#allocation0 + $0x68] sm:$0xff] %vm6583_vm15, %v6788_v47  }
 0x3fe   :  { %v10093_v8 = vld [vmem:[%s16975_s0 + $0x183] ss:$16 sm:%s7528_s17]   ;;  %v7567_v9 = vsel %vm15_vm2, %v10100_v4, %v7562_v7  ;;  %v10132_v4 = vld [vmem:[%s16975_s0 + $0x602] ss:$16 sm:%s7747_s26]   ;;  %s7839_s17 = smov 192  ;;  %s7806_s26 = smov 12 }
 0x3ff   :  { %v10094_v16 = vld [vmem:[%s16975_s0 + $0x183] ss:$16 sm:%s7531_s22]   ;;  %7568 = vrot.lane.b32.xlu1 %v7567_v9, %s10361_s21  ;;  %s7857_s22 = smov 48 }
 0x400   :  { %v10095_v54 = vld [vmem:[%s16975_s0 + $0x183] ss:$16 sm:%s7536_s23]   ;;  %v7534_v10 = vsel %vm7_vm0, %v10094_v16, %v10093_v8  ;;  %s7688_s23 = smov 3  ;;  %v10125_v8 = vld [vmem:[%s16975_s0 + $0x402] ss:$16 sm:%s7711_s27]   ;;  %v6765_v53 = vpop.permute.xlu0 %6764   ;;  %s8018_s27 = smov 48 }
 0x401   :  { %v10096_v11 = vld [vmem:[%s16975_s0 + $0x183] ss:$16 sm:%s7541_s29]   ;;  %v7539_v36 = vsel %vm11_vm1, %v10095_v54, %v7534_v10  ;;  %s7646_s29 = smov 12  ;;  %v10121_v50 = vld [vmem:[%s16975_s0 + $0x202] ss:$16 sm:%s7688_s23]   ;;  %6768 = vst.msk [vmem:[#allocation0 + $0x48] sm:$0xff] %vm6583_vm15, %v6765_v53  }
 0x402   :  { %v10105_v57 = vld [vmem:[%s16975_s0 + $0x783] ss:$16 sm:%s7597_s2]   ;;  %v7544_v17 = vsel %vm15_vm2, %v10096_v11, %v7539_v36  ;;  %v10127_v54 = vld [vmem:[%s16975_s0 + $0x402] ss:$16 sm:%s7719_s5]   ;;  %s7765_s2 = smov 48  ;;  %s7872_s5 = smov 3 }
 0x403   :  { %v10106_v13 = vld [vmem:[%s16975_s0 + $0x783] ss:$16 sm:%s7600_s3]   ;;  %7545 = vrot.lane.b32.xlu0 %v7544_v17, %s10361_s21  ;;  %s7816_s3 = smov 192  ;;  %s7908_s23 = smov 192 }
 0x404   :  { %v7603_v18 = vsel %vm7_vm0, %v10106_v13, %v10105_v57  ;;  %v10107_v19 = vld [vmem:[%s16975_s0 + $0x783] ss:$16 sm:%s7605_s13]   ;;  %s7620_s13 = smov 3  ;;  %v10128_v11 = vld [vmem:[%s16975_s0 + $0x402] ss:$16 sm:%s7724_s10]   ;;  %s7829_s10 = smov 12  ;;  %v6834_v44 = vpop.permute.xlu1 %6833  }
 0x405   :  { %v10108_v20 = vld [vmem:[%s16975_s0 + $0x783] ss:$16 sm:%s7610_s11]   ;;  %v7608_v23 = vsel %vm11_vm1, %v10107_v19, %v7603_v18  ;;  %s7669_s11 = smov 12  ;;  %v10138_v13 = vld [vmem:[%s16975_s0 + $0xa02] ss:$16 sm:%s7783_s15]   ;;  %6837 = vst.msk [vmem:[#allocation0 + $0xa8] sm:$0xff] %vm6583_vm15, %v6834_v44  }
 0x406   :  { %v10101_v26 = vld [vmem:[%s16975_s0 + $0x583] ss:$16 sm:%s7574_s12]   ;;  %v7613_v27 = vsel %vm15_vm2, %v10108_v20, %v7608_v23  ;;  %v10118_v61 = vld [vmem:[%s16975_s0 + $0x2] ss:$16 sm:%s7669_s11]   ;;  %s7880_s12 = smov 48  ;;  %s7931_s11 = smov 192 }
 0x407   :  { %v10102_v49 = vld [vmem:[%s16975_s0 + $0x583] ss:$16 sm:%s7577_s19]   ;;  %7614 = vrot.lane.b32.xlu1 %v7613_v27, %s10361_s21  ;;  %s7734_s19 = smov 3  ;;  %s8000_s15 = smov 192 }
 0x408   :  { %v10103_v24 = vld [vmem:[%s16975_s0 + $0x583] ss:$16 sm:%s7582_s18]   ;;  %v7580_v30 = vsel %vm7_vm0, %v10102_v49, %v10101_v26  ;;  %s7737_s18 = smov 12  ;;  %v10129_v42 = vld [vmem:[%s16975_s0 + $0x602] ss:$16 sm:%s7734_s19]   ;;  %s7903_s19 = smov 48  ;;  %v6811_v22 = vpop.permute.xlu0 %6810  }
 0x409   :  { %v10104_v32 = vld [vmem:[%s16975_s0 + $0x583] ss:$16 sm:%s7587_s25]   ;;  %v7585_v33 = vsel %vm11_vm1, %v10103_v24, %v7580_v30  ;;  %s7691_s25 = smov 12  ;;  %v10130_v2 = vld [vmem:[%s16975_s0 + $0x602] ss:$16 sm:%s7737_s18]   ;;  %6814 = vst.msk [vmem:[#allocation0 + $0x88] sm:$0xff] %vm6583_vm15, %v6811_v22  }
 0x40a   :  { %v10113_v34 = vld [vmem:[%s16975_s0 + $0xb83] ss:$16 sm:%s7643_s28]   ;;  %v7590_v35 = vsel %vm15_vm2, %v10104_v32, %v7585_v33  ;;  %v10122_v51 = vld [vmem:[%s16975_s0 + $0x202] ss:$16 sm:%s7691_s25]   ;;  %s7742_s25 = smov 48  ;;  %v7740_v3 = vsel %vm7_vm0, %v10130_v2, %v10129_v42  ;;  %s7811_s28 = smov 48 }
 0x40b   :  { %v10114_v25 = vld [vmem:[%s16975_s0 + $0xb83] ss:$16 sm:%s7646_s29]   ;;  %7591 = vrot.lane.b32.xlu0 %v7590_v35, %s10361_s21  ;;  %v7694_v14 = vsel %vm7_vm0, %v10122_v51, %v10121_v50  ;;  %s7862_s29 = smov 192  ;;  %s7954_s18 = smov 192 }
 0x40c   :  { %v7649_v60 = vsel %vm7_vm0, %v10114_v25, %v10113_v34  ;;  %v10115_v1 = vld [vmem:[%s16975_s0 + $0xb83] ss:$16 sm:%s7651_s4]   ;;  %s7666_s4 = smov 3  ;;  %v7699_v55 = vsel %vm11_vm1, %v10123_v31, %v7694_v14  ;;  %v10131_v28 = vld [vmem:[%s16975_s0 + $0x602] ss:$16 sm:%s7742_s25]   ;;  %s7757_s25 = smov 3  ;;  %v6880_v12 = vpop.permute.xlu1 %6879  }
 0x40d   :  { %v10116_v38 = vld [vmem:[%s16975_s0 + $0xb83] ss:$16 sm:%s7656_s8]   ;;  %v7654_v59 = vsel %vm11_vm1, %v10115_v1, %v7649_v60  ;;  %v10117_v56 = vld [vmem:[%s16975_s0 + $0x2] ss:$16 sm:%s7666_s4]   ;;  %v7704_v58 = vsel %vm15_vm2, %v10124_v52, %v7699_v55  ;;  %s7714_s8 = smov 12  ;;  %v7745_v7 = vsel %vm11_vm1, %v10131_v28, %v7740_v3  ;;  %s7972_s4 = smov 48 }
 0x40e   :  { %v10109_v40 = vld [vmem:[%s16975_s0 + $0x983] ss:$16 sm:%s7620_s13]   ;;  %v7659_v41 = vsel %vm15_vm2, %v10116_v38, %v7654_v59  ;;  %v7672_v5 = vsel %vm7_vm0, %v10118_v61, %v10117_v56  ;;  %v7750_v9 = vsel %vm15_vm2, %v10132_v4, %v7745_v7  ;;  %v10126_v16 = vld [vmem:[%s16975_s0 + $0x402] ss:$16 sm:%s7714_s8]   ;;  %s7926_s13 = smov 48  ;;  %s7977_s8 = smov 192 }
 0x40f   :  { %v10110_v43 = vld [vmem:[%s16975_s0 + $0x983] ss:$16 sm:%s7623_s16]   ;;  %7660 = vrot.lane.b32.xlu1 %v7659_v41, %s10361_s21  ;;  %v7677_v0 = vsel %vm11_vm1, %v10119_v62, %v7672_v5  ;;  %v7717_v10 = vsel %vm7_vm0, %v10126_v16, %v10125_v8  ;;  %s7885_s16 = smov 192  ;;  %6883 = vst.msk [vmem:[#allocation0 + $0x30] sm:$0xff] %vm6583_vm15, %v6880_v12  }
 0x410   :  { %v10111_v45 = vld [vmem:[%s16975_s0 + $0x983] ss:$16 sm:%s7628_s14]   ;;  %v7626_v37 = vsel %vm7_vm0, %v10110_v43, %v10109_v40  ;;  %v7682_v46 = vsel %vm15_vm2, %v10120_v63, %v7677_v0  ;;  %s7780_s14 = smov 3  ;;  %v7722_v36 = vsel %vm11_vm1, %v10127_v54, %v7717_v10  ;;  %v10140_v20 = vld [vmem:[%s16975_s0 + $0xa02] ss:$16 sm:%s7793_s24]   ;;  %s7852_s24 = smov 12  ;;  %v6857_v21 = vpop.permute.xlu0 %6856  }
 0x411   :  { %v10112_v48 = vld [vmem:[%s16975_s0 + $0x983] ss:$16 sm:%s7633_s20]   ;;  %v7631_v15 = vsel %vm11_vm1, %v10111_v45, %v7626_v37  ;;  %s7788_s20 = smov 48  ;;  %v10137_v57 = vld [vmem:[%s16975_s0 + $0xa02] ss:$16 sm:%s7780_s14]   ;;  %v7727_v17 = vsel %vm15_vm2, %v10128_v11, %v7722_v36  ;;  %s7949_s14 = smov 48 }
 0x412   :  { %v7636_v6 = vsel %vm15_vm2, %v10112_v48, %v7631_v15  ;;  %v7786_v18 = vsel %vm7_vm0, %v10138_v13, %v10137_v57  ;;  %v10139_v19 = vld [vmem:[%s16975_s0 + $0xa02] ss:$16 sm:%s7788_s20]   ;;  %s7803_s20 = smov 3  ;;  %6860 = vst.msk [vmem:[#allocation0 + $0x10] sm:$0xff] %vm6583_vm15, %v6857_v21  }
 0x413   :  { %7637 = vrot.lane.b32.xlu0 %v7636_v6, %s10361_s21  ;;  %7705 = vrot.lane.b32.xlu1 %v7704_v58, %s10362_s6  ;;  %v7791_v23 = vsel %vm11_vm1, %v10139_v19, %v7786_v18  ;;  %v10133_v26 = vld [vmem:[%s16975_s0 + $0x802] ss:$16 sm:%s7757_s25]   ;;  %s7834_s21 = smov 48  ;;  %s8064_s25 = smov 48 }
 0x414   :  { %v7796_v27 = vsel %vm15_vm2, %v10140_v20, %v7791_v23  ;;  %v10134_v49 = vld [vmem:[%s16975_s0 + $0x802] ss:$16 sm:%s7760_s30]   ;;  %s8023_s30 = smov 192  ;;  %v6926_v29 = vpop.permute.xlu1 %6925  }
 0x415   :  { %v10135_v24 = vld [vmem:[%s16975_s0 + $0x802] ss:$16 sm:%s7765_s2]   ;;  %v7763_v30 = vsel %vm7_vm0, %v10134_v49, %v10133_v26  ;;  %s7918_s2 = smov 3  ;;  %6929 = vst.msk [vmem:[#allocation0 + $0x70] sm:$0xff] %vm6583_vm15, %v6926_v29  }
 0x416   :  { %v10136_v32 = vld [vmem:[%s16975_s0 + $0x802] ss:$16 sm:%s7770_s7]   ;;  %v7768_v33 = vsel %vm11_vm1, %v10135_v24, %v7763_v30  ;;  %s7875_s7 = smov 12 }
 0x417   :  { %7683 = vrot.lane.b32.xlu0 %v7682_v46, %s10362_s6  ;;  %7751 = vrot.lane.b32.xlu1 %v7750_v9, %s10362_s6  ;;  %v10145_v34 = vld [vmem:[%s16975_s0 + $0x282] ss:$16 sm:%s7826_s9]   ;;  %v7773_v35 = vsel %vm15_vm2, %v10136_v32, %v7768_v33  ;;  %s7995_s9 = smov 48 }
 0x418   :  { %v10146_v25 = vld [vmem:[%s16975_s0 + $0x282] ss:$16 sm:%s7829_s10]   ;;  %v6903_v39 = vpop.permute.xlu0 %6902   ;;  %s8046_s10 = smov 192 }
 0x419   :  { %v7832_v60 = vsel %vm7_vm0, %v10146_v25, %v10145_v34  ;;  %v10147_v1 = vld [vmem:[%s16975_s0 + $0x282] ss:$16 sm:%s7834_s21]   ;;  %s7849_s21 = smov 3  ;;  %6906 = vst.msk [vmem:[#allocation0 + $0x50] sm:$0xff] %vm6583_vm15, %v6903_v39  }
 0x41a   :  { %v10148_v38 = vld [vmem:[%s16975_s0 + $0x282] ss:$16 sm:%s7839_s17]   ;;  %v7837_v59 = vsel %vm11_vm1, %v10147_v1, %v7832_v60  ;;  %s7898_s17 = smov 12 }
 0x41b   :  { %7728 = vrot.lane.b32.xlu0 %v7727_v17, %s10362_s6  ;;  %7797 = vrot.lane.b32.xlu1 %v7796_v27, %s10362_s6  ;;  %v10141_v40 = vld [vmem:[%s16975_s0 + $0x82] ss:$16 sm:%s7803_s20]   ;;  %v7842_v41 = vsel %vm15_vm2, %v10148_v38, %v7837_v59  ;;  %s8110_s20 = smov 48 }
 0x41c   :  { %v10142_v43 = vld [vmem:[%s16975_s0 + $0x82] ss:$16 sm:%s7806_s26]   ;;  %s8069_s26 = smov 192  ;;  %v6972_v47 = vpop.permute.xlu1 %6971  }
 0x41d   :  { %v10143_v45 = vld [vmem:[%s16975_s0 + $0x82] ss:$16 sm:%s7811_s28]   ;;  %v7809_v37 = vsel %vm7_vm0, %v10142_v43, %v10141_v40  ;;  %s7964_s28 = smov 3  ;;  %6975 = vst.msk [vmem:[#allocation0 + $0xb0] sm:$0xff] %vm6583_vm15, %v6972_v47  }
 0x41e   :  { %v10144_v48 = vld [vmem:[%s16975_s0 + $0x82] ss:$16 sm:%s7816_s3]   ;;  %v7814_v15 = vsel %vm11_vm1, %v10143_v45, %v7809_v37  ;;  %s7921_s3 = smov 12 }
 0x41f   :  { %7774 = vrot.lane.b32.xlu0 %v7773_v35, %s10362_s6  ;;  %7843 = vrot.lane.b32.xlu1 %v7842_v41, %s10362_s6  ;;  %v10153_v50 = vld [vmem:[%s16975_s0 + $0x682] ss:$16 sm:%s7872_s5]   ;;  %v7819_v6 = vsel %vm15_vm2, %v10144_v48, %v7814_v15  ;;  %s8041_s5 = smov 48 }
 0x420   :  { %v10154_v51 = vld [vmem:[%s16975_s0 + $0x682] ss:$16 sm:%s7875_s7]   ;;  %v6949_v53 = vpop.permute.xlu0 %6948   ;;  %s8092_s7 = smov 192 }
 0x421   :  { %v7878_v14 = vsel %vm7_vm0, %v10154_v51, %v10153_v50  ;;  %v10155_v31 = vld [vmem:[%s16975_s0 + $0x682] ss:$16 sm:%s7880_s12]   ;;  %s7895_s12 = smov 3  ;;  %6952 = vst.msk [vmem:[#allocation0 + $0x90] sm:$0xff] %vm6583_vm15, %v6949_v53  }
 0x422   :  { %v10156_v52 = vld [vmem:[%s16975_s0 + $0x682] ss:$16 sm:%s7885_s16]   ;;  %v7883_v55 = vsel %vm11_vm1, %v10155_v31, %v7878_v14  ;;  %s7944_s16 = smov 12 }
 0x423   :  { %7820 = vrot.lane.b32.xlu0 %v7819_v6, %s10362_s6  ;;  %v10149_v56 = vld [vmem:[%s16975_s0 + $0x482] ss:$16 sm:%s7849_s21]   ;;  %v7888_v58 = vsel %vm15_vm2, %v10156_v52, %v7883_v55  ;;  %s8156_s21 = smov 48 }
 0x424   :  { %v10150_v61 = vld [vmem:[%s16975_s0 + $0x482] ss:$16 sm:%s7852_s24]   ;;  %7889 = vrot.lane.b32.xlu1 %v7888_v58, %s10362_s6  ;;  %s8115_s24 = smov 192  ;;  %v7018_v44 = vpop.permute.xlu1 %7017  }
 0x425   :  { %v10151_v62 = vld [vmem:[%s16975_s0 + $0x482] ss:$16 sm:%s7857_s22]   ;;  %v7855_v5 = vsel %vm7_vm0, %v10150_v61, %v10149_v56  ;;  %s8010_s22 = smov 3  ;;  %7021 = vst.msk [vmem:[#allocation0 + $0x38] sm:$0xff] %vm6583_vm15, %v7018_v44  }
 0x426   :  { %v10152_v63 = vld [vmem:[%s16975_s0 + $0x482] ss:$16 sm:%s7862_s29]   ;;  %v7860_v0 = vsel %vm11_vm1, %v10151_v62, %v7855_v5  ;;  %s7967_s29 = smov 12 }
 0x427   :  { %v10161_v42 = vld [vmem:[%s16975_s0 + $0xa82] ss:$16 sm:%s7918_s2]   ;;  %v7865_v46 = vsel %vm15_vm2, %v10152_v63, %v7860_v0  ;;  %s8087_s2 = smov 48 }
 0x428   :  { %v10162_v2 = vld [vmem:[%s16975_s0 + $0xa82] ss:$16 sm:%s7921_s3]   ;;  %7866 = vrot.lane.b32.xlu0 %v7865_v46, %s10362_s6  ;;  %v6995_v22 = vpop.permute.xlu0 %6994   ;;  %s8138_s3 = smov 192 }
 0x429   :  { %v7924_v3 = vsel %vm7_vm0, %v10162_v2, %v10161_v42  ;;  %v10163_v28 = vld [vmem:[%s16975_s0 + $0xa82] ss:$16 sm:%s7926_s13]   ;;  %s7941_s13 = smov 3  ;;  %6998 = vst.msk [vmem:[#allocation0 + $0x18] sm:$0xff] %vm6583_vm15, %v6995_v22  }
 0x42a   :  { %v10164_v4 = vld [vmem:[%s16975_s0 + $0xa82] ss:$16 sm:%s7931_s11]   ;;  %v7929_v7 = vsel %vm11_vm1, %v10163_v28, %v7924_v3  ;;  %s7990_s11 = smov 12 }
 0x42b   :  { %v10157_v8 = vld [vmem:[%s16975_s0 + $0x882] ss:$16 sm:%s7895_s12]   ;;  %v7934_v9 = vsel %vm15_vm2, %v10164_v4, %v7929_v7  ;;  %s8202_s12 = smov 48 }
 0x42c   :  { %v10158_v16 = vld [vmem:[%s16975_s0 + $0x882] ss:$16 sm:%s7898_s17]   ;;  %7935 = vrot.lane.b32.xlu1 %v7934_v9, %s10362_s6  ;;  %s8161_s17 = smov 192  ;;  %v7064_v12 = vpop.permute.xlu1 %7063  }
 0x42d   :  { %v10159_v54 = vld [vmem:[%s16975_s0 + $0x882] ss:$16 sm:%s7903_s19]   ;;  %v7901_v10 = vsel %vm7_vm0, %v10158_v16, %v10157_v8  ;;  %s8056_s19 = smov 3  ;;  %7067 = vst.msk [vmem:[#allocation0 + $0x78] sm:$0xff] %vm6583_vm15, %v7064_v12  }
 0x42e   :  { %v10160_v11 = vld [vmem:[%s16975_s0 + $0x882] ss:$16 sm:%s7908_s23]   ;;  %v7906_v36 = vsel %vm11_vm1, %v10159_v54, %v7901_v10  ;;  %s8013_s23 = smov 12 }
 0x42f   :  { %v10169_v57 = vld [vmem:[%s16975_s0 + $0x302] ss:$16 sm:%s7964_s28]   ;;  %v7911_v17 = vsel %vm15_vm2, %v10160_v11, %v7906_v36  ;;  %s8133_s28 = smov 48 }
 0x430   :  { %v10170_v13 = vld [vmem:[%s16975_s0 + $0x302] ss:$16 sm:%s7967_s29]   ;;  %7912 = vrot.lane.b32.xlu0 %v7911_v17, %s10362_s6  ;;  %v7041_v21 = vpop.permute.xlu0 %7040   ;;  %s8184_s29 = smov 192 }
 0x431   :  { %v7970_v18 = vsel %vm7_vm0, %v10170_v13, %v10169_v57  ;;  %v10171_v19 = vld [vmem:[%s16975_s0 + $0x302] ss:$16 sm:%s7972_s4]   ;;  %s7987_s4 = smov 3  ;;  %7044 = vst.msk [vmem:[#allocation0 + $0x58] sm:$0xff] %vm6583_vm15, %v7041_v21  }
 0x432   :  { %v10172_v20 = vld [vmem:[%s16975_s0 + $0x302] ss:$16 sm:%s7977_s8]   ;;  %v7975_v23 = vsel %vm11_vm1, %v10171_v19, %v7970_v18  ;;  %s8036_s8 = smov 12 }
 0x433   :  { %v10165_v26 = vld [vmem:[%s16975_s0 + $0x102] ss:$16 sm:%s7941_s13]   ;;  %v7980_v27 = vsel %vm15_vm2, %v10172_v20, %v7975_v23  ;;  %s8247_s13 = smov 48 }
 0x434   :  { %v10166_v49 = vld [vmem:[%s16975_s0 + $0x102] ss:$16 sm:%s7944_s16]   ;;  %7981 = vrot.lane.b32.xlu1 %v7980_v27, %s10362_s6  ;;  %s8207_s16 = smov 192  ;;  %v7110_v29 = vpop.permute.xlu1 %7109  }
 0x435   :  { %v10167_v24 = vld [vmem:[%s16975_s0 + $0x102] ss:$16 sm:%s7949_s14]   ;;  %v7947_v30 = vsel %vm7_vm0, %v10166_v49, %v10165_v26  ;;  %s8102_s14 = smov 3  ;;  %7113 = vst.msk [vmem:[#allocation0 + $0xb8] sm:$0xff] %vm6583_vm15, %v7110_v29  }
 0x436   :  { %v10168_v32 = vld [vmem:[%s16975_s0 + $0x102] ss:$16 sm:%s7954_s18]   ;;  %v7952_v33 = vsel %vm11_vm1, %v10167_v24, %v7947_v30  ;;  %s8059_s18 = smov 12 }
 0x437   :  { %v10177_v34 = vld [vmem:[%s16975_s0 + $0x702] ss:$16 sm:%s8010_s22]   ;;  %v7957_v35 = vsel %vm15_vm2, %v10168_v32, %v7952_v33  ;;  %s8179_s22 = smov 48 }
 0x438   :  { %v10178_v25 = vld [vmem:[%s16975_s0 + $0x702] ss:$16 sm:%s8013_s23]   ;;  %7958 = vrot.lane.b32.xlu0 %v7957_v35, %s10362_s6  ;;  %v7087_v39 = vpop.permute.xlu0 %7086   ;;  %v7155_v47 = vpop.permute.xlu1 %7154   ;;  %s8230_s23 = smov 192 }
 0x439   :  { %v8016_v60 = vsel %vm7_vm0, %v10178_v25, %v10177_v34  ;;  %v10179_v1 = vld [vmem:[%s16975_s0 + $0x702] ss:$16 sm:%s8018_s27]   ;;  %s8033_s27 = smov 3  ;;  %7090 = vst.msk [vmem:[#allocation0 + $0x98] sm:$0xff] %vm6583_vm15, %v7087_v39  }
 0x43a   :  { %v10180_v38 = vld [vmem:[%s16975_s0 + $0x702] ss:$16 sm:%s8023_s30]   ;;  %v8021_v59 = vsel %vm11_vm1, %v10179_v1, %v8016_v60  ;;  %s8082_s30 = smov 12  ;;  %7158 = vst.msk [vmem:[#allocation0 + $0x20] sm:$0xff] %vm7134_vm3, %v7155_v47  }
 0x43b   :  { %v10173_v40 = vld [vmem:[%s16975_s0 + $0x502] ss:$16 sm:%s7987_s4]   ;;  %v8026_v41 = vsel %vm15_vm2, %v10180_v38, %v8021_v59  ;;  %s8298_s4 = smov 192 }
 0x43c   :  { %v10174_v43 = vld [vmem:[%s16975_s0 + $0x502] ss:$16 sm:%s7990_s11]   ;;  %8027 = vrot.lane.b32.xlu1 %v8026_v41, %s10362_s6  ;;  %s8252_s11 = smov 192  ;;  %v7133_v53 = vpop.permute.xlu0 %7132   ;;  %v7201_v44 = vpop.permute.xlu1 %7200  }
 0x43d   :  { %v10175_v45 = vld [vmem:[%s16975_s0 + $0x502] ss:$16 sm:%s7995_s9]   ;;  %v7993_v37 = vsel %vm7_vm0, %v10174_v43, %v10173_v40  ;;  %s8148_s9 = smov 3  ;;  %7135 = vst.msk [vmem:[#allocation0] sm:$0xff] %vm7134_vm3, %v7133_v53   ;;  %7204 = vst.msk [vmem:[#allocation0 + $0x60] sm:$0xff] %vm7134_vm3, %v7201_v44  }
 0x43e   :  { %v10176_v48 = vld [vmem:[%s16975_s0 + $0x502] ss:$16 sm:%s8000_s15]   ;;  %v7998_v15 = vsel %vm11_vm1, %v10175_v45, %v7993_v37  ;;  %s8105_s15 = smov 12 }
 0x43f   :  { %v10185_v50 = vld [vmem:[%s16975_s0 + $0xb02] ss:$16 sm:%s8056_s19]   ;;  %v8003_v6 = vsel %vm15_vm2, %v10176_v48, %v7998_v15  ;;  %s8225_s19 = smov 48 }
 0x440   :  { %v10186_v51 = vld [vmem:[%s16975_s0 + $0xb02] ss:$16 sm:%s8059_s18]   ;;  %8004 = vrot.lane.b32.xlu0 %v8003_v6, %s10362_s6  ;;  %s8275_s18 = smov 192  ;;  %v7178_v22 = vpop.permute.xlu0 %7177   ;;  %v7247_v12 = vpop.permute.xlu1 %7246  }
 0x441   :  { %v8062_v14 = vsel %vm7_vm0, %v10186_v51, %v10185_v50  ;;  %v10187_v31 = vld [vmem:[%s16975_s0 + $0xb02] ss:$16 sm:%s8064_s25]   ;;  %s8079_s25 = smov 3  ;;  %7181 = vst.msk [vmem:[#allocation0 + $0x40] sm:$0xff] %vm7134_vm3, %v7178_v22   ;;  %7250 = vst.msk [vmem:[#allocation0 + $0xa0] sm:$0xff] %vm7134_vm3, %v7247_v12  }
 0x442   :  { %v10188_v52 = vld [vmem:[%s16975_s0 + $0xb02] ss:$16 sm:%s8069_s26]   ;;  %v8067_v55 = vsel %vm11_vm1, %v10187_v31, %v8062_v14  ;;  %s8128_s26 = smov 12  ;;  %v10219_v31 = vld [vmem:[%s16975_s0 + $0x201] ss:$16 sm:%s8247_s13]   ;;  %s8262_s13 = smov 3 }
 0x443   :  { %v10181_v56 = vld [vmem:[%s16975_s0 + $0x902] ss:$16 sm:%s8033_s27]   ;;  %v8072_v58 = vsel %vm15_vm2, %v10188_v52, %v8067_v55  ;;  %v10220_v52 = vld [vmem:[%s16975_s0 + $0x201] ss:$16 sm:%s8252_s11]   ;;  %s8344_s27 = smov 192  ;;  %s8311_s11 = smov 12 }
 0x444   :  { %v10182_v61 = vld [vmem:[%s16975_s0 + $0x902] ss:$16 sm:%s8036_s8]   ;;  %8073 = vrot.lane.b32.xlu1 %v8072_v58, %s10362_s6  ;;  %s10363_s8 = smov 2   ;;  %v7224_v21 = vpop.permute.xlu0 %7223   ;;  %v7293_v29 = vpop.permute.xlu1 %7292  }
 0x445   :  { %v10183_v62 = vld [vmem:[%s16975_s0 + $0x902] ss:$16 sm:%s8041_s5]   ;;  %v8039_v5 = vsel %vm7_vm0, %v10182_v61, %v10181_v56  ;;  %s8194_s5 = smov 3  ;;  %7227 = vst.msk [vmem:[#allocation0 + $0x80] sm:$0xff] %vm7134_vm3, %v7224_v21   ;;  %7296 = vst.msk [vmem:[#allocation0 + $0x28] sm:$0xff] %vm7134_vm3, %v7293_v29  }
 0x446   :  { %v10184_v63 = vld [vmem:[%s16975_s0 + $0x902] ss:$16 sm:%s8046_s10]   ;;  %v8044_v0 = vsel %vm11_vm1, %v10183_v62, %v8039_v5  ;;  %s8151_s10 = smov 12  ;;  %v10215_v62 = vld [vmem:[%s16975_s0 + $0x1] ss:$16 sm:%s8225_s19]   ;;  %s8377_s19 = smov 3 }
 0x447   :  { %v10193_v42 = vld [vmem:[%s16975_s0 + $0x382] ss:$16 sm:%s8102_s14]   ;;  %v8049_v46 = vsel %vm15_vm2, %v10184_v63, %v8044_v0  ;;  %v10216_v63 = vld [vmem:[%s16975_s0 + $0x1] ss:$16 sm:%s8230_s23]   ;;  %s8270_s14 = smov 48  ;;  %s8334_s23 = smov 12 }
 0x448   :  { %v10194_v2 = vld [vmem:[%s16975_s0 + $0x382] ss:$16 sm:%s8105_s15]   ;;  %8050 = vrot.lane.b32.xlu0 %v8049_v46, %s10362_s6  ;;  %s8321_s15 = smov 192  ;;  %v7270_v39 = vpop.permute.xlu0 %7269  }
 0x449   :  { %v8108_v3 = vsel %vm7_vm0, %v10194_v2, %v10193_v42  ;;  %v10195_v28 = vld [vmem:[%s16975_s0 + $0x382] ss:$16 sm:%s8110_s20]   ;;  %s8125_s20 = smov 3  ;;  %7273 = vst.msk [vmem:[#allocation0 + $0x8] sm:$0xff] %vm7134_vm3, %v7270_v39   ;;  %v7339_v47 = vpop.permute.xlu1 %7338  }
 0x44a   :  { %v10196_v4 = vld [vmem:[%s16975_s0 + $0x382] ss:$16 sm:%s8115_s24]   ;;  %v8113_v7 = vsel %vm11_vm1, %v10195_v28, %v8108_v3  ;;  %s8174_s24 = smov 12  ;;  %7342 = vst.msk [vmem:[#allocation0 + $0x68] sm:$0xff] %vm7134_vm3, %v7339_v47  }
 0x44b   :  { %v10189_v8 = vld [vmem:[%s16975_s0 + $0x182] ss:$16 sm:%s8079_s25]   ;;  %v8118_v9 = vsel %vm15_vm2, %v10196_v4, %v8113_v7  ;;  %v10228_v4 = vld [vmem:[%s16975_s0 + $0x601] ss:$16 sm:%s8298_s4]   ;;  %s8390_s25 = smov 192  ;;  %s8357_s4 = smov 12 }
 0x44c   :  { %v10190_v16 = vld [vmem:[%s16975_s0 + $0x182] ss:$16 sm:%s8082_s30]   ;;  %8119 = vrot.lane.b32.xlu1 %v8118_v9, %s10362_s6  ;;  %s8408_s30 = smov 48 }
 0x44d   :  { %v10191_v54 = vld [vmem:[%s16975_s0 + $0x182] ss:$16 sm:%s8087_s2]   ;;  %v8085_v10 = vsel %vm7_vm0, %v10190_v16, %v10189_v8  ;;  %s8239_s2 = smov 3  ;;  %v10221_v8 = vld [vmem:[%s16975_s0 + $0x401] ss:$16 sm:%s8262_s13]   ;;  %v7316_v53 = vpop.permute.xlu0 %7315   ;;  %s8569_s13 = smov 48 }
 0x44e   :  { %v10192_v11 = vld [vmem:[%s16975_s0 + $0x182] ss:$16 sm:%s8092_s7]   ;;  %v8090_v36 = vsel %vm11_vm1, %v10191_v54, %v8085_v10  ;;  %s8197_s7 = smov 12  ;;  %v10217_v50 = vld [vmem:[%s16975_s0 + $0x201] ss:$16 sm:%s8239_s2]   ;;  %7319 = vst.msk [vmem:[#allocation0 + $0x48] sm:$0xff] %vm7134_vm3, %v7316_v53  }
 0x44f   :  { %v10201_v57 = vld [vmem:[%s16975_s0 + $0x782] ss:$16 sm:%s8148_s9]   ;;  %v8095_v17 = vsel %vm15_vm2, %v10192_v11, %v8090_v36  ;;  %v10223_v54 = vld [vmem:[%s16975_s0 + $0x401] ss:$16 sm:%s8270_s14]   ;;  %s8316_s9 = smov 48  ;;  %s8423_s14 = smov 3 }
 0x450   :  { %v10202_v13 = vld [vmem:[%s16975_s0 + $0x782] ss:$16 sm:%s8151_s10]   ;;  %8096 = vrot.lane.b32.xlu0 %v8095_v17, %s10362_s6  ;;  %s8367_s10 = smov 192  ;;  %s8459_s2 = smov 192 }
 0x451   :  { %v8154_v18 = vsel %vm7_vm0, %v10202_v13, %v10201_v57  ;;  %v10203_v19 = vld [vmem:[%s16975_s0 + $0x782] ss:$16 sm:%s8156_s21]   ;;  %s8171_s21 = smov 3  ;;  %v10224_v11 = vld [vmem:[%s16975_s0 + $0x401] ss:$16 sm:%s8275_s18]   ;;  %s8380_s18 = smov 12  ;;  %v7385_v44 = vpop.permute.xlu1 %7384  }
 0x452   :  { %v10204_v20 = vld [vmem:[%s16975_s0 + $0x782] ss:$16 sm:%s8161_s17]   ;;  %v8159_v23 = vsel %vm11_vm1, %v10203_v19, %v8154_v18  ;;  %s8220_s17 = smov 12  ;;  %v10234_v13 = vld [vmem:[%s16975_s0 + $0xa01] ss:$16 sm:%s8334_s23]   ;;  %7388 = vst.msk [vmem:[#allocation0 + $0xa8] sm:$0xff] %vm7134_vm3, %v7385_v44  }
 0x453   :  { %v10197_v26 = vld [vmem:[%s16975_s0 + $0x582] ss:$16 sm:%s8125_s20]   ;;  %v8164_v27 = vsel %vm15_vm2, %v10204_v20, %v8159_v23  ;;  %v10214_v61 = vld [vmem:[%s16975_s0 + $0x1] ss:$16 sm:%s8220_s17]   ;;  %s8431_s20 = smov 48  ;;  %s8482_s17 = smov 192 }
 0x454   :  { %v10198_v49 = vld [vmem:[%s16975_s0 + $0x582] ss:$16 sm:%s8128_s26]   ;;  %8165 = vrot.lane.b32.xlu1 %v8164_v27, %s10362_s6  ;;  %s8285_s26 = smov 3  ;;  %s8551_s23 = smov 192 }
 0x455   :  { %v10199_v24 = vld [vmem:[%s16975_s0 + $0x582] ss:$16 sm:%s8133_s28]   ;;  %v8131_v30 = vsel %vm7_vm0, %v10198_v49, %v10197_v26  ;;  %s8288_s28 = smov 12  ;;  %v10225_v42 = vld [vmem:[%s16975_s0 + $0x601] ss:$16 sm:%s8285_s26]   ;;  %s8454_s26 = smov 48  ;;  %v7362_v22 = vpop.permute.xlu0 %7361  }
 0x456   :  { %v10200_v32 = vld [vmem:[%s16975_s0 + $0x582] ss:$16 sm:%s8138_s3]   ;;  %v8136_v33 = vsel %vm11_vm1, %v10199_v24, %v8131_v30  ;;  %s8242_s3 = smov 12  ;;  %v10226_v2 = vld [vmem:[%s16975_s0 + $0x601] ss:$16 sm:%s8288_s28]   ;;  %7365 = vst.msk [vmem:[#allocation0 + $0x88] sm:$0xff] %vm7134_vm3, %v7362_v22  }
 0x457   :  { %v10209_v34 = vld [vmem:[%s16975_s0 + $0xb82] ss:$16 sm:%s8194_s5]   ;;  %v8141_v35 = vsel %vm15_vm2, %v10200_v32, %v8136_v33  ;;  %v10218_v51 = vld [vmem:[%s16975_s0 + $0x201] ss:$16 sm:%s8242_s3]   ;;  %s8293_s3 = smov 48  ;;  %v8291_v3 = vsel %vm7_vm0, %v10226_v2, %v10225_v42  ;;  %s8362_s5 = smov 48 }
 0x458   :  { %v10210_v25 = vld [vmem:[%s16975_s0 + $0xb82] ss:$16 sm:%s8197_s7]   ;;  %8142 = vrot.lane.b32.xlu0 %v8141_v35, %s10362_s6  ;;  %v8245_v14 = vsel %vm7_vm0, %v10218_v51, %v10217_v50  ;;  %s8413_s7 = smov 192  ;;  %s8505_s28 = smov 192 }
 0x459   :  { %v8200_v60 = vsel %vm7_vm0, %v10210_v25, %v10209_v34  ;;  %v10211_v1 = vld [vmem:[%s16975_s0 + $0xb82] ss:$16 sm:%s8202_s12]   ;;  %s8217_s12 = smov 3  ;;  %v8250_v55 = vsel %vm11_vm1, %v10219_v31, %v8245_v14  ;;  %v10227_v28 = vld [vmem:[%s16975_s0 + $0x601] ss:$16 sm:%s8293_s3]   ;;  %s8308_s3 = smov 3  ;;  %v7431_v12 = vpop.permute.xlu1 %7430  }
 0x45a   :  { %v10212_v38 = vld [vmem:[%s16975_s0 + $0xb82] ss:$16 sm:%s8207_s16]   ;;  %v8205_v59 = vsel %vm11_vm1, %v10211_v1, %v8200_v60  ;;  %v10213_v56 = vld [vmem:[%s16975_s0 + $0x1] ss:$16 sm:%s8217_s12]   ;;  %v8255_v58 = vsel %vm15_vm2, %v10220_v52, %v8250_v55  ;;  %s8265_s16 = smov 12  ;;  %v8296_v7 = vsel %vm11_vm1, %v10227_v28, %v8291_v3  ;;  %s8523_s12 = smov 48 }
 0x45b   :  { %v10205_v40 = vld [vmem:[%s16975_s0 + $0x982] ss:$16 sm:%s8171_s21]   ;;  %v8210_v41 = vsel %vm15_vm2, %v10212_v38, %v8205_v59  ;;  %v8223_v5 = vsel %vm7_vm0, %v10214_v61, %v10213_v56  ;;  %v8301_v9 = vsel %vm15_vm2, %v10228_v4, %v8296_v7  ;;  %v10222_v16 = vld [vmem:[%s16975_s0 + $0x401] ss:$16 sm:%s8265_s16]   ;;  %s8477_s21 = smov 48  ;;  %s8528_s16 = smov 192 }
 0x45c   :  { %v10206_v43 = vld [vmem:[%s16975_s0 + $0x982] ss:$16 sm:%s8174_s24]   ;;  %8211 = vrot.lane.b32.xlu1 %v8210_v41, %s10362_s6  ;;  %v8228_v0 = vsel %vm11_vm1, %v10215_v62, %v8223_v5  ;;  %v8268_v10 = vsel %vm7_vm0, %v10222_v16, %v10221_v8  ;;  %s8436_s24 = smov 192  ;;  %7434 = vst.msk [vmem:[#allocation0 + $0x30] sm:$0xff] %vm7134_vm3, %v7431_v12  }
 0x45d   :  { %v10207_v45 = vld [vmem:[%s16975_s0 + $0x982] ss:$16 sm:%s8179_s22]   ;;  %v8177_v37 = vsel %vm7_vm0, %v10206_v43, %v10205_v40  ;;  %v8233_v46 = vsel %vm15_vm2, %v10216_v63, %v8228_v0  ;;  %s8331_s22 = smov 3  ;;  %v8273_v36 = vsel %vm11_vm1, %v10223_v54, %v8268_v10  ;;  %v10236_v20 = vld [vmem:[%s16975_s0 + $0xa01] ss:$16 sm:%s8344_s27]   ;;  %s8403_s27 = smov 12  ;;  %v7408_v21 = vpop.permute.xlu0 %7407  }
 0x45e   :  { %v10208_v48 = vld [vmem:[%s16975_s0 + $0x982] ss:$16 sm:%s8184_s29]   ;;  %v8182_v15 = vsel %vm11_vm1, %v10207_v45, %v8177_v37  ;;  %s8339_s29 = smov 48  ;;  %v10233_v57 = vld [vmem:[%s16975_s0 + $0xa01] ss:$16 sm:%s8331_s22]   ;;  %v8278_v17 = vsel %vm15_vm2, %v10224_v11, %v8273_v36  ;;  %s8500_s22 = smov 48 }
 0x45f   :  { %v8187_v6 = vsel %vm15_vm2, %v10208_v48, %v8182_v15  ;;  %v8337_v18 = vsel %vm7_vm0, %v10234_v13, %v10233_v57  ;;  %v10235_v19 = vld [vmem:[%s16975_s0 + $0xa01] ss:$16 sm:%s8339_s29]   ;;  %s8354_s29 = smov 3  ;;  %7411 = vst.msk [vmem:[#allocation0 + $0x10] sm:$0xff] %vm7134_vm3, %v7408_v21  }
 0x460   :  { %8188 = vrot.lane.b32.xlu0 %v8187_v6, %s10362_s6  ;;  %8256 = vrot.lane.b32.xlu1 %v8255_v58, %s10363_s8  ;;  %v8342_v23 = vsel %vm11_vm1, %v10235_v19, %v8337_v18  ;;  %v10229_v26 = vld [vmem:[%s16975_s0 + $0x801] ss:$16 sm:%s8308_s3]   ;;  %s8385_s6 = smov 48  ;;  %s8615_s3 = smov 48 }
 0x461   :  { %v8347_v27 = vsel %vm15_vm2, %v10236_v20, %v8342_v23  ;;  %v10230_v49 = vld [vmem:[%s16975_s0 + $0x801] ss:$16 sm:%s8311_s11]   ;;  %s8574_s11 = smov 192  ;;  %v7477_v29 = vpop.permute.xlu1 %7476  }
 0x462   :  { %v10231_v24 = vld [vmem:[%s16975_s0 + $0x801] ss:$16 sm:%s8316_s9]   ;;  %v8314_v30 = vsel %vm7_vm0, %v10230_v49, %v10229_v26  ;;  %s8469_s9 = smov 3  ;;  %7480 = vst.msk [vmem:[#allocation0 + $0x70] sm:$0xff] %vm7134_vm3, %v7477_v29  }
 0x463   :  { %v10232_v32 = vld [vmem:[%s16975_s0 + $0x801] ss:$16 sm:%s8321_s15]   ;;  %v8319_v33 = vsel %vm11_vm1, %v10231_v24, %v8314_v30  ;;  %s8426_s15 = smov 12 }
 0x464   :  { %8234 = vrot.lane.b32.xlu0 %v8233_v46, %s10363_s8  ;;  %8302 = vrot.lane.b32.xlu1 %v8301_v9, %s10363_s8  ;;  %v10241_v34 = vld [vmem:[%s16975_s0 + $0x281] ss:$16 sm:%s8377_s19]   ;;  %v8324_v35 = vsel %vm15_vm2, %v10232_v32, %v8319_v33  ;;  %s8546_s19 = smov 48 }
 0x465   :  { %v10242_v25 = vld [vmem:[%s16975_s0 + $0x281] ss:$16 sm:%s8380_s18]   ;;  %v7454_v39 = vpop.permute.xlu0 %7453   ;;  %s8597_s18 = smov 192 }
 0x466   :  { %v8383_v60 = vsel %vm7_vm0, %v10242_v25, %v10241_v34  ;;  %v10243_v1 = vld [vmem:[%s16975_s0 + $0x281] ss:$16 sm:%s8385_s6]   ;;  %s8400_s6 = smov 3  ;;  %7457 = vst.msk [vmem:[#allocation0 + $0x50] sm:$0xff] %vm7134_vm3, %v7454_v39  }
 0x467   :  { %v10244_v38 = vld [vmem:[%s16975_s0 + $0x281] ss:$16 sm:%s8390_s25]   ;;  %v8388_v59 = vsel %vm11_vm1, %v10243_v1, %v8383_v60  ;;  %s8449_s25 = smov 12 }
 0x468   :  { %8279 = vrot.lane.b32.xlu0 %v8278_v17, %s10363_s8  ;;  %8348 = vrot.lane.b32.xlu1 %v8347_v27, %s10363_s8  ;;  %v10237_v40 = vld [vmem:[%s16975_s0 + $0x81] ss:$16 sm:%s8354_s29]   ;;  %v8393_v41 = vsel %vm15_vm2, %v10244_v38, %v8388_v59  ;;  %s8661_s29 = smov 48 }
 0x469   :  { %v10238_v43 = vld [vmem:[%s16975_s0 + $0x81] ss:$16 sm:%s8357_s4]   ;;  %s8620_s4 = smov 192  ;;  %v7523_v47 = vpop.permute.xlu1 %7522  }
 0x46a   :  { %v10239_v45 = vld [vmem:[%s16975_s0 + $0x81] ss:$16 sm:%s8362_s5]   ;;  %v8360_v37 = vsel %vm7_vm0, %v10238_v43, %v10237_v40  ;;  %s8515_s5 = smov 3  ;;  %7526 = vst.msk [vmem:[#allocation0 + $0xb0] sm:$0xff] %vm7134_vm3, %v7523_v47  }
 0x46b   :  { %v10240_v48 = vld [vmem:[%s16975_s0 + $0x81] ss:$16 sm:%s8367_s10]   ;;  %v8365_v15 = vsel %vm11_vm1, %v10239_v45, %v8360_v37  ;;  %s8472_s10 = smov 12 }
 0x46c   :  { %8325 = vrot.lane.b32.xlu0 %v8324_v35, %s10363_s8  ;;  %8394 = vrot.lane.b32.xlu1 %v8393_v41, %s10363_s8  ;;  %v10249_v50 = vld [vmem:[%s16975_s0 + $0x681] ss:$16 sm:%s8423_s14]   ;;  %v8370_v6 = vsel %vm15_vm2, %v10240_v48, %v8365_v15  ;;  %s8592_s14 = smov 48 }
 0x46d   :  { %v10250_v51 = vld [vmem:[%s16975_s0 + $0x681] ss:$16 sm:%s8426_s15]   ;;  %v7500_v53 = vpop.permute.xlu0 %7499   ;;  %s8643_s15 = smov 192 }
 0x46e   :  { %v8429_v14 = vsel %vm7_vm0, %v10250_v51, %v10249_v50  ;;  %v10251_v31 = vld [vmem:[%s16975_s0 + $0x681] ss:$16 sm:%s8431_s20]   ;;  %s8446_s20 = smov 3  ;;  %7503 = vst.msk [vmem:[#allocation0 + $0x90] sm:$0xff] %vm7134_vm3, %v7500_v53  }
 0x46f   :  { %v10252_v52 = vld [vmem:[%s16975_s0 + $0x681] ss:$16 sm:%s8436_s24]   ;;  %v8434_v55 = vsel %vm11_vm1, %v10251_v31, %v8429_v14  ;;  %s8495_s24 = smov 12 }
 0x470   :  { %8371 = vrot.lane.b32.xlu0 %v8370_v6, %s10363_s8  ;;  %v10245_v56 = vld [vmem:[%s16975_s0 + $0x481] ss:$16 sm:%s8400_s6]   ;;  %v8439_v58 = vsel %vm15_vm2, %v10252_v52, %v8434_v55  ;;  %s8707_s6 = smov 48 }
 0x471   :  { %v10246_v61 = vld [vmem:[%s16975_s0 + $0x481] ss:$16 sm:%s8403_s27]   ;;  %8440 = vrot.lane.b32.xlu1 %v8439_v58, %s10363_s8  ;;  %s8666_s27 = smov 192  ;;  %v7569_v44 = vpop.permute.xlu1 %7568  }
 0x472   :  { %v10247_v62 = vld [vmem:[%s16975_s0 + $0x481] ss:$16 sm:%s8408_s30]   ;;  %v8406_v5 = vsel %vm7_vm0, %v10246_v61, %v10245_v56  ;;  %s8561_s30 = smov 3  ;;  %7572 = vst.msk [vmem:[#allocation0 + $0x38] sm:$0xff] %vm7134_vm3, %v7569_v44  }
 0x473   :  { %v10248_v63 = vld [vmem:[%s16975_s0 + $0x481] ss:$16 sm:%s8413_s7]   ;;  %v8411_v0 = vsel %vm11_vm1, %v10247_v62, %v8406_v5  ;;  %s8518_s7 = smov 12 }
 0x474   :  { %v10257_v42 = vld [vmem:[%s16975_s0 + $0xa81] ss:$16 sm:%s8469_s9]   ;;  %v8416_v46 = vsel %vm15_vm2, %v10248_v63, %v8411_v0  ;;  %s8638_s9 = smov 48 }
 0x475   :  { %v10258_v2 = vld [vmem:[%s16975_s0 + $0xa81] ss:$16 sm:%s8472_s10]   ;;  %8417 = vrot.lane.b32.xlu0 %v8416_v46, %s10363_s8  ;;  %v7546_v22 = vpop.permute.xlu0 %7545   ;;  %s8689_s10 = smov 192 }
 0x476   :  { %v8475_v3 = vsel %vm7_vm0, %v10258_v2, %v10257_v42  ;;  %v10259_v28 = vld [vmem:[%s16975_s0 + $0xa81] ss:$16 sm:%s8477_s21]   ;;  %s8492_s21 = smov 3  ;;  %7549 = vst.msk [vmem:[#allocation0 + $0x18] sm:$0xff] %vm7134_vm3, %v7546_v22  }
 0x477   :  { %v10260_v4 = vld [vmem:[%s16975_s0 + $0xa81] ss:$16 sm:%s8482_s17]   ;;  %v8480_v7 = vsel %vm11_vm1, %v10259_v28, %v8475_v3  ;;  %s8541_s17 = smov 12 }
 0x478   :  { %v10253_v8 = vld [vmem:[%s16975_s0 + $0x881] ss:$16 sm:%s8446_s20]   ;;  %v8485_v9 = vsel %vm15_vm2, %v10260_v4, %v8480_v7  ;;  %s8753_s20 = smov 48 }
 0x479   :  { %v10254_v16 = vld [vmem:[%s16975_s0 + $0x881] ss:$16 sm:%s8449_s25]   ;;  %8486 = vrot.lane.b32.xlu1 %v8485_v9, %s10363_s8  ;;  %s8712_s25 = smov 192  ;;  %v7615_v12 = vpop.permute.xlu1 %7614  }
 0x47a   :  { %v10255_v54 = vld [vmem:[%s16975_s0 + $0x881] ss:$16 sm:%s8454_s26]   ;;  %v8452_v10 = vsel %vm7_vm0, %v10254_v16, %v10253_v8  ;;  %s8607_s26 = smov 3  ;;  %7618 = vst.msk [vmem:[#allocation0 + $0x78] sm:$0xff] %vm7134_vm3, %v7615_v12  }
 0x47b   :  { %v10256_v11 = vld [vmem:[%s16975_s0 + $0x881] ss:$16 sm:%s8459_s2]   ;;  %v8457_v36 = vsel %vm11_vm1, %v10255_v54, %v8452_v10  ;;  %s8564_s2 = smov 12 }
 0x47c   :  { %v10265_v57 = vld [vmem:[%s16975_s0 + $0x301] ss:$16 sm:%s8515_s5]   ;;  %v8462_v17 = vsel %vm15_vm2, %v10256_v11, %v8457_v36  ;;  %s8684_s5 = smov 48 }
 0x47d   :  { %v10266_v13 = vld [vmem:[%s16975_s0 + $0x301] ss:$16 sm:%s8518_s7]   ;;  %8463 = vrot.lane.b32.xlu0 %v8462_v17, %s10363_s8  ;;  %v7592_v21 = vpop.permute.xlu0 %7591   ;;  %s8735_s7 = smov 192 }
 0x47e   :  { %v8521_v18 = vsel %vm7_vm0, %v10266_v13, %v10265_v57  ;;  %v10267_v19 = vld [vmem:[%s16975_s0 + $0x301] ss:$16 sm:%s8523_s12]   ;;  %s8538_s12 = smov 3  ;;  %7595 = vst.msk [vmem:[#allocation0 + $0x58] sm:$0xff] %vm7134_vm3, %v7592_v21  }
 0x47f   :  { %v10268_v20 = vld [vmem:[%s16975_s0 + $0x301] ss:$16 sm:%s8528_s16]   ;;  %v8526_v23 = vsel %vm11_vm1, %v10267_v19, %v8521_v18  ;;  %s8587_s16 = smov 12 }
 0x480   :  { %v10261_v26 = vld [vmem:[%s16975_s0 + $0x101] ss:$16 sm:%s8492_s21]   ;;  %v8531_v27 = vsel %vm15_vm2, %v10268_v20, %v8526_v23 }
 0x481   :  { %v10262_v49 = vld [vmem:[%s16975_s0 + $0x101] ss:$16 sm:%s8495_s24]   ;;  %8532 = vrot.lane.b32.xlu1 %v8531_v27, %s10363_s8  ;;  %s8758_s24 = smov 192  ;;  %v7661_v29 = vpop.permute.xlu1 %7660  }
 0x482   :  { %v10263_v24 = vld [vmem:[%s16975_s0 + $0x101] ss:$16 sm:%s8500_s22]   ;;  %v8498_v30 = vsel %vm7_vm0, %v10262_v49, %v10261_v26  ;;  %s8653_s22 = smov 3  ;;  %7664 = vst.msk [vmem:[#allocation0 + $0xb8] sm:$0xff] %vm7134_vm3, %v7661_v29  }
 0x483   :  { %v10264_v32 = vld [vmem:[%s16975_s0 + $0x101] ss:$16 sm:%s8505_s28]   ;;  %v8503_v33 = vsel %vm11_vm1, %v10263_v24, %v8498_v30  ;;  %s8610_s28 = smov 12 }
 0x484   :  { %v10273_v34 = vld [vmem:[%s16975_s0 + $0x701] ss:$16 sm:%s8561_s30]   ;;  %v8508_v35 = vsel %vm15_vm2, %v10264_v32, %v8503_v33  ;;  %s8730_s30 = smov 48 }
 0x485   :  { %v10274_v25 = vld [vmem:[%s16975_s0 + $0x701] ss:$16 sm:%s8564_s2]   ;;  %8509 = vrot.lane.b32.xlu0 %v8508_v35, %s10363_s8  ;;  %v7638_v39 = vpop.permute.xlu0 %7637   ;;  %v7706_v47 = vpop.permute.xlu1 %7705  }
 0x486   :  { %v8567_v60 = vsel %vm7_vm0, %v10274_v25, %v10273_v34  ;;  %v10275_v1 = vld [vmem:[%s16975_s0 + $0x701] ss:$16 sm:%s8569_s13]   ;;  %s8584_s13 = smov 3  ;;  %7641 = vst.msk [vmem:[#allocation0 + $0x98] sm:$0xff] %vm7134_vm3, %v7638_v39  }
 0x487   :  { %v10276_v38 = vld [vmem:[%s16975_s0 + $0x701] ss:$16 sm:%s8574_s11]   ;;  %v8572_v59 = vsel %vm11_vm1, %v10275_v1, %v8567_v60  ;;  %s8633_s11 = smov 12  ;;  %7709 = vst.msk [vmem:[#allocation0 + $0x20] sm:$0xff] %vm7685_vm4, %v7706_v47  }
 0x488   :  { %v10269_v40 = vld [vmem:[%s16975_s0 + $0x501] ss:$16 sm:%s8538_s12]   ;;  %v8577_v41 = vsel %vm15_vm2, %v10276_v38, %v8572_v59 }
 0x489   :  { %v10270_v43 = vld [vmem:[%s16975_s0 + $0x501] ss:$16 sm:%s8541_s17]   ;;  %8578 = vrot.lane.b32.xlu1 %v8577_v41, %s10363_s8 }
 0x48a   :  { %v10271_v45 = vld [vmem:[%s16975_s0 + $0x501] ss:$16 sm:%s8546_s19]   ;;  %v8544_v37 = vsel %vm7_vm0, %v10270_v43, %v10269_v40  ;;  %s8699_s19 = smov 3 }
 0x48b   :  { %v10272_v48 = vld [vmem:[%s16975_s0 + $0x501] ss:$16 sm:%s8551_s23]   ;;  %v8549_v15 = vsel %vm11_vm1, %v10271_v45, %v8544_v37  ;;  %s8656_s23 = smov 12 }
 0x48c   :  { %v10281_v50 = vld [vmem:[%s16975_s0 + $0xb01] ss:$16 sm:%s8607_s26]   ;;  %v8554_v6 = vsel %vm15_vm2, %v10272_v48, %v8549_v15 }
 0x48d   :  { %v10282_v51 = vld [vmem:[%s16975_s0 + $0xb01] ss:$16 sm:%s8610_s28]   ;;  %8555 = vrot.lane.b32.xlu0 %v8554_v6, %s10363_s8  ;;  %v7752_v6 = vpop.permute.xlu1 %7751  }
 0x48e   :  { %v8613_v14 = vsel %vm7_vm0, %v10282_v51, %v10281_v50  ;;  %v10283_v31 = vld [vmem:[%s16975_s0 + $0xb01] ss:$16 sm:%s8615_s3]   ;;  %s8630_s3 = smov 3  ;;  %v7684_v51 = vpop.permute.xlu0 %7683   ;;  %7755 = vst.msk [vmem:[#allocation0 + $0x60] sm:$0xff] %vm7685_vm4, %v7752_v6  }
 0x48f   :  { %v10284_v52 = vld [vmem:[%s16975_s0 + $0xb01] ss:$16 sm:%s8620_s4]   ;;  %v8618_v55 = vsel %vm11_vm1, %v10283_v31, %v8613_v14  ;;  %s8679_s4 = smov 12  ;;  %7686 = vst.msk [vmem:[#allocation0] sm:$0xff] %vm7685_vm4, %v7684_v51  }
 0x490   :  { %v10277_v56 = vld [vmem:[%s16975_s0 + $0x901] ss:$16 sm:%s8584_s13]   ;;  %v8623_v58 = vsel %vm15_vm2, %v10284_v52, %v8618_v55 }
 0x491   :  { %v10278_v61 = vld [vmem:[%s16975_s0 + $0x901] ss:$16 sm:%s8587_s16]   ;;  %8624 = vrot.lane.b32.xlu1 %v8623_v58, %s10363_s8  ;;  %v7798_v31 = vpop.permute.xlu1 %7797  }
 0x492   :  { %v10279_v62 = vld [vmem:[%s16975_s0 + $0x901] ss:$16 sm:%s8592_s14]   ;;  %v8590_v5 = vsel %vm7_vm0, %v10278_v61, %v10277_v56  ;;  %s8745_s14 = smov 3  ;;  %v7729_v14 = vpop.permute.xlu0 %7728   ;;  %7801 = vst.msk [vmem:[#allocation0 + $0xa0] sm:$0xff] %vm7685_vm4, %v7798_v31  }
 0x493   :  { %v10280_v63 = vld [vmem:[%s16975_s0 + $0x901] ss:$16 sm:%s8597_s18]   ;;  %v8595_v0 = vsel %vm11_vm1, %v10279_v62, %v8590_v5  ;;  %s8702_s18 = smov 12  ;;  %7732 = vst.msk [vmem:[#allocation0 + $0x40] sm:$0xff] %vm7685_vm4, %v7729_v14  }
 0x494   :  { %v10289_v42 = vld [vmem:[%s16975_s0 + $0x381] ss:$16 sm:%s8653_s22]   ;;  %v8600_v46 = vsel %vm15_vm2, %v10280_v63, %v8595_v0 }
 0x495   :  { %v10290_v2 = vld [vmem:[%s16975_s0 + $0x381] ss:$16 sm:%s8656_s23]   ;;  %8601 = vrot.lane.b32.xlu0 %v8600_v46, %s10363_s8  ;;  %v7844_v53 = vpop.permute.xlu1 %7843  }
 0x496   :  { %v8659_v3 = vsel %vm7_vm0, %v10290_v2, %v10289_v42  ;;  %v10291_v28 = vld [vmem:[%s16975_s0 + $0x381] ss:$16 sm:%s8661_s29]   ;;  %s8676_s29 = smov 3  ;;  %v7775_v52 = vpop.permute.xlu0 %7774   ;;  %7847 = vst.msk [vmem:[#allocation0 + $0x28] sm:$0xff] %vm7685_vm4, %v7844_v53  }
 0x497   :  { %v10292_v4 = vld [vmem:[%s16975_s0 + $0x381] ss:$16 sm:%s8666_s27]   ;;  %v8664_v7 = vsel %vm11_vm1, %v10291_v28, %v8659_v3  ;;  %s8725_s27 = smov 12  ;;  %7778 = vst.msk [vmem:[#allocation0 + $0x80] sm:$0xff] %vm7685_vm4, %v7775_v52  }
 0x498   :  { %v10285_v8 = vld [vmem:[%s16975_s0 + $0x181] ss:$16 sm:%s8630_s3]   ;;  %v8669_v9 = vsel %vm15_vm2, %v10292_v4, %v8664_v7 }
 0x499   :  { %v10286_v16 = vld [vmem:[%s16975_s0 + $0x181] ss:$16 sm:%s8633_s11]   ;;  %8670 = vrot.lane.b32.xlu1 %v8669_v9, %s10363_s8  ;;  %v7890_v56 = vpop.permute.xlu1 %7889  }
 0x49a   :  { %v10287_v54 = vld [vmem:[%s16975_s0 + $0x181] ss:$16 sm:%s8638_s9]   ;;  %v8636_v10 = vsel %vm7_vm0, %v10286_v16, %v10285_v8  ;;  %v7821_v55 = vpop.permute.xlu0 %7820   ;;  %7893 = vst.msk [vmem:[#allocation0 + $0x68] sm:$0xff] %vm7685_vm4, %v7890_v56  }
 0x49b   :  { %v10288_v11 = vld [vmem:[%s16975_s0 + $0x181] ss:$16 sm:%s8643_s15]   ;;  %v8641_v36 = vsel %vm11_vm1, %v10287_v54, %v8636_v10  ;;  %s8748_s15 = smov 12  ;;  %7824 = vst.msk [vmem:[#allocation0 + $0x8] sm:$0xff] %vm7685_vm4, %v7821_v55  }
 0x49c   :  { %v10297_v57 = vld [vmem:[%s16975_s0 + $0x781] ss:$16 sm:%s8699_s19]   ;;  %v8646_v17 = vsel %vm15_vm2, %v10288_v11, %v8641_v36 }
 0x49d   :  { %v10298_v13 = vld [vmem:[%s16975_s0 + $0x781] ss:$16 sm:%s8702_s18]   ;;  %8647 = vrot.lane.b32.xlu0 %v8646_v17, %s10363_s8 }
 0x49e   :  { %v8705_v18 = vsel %vm7_vm0, %v10298_v13, %v10297_v57  ;;  %v10299_v19 = vld [vmem:[%s16975_s0 + $0x781] ss:$16 sm:%s8707_s6]   ;;  %s8722_s6 = smov 3  ;;  %v7867_v58 = vpop.permute.xlu0 %7866   ;;  %v7936_v61 = vpop.permute.xlu1 %7935  }
 0x49f   :  { %v10300_v20 = vld [vmem:[%s16975_s0 + $0x781] ss:$16 sm:%s8712_s25]   ;;  %v8710_v23 = vsel %vm11_vm1, %v10299_v19, %v8705_v18  ;;  %7870 = vst.msk [vmem:[#allocation0 + $0x48] sm:$0xff] %vm7685_vm4, %v7867_v58   ;;  %7939 = vst.msk [vmem:[#allocation0 + $0xa8] sm:$0xff] %vm7685_vm4, %v7936_v61  }
 0x4a0   :  { %v10293_v26 = vld [vmem:[%s16975_s0 + $0x581] ss:$16 sm:%s8676_s29]   ;;  %v8715_v27 = vsel %vm15_vm2, %v10300_v20, %v8710_v23 }
 0x4a1   :  { %v10294_v49 = vld [vmem:[%s16975_s0 + $0x581] ss:$16 sm:%s8679_s4]   ;;  %8716 = vrot.lane.b32.xlu1 %v8715_v27, %s10363_s8 }
 0x4a2   :  { %v10295_v24 = vld [vmem:[%s16975_s0 + $0x581] ss:$16 sm:%s8684_s5]   ;;  %v8682_v30 = vsel %vm7_vm0, %v10294_v49, %v10293_v26  ;;  %v7913_v62 = vpop.permute.xlu0 %7912  }
 0x4a3   :  { %v10296_v32 = vld [vmem:[%s16975_s0 + $0x581] ss:$16 sm:%s8689_s10]   ;;  %v8687_v33 = vsel %vm11_vm1, %v10295_v24, %v8682_v30  ;;  %7916 = vst.msk [vmem:[#allocation0 + $0x88] sm:$0xff] %vm7685_vm4, %v7913_v62  }
 0x4a4   :  { %v10305_v34 = vld [vmem:[%s16975_s0 + $0xb81] ss:$16 sm:%s8745_s14]   ;;  %v8692_v35 = vsel %vm15_vm2, %v10296_v32, %v8687_v33 }
 0x4a5   :  { %v10306_v25 = vld [vmem:[%s16975_s0 + $0xb81] ss:$16 sm:%s8748_s15]   ;;  %8693 = vrot.lane.b32.xlu0 %v8692_v35, %s10363_s8 }
 0x4a6   :  { %v8751_v60 = vsel %vm7_vm0, %v10306_v25, %v10305_v34  ;;  %v10307_v1 = vld [vmem:[%s16975_s0 + $0xb81] ss:$16 sm:%s8753_s20]   ;;  %v7982_v44 = vpop.permute.xlu1 %7981  }
 0x4a7   :  { %v10308_v38 = vld [vmem:[%s16975_s0 + $0xb81] ss:$16 sm:%s8758_s24]   ;;  %v8756_v59 = vsel %vm11_vm1, %v10307_v1, %v8751_v60  ;;  %7985 = vst.msk [vmem:[#allocation0 + $0x30] sm:$0xff] %vm7685_vm4, %v7982_v44  }
 0x4a8   :  { %v10301_v40 = vld [vmem:[%s16975_s0 + $0x981] ss:$16 sm:%s8722_s6]   ;;  %v8761_v41 = vsel %vm15_vm2, %v10308_v38, %v8756_v59 }
 0x4a9   :  { %v10302_v43 = vld [vmem:[%s16975_s0 + $0x981] ss:$16 sm:%s8725_s27]   ;;  %8762 = vrot.lane.b32.xlu1 %v8761_v41, %s10363_s8 }
 0x4aa   :  { %v10303_v45 = vld [vmem:[%s16975_s0 + $0x981] ss:$16 sm:%s8730_s30]   ;;  %v8728_v37 = vsel %vm7_vm0, %v10302_v43, %v10301_v40  ;;  %v7959_v5 = vpop.permute.xlu0 %7958   ;;  %vm8236_vm0 = vcmask 31760  }
 0x4ab   :  { %v10304_v48 = vld [vmem:[%s16975_s0 + $0x981] ss:$16 sm:%s8735_s7]   ;;  %v8733_v15 = vsel %vm11_vm1, %v10303_v45, %v8728_v37  ;;  %7962 = vst.msk [vmem:[#allocation0 + $0x10] sm:$0xff] %vm7685_vm4, %v7959_v5   ;;  %s10364_s0 = smov [#allocation0]  }
 0x4ac   :  { %v8738_v50 = vsel %vm15_vm2, %v10304_v48, %v8733_v15 }
 0x4ad   :  { %8739 = vrot.lane.b32.xlu0 %v8738_v50, %s10363_s8  ;;  %s8771_s8 = sshll.u32 %s10364_s0, 4  ;;  %s8772_s8 = int_to_ptr.vmem [resolvable:$true] %s8771_s8 }
 0x4ae   :  { %v8028_v63 = vpop.permute.xlu1 %8027   ;;  %s10325_s21 = scalar_lea.vmem %s8772_s8, 3072  ;;  %p10330_p1 = scmp.lt.s32.totalorder %s8772_s8, %s8772_s8 }
 0x4af   :  { %8031 = vst.msk [vmem:[#allocation0 + $0x70] sm:$0xff] %vm7685_vm4, %v8028_v63   ;;  %p10326_p0 = scmp.ne.s32.totalorder %s8772_s8, %s10325_s21  ;;  %p10331_p2 = scmp.lt.s32.totalorder %s10325_s21, %s10325_s21 }
 0x4b1   :  { %p10332_p3 = por %p10331_p2, %p10330_p1 }
 0x4b2   :  { %v8005_v0 = vpop.permute.xlu0 %8004  }
 0x4b3   :  { %8008 = vst.msk [vmem:[#allocation0 + $0x50] sm:$0xff] %vm7685_vm4, %v8005_v0   ;;  %p10333_p4 = pnand %p10332_p3, %p10326_p0 }
 0x4b6   :  { %v8074_v42 = vpop.permute.xlu1 %8073  }
 0x4b7   :  { %8077 = vst.msk [vmem:[#allocation0 + $0xb0] sm:$0xff] %vm7685_vm4, %v8074_v42  }
 0x4ba   :  { %v8051_v2 = vpop.permute.xlu0 %8050  }
 0x4bb   :  { %8054 = vst.msk [vmem:[#allocation0 + $0x90] sm:$0xff] %vm7685_vm4, %v8051_v2  }
 0x4be   :  { %v8120_v46 = vpop.permute.xlu1 %8119  }
 0x4bf   :  { %8123 = vst.msk [vmem:[#allocation0 + $0x38] sm:$0xff] %vm7685_vm4, %v8120_v46  }
 0x4c2   :  { %v8097_v3 = vpop.permute.xlu0 %8096  }
 0x4c3   :  { %8100 = vst.msk [vmem:[#allocation0 + $0x18] sm:$0xff] %vm7685_vm4, %v8097_v3  }
 0x4c6   :  { %v8166_v28 = vpop.permute.xlu1 %8165  }
 0x4c7   :  { %8169 = vst.msk [vmem:[#allocation0 + $0x78] sm:$0xff] %vm7685_vm4, %v8166_v28  }
 0x4ca   :  { %v8143_v4 = vpop.permute.xlu0 %8142  }
 0x4cb   :  { %8146 = vst.msk [vmem:[#allocation0 + $0x58] sm:$0xff] %vm7685_vm4, %v8143_v4  }
 0x4ce   :  { %v8212_v22 = vpop.permute.xlu1 %8211  }
 0x4cf   :  { %8215 = vst.msk [vmem:[#allocation0 + $0xb8] sm:$0xff] %vm7685_vm4, %v8212_v22  }
 0x4d2   :  { %v8189_v7 = vpop.permute.xlu0 %8188   ;;  %v8257_v8 = vpop.permute.xlu1 %8256  }
 0x4d3   :  { %8192 = vst.msk [vmem:[#allocation0 + $0x98] sm:$0xff] %vm7685_vm4, %v8189_v7  }
 0x4d4   :  { %8260 = vst.msk [vmem:[#allocation0 + $0x20] sm:$0xff] %vm8236_vm0, %v8257_v8  }
 0x4d6   :  { %v8235_v9 = vpop.permute.xlu0 %8234   ;;  %v8303_v16 = vpop.permute.xlu1 %8302  }
 0x4d7   :  { %8237 = vst.msk [vmem:[#allocation0] sm:$0xff] %vm8236_vm0, %v8235_v9   ;;  %8306 = vst.msk [vmem:[#allocation0 + $0x60] sm:$0xff] %vm8236_vm0, %v8303_v16  }
 0x4da   :  { %v8280_v54 = vpop.permute.xlu0 %8279   ;;  %v8349_v12 = vpop.permute.xlu1 %8348  }
 0x4db   :  { %8283 = vst.msk [vmem:[#allocation0 + $0x40] sm:$0xff] %vm8236_vm0, %v8280_v54   ;;  %8352 = vst.msk [vmem:[#allocation0 + $0xa0] sm:$0xff] %vm8236_vm0, %v8349_v12  }
 0x4de   :  { %v8326_v10 = vpop.permute.xlu0 %8325   ;;  %v8395_v11 = vpop.permute.xlu1 %8394  }
 0x4df   :  { %8329 = vst.msk [vmem:[#allocation0 + $0x80] sm:$0xff] %vm8236_vm0, %v8326_v10   ;;  %8398 = vst.msk [vmem:[#allocation0 + $0x28] sm:$0xff] %vm8236_vm0, %v8395_v11  }
 0x4e2   :  { %v8372_v36 = vpop.permute.xlu0 %8371  }
 0x4e3   :  { %8375 = vst.msk [vmem:[#allocation0 + $0x8] sm:$0xff] %vm8236_vm0, %v8372_v36   ;;  %v8441_v57 = vpop.permute.xlu1 %8440  }
 0x4e4   :  { %8444 = vst.msk [vmem:[#allocation0 + $0x68] sm:$0xff] %vm8236_vm0, %v8441_v57  }
 0x4e7   :  { %v8418_v13 = vpop.permute.xlu0 %8417  }
 0x4e8   :  { %8421 = vst.msk [vmem:[#allocation0 + $0x48] sm:$0xff] %vm8236_vm0, %v8418_v13  }
 0x4eb   :  { %v8487_v17 = vpop.permute.xlu1 %8486  }
 0x4ec   :  { %8490 = vst.msk [vmem:[#allocation0 + $0xa8] sm:$0xff] %vm8236_vm0, %v8487_v17  }
 0x4ef   :  { %v8464_v18 = vpop.permute.xlu0 %8463  }
 0x4f0   :  { %8467 = vst.msk [vmem:[#allocation0 + $0x88] sm:$0xff] %vm8236_vm0, %v8464_v18  }
 0x4f3   :  { %v8533_v19 = vpop.permute.xlu1 %8532  }
 0x4f4   :  { %8536 = vst.msk [vmem:[#allocation0 + $0x30] sm:$0xff] %vm8236_vm0, %v8533_v19  }
 0x4f7   :  { %v8510_v20 = vpop.permute.xlu0 %8509  }
 0x4f8   :  { %8513 = vst.msk [vmem:[#allocation0 + $0x10] sm:$0xff] %vm8236_vm0, %v8510_v20  }
 0x4fb   :  { %v8579_v21 = vpop.permute.xlu1 %8578  }
 0x4fc   :  { %8582 = vst.msk [vmem:[#allocation0 + $0x70] sm:$0xff] %vm8236_vm0, %v8579_v21  }
 0x4ff   :  { %v8556_v23 = vpop.permute.xlu0 %8555  }
 0x500   :  { %8559 = vst.msk [vmem:[#allocation0 + $0x50] sm:$0xff] %vm8236_vm0, %v8556_v23  }
 0x503   :  { %v8625_v26 = vpop.permute.xlu1 %8624  }
 0x504   :  { %8628 = vst.msk [vmem:[#allocation0 + $0xb0] sm:$0xff] %vm8236_vm0, %v8625_v26  }
 0x507   :  { %v8602_v27 = vpop.permute.xlu0 %8601  }
 0x508   :  { %8605 = vst.msk [vmem:[#allocation0 + $0x90] sm:$0xff] %vm8236_vm0, %v8602_v27  }
 0x50b   :  { %v8671_v49 = vpop.permute.xlu1 %8670  }
 0x50c   :  { %8674 = vst.msk [vmem:[#allocation0 + $0x38] sm:$0xff] %vm8236_vm0, %v8671_v49  }
 0x50f   :  { %v8648_v24 = vpop.permute.xlu0 %8647  }
 0x510   :  { %8651 = vst.msk [vmem:[#allocation0 + $0x18] sm:$0xff] %vm8236_vm0, %v8648_v24  }
 0x513   :  { %v8717_v29 = vpop.permute.xlu1 %8716  }
 0x514   :  { %8720 = vst.msk [vmem:[#allocation0 + $0x78] sm:$0xff] %vm8236_vm0, %v8717_v29  }
 0x517   :  { %v8694_v30 = vpop.permute.xlu0 %8693  }
 0x518   :  { %8697 = vst.msk [vmem:[#allocation0 + $0x58] sm:$0xff] %vm8236_vm0, %v8694_v30  }
 0x51b   :  { %v8763_v32 = vpop.permute.xlu1 %8762  }
 0x51c   :  { %8766 = vst.msk [vmem:[#allocation0 + $0xb8] sm:$0xff] %vm8236_vm0, %v8763_v32  }
 0x51f   :  { %v8740_v33 = vpop.permute.xlu0 %8739  }
 0x520   :  { %8743 = vst.msk [vmem:[#allocation0 + $0x98] sm:$0xff] %vm8236_vm0, %v8740_v33  }
 0x521   :  { %10336 = shalt.err (!%p10333_p4)
}
 0x522   :  { %s10337_s18 = scalar_lea.hbm %s16976_s1, 3072 }
 0x523   :  { %p10338_p5 = scmp.ne.s32.totalorder %s16976_s1, %s10337_s18  ;;  %p10341_p6 = scmp.lt.u32.totalorder %s10337_s18, %s16976_s1 }
 0x525   :  { %p10343_p7 = pnand %p10341_p6, %p10338_p5 }
 0x527   :  { %10346 = shalt.err (!%p10343_p7)
}
 0x528   :  { %8774 = dma.vmem_to_hbm [thread:$0]  %s8772_s8, 3072, %s16976_s1, [#allocation1]  }
 0x529   :  { %10347 = dma.done.wait [#allocation1], 3072  }
 0x52a   :  { %10348 = vsyncadd [#allocation1], 4294964224 }
 0x52b   :  { %8776 = vsyncpa [#allocation1], 1 }

// kernel: _upconv4_apply.1
= control target key start
LH: loop header
LB: loop body
LE: loop exit
PB: predicated region body
PF: predicated region fallthrough
CT: control target
= control target key end

     0   :  { %s1451_s15 = smov 0   ;;  %s1453_s16 = smov 0   ;;  %s1721_s0 = inlined_call_operand.vmem [shape: bf16[2,48,384], index: 0, kind: input, shape index: {}]   ;;  %s1722_s1 = inlined_call_operand.vmem [shape: bf16[2,1,48,72], index: 1, kind: input, shape index: {}]   ;;  %s1723_s2 = inlined_call_operand.vmem [shape: bf16[144,48], index: 2, kind: input, shape index: {}]   ;;  %s1724_s3 = inlined_call_operand.vmem [shape: f32[16,1], index: 3, kind: input, shape index: {}]   ;;  %s1725_s4 = inlined_call_operand.vmem [shape: f32[32,768], index: 4, kind: output, shape index: {}]  }
   0x1   :  { %s1455_s17 = smov 0   ;;  %s1457_s18 = smov 0  }
   0x2   :  { %s1459_s19 = smov 0  }
   0x3 LB: > { %s1225_s20 = sadd.s32 4294967295, %s1415_s19   ;;  %s26_s21 = sadd.s32 1, %s1411_s18  ;;  %s1415_s19 = sphi %s1459_s19, %s14_s19   ;;  %s1411_s18 = sphi %s1457_s18, %s1730_s18   ;;  %s1407_s17 = sphi %s1455_s17, %s1729_s17   ;;  %s1403_s16 = sphi %s1453_s16, %s1728_s16   ;;  %s1399_s15 = sphi %s1451_s15, %s1727_s15  }
   0x4   : > { %p28_p0 = scmp.ge.s32.totalorder %s26_s21, 2  ;;  %s133_s22 = sadd.s32 1, %s1403_s16 }
   0x5   : > { %p143_p1 = scmp.ne.s32.totalorder %s1403_s16, %s1399_s15  ;;  %p144_p2 = scmp.eq.s32.totalorder %s1225_s20, 1 }
   0x6   : > { %s1732_s21 = smov (%p28_p0, %s26_s21), 0  ;;  %p1229_p4 = scmp.ge.s32.totalorder %s1415_s19, 1 }
   0x7   : > { %p1483_p3 = por %p144_p2, %p143_p1  ;;  %s130_s24 = ssub.s32 %s1411_s18, %s1732_s21 }
   0x8   : > { %p199_p5 = scmp.lt.s32.totalorder %s1415_s19, 3  ;;  %p131_p6 = scmp.eq.s32.totalorder %s130_s24, 0 }
   0xa   : > { %p200_p7 = pnand %p1229_p4, %p199_p5 }
   0xb   : > { %s1492_s25 = scalar_select %p131_p6, %s1403_s16, %s133_s22  }
   0xc   : > { %203 = sbr.rel (%p200_p7) target bundleno = 541 (0x21d), region = 36  ;;  %p238_p8 = scmp.lt.s32.totalorder (!%p200_p7), %s1407_s17, 1  ;;  %v1417_v0 = vmov (!%p200_p7), 0   ;;  %v1344_v13 = vld [vmem:[%s1723_s2] sm:$0xff] (!%p200_p7)   ;;  %vm406_vm0 = vcmask (!%p200_p7), 392192   ;;  %v1023_v14 = vld [vmem:[%s1724_s3 + $0x8] sm:$0xff] (!%p200_p7) }
   0xd   : > { %466 = vmatprep.mubr.bf16.mxu0 (!%p200_p7), %v1417_v0  ;;  %589 = vmatprep.mubr.bf16.mxu1 (!%p200_p7), %v1417_v0  ;;  %v1022_v15 = vld [vmem:[%s1724_s3] sm:$0xff] (!%p200_p7)  ;;  %v1345_v16 = vld [vmem:[%s1723_s2 + $0x8] sm:$0xff] (!%p200_p7)   ;;  %v1346_v17 = vld [vmem:[%s1723_s2 + $0x10] sm:$0xff] (!%p200_p7)   ;;  %s1418_s13 = smov (!%p200_p7), 127   ;;  %s1419_s14 = smov (!%p200_p7), 126   ;;  %vm702_vm1 = vcmask (!%p200_p7), 1039360  }
   0xe   : > { %1328 = vset.pattern.permute.xlu1 (!%p200_p7), %v1417_v0  ;;  %1327 = vset.pattern.permute.xlu0 (!%p200_p7), %v1417_v0  ;;  %v1347_v18 = vld [vmem:[%s1723_s2 + $0x18] sm:$0xff] (!%p200_p7)   ;;  %v1348_v19 = vld [vmem:[%s1723_s2 + $0x20] sm:$0xff] (!%p200_p7)   ;;  %v1349_v20 = vld [vmem:[%s1723_s2 + $0x28] sm:$0xff] (!%p200_p7)   ;;  %s1420_s20 = smov (!%p200_p7), 104   ;;  %s1421_s22 = smov (!%p200_p7), 103   ;;  %vm745_vm2 = vcmask (!%p200_p7), 1031168  }
   0xf   : > { %1031 = vperm.xlu1 (!%p200_p7), %1328, %v1023_v14   ;;  %1026 = vperm.xlu0 (!%p200_p7), %1327, %v1022_v15   ;;  %v1350_v21 = vld [vmem:[%s1723_s2 + $0x30] sm:$0xff] (!%p200_p7)   ;;  %v1351_v22 = vld [vmem:[%s1723_s2 + $0x38] sm:$0xff] (!%p200_p7)   ;;  %v1352_v23 = vld [vmem:[%s1723_s2 + $0x40] sm:$0xff] (!%p200_p7)   ;;  %s1422_s24 = smov (!%p200_p7), 102   ;;  %vm788_vm3 = vcmask (!%p200_p7), 850944   ;;  %vm831_vm4 = vcmask (!%p200_p7), 842752  }
  0x10   : > { %vm874_vm5 = vcmask (!%p200_p7), 834560   ;;  %vm917_vm6 = vcmask (!%p200_p7), 654336   ;;  %vm960_vm7 = vcmask (!%p200_p7), 646144   ;;  %s234_s29 = sand.u32 (!%p200_p7), 1, %s1399_s15   ;;  %vm1003_vm8 = vcmask (!%p200_p7), 637952  }
  0x11   : > { %s1275_s15 = smul.u32 (!%p200_p7), 96, %s234_s29 }
  0x13   : > { %s239_s26 = scalar_select %p238_p8, %s1407_s17, 1 }
  0x14   : > { %s1662_s30 = scalar_lea.vmem [#allocation2], %s1275_s15 }
  0x15   : > { %s1276_s27 = smul.u32 72, %s239_s26 }
  0x16   : > { %s1277_s28 = smul.u32 24, %s239_s26  ;;  %s1423_s26 = smov 80  }
  0x17   : > { %s245_s5 = scalar_lea.vmem %s1721_s0, %s1276_s27  ;;  %s1424_s27 = smov 79  }
  0x18   : > { %v1329_v1 = vld [vmem:[%s245_s5 + $0x4] ss:$12 sps:$4 sm:$0xff]   ;;  %s255_s8 = scalar_lea.vmem %s1722_s1, %s1277_s28  ;;  %v1332_v3 = vld [vmem:[%s245_s5] ss:$12 sps:$4 sm:$0xff]   ;;  %v1333_v4 = vld [vmem:[%s245_s5 + $0x8] ss:$12 sps:$4 sm:$0xff]  }
  0x19   : > { %v1331_v2 = vld [vmem:[%s255_s8] sm:$0xff]   ;;  %434 = vmatprep.subr.bf16.mxu0 %v1329_v1  ;;  %v1334_v5 = vld [vmem:[%s245_s5 + $0x1c] ss:$12 sps:$4 sm:$0xff]   ;;  %v1341_v10 = vld [vmem:[%s255_s8 + $0x10] sm:$0xff]   ;;  %s1425_s28 = smov 78  }
  0x1a   : > { %557 = vmatprep.subr.bf16.mxu1 %v1331_v2  ;;  %435 = vmatpush1.bf16.msra.mxu0 %v1332_v3  ;;  %v1336_v6 = vld [vmem:[%s255_s8 + $0x8] sm:$0xff]   ;;  %v1337_v7 = vld [vmem:[%s245_s5 + $0x18] ss:$12 sps:$4 sm:$0xff]   ;;  %v1339_v9 = vld [vmem:[%s245_s5 + $0x34] ss:$12 sps:$4 sm:$0xff]  }
  0x1b   : > { %558 = vmatpush1.bf16.msra.mxu1 %v1333_v4  ;;  %436 = vmatprep.subr.bf16.mxu0 %v1334_v5  ;;  %v1338_v8 = vld [vmem:[%s245_s5 + $0x20] ss:$12 sps:$4 sm:$0xff]   ;;  %v1342_v11 = vld [vmem:[%s245_s5 + $0x30] ss:$12 sps:$4 sm:$0xff]   ;;  %v1343_v12 = vld [vmem:[%s245_s5 + $0x38] ss:$12 sps:$4 sm:$0xff]  }
  0x1c   : > { %559 = vmatprep.subr.bf16.mxu1 %v1336_v6  ;;  %s1274_s5 = smul.u32 (%p1483_p3), 24, %s1407_s17 }
  0x1e   : > { %437 = vmatpush1.bf16.msra.mxu0 %v1337_v7  ;;  %s1098_s7 = scalar_lea.vmem (%p1483_p3), %s1725_s4, %s1274_s5 }
  0x1f   : > { %560 = vmatpush1.bf16.msra.mxu1 %v1338_v8  ;;  %438 = vmatprep.subr.bf16.mxu0 %v1339_v9 }
  0x20   : > { %561 = vmatprep.subr.bf16.mxu1 %v1341_v10 }
  0x22   : > { %439 = vmatpush1.bf16.msra.mxu0 %v1342_v11 }
  0x23   : > { %562 = vmatpush1.bf16.msra.mxu1 %v1343_v12 }
  0x25   : > { %1253 = vmatmul.mubr.msk.bf16.vlgmr.msra.gmra.mrb[0].mxu0 %vm406_vm0, %v1344_v13 }
  0x26   : > { %1262 = vmatmul.mubr.msk.bf16.vlgmr.msra.gmra.mrb[0].mxu1 %vm406_vm0, %v1344_v13  ;;  %476 = vmatprep.mubr.bf16.mxu0 %v1417_v0 }
  0x27   : > { %597 = vmatprep.mubr.bf16.mxu1 %v1417_v0 }
  0x2d   : > { %1254 = vmatmul.mubr.msk.bf16.gmra.mrb[4].mxu0 %vm406_vm0, %v1345_v16 }
  0x2e   : > { %1263 = vmatmul.mubr.msk.bf16.gmra.mrb[4].mxu1 %vm406_vm0, %v1345_v16  ;;  %486 = vmatprep.mubr.bf16.mxu0 %v1417_v0 }
  0x2f   : > { %607 = vmatprep.mubr.bf16.mxu1 %v1417_v0 }
  0x35   : > { %1255 = vmatmul.mubr.msk.bf16.gmra.mrb[8].mxu0 %vm406_vm0, %v1346_v17 }
  0x36   : > { %1264 = vmatmul.mubr.msk.bf16.gmra.mrb[8].mxu1 %vm406_vm0, %v1346_v17  ;;  %496 = vmatprep.mubr.bf16.mxu0 %v1417_v0 }
  0x37   : > { %617 = vmatprep.mubr.bf16.mxu1 %v1417_v0 }
  0x3d   : > { %1256 = vmatmul.mubr.msk.bf16.gmra.mrb[12].mxu0 %vm406_vm0, %v1347_v18 }
  0x3e   : > { %1265 = vmatmul.mubr.msk.bf16.gmra.mrb[12].mxu1 %vm406_vm0, %v1347_v18  ;;  %506 = vmatprep.mubr.bf16.mxu0 %v1417_v0 }
  0x3f   : > { %627 = vmatprep.mubr.bf16.mxu1 %v1417_v0 }
  0x45   : > { %1257 = vmatmul.mubr.msk.bf16.gmra.mrb[16].mxu0 %vm406_vm0, %v1348_v19 }
  0x46   : > { %1266 = vmatmul.mubr.msk.bf16.gmra.mrb[16].mxu1 %vm406_vm0, %v1348_v19  ;;  %516 = vmatprep.mubr.bf16.mxu0 %v1417_v0 }
  0x47   : > { %637 = vmatprep.mubr.bf16.mxu1 %v1417_v0 }
  0x4d   : > { %1258 = vmatmul.mubr.msk.bf16.gmra.mrb[20].mxu0 %vm406_vm0, %v1349_v20 }
  0x4e   : > { %1267 = vmatmul.mubr.msk.bf16.gmra.mrb[20].mxu1 %vm406_vm0, %v1349_v20  ;;  %526 = vmatprep.mubr.bf16.mxu0 %v1417_v0 }
  0x4f   : > { %647 = vmatprep.mubr.bf16.mxu1 %v1417_v0 }
  0x55   : > { %1259 = vmatmul.mubr.msk.bf16.gmra.mrb[24].mxu0 %vm406_vm0, %v1350_v21 }
  0x56   : > { %1268 = vmatmul.mubr.msk.bf16.gmra.mrb[24].mxu1 %vm406_vm0, %v1350_v21  ;;  %536 = vmatprep.mubr.bf16.mxu0 %v1417_v0 }
  0x57   : > { %657 = vmatprep.mubr.bf16.mxu1 %v1417_v0 }
  0x5d   : > { %1260 = vmatmul.mubr.msk.bf16.gmra.mrb[28].mxu0 %vm406_vm0, %v1351_v22 }
  0x5e   : > { %1269 = vmatmul.mubr.msk.bf16.gmra.mrb[28].mxu1 %vm406_vm0, %v1351_v22  ;;  %546 = vmatprep.mubr.bf16.mxu0 %v1417_v0 }
  0x5f   : > { %667 = vmatprep.mubr.bf16.mxu1 %v1417_v0 }
  0x65   : > { %1261 = vmatmul.mubr.msk.bf16.gmra.mrb[32].mxu0 %vm406_vm0, %v1352_v23 }
  0x66   : > { %1270 = vmatmul.mubr.msk.bf16.gmra.mrb[32].mxu1 %vm406_vm0, %v1352_v23 }
  0xf8   : > { %v1573_v24 = vpop.f32.mrb[0].mxu0 }
  0xf9   : > { %v1575_v25 = vpop.f32.mrb[0].mxu1  ;;  %v1577_v26 = vpop.f32.mrb[1].mxu0 }
  0xfa   : > { %v593_v27 = vpop.f32.mrb[1].mxu1  ;;  %v1579_v28 = vpop.f32.mrb[2].mxu0 }
  0xfb   : > { %v1581_v29 = vpop.f32.mrb[2].mxu1  ;;  %v1583_v30 = vpop.f32.mrb[3].mxu0 }
  0xfc   : > { %v596_v31 = vpop.f32.mrb[3].mxu1 }
 0x100   : > { %v478_v32 = vpop.f32.mrb[4].mxu0 }
 0x101   : > { %v599_v33 = vpop.f32.mrb[4].mxu1  ;;  %686 = vrot.lane.b32.xlu0 %v478_v32, %s1418_s13  ;;  %v480_v34 = vpop.f32.mrb[5].mxu0 }
 0x102   : > { %690 = vrot.lane.b32.xlu1 %v599_v33, %s1418_s13  ;;  %v601_v35 = vpop.f32.mrb[5].mxu1  ;;  %v482_v36 = vpop.f32.mrb[6].mxu0 }
 0x103   : > { %v603_v37 = vpop.f32.mrb[6].mxu1  ;;  %v484_v38 = vpop.f32.mrb[7].mxu0 }
 0x104   : > { %v605_v39 = vpop.f32.mrb[7].mxu1 }
 0x105   : > { %688 = vrot.lane.b32.xlu0 %v480_v34, %s1418_s13 }
 0x106   : > { %692 = vrot.lane.b32.xlu1 %v601_v35, %s1418_s13 }
 0x108   : > { %v488_v40 = vpop.f32.mrb[8].mxu0 }
 0x109   : > { %694 = vrot.lane.b32.xlu0 %v482_v36, %s1418_s13  ;;  %v490_v41 = vpop.f32.mrb[9].mxu0  ;;  %v609_v42 = vpop.f32.mrb[8].mxu1 }
 0x10a   : > { %696 = vrot.lane.b32.xlu1 %v484_v38, %s1418_s13  ;;  %v492_v43 = vpop.f32.mrb[10].mxu0  ;;  %v611_v44 = vpop.f32.mrb[9].mxu1 }
 0x10b   : > { %v494_v45 = vpop.f32.mrb[11].mxu0  ;;  %v613_v46 = vpop.f32.mrb[10].mxu1 }
 0x10c   : > { %v615_v47 = vpop.f32.mrb[11].mxu1  ;;  %v1585_v38 = vpop.permute.xlu0 %1026 }
 0x10d   : > { %698 = vrot.lane.b32.xlu0 %v603_v37, %s1418_s13 }
 0x10e   : > { %700 = vrot.lane.b32.xlu1 %v605_v39, %s1418_s13  ;;  %v1587_v39 = vpop.permute.xlu1 %1031 }
 0x110   : > { %v498_v48 = vpop.f32.mrb[12].mxu0 }
 0x111   : > { %729 = vrot.lane.b32.xlu0 %v488_v40, %s1419_s14  ;;  %v500_v49 = vpop.f32.mrb[13].mxu0  ;;  %v619_v50 = vpop.f32.mrb[12].mxu1 }
 0x112   : > { %731 = vrot.lane.b32.xlu1 %v490_v41, %s1419_s14  ;;  %v502_v51 = vpop.f32.mrb[14].mxu0  ;;  %v621_v52 = vpop.f32.mrb[13].mxu1 }
 0x113   : > { %v504_v53 = vpop.f32.mrb[15].mxu0  ;;  %v623_v54 = vpop.f32.mrb[14].mxu1 }
 0x114   : > { %v625_v55 = vpop.f32.mrb[15].mxu1 }
 0x115   : > { %733 = vrot.lane.b32.xlu0 %v609_v42, %s1419_s14 }
 0x116   : > { %735 = vrot.lane.b32.xlu1 %v611_v44, %s1419_s14 }
 0x118   : > { %v508_v56 = vpop.f32.mrb[16].mxu0 }
 0x119   : > { %737 = vrot.lane.b32.xlu0 %v492_v43, %s1419_s14  ;;  %v510_v57 = vpop.f32.mrb[17].mxu0  ;;  %v629_v58 = vpop.f32.mrb[16].mxu1 }
 0x11a   : > { %739 = vrot.lane.b32.xlu1 %v494_v45, %s1419_s14  ;;  %v512_v59 = vpop.f32.mrb[18].mxu0  ;;  %v631_v60 = vpop.f32.mrb[17].mxu1 }
 0x11b   : > { %v514_v61 = vpop.f32.mrb[19].mxu0  ;;  %v633_v62 = vpop.f32.mrb[18].mxu1 }
 0x11c   : > { %v635_v63 = vpop.f32.mrb[19].mxu1 }
 0x11d   : > { %741 = vrot.lane.b32.xlu0 %v613_v46, %s1419_s14 }
 0x11e   : > { %743 = vrot.lane.b32.xlu1 %v615_v47, %s1419_s14 }
 0x120   : > { %v518_v0 = vpop.f32.mrb[20].mxu0 }
 0x121   : > { %772 = vrot.lane.b32.xlu0 %v498_v48, %s1420_s20  ;;  %v520_v1 = vpop.f32.mrb[21].mxu0  ;;  %v639_v2 = vpop.f32.mrb[20].mxu1 }
 0x122   : > { %774 = vrot.lane.b32.xlu1 %v500_v49, %s1420_s20  ;;  %v522_v3 = vpop.f32.mrb[22].mxu0  ;;  %v641_v4 = vpop.f32.mrb[21].mxu1 }
 0x123   : > { %v524_v5 = vpop.f32.mrb[23].mxu0  ;;  %v643_v6 = vpop.f32.mrb[22].mxu1 }
 0x124   : > { %v645_v7 = vpop.f32.mrb[23].mxu1 }
 0x125   : > { %776 = vrot.lane.b32.xlu0 %v619_v50, %s1420_s20 }
 0x126   : > { %778 = vrot.lane.b32.xlu1 %v621_v52, %s1420_s20 }
 0x128   : > { %v528_v8 = vpop.f32.mrb[24].mxu0 }
 0x129   : > { %780 = vrot.lane.b32.xlu0 %v502_v51, %s1420_s20  ;;  %v530_v9 = vpop.f32.mrb[25].mxu0  ;;  %v649_v10 = vpop.f32.mrb[24].mxu1 }
 0x12a   : > { %782 = vrot.lane.b32.xlu1 %v504_v53, %s1420_s20  ;;  %v532_v11 = vpop.f32.mrb[26].mxu0  ;;  %v651_v12 = vpop.f32.mrb[25].mxu1 }
 0x12b   : > { %v534_v13 = vpop.f32.mrb[27].mxu0  ;;  %v653_v14 = vpop.f32.mrb[26].mxu1 }
 0x12c   : > { %v655_v15 = vpop.f32.mrb[27].mxu1 }
 0x12d   : > { %784 = vrot.lane.b32.xlu0 %v623_v54, %s1420_s20 }
 0x12e   : > { %786 = vrot.lane.b32.xlu1 %v625_v55, %s1420_s20 }
 0x130   : > { %v538_v16 = vpop.f32.mrb[28].mxu0 }
 0x131   : > { %815 = vrot.lane.b32.xlu0 %v508_v56, %s1421_s22  ;;  %v540_v17 = vpop.f32.mrb[29].mxu0  ;;  %v659_v18 = vpop.f32.mrb[28].mxu1 }
 0x132   : > { %817 = vrot.lane.b32.xlu1 %v510_v57, %s1421_s22  ;;  %v542_v19 = vpop.f32.mrb[30].mxu0  ;;  %v661_v20 = vpop.f32.mrb[29].mxu1 }
 0x133   : > { %v544_v21 = vpop.f32.mrb[31].mxu0  ;;  %v663_v22 = vpop.f32.mrb[30].mxu1 }
 0x134   : > { %v665_v23 = vpop.f32.mrb[31].mxu1 }
 0x135   : > { %819 = vrot.lane.b32.xlu0 %v629_v58, %s1421_s22 }
 0x136   : > { %821 = vrot.lane.b32.xlu1 %v631_v60, %s1421_s22 }
 0x138   : > { %v548_v27 = vpop.f32.mrb[32].mxu0 }
 0x139   : > { %823 = vrot.lane.b32.xlu0 %v512_v59, %s1421_s22  ;;  %v550_v31 = vpop.f32.mrb[33].mxu0  ;;  %v669_v32 = vpop.f32.mrb[32].mxu1 }
 0x13a   : > { %825 = vrot.lane.b32.xlu1 %v514_v61, %s1421_s22  ;;  %v552_v33 = vpop.f32.mrb[34].mxu0  ;;  %v671_v34 = vpop.f32.mrb[33].mxu1 }
 0x13b   : > { %v554_v35 = vpop.f32.mrb[35].mxu0  ;;  %v673_v36 = vpop.f32.mrb[34].mxu1 }
 0x13c   : > { %v675_v37 = vpop.f32.mrb[35].mxu1 }
 0x13d   : > { %827 = vrot.lane.b32.xlu0 %v633_v62, %s1421_s22 }
 0x13e   : > { %829 = vrot.lane.b32.xlu1 %v635_v63, %s1421_s22 }
 0x141   : > { %858 = vrot.lane.b32.xlu0 %v518_v0, %s1422_s24 }
 0x142   : > { %860 = vrot.lane.b32.xlu1 %v520_v1, %s1422_s24 }
 0x145   : > { %862 = vrot.lane.b32.xlu0 %v639_v2, %s1422_s24 }
 0x146   : > { %864 = vrot.lane.b32.xlu1 %v641_v4, %s1422_s24 }
 0x149   : > { %866 = vrot.lane.b32.xlu0 %v522_v3, %s1422_s24 }
 0x14a   : > { %868 = vrot.lane.b32.xlu1 %v524_v5, %s1422_s24 }
 0x14d   : > { %870 = vrot.lane.b32.xlu0 %v643_v6, %s1422_s24 }
 0x14e   : > { %872 = vrot.lane.b32.xlu1 %v645_v7, %s1422_s24 }
 0x151   : > { %901 = vrot.lane.b32.xlu0 %v528_v8, %s1423_s26 }
 0x152   : > { %903 = vrot.lane.b32.xlu1 %v530_v9, %s1423_s26 }
 0x155   : > { %905 = vrot.lane.b32.xlu0 %v649_v10, %s1423_s26 }
 0x156   : > { %907 = vrot.lane.b32.xlu1 %v651_v12, %s1423_s26 }
 0x159   : > { %909 = vrot.lane.b32.xlu0 %v532_v11, %s1423_s26 }
 0x15a   : > { %911 = vrot.lane.b32.xlu1 %v534_v13, %s1423_s26 }
 0x15d   : > { %913 = vrot.lane.b32.xlu0 %v653_v14, %s1423_s26 }
 0x15e   : > { %915 = vrot.lane.b32.xlu1 %v655_v15, %s1423_s26 }
 0x161   : > { %946 = vrot.lane.b32.xlu0 %v540_v17, %s1424_s27 }
 0x162   : > { %944 = vrot.lane.b32.xlu1 %v538_v16, %s1424_s27 }
 0x165   : > { %950 = vrot.lane.b32.xlu0 %v661_v20, %s1424_s27 }
 0x166   : > { %948 = vrot.lane.b32.xlu1 %v659_v18, %s1424_s27 }
 0x169   : > { %954 = vrot.lane.b32.xlu0 %v544_v21, %s1424_s27 }
 0x16a   : > { %952 = vrot.lane.b32.xlu1 %v542_v19, %s1424_s27 }
 0x16d   : > { %958 = vrot.lane.b32.xlu0 %v665_v23, %s1424_s27 }
 0x16e   : > { %956 = vrot.lane.b32.xlu1 %v663_v22, %s1424_s27 }
 0x171   : > { %989 = vrot.lane.b32.xlu0 %v550_v31, %s1425_s28 }
 0x172   : > { %987 = vrot.lane.b32.xlu1 %v548_v27, %s1425_s28 }
 0x173   : > { %v687_v40 = vpop.permute.xlu0 %686 }
 0x174   : > { %v691_v41 = vpop.permute.xlu1 %690 }
 0x175   : > { %993 = vrot.lane.b32.xlu0 %v671_v34, %s1425_s28 }
 0x176   : > { %991 = vrot.lane.b32.xlu1 %v669_v32, %s1425_s28 }
 0x177   : > { %v689_v42 = vpop.permute.xlu0 %688 }
 0x178   : > { %v693_v43 = vpop.permute.xlu1 %692  ;;  %v703_v44 = vsel %vm702_vm1, %v687_v40, %v689_v42  ;;  %v704_v45 = vsel %vm702_vm1, %v689_v42, %v691_v41 }
 0x179   : > { %v705_v46 = vsel %vm702_vm1, %v691_v41, %v693_v43  ;;  %v715_v47 = vadd.f32 %v703_v44, %v1573_v24  ;;  %v716_v48 = vadd.f32 %v704_v45, %v1577_v26  ;;  %997 = vrot.lane.b32.xlu0 %v554_v35, %s1425_s28 }
 0x17a   : > { %v717_v49 = vadd.f32 %v705_v46, %v1575_v25  ;;  %995 = vrot.lane.b32.xlu1 %v552_v33, %s1425_s28 }
 0x17b   : > { %v695_v50 = vpop.permute.xlu0 %694 }
 0x17c   : > { %v697_v51 = vpop.permute.xlu1 %696 }
 0x17d   : > { %v706_v52 = vsel %vm702_vm1, %v695_v50, %v697_v51  ;;  %1001 = vrot.lane.b32.xlu0 %v675_v37, %s1425_s28 }
 0x17e   : > { %v718_v53 = vadd.f32 %v706_v52, %v1579_v28  ;;  %999 = vrot.lane.b32.xlu1 %v673_v36, %s1425_s28 }
 0x17f   : > { %v699_v54 = vpop.permute.xlu0 %698 }
 0x180   : > { %v707_v55 = vsel %vm702_vm1, %v697_v51, %v699_v54  ;;  %v701_v56 = vpop.permute.xlu1 %700 }
 0x181   : > { %v719_v24 = vadd.f32 %v707_v55, %v1583_v30  ;;  %v708_v26 = vsel %vm702_vm1, %v699_v54, %v701_v56 }
 0x182   : > { %v720_v57 = vadd.f32 %v708_v26, %v1581_v29 }
 0x183   : > { %v730_v25 = vpop.permute.xlu0 %729 }
 0x184   : > { %v732_v58 = vpop.permute.xlu1 %731 }
 0x185   : > { %v746_v59 = vsel %vm745_vm2, %v730_v25, %v732_v58 }
 0x186   : > { %v758_v60 = vadd.f32 %v746_v59, %v715_v47 }
 0x187   : > { %v734_v61 = vpop.permute.xlu0 %733 }
 0x188   : > { %v747_v28 = vsel %vm745_vm2, %v732_v58, %v734_v61  ;;  %v736_v62 = vpop.permute.xlu1 %735 }
 0x189   : > { %v759_v63 = vadd.f32 %v747_v28, %v716_v48  ;;  %v748_v0 = vsel %vm745_vm2, %v734_v61, %v736_v62 }
 0x18a   : > { %v760_v1 = vadd.f32 %v748_v0, %v717_v49 }
 0x18b   : > { %v738_v2 = vpop.permute.xlu0 %737 }
 0x18c   : > { %v740_v30 = vpop.permute.xlu1 %739 }
 0x18d   : > { %v749_v3 = vsel %vm745_vm2, %v738_v2, %v740_v30 }
 0x18e   : > { %v761_v4 = vadd.f32 %v749_v3, %v718_v53 }
 0x18f   : > { %v742_v29 = vpop.permute.xlu0 %741 }
 0x190   : > { %v750_v5 = vsel %vm745_vm2, %v740_v30, %v742_v29  ;;  %v744_v6 = vpop.permute.xlu1 %743 }
 0x191   : > { %v762_v7 = vadd.f32 %v750_v5, %v719_v24  ;;  %v751_v8 = vsel %vm745_vm2, %v742_v29, %v744_v6 }
 0x192   : > { %v763_v9 = vadd.f32 %v751_v8, %v720_v57 }
 0x193   : > { %v773_v10 = vpop.permute.xlu0 %772 }
 0x194   : > { %v775_v11 = vpop.permute.xlu1 %774 }
 0x195   : > { %v789_v12 = vsel %vm788_vm3, %v773_v10, %v775_v11 }
 0x196   : > { %v801_v13 = vadd.f32 %v789_v12, %v758_v60 }
 0x197   : > { %v777_v14 = vpop.permute.xlu0 %776 }
 0x198   : > { %v790_v15 = vsel %vm788_vm3, %v775_v11, %v777_v14  ;;  %v779_v16 = vpop.permute.xlu1 %778 }
 0x199   : > { %v802_v17 = vadd.f32 %v790_v15, %v759_v63  ;;  %v791_v18 = vsel %vm788_vm3, %v777_v14, %v779_v16 }
 0x19a   : > { %v803_v19 = vadd.f32 %v791_v18, %v760_v1 }
 0x19b   : > { %v781_v20 = vpop.permute.xlu0 %780 }
 0x19c   : > { %v783_v21 = vpop.permute.xlu1 %782 }
 0x19d   : > { %v792_v22 = vsel %vm788_vm3, %v781_v20, %v783_v21 }
 0x19e   : > { %v804_v23 = vadd.f32 %v792_v22, %v761_v4 }
 0x19f   : > { %v785_v27 = vpop.permute.xlu0 %784 }
 0x1a0   : > { %v793_v31 = vsel %vm788_vm3, %v783_v21, %v785_v27  ;;  %v787_v32 = vpop.permute.xlu1 %786 }
 0x1a1   : > { %v1612_v33 = vadd.f32 %v793_v31, %v762_v7  ;;  %v794_v34 = vsel %vm788_vm3, %v785_v27, %v787_v32 }
 0x1a2   : > { %v1615_v35 = vadd.f32 %v794_v34, %v763_v9 }
 0x1a3   : > { %v816_v36 = vpop.permute.xlu0 %815 }
 0x1a4   : > { %v818_v37 = vpop.permute.xlu1 %817 }
 0x1a5   : > { %v832_v62 = vsel %vm831_vm4, %v816_v36, %v818_v37 }
 0x1a6   : > { %v844_v2 = vadd.f32 %v832_v62, %v801_v13 }
 0x1a7   : > { %v820_v40 = vpop.permute.xlu0 %819 }
 0x1a8   : > { %v822_v41 = vpop.permute.xlu1 %821  ;;  %v833_v30 = vsel %vm831_vm4, %v818_v37, %v820_v40 }
 0x1a9   : > { %v834_v3 = vsel %vm831_vm4, %v820_v40, %v822_v41  ;;  %v845_v11 = vadd.f32 %v833_v30, %v802_v17 }
 0x1aa   : > { %v846_v12 = vadd.f32 %v834_v3, %v803_v19 }
 0x1ab   : > { %v824_v42 = vpop.permute.xlu0 %823 }
 0x1ac   : > { %v826_v43 = vpop.permute.xlu1 %825 }
 0x1ad   : > { %v835_v5 = vsel %vm831_vm4, %v824_v42, %v826_v43 }
 0x1ae   : > { %v847_v15 = vadd.f32 %v835_v5, %v804_v23 }
 0x1af   : > { %v828_v44 = vpop.permute.xlu0 %827 }
 0x1b0   : > { %v830_v45 = vpop.permute.xlu1 %829  ;;  %v836_v13 = vsel %vm831_vm4, %v826_v43, %v828_v44 }
 0x1b1   : > { %v837_v16 = vsel %vm831_vm4, %v828_v44, %v830_v45  ;;  %v848_v17 = vadd.f32 %v836_v13, %v1612_v33 }
 0x1b2   : > { %v849_v43 = vadd.f32 %v837_v16, %v1615_v35 }
 0x1b3   : > { %v859_v46 = vpop.permute.xlu0 %858 }
 0x1b4   : > { %v861_v47 = vpop.permute.xlu1 %860 }
 0x1b5   : > { %v875_v1 = vsel %vm874_vm5, %v859_v46, %v861_v47 }
 0x1b6   : > { %v887_v6 = vadd.f32 %v875_v1, %v844_v2 }
 0x1b7   : > { %v863_v48 = vpop.permute.xlu0 %862 }
 0x1b8   : > { %v865_v49 = vpop.permute.xlu1 %864  ;;  %v876_v8 = vsel %vm874_vm5, %v861_v47, %v863_v48 }
 0x1b9   : > { %v877_v9 = vsel %vm874_vm5, %v863_v48, %v865_v49  ;;  %v888_v22 = vadd.f32 %v876_v8, %v845_v11 }
 0x1ba   : > { %v889_v27 = vadd.f32 %v877_v9, %v846_v12 }
 0x1bb   : > { %v867_v50 = vpop.permute.xlu0 %866 }
 0x1bc   : > { %v869_v51 = vpop.permute.xlu1 %868 }
 0x1bd   : > { %v878_v31 = vsel %vm874_vm5, %v867_v50, %v869_v51 }
 0x1be   : > { %v890_v44 = vadd.f32 %v878_v31, %v847_v15 }
 0x1bf   : > { %v871_v52 = vpop.permute.xlu0 %870 }
 0x1c0   : > { %v873_v53 = vpop.permute.xlu1 %872  ;;  %v879_v45 = vsel %vm874_vm5, %v869_v51, %v871_v52 }
 0x1c1   : > { %v880_v46 = vsel %vm874_vm5, %v871_v52, %v873_v53 }
 0x1c3   : > { %v902_v54 = vpop.permute.xlu0 %901 }
 0x1c4   : > { %v904_v55 = vpop.permute.xlu1 %903 }
 0x1c5   : > { %v918_v4 = vsel %vm917_vm6, %v902_v54, %v904_v55 }
 0x1c6   : > { %v930_v14 = vadd.f32 %v918_v4, %v887_v6 }
 0x1c7   : > { %v906_v56 = vpop.permute.xlu0 %905 }
 0x1c8   : > { %v908_v24 = vpop.permute.xlu1 %907  ;;  %v919_v18 = vsel %vm917_vm6, %v904_v55, %v906_v56 }
 0x1c9   : > { %v920_v20 = vsel %vm917_vm6, %v906_v56, %v908_v24  ;;  %v931_v37 = vadd.f32 %v919_v18, %v888_v22 }
 0x1ca   : > { %v932_v40 = vadd.f32 %v920_v20, %v889_v27 }
 0x1cb   : > { %v910_v26 = vpop.permute.xlu0 %909 }
 0x1cc   : > { %v1617_v57 = vpop.permute.xlu1 %911 }
 0x1cd   : > { %v921_v41 = vsel %vm917_vm6, %v910_v26, %v1617_v57 }
 0x1ce   : > { %v933_v55 = vadd.f32 %v921_v41, %v890_v44 }
 0x1cf   : > { %v1619_v25 = vpop.permute.xlu0 %913 }
 0x1d0   : > { %v1621_v58 = vpop.permute.xlu1 %915  ;;  %v922_v56 = vsel %vm917_vm6, %v1617_v57, %v1619_v25 }
 0x1d1   : > { %v923_v52 = vsel %vm917_vm6, %v1619_v25, %v1621_v58 }
 0x1d3   : > { %v947_v59 = vpop.permute.xlu0 %946 }
 0x1d4   : > { %v945_v60 = vpop.permute.xlu1 %944 }
 0x1d5   : > { %v961_v10 = vsel %vm960_vm7, %v945_v60, %v947_v59  ;;  %v892_v60 = vadd.f32 %v880_v46, %v849_v43 }
 0x1d6   : > { %v973_v32 = vadd.f32 %v961_v10, %v930_v14 }
 0x1d7   : > { %v951_v61 = vpop.permute.xlu0 %950  ;;  %v935_v2 = vadd.f32 %v923_v52, %v892_v60 }
 0x1d8   : > { %v949_v28 = vpop.permute.xlu1 %948 }
 0x1d9   : > { %v962_v19 = vsel %vm960_vm7, %v947_v59, %v949_v28  ;;  %v963_v23 = vsel %vm960_vm7, %v949_v28, %v951_v61  ;;  %v891_v59 = vadd.f32 %v879_v45, %v848_v17 }
 0x1da   : > { %v974_v47 = vadd.f32 %v962_v19, %v931_v37  ;;  %v975_v48 = vadd.f32 %v963_v23, %v932_v40 }
 0x1db   : > { %v1624_v63 = vpop.permute.xlu0 %954  ;;  %v934_v1 = vadd.f32 %v922_v56, %v891_v59 }
 0x1dc   : > { %v953_v0 = vpop.permute.xlu1 %952 }
 0x1dd   : > { %v964_v49 = vsel %vm960_vm7, %v953_v0, %v1624_v63 }
 0x1de   : > { %v976_v57 = vadd.f32 %v964_v49, %v933_v55 }
 0x1df   : > { %v1630_v29 = vpop.permute.xlu0 %958 }
 0x1e0   : > { %v957_v7 = vpop.permute.xlu1 %956 }
 0x1e1   : > { %v965_v28 = vsel %vm960_vm7, %v1624_v63, %v957_v7  ;;  %v966_v30 = vsel %vm960_vm7, %v957_v7, %v1630_v29 }
 0x1e2   : > { %v977_v6 = vadd.f32 %v965_v28, %v934_v1  ;;  %v978_v9 = vadd.f32 %v966_v30, %v935_v2 }
 0x1e3   : > { %v990_v21 = vpop.permute.xlu0 %989 }
 0x1e4   : > { %v988_v34 = vpop.permute.xlu1 %987 }
 0x1e5   : > { %v1004_v36 = vsel %vm1003_vm8, %v988_v34, %v990_v21 }
 0x1e6   : > { %v1016_v42 = vadd.f32 %v1004_v36, %v973_v32 }
 0x1e7   : > { %v994_v33 = vpop.permute.xlu0 %993 }
 0x1e8   : > { %v1034_v50 = vadd.f32 %v1585_v38, %v1016_v42  ;;  %v992_v54 = vpop.permute.xlu1 %991 }
 0x1e9   : > { %v1005_v35 = vsel %vm1003_vm8, %v990_v21, %v992_v54  ;;  %v1006_v51 = vsel %vm1003_vm8, %v992_v54, %v994_v33 }
 0x1ea   : > { %1040 = vst [vmem:[%s1662_s30] sm:$0xff] %v1034_v50  ;;  %v1046_v53 = vsub.f32 0.0, %v1034_v50  ;;  %v1017_v24 = vadd.f32 %v1005_v35, %v974_v47  ;;  %v1018_v26 = vadd.f32 %v1006_v51, %v975_v48 }
 0x1eb   : > { %v998_v61 = vpop.permute.xlu0 %997 }
 0x1ec   : > { %v1052_v62 = vmul.f32 1.442695, %v1046_v53  ;;  %v1035_v0 = vadd.f32 %v1585_v38, %v1017_v24  ;;  %v1036_v25 = vadd.f32 %v1585_v38, %v1018_v26  ;;  %v996_v58 = vpop.permute.xlu1 %995 }
 0x1ed   : > { %v1007_v3 = vsel %vm1003_vm8, %v996_v58, %v998_v61 }
 0x1ee   : > { %1353 = vpow2.f32 %v1052_v62  ;;  %1041 = vst [vmem:[%s1662_s30 + $0x8] sm:$0xff] %v1035_v0  ;;  %v1047_v4 = vsub.f32 0.0, %v1035_v0  ;;  %1042 = vst [vmem:[%s1662_s30 + $0x10] sm:$0xff] %v1036_v25  ;;  %v1048_v5 = vsub.f32 0.0, %v1036_v25  ;;  %v1019_v63 = vadd.f32 %v1007_v3, %v976_v57 }
 0x1ef   : > { %v1002_v8 = vpop.permute.xlu0 %1001 }
 0x1f0   : > { %v1054_v10 = vmul.f32 1.442695, %v1047_v4  ;;  %v1056_v38 = vmul.f32 1.442695, %v1048_v5  ;;  %v1037_v11 = vadd.f32 %v1587_v39, %v1019_v63  ;;  %v1000_v12 = vpop.permute.xlu1 %999 }
 0x1f1   : > { %v1008_v29 = vsel %vm1003_vm8, %v998_v61, %v1000_v12  ;;  %v1009_v7 = vsel %vm1003_vm8, %v1000_v12, %v1002_v8  ;;  %v1111_v49 = vld [vmem:[%s1662_s30] sm:$0xff] (%p1483_p3) }
 0x1f2   : > { %1355 = vpow2.f32 %v1054_v10  ;;  %1043 = vst [vmem:[%s1662_s30 + $0x18] sm:$0xff] %v1037_v11  ;;  %v1049_v13 = vsub.f32 0.0, %v1037_v11  ;;  %v1020_v14 = vadd.f32 %v1008_v29, %v977_v6  ;;  %v1021_v15 = vadd.f32 %v1009_v7, %v978_v9  ;;  %1112 = vst [vmem:[%s1098_s7] sm:$0xff] (%p1483_p3), %v1111_v49 }
 0x1f3   : > { %1357 = vpow2.f32 %v1056_v38 }
 0x1f4   : > { %v1058_v16 = vmul.f32 1.442695, %v1049_v13  ;;  %v1038_v18 = vadd.f32 %v1587_v39, %v1020_v14  ;;  %v1039_v20 = vadd.f32 %v1587_v39, %v1021_v15 }
 0x1f5   : > { %v1113_v50 = vld [vmem:[%s1662_s30 + $0x8] sm:$0xff] (%p1483_p3)  ;;  %v1115_v54 = vld [vmem:[%s1662_s30 + $0x10] sm:$0xff] (%p1483_p3) }
 0x1f6   : > { %1359 = vpow2.f32 %v1058_v16  ;;  %1044 = vst [vmem:[%s1662_s30 + $0x20] sm:$0xff] %v1038_v18  ;;  %v1050_v21 = vsub.f32 0.0, %v1038_v18  ;;  %1045 = vst [vmem:[%s1662_s30 + $0x28] sm:$0xff] %v1039_v20  ;;  %v1051_v22 = vsub.f32 0.0, %v1039_v20 }
 0x1f7   : > { %1114 = vst [vmem:[%s1098_s7 + $0x8] sm:$0xff] (%p1483_p3), %v1113_v50  ;;  %1116 = vst [vmem:[%s1098_s7 + $0x10] sm:$0xff] (%p1483_p3), %v1115_v54 }
 0x1f8   : > { %v1354_v27 = vpop.eup %1353  ;;  %v1060_v31 = vmul.f32 1.442695, %v1050_v21  ;;  %v1062_v32 = vmul.f32 1.442695, %v1051_v22 }
 0x1f9   : > { %v1064_v34 = vadd.f32 1.0, %v1354_v27  ;;  %v1117_v55 = vld [vmem:[%s1662_s30 + $0x18] sm:$0xff] (%p1483_p3) }
 0x1fa   : > { %1361 = vpow2.f32 %v1060_v31  ;;  %1118 = vst [vmem:[%s1098_s7 + $0x30] sm:$0xff] (%p1483_p3), %v1117_v55 }
 0x1fb   : > { %1363 = vrcp.f32 %v1064_v34 }
 0x1fc   : > { %v1356_v17 = vpop.eup %1355  ;;  %1365 = vpow2.f32 %v1062_v32 }
 0x1fd   : > { %v1358_v19 = vpop.eup %1357  ;;  %v1065_v23 = vadd.f32 1.0, %v1356_v17  ;;  %v1119_v56 = vld [vmem:[%s1662_s30 + $0x20] sm:$0xff] (%p1483_p3)  ;;  %v1121_v35 = vld [vmem:[%s1662_s30 + $0x28] sm:$0xff] (%p1483_p3) }
 0x1fe   : > { %v1066_v36 = vadd.f32 1.0, %v1358_v19  ;;  %1120 = vst [vmem:[%s1098_s7 + $0x38] sm:$0xff] (%p1483_p3), %v1119_v56  ;;  %1122 = vst [vmem:[%s1098_s7 + $0x40] sm:$0xff] (%p1483_p3), %v1121_v35 }
 0x1ff   : > { %1367 = vrcp.f32 %v1065_v23 }
 0x200   : > { %v1360_v39 = vpop.eup %1359  ;;  %1369 = vrcp.f32 %v1066_v36 }
 0x201   : > { %v1067_v37 = vadd.f32 1.0, %v1360_v39 }
 0x203   : > { %1371 = vrcp.f32 %v1067_v37 }
 0x204   : > { %v1362_v40 = vpop.eup %1361 }
 0x205   : > { %v1364_v41 = vpop.eup %1363  ;;  %v1068_v42 = vadd.f32 1.0, %v1362_v40 }
 0x206   : > { %v1366_v43 = vpop.eup %1365  ;;  %1082 = vst [vmem:[%s1662_s30 + $0x30] sm:$0xff] %v1364_v41 }
 0x207   : > { %1373 = vrcp.f32 %v1068_v42  ;;  %v1069_v44 = vadd.f32 1.0, %v1366_v43 }
 0x209   : > { %v1368_v45 = vpop.eup %1367  ;;  %1375 = vrcp.f32 %v1069_v44 }
 0x20a   : > { %v1370_v46 = vpop.eup %1369  ;;  %1083 = vst [vmem:[%s1662_s30 + $0x38] sm:$0xff] %v1368_v45 }
 0x20b   : > { %1084 = vst [vmem:[%s1662_s30 + $0x40] sm:$0xff] %v1370_v46 }
 0x20d   : > { %v1372_v33 = vpop.eup %1371  ;;  %v1123_v51 = vld [vmem:[%s1662_s30 + $0x30] sm:$0xff] (%p1483_p3) }
 0x20e   : > { %1085 = vst [vmem:[%s1662_s30 + $0x48] sm:$0xff] %v1372_v33  ;;  %1094 = sbr.rel (!%p1483_p3) target bundleno = 541 (0x21d), region = 40  ;;  %1124 = vst [vmem:[%s1098_s7 + $0x60] sm:$0xff] (%p1483_p3), %v1123_v51 }
 0x211   : > { %v1374_v47 = vpop.eup %1373  ;;  %v1125_v52 = vld [vmem:[%s1662_s30 + $0x38] sm:$0xff] (%p1483_p3) }
 0x212   : > { %1086 = vst [vmem:[%s1662_s30 + $0x50] sm:$0xff] %v1374_v47  ;;  %v1127_v53 = vld [vmem:[%s1662_s30 + $0x40] sm:$0xff] (%p1483_p3)  ;;  %1126 = vst [vmem:[%s1098_s7 + $0x68] sm:$0xff] (%p1483_p3), %v1125_v52 }
 0x213   : > { %v1376_v48 = vpop.eup %1375  ;;  %1128 = vst [vmem:[%s1098_s7 + $0x70] sm:$0xff] (%p1483_p3), %v1127_v53 }
 0x214   : > { %1087 = vst [vmem:[%s1662_s30 + $0x58] sm:$0xff] %v1376_v48 }
 0x215   : > { %v1129_v24 = vld [vmem:[%s1662_s30 + $0x48] sm:$0xff] }
 0x216   : > { %1130 = vst [vmem:[%s1098_s7 + $0x90] sm:$0xff] %v1129_v24 }
 0x219   : > { %v1131_v26 = vld [vmem:[%s1662_s30 + $0x50] sm:$0xff] }
 0x21a   : > { %1132 = vst [vmem:[%s1098_s7 + $0x98] sm:$0xff] %v1131_v26 }
 0x21b   : > { %v1133_v59 = vld [vmem:[%s1662_s30 + $0x58] sm:$0xff] }
 0x21c   : > { %1134 = vst [vmem:[%s1098_s7 + $0xa0] sm:$0xff] %v1133_v59 }
 0x21d PF: > { %s14_s19 = sadd.s32 1, %s1415_s19   ;;  %s1727_s15 = smov %s1403_s16 }
 0x21e   : > { %p11_p9 = scmp.ge.s32.totalorder %s14_s19, 4   ;;  %s1728_s16 = smov %s1492_s25 }
 0x21f   : > { %s1729_s17 = smov %s1411_s18  ;;  %s1730_s18 = smov %s1732_s21 }
 0x220   :  { %13 = sbr.rel (!%p11_p9) target bundleno = 3 (0x3), region = 92 }

</bundles_post_ra>
